<compile_context>
chip_gen: v5e
topology: v5e:2x2
jax: 0.10.0
libtpu: 0.0.40
codegen_flags: <defaults>
</compile_context>

<pallas_src>
import functools

import jax
import jax.numpy as jnp
from jax.experimental import pallas as pl
from jax.experimental.pallas import tpu as pltpu

KERNEL_SIZE = 4


def _full_spec(shape):
    nd = len(shape)
    return pl.BlockSpec(shape, lambda *args: (0,) * nd)


# ----------------------------- fused forward kernel ---------------------------------

def convgru_fused_kernel(
    x_ref, cw_ref,
    wih0f_ref, whh0f_ref, bih0f_ref, bhh0f_ref,
    wih0b_ref, whh0b_ref, bih0b_ref, bhh0b_ref,
    wih1f_ref, whh1f_ref, bih1f_ref, bhh1f_ref,
    wih1b_ref, whh1b_ref, bih1b_ref, bhh1b_ref,
    wd_ref, wa_ref,
    o_ref,
    y0_scr,
    *, B, L,
):
    f32 = jnp.float32
    K, Cin, Cout = cw_ref.shape
    H = whh0f_ref.shape[0]
    H2 = 2 * H

    # ---------------- conv1d ('same'-padded in the wrapper), time-major --------------
    # x_ref: (Lp*B, Cin) with rows ordered (t, b).  conv2: (L*B, Cout), rows (t, b)
    # == permute(0, 2, 1) of the PyTorch NCW conv output, flattened time-major.
    x = x_ref[...]
    conv2 = jnp.zeros((L * B, Cout), f32)
    for k in range(K):                           # K * Cin = 4 -> static unroll, pure VPU
        wk = cw_ref[k]                           # (Cin, Cout)
        xk = x[k * B:(k + L) * B, :]             # (L*B, Cin) shifted slice (contiguous)
        for c in range(Cin):
            conv2 = conv2 + xk[:, c:c + 1] * wk[c:c + 1, :]

    # ---------------- GRU cell (PyTorch semantics, gate order [r | z | n]) -----------
    def gru_cell(gi_t, h_prev, whh, bhh):
        gh = jnp.dot(h_prev, whh, preferred_element_type=f32) + bhh
        rz = jax.nn.sigmoid(gi_t[:, :H2] + gh[:, :H2])        # lane-aligned 128 slice
        r = rz[:, :H]
        z = rz[:, H:]
        n = jnp.tanh(gi_t[:, H2:] + r * gh[:, H2:])
        return (1.0 - z) * n + z * h_prev

    # ---------------- BiGRU layer 0: both directions in one unrolled loop ------------
    # Hoisted input projections: one (L*B, Fin) @ (Fin, 3H) matmul per direction.
    gi0f = jnp.dot(conv2, wih0f_ref[...], preferred_element_type=f32) + bih0f_ref[...]
    gi0b = jnp.dot(conv2, wih0b_ref[...], preferred_element_type=f32) + bih0b_ref[...]
    whh0f = whh0f_ref[...]; bhh0f = bhh0f_ref[...]
    whh0b = whh0b_ref[...]; bhh0b = bhh0b_ref[...]

    hf = jnp.zeros((B, H), f32)
    hb = jnp.zeros((B, H), f32)
    for s in range(L):                           # static unroll (L = 16)
        # forward direction processes time s
        hf = gru_cell(gi0f[s * B:(s + 1) * B], hf, whh0f, bhh0f)
        y0_scr[s * B:(s + 1) * B, 0:H] = hf
        # backward direction processes time L-1-s
        tb = L - 1 - s
        hb = gru_cell(gi0b[tb * B:(tb + 1) * B], hb, whh0b, bhh0b)
        y0_scr[tb * B:(tb + 1) * B, H:H2] = hb

    y0 = y0_scr[...]                             # (L*B, 2H) layer-1 input, time-major

    # ---------------- BiGRU layer 1 ---------------------------------------------------
    # Forward direction: only the final hidden state is consumed -> no per-step stores.
    gi1f = jnp.dot(y0, wih1f_ref[...], preferred_element_type=f32) + bih1f_ref[...]
    whh1f = whh1f_ref[...]; bhh1f = bhh1f_ref[...]
    h1f = jnp.zeros((B, H), f32)
    for s in range(L):
        h1f = gru_cell(gi1f[s * B:(s + 1) * B], h1f, whh1f, bhh1f)

    # Backward direction: output[:, -1, :] only needs its state at t = L-1, i.e. a
    # single GRU cell applied to y0[L-1] with h0 = 0.
    y_last = y0[(L - 1) * B:L * B]
    gi1b = jnp.dot(y_last, wih1b_ref[...], preferred_element_type=f32) + bih1b_ref[...]
    h1b = gru_cell(gi1b, jnp.zeros((B, H), f32), whh1b_ref[...], bhh1b_ref[...])

    # ---------------- dense -> tanh -> activation head (both bias-free) ---------------
    gru_last = jnp.concatenate([h1f, h1b], axis=-1)            # (B, 2H)
    d = jnp.tanh(jnp.dot(gru_last, wd_ref[...], preferred_element_type=f32))
    o_ref[...] = jnp.dot(d, wa_ref[...], preferred_element_type=f32)


# ----------------------------- full forward pass ------------------------------------

def convgru_forward(x, params):
    """x: (B, Cin, L) float32 (PyTorch NCW). Returns (B, out_channels)."""
    B, Cin, L = x.shape
    ks = KERNEL_SIZE
    if (ks - 1) % 2 == 0:
        pad_l = pad_r = ks // 2
    else:
        pad_l, pad_r = ks // 2 - 1, ks // 2
    # 'same' padding + flatten to time-major (Lp*B, Cin); trivial XLA prep on ~150 B.
    x_pad = jnp.pad(x, ((0, 0), (0, 0), (pad_l, pad_r)))
    Lp = L + pad_l + pad_r
    x_flat = jnp.transpose(x_pad, (2, 0, 1)).reshape(Lp * B, Cin)

    H = params["gru_l0_fwd"][1].shape[0]
    n_out = params["act_w"].shape[1]

    args = (
        x_flat, params["conv_w"],
        *params["gru_l0_fwd"], *params["gru_l0_bwd"],
        *params["gru_l1_fwd"], *params["gru_l1_bwd"],
        params["dense_w"], params["act_w"],
    )

    kernel = functools.partial(convgru_fused_kernel, B=B, L=L)
    return pl.pallas_call(
        kernel,
        out_shape=jax.ShapeDtypeStruct((B, n_out), jnp.float32),
        in_specs=[_full_spec(a.shape) for a in args],
        out_specs=_full_spec((B, n_out)),
        scratch_shapes=[pltpu.VMEM((L * B, 2 * H), jnp.float32)],
    )(*args)


# ----------------------------- deterministic param init -----------------------------

def init_params(key, in_channels=1, out_channels=3):
    H = 64
    cout = 16
    ks = KERNEL_SIZE
    keys = jax.random.split(key, 32)
    idx = iter(range(32))

    def u(shape, scale):
        return jax.random.uniform(keys[next(idx)], shape, jnp.float32, -scale, scale)

    params = {}
    # conv weight stored as (K, Cin, Cout) == PyTorch Conv1d weight transposed (2, 1, 0)
    params["conv_w"] = u((ks, in_channels, cout), 1.0 / (in_channels * ks) ** 0.5)

    s = 1.0 / H ** 0.5

    def gru_dir(fin):
        wih = u((fin, 3 * H), s)      # == PyTorch W_ih.T, gate order [r | z | n]
        whh = u((H, 3 * H), s)        # == PyTorch W_hh.T
        bih = u((1, 3 * H), s)
        bhh = u((1, 3 * H), s)
        return (wih, whh, bih, bhh)

    params["gru_l0_fwd"] = gru_dir(16)
    params["gru_l0_bwd"] = gru_dir(16)
    params["gru_l1_fwd"] = gru_dir(2 * H)
    params["gru_l1_bwd"] = gru_dir(2 * H)

    sd = 1.0 / 128 ** 0.5
    params["dense_w"] = u((128, 128), sd)            # (in, out), bias-free
    params["act_w"] = u((128, out_channels), sd)     # (in, out), bias-free
    return params


# ----------------------------- main --------------------------------------------------

if __name__ == "__main__":
    key = jax.random.PRNGKey(0)
    k_x, k_p = jax.random.split(key)

    B, Cin, L = 2, 1, 16
    x = jax.random.normal(k_x, (B, Cin, L), jnp.float32)
    params = init_params(k_p, in_channels=Cin, out_channels=3)

    fwd = jax.jit(convgru_forward)
    out = fwd(x, params)
    out = jax.block_until_ready(out)

    assert out.shape == (B, 3), out.shape
    assert jnp.all(jnp.isfinite(out))
    print("KERNEL_OK")
</pallas_src>

<mosaic_0001>
module attributes {stable_mosaic.version = 11 : i64} {
  func.func @convgru_fused_kernel(%arg0: memref<38x1xf32, #tpu.memory_space<vmem>>, %arg1: memref<4x1x16xf32, #tpu.memory_space<vmem>>, %arg2: memref<16x192xf32, #tpu.memory_space<vmem>>, %arg3: memref<64x192xf32, #tpu.memory_space<vmem>>, %arg4: memref<1x192xf32, #tpu.memory_space<vmem>>, %arg5: memref<1x192xf32, #tpu.memory_space<vmem>>, %arg6: memref<16x192xf32, #tpu.memory_space<vmem>>, %arg7: memref<64x192xf32, #tpu.memory_space<vmem>>, %arg8: memref<1x192xf32, #tpu.memory_space<vmem>>, %arg9: memref<1x192xf32, #tpu.memory_space<vmem>>, %arg10: memref<128x192xf32, #tpu.memory_space<vmem>>, %arg11: memref<64x192xf32, #tpu.memory_space<vmem>>, %arg12: memref<1x192xf32, #tpu.memory_space<vmem>>, %arg13: memref<1x192xf32, #tpu.memory_space<vmem>>, %arg14: memref<128x192xf32, #tpu.memory_space<vmem>>, %arg15: memref<64x192xf32, #tpu.memory_space<vmem>>, %arg16: memref<1x192xf32, #tpu.memory_space<vmem>>, %arg17: memref<1x192xf32, #tpu.memory_space<vmem>>, %arg18: memref<128x128xf32, #tpu.memory_space<vmem>>, %arg19: memref<128x3xf32, #tpu.memory_space<vmem>>, %arg20: memref<2x3xf32, #tpu.memory_space<vmem>>, %arg21: memref<32x128xf32, #tpu.memory_space<vmem>>) attributes {dimension_semantics = [], scalar_prefetch = 0 : i64, scratch_operands = 1 : i64, tpu.core_type = #tpu.core_type<tc>} {
    %c0 = arith.constant 0 : index
    %c0_0 = arith.constant 0 : index
    %0 = vector.load %arg0[%c0, %c0_0] : memref<38x1xf32, #tpu.memory_space<vmem>>, vector<38x1xf32>
    %cst = arith.constant 0.000000e+00 : f32
    %1 = vector.broadcast %cst : f32 to vector<32x16xf32>
    %c0_1 = arith.constant 0 : index
    %c0_2 = arith.constant 0 : index
    %c0_3 = arith.constant 0 : index
    %2 = vector.load %arg1[%c0_1, %c0_2, %c0_3] : memref<4x1x16xf32, #tpu.memory_space<vmem>>, vector<1x1x16xf32>
    %3 = vector.shape_cast %2 : vector<1x1x16xf32> to vector<1x16xf32>
    %4 = vector.extract_strided_slice %0 {offsets = [0, 0], sizes = [32, 1], strides = [1, 1]} : vector<38x1xf32> to vector<32x1xf32>
    %5 = vector.broadcast %4 : vector<32x1xf32> to vector<32x16xf32>
    %6 = vector.broadcast %3 : vector<1x16xf32> to vector<32x16xf32>
    %7 = arith.mulf %5, %6 : vector<32x16xf32>
    %8 = arith.addf %1, %7 : vector<32x16xf32>
    %c1 = arith.constant 1 : index
    %c0_4 = arith.constant 0 : index
    %c0_5 = arith.constant 0 : index
    %9 = vector.load %arg1[%c1, %c0_4, %c0_5] : memref<4x1x16xf32, #tpu.memory_space<vmem>>, vector<1x1x16xf32>
    %10 = vector.shape_cast %9 : vector<1x1x16xf32> to vector<1x16xf32>
    %11 = vector.extract_strided_slice %0 {offsets = [2, 0], sizes = [32, 1], strides = [1, 1]} : vector<38x1xf32> to vector<32x1xf32>
    %12 = vector.broadcast %11 : vector<32x1xf32> to vector<32x16xf32>
    %13 = vector.broadcast %10 : vector<1x16xf32> to vector<32x16xf32>
    %14 = arith.mulf %12, %13 : vector<32x16xf32>
    %15 = arith.addf %8, %14 : vector<32x16xf32>
    %c2 = arith.constant 2 : index
    %c0_6 = arith.constant 0 : index
    %c0_7 = arith.constant 0 : index
    %16 = vector.load %arg1[%c2, %c0_6, %c0_7] : memref<4x1x16xf32, #tpu.memory_space<vmem>>, vector<1x1x16xf32>
    %17 = vector.shape_cast %16 : vector<1x1x16xf32> to vector<1x16xf32>
    %18 = vector.extract_strided_slice %0 {offsets = [4, 0], sizes = [32, 1], strides = [1, 1]} : vector<38x1xf32> to vector<32x1xf32>
    %19 = vector.broadcast %18 : vector<32x1xf32> to vector<32x16xf32>
    %20 = vector.broadcast %17 : vector<1x16xf32> to vector<32x16xf32>
    %21 = arith.mulf %19, %20 : vector<32x16xf32>
    %22 = arith.addf %15, %21 : vector<32x16xf32>
    %c3 = arith.constant 3 : index
    %c0_8 = arith.constant 0 : index
    %c0_9 = arith.constant 0 : index
    %23 = vector.load %arg1[%c3, %c0_8, %c0_9] : memref<4x1x16xf32, #tpu.memory_space<vmem>>, vector<1x1x16xf32>
    %24 = vector.shape_cast %23 : vector<1x1x16xf32> to vector<1x16xf32>
    %25 = vector.extract_strided_slice %0 {offsets = [6, 0], sizes = [32, 1], strides = [1, 1]} : vector<38x1xf32> to vector<32x1xf32>
    %26 = vector.broadcast %25 : vector<32x1xf32> to vector<32x16xf32>
    %27 = vector.broadcast %24 : vector<1x16xf32> to vector<32x16xf32>
    %28 = arith.mulf %26, %27 : vector<32x16xf32>
    %29 = arith.addf %22, %28 : vector<32x16xf32>
    %c0_10 = arith.constant 0 : index
    %c0_11 = arith.constant 0 : index
    %30 = vector.load %arg2[%c0_10, %c0_11] : memref<16x192xf32, #tpu.memory_space<vmem>>, vector<16x192xf32>
    %cst_12 = arith.constant dense<0.000000e+00> : vector<32x192xf32>
    %31 = tpu.matmul %29, %30, %cst_12 {dimension_numbers = #tpu.dot_dimension_numbers<[1], [0], [0], [1], [0, 0, 1, 1], [], []>} : vector<32x16xf32>, vector<16x192xf32>, vector<32x192xf32> -> vector<32x192xf32>
    %c0_13 = arith.constant 0 : index
    %c0_14 = arith.constant 0 : index
    %32 = vector.load %arg4[%c0_13, %c0_14] : memref<1x192xf32, #tpu.memory_space<vmem>>, vector<1x192xf32>
    %33 = vector.broadcast %32 : vector<1x192xf32> to vector<32x192xf32>
    %34 = arith.addf %31, %33 : vector<32x192xf32>
    %c0_15 = arith.constant 0 : index
    %c0_16 = arith.constant 0 : index
    %35 = vector.load %arg6[%c0_15, %c0_16] : memref<16x192xf32, #tpu.memory_space<vmem>>, vector<16x192xf32>
    %cst_17 = arith.constant dense<0.000000e+00> : vector<32x192xf32>
    %36 = tpu.matmul %29, %35, %cst_17 {dimension_numbers = #tpu.dot_dimension_numbers<[1], [0], [0], [1], [0, 0, 1, 1], [], []>} : vector<32x16xf32>, vector<16x192xf32>, vector<32x192xf32> -> vector<32x192xf32>
    %c0_18 = arith.constant 0 : index
    %c0_19 = arith.constant 0 : index
    %37 = vector.load %arg8[%c0_18, %c0_19] : memref<1x192xf32, #tpu.memory_space<vmem>>, vector<1x192xf32>
    %38 = vector.broadcast %37 : vector<1x192xf32> to vector<32x192xf32>
    %39 = arith.addf %36, %38 : vector<32x192xf32>
    %c0_20 = arith.constant 0 : index
    %c0_21 = arith.constant 0 : index
    %40 = vector.load %arg3[%c0_20, %c0_21] : memref<64x192xf32, #tpu.memory_space<vmem>>, vector<64x192xf32>
    %c0_22 = arith.constant 0 : index
    %c0_23 = arith.constant 0 : index
    %41 = vector.load %arg5[%c0_22, %c0_23] : memref<1x192xf32, #tpu.memory_space<vmem>>, vector<1x192xf32>
    %c0_24 = arith.constant 0 : index
    %c0_25 = arith.constant 0 : index
    %42 = vector.load %arg7[%c0_24, %c0_25] : memref<64x192xf32, #tpu.memory_space<vmem>>, vector<64x192xf32>
    %c0_26 = arith.constant 0 : index
    %c0_27 = arith.constant 0 : index
    %43 = vector.load %arg9[%c0_26, %c0_27] : memref<1x192xf32, #tpu.memory_space<vmem>>, vector<1x192xf32>
    %cst_28 = arith.constant 0.000000e+00 : f32
    %44 = vector.broadcast %cst_28 : f32 to vector<2x64xf32>
    %cst_29 = arith.constant 0.000000e+00 : f32
    %45 = vector.broadcast %cst_29 : f32 to vector<2x64xf32>
    %46 = vector.extract_strided_slice %34 {offsets = [0, 0], sizes = [2, 192], strides = [1, 1]} : vector<32x192xf32> to vector<2x192xf32>
    %cst_30 = arith.constant dense<0.000000e+00> : vector<2x192xf32>
    %47 = tpu.matmul %44, %40, %cst_30 {dimension_numbers = #tpu.dot_dimension_numbers<[1], [0], [0], [1], [0, 0, 1, 1], [], []>} : vector<2x64xf32>, vector<64x192xf32>, vector<2x192xf32> -> vector<2x192xf32>
    %48 = vector.broadcast %41 : vector<1x192xf32> to vector<2x192xf32>
    %49 = arith.addf %47, %48 : vector<2x192xf32>
    %50 = vector.extract_strided_slice %46 {offsets = [0, 0], sizes = [2, 128], strides = [1, 1]} : vector<2x192xf32> to vector<2x128xf32>
    %51 = vector.extract_strided_slice %49 {offsets = [0, 0], sizes = [2, 128], strides = [1, 1]} : vector<2x192xf32> to vector<2x128xf32>
    %52 = arith.addf %50, %51 : vector<2x128xf32>
    %53 = arith.negf %52 : vector<2x128xf32>
    %54 = math.exp %53 : vector<2x128xf32>
    %cst_31 = arith.constant 1.000000e+00 : f32
    %55 = vector.broadcast %cst_31 : f32 to vector<2x128xf32>
    %56 = arith.addf %55, %54 : vector<2x128xf32>
    %57 = arith.divf %55, %56 : vector<2x128xf32>
    %58 = vector.extract_strided_slice %57 {offsets = [0, 0], sizes = [2, 64], strides = [1, 1]} : vector<2x128xf32> to vector<2x64xf32>
    %59 = vector.extract_strided_slice %57 {offsets = [0, 64], sizes = [2, 64], strides = [1, 1]} : vector<2x128xf32> to vector<2x64xf32>
    %60 = vector.extract_strided_slice %46 {offsets = [0, 128], sizes = [2, 64], strides = [1, 1]} : vector<2x192xf32> to vector<2x64xf32>
    %61 = vector.extract_strided_slice %49 {offsets = [0, 128], sizes = [2, 64], strides = [1, 1]} : vector<2x192xf32> to vector<2x64xf32>
    %62 = arith.mulf %58, %61 : vector<2x64xf32>
    %63 = arith.addf %60, %62 : vector<2x64xf32>
    %64 = math.tanh %63 : vector<2x64xf32>
    %cst_32 = arith.constant 1.000000e+00 : f32
    %65 = vector.broadcast %cst_32 : f32 to vector<2x64xf32>
    %66 = arith.subf %65, %59 : vector<2x64xf32>
    %67 = arith.mulf %66, %64 : vector<2x64xf32>
    %68 = arith.mulf %59, %44 : vector<2x64xf32>
    %69 = arith.addf %67, %68 : vector<2x64xf32>
    %c0_33 = arith.constant 0 : index
    %c0_34 = arith.constant 0 : index
    %70 = vector.load %arg21[%c0_33, %c0_34] : memref<32x128xf32, #tpu.memory_space<vmem>>, vector<2x64xf32>
    tpu.vector_store %arg21[%c0_33, %c0_34], %69 {strides = array<i32>} : memref<32x128xf32, #tpu.memory_space<vmem>>, vector<2x64xf32>,
    %71 = vector.extract_strided_slice %39 {offsets = [30, 0], sizes = [2, 192], strides = [1, 1]} : vector<32x192xf32> to vector<2x192xf32>
    %cst_35 = arith.constant dense<0.000000e+00> : vector<2x192xf32>
    %72 = tpu.matmul %45, %42, %cst_35 {dimension_numbers = #tpu.dot_dimension_numbers<[1], [0], [0], [1], [0, 0, 1, 1], [], []>} : vector<2x64xf32>, vector<64x192xf32>, vector<2x192xf32> -> vector<2x192xf32>
    %73 = vector.broadcast %43 : vector<1x192xf32> to vector<2x192xf32>
    %74 = arith.addf %72, %73 : vector<2x192xf32>
    %75 = vector.extract_strided_slice %71 {offsets = [0, 0], sizes = [2, 128], strides = [1, 1]} : vector<2x192xf32> to vector<2x128xf32>
    %76 = vector.extract_strided_slice %74 {offsets = [0, 0], sizes = [2, 128], strides = [1, 1]} : vector<2x192xf32> to vector<2x128xf32>
    %77 = arith.addf %75, %76 : vector<2x128xf32>
    %78 = arith.negf %77 : vector<2x128xf32>
    %79 = math.exp %78 : vector<2x128xf32>
    %cst_36 = arith.constant 1.000000e+00 : f32
    %80 = vector.broadcast %cst_36 : f32 to vector<2x128xf32>
    %81 = arith.addf %80, %79 : vector<2x128xf32>
    %82 = arith.divf %80, %81 : vector<2x128xf32>
    %83 = vector.extract_strided_slice %82 {offsets = [0, 0], sizes = [2, 64], strides = [1, 1]} : vector<2x128xf32> to vector<2x64xf32>
    %84 = vector.extract_strided_slice %82 {offsets = [0, 64], sizes = [2, 64], strides = [1, 1]} : vector<2x128xf32> to vector<2x64xf32>
    %85 = vector.extract_strided_slice %71 {offsets = [0, 128], sizes = [2, 64], strides = [1, 1]} : vector<2x192xf32> to vector<2x64xf32>
    %86 = vector.extract_strided_slice %74 {offsets = [0, 128], sizes = [2, 64], strides = [1, 1]} : vector<2x192xf32> to vector<2x64xf32>
    %87 = arith.mulf %83, %86 : vector<2x64xf32>
    %88 = arith.addf %85, %87 : vector<2x64xf32>
    %89 = math.tanh %88 : vector<2x64xf32>
    %cst_37 = arith.constant 1.000000e+00 : f32
    %90 = vector.broadcast %cst_37 : f32 to vector<2x64xf32>
    %91 = arith.subf %90, %84 : vector<2x64xf32>
    %92 = arith.mulf %91, %89 : vector<2x64xf32>
    %93 = arith.mulf %84, %45 : vector<2x64xf32>
    %94 = arith.addf %92, %93 : vector<2x64xf32>
    %c30 = arith.constant 30 : index
    %c64 = arith.constant 64 : index
    %95 = vector.load %arg21[%c30, %c64] : memref<32x128xf32, #tpu.memory_space<vmem>>, vector<2x64xf32>
    tpu.vector_store %arg21[%c30, %c64], %94 {strides = array<i32>} : memref<32x128xf32, #tpu.memory_space<vmem>>, vector<2x64xf32>,
    %96 = vector.extract_strided_slice %34 {offsets = [2, 0], sizes = [2, 192], strides = [1, 1]} : vector<32x192xf32> to vector<2x192xf32>
    %cst_38 = arith.constant dense<0.000000e+00> : vector<2x192xf32>
    %97 = tpu.matmul %69, %40, %cst_38 {dimension_numbers = #tpu.dot_dimension_numbers<[1], [0], [0], [1], [0, 0, 1, 1], [], []>} : vector<2x64xf32>, vector<64x192xf32>, vector<2x192xf32> -> vector<2x192xf32>
    %98 = vector.broadcast %41 : vector<1x192xf32> to vector<2x192xf32>
    %99 = arith.addf %97, %98 : vector<2x192xf32>
    %100 = vector.extract_strided_slice %96 {offsets = [0, 0], sizes = [2, 128], strides = [1, 1]} : vector<2x192xf32> to vector<2x128xf32>
    %101 = vector.extract_strided_slice %99 {offsets = [0, 0], sizes = [2, 128], strides = [1, 1]} : vector<2x192xf32> to vector<2x128xf32>
    %102 = arith.addf %100, %101 : vector<2x128xf32>
    %103 = arith.negf %102 : vector<2x128xf32>
    %104 = math.exp %103 : vector<2x128xf32>
    %cst_39 = arith.constant 1.000000e+00 : f32
    %105 = vector.broadcast %cst_39 : f32 to vector<2x128xf32>
    %106 = arith.addf %105, %104 : vector<2x128xf32>
    %107 = arith.divf %105, %106 : vector<2x128xf32>
    %108 = vector.extract_strided_slice %107 {offsets = [0, 0], sizes = [2, 64], strides = [1, 1]} : vector<2x128xf32> to vector<2x64xf32>
    %109 = vector.extract_strided_slice %107 {offsets = [0, 64], sizes = [2, 64], strides = [1, 1]} : vector<2x128xf32> to vector<2x64xf32>
    %110 = vector.extract_strided_slice %96 {offsets = [0, 128], sizes = [2, 64], strides = [1, 1]} : vector<2x192xf32> to vector<2x64xf32>
    %111 = vector.extract_strided_slice %99 {offsets = [0, 128], sizes = [2, 64], strides = [1, 1]} : vector<2x192xf32> to vector<2x64xf32>
    %112 = arith.mulf %108, %111 : vector<2x64xf32>
    %113 = arith.addf %110, %112 : vector<2x64xf32>
    %114 = math.tanh %113 : vector<2x64xf32>
    %cst_40 = arith.constant 1.000000e+00 : f32
    %115 = vector.broadcast %cst_40 : f32 to vector<2x64xf32>
    %116 = arith.subf %115, %109 : vector<2x64xf32>
    %117 = arith.mulf %116, %114 : vector<2x64xf32>
    %118 = arith.mulf %109, %69 : vector<2x64xf32>
    %119 = arith.addf %117, %118 : vector<2x64xf32>
    %c2_41 = arith.constant 2 : index
    %c0_42 = arith.constant 0 : index
    %120 = vector.load %arg21[%c2_41, %c0_42] : memref<32x128xf32, #tpu.memory_space<vmem>>, vector<2x64xf32>
    tpu.vector_store %arg21[%c2_41, %c0_42], %119 {strides = array<i32>} : memref<32x128xf32, #tpu.memory_space<vmem>>, vector<2x64xf32>,
    %121 = vector.extract_strided_slice %39 {offsets = [28, 0], sizes = [2, 192], strides = [1, 1]} : vector<32x192xf32> to vector<2x192xf32>
    %cst_43 = arith.constant dense<0.000000e+00> : vector<2x192xf32>
    %122 = tpu.matmul %94, %42, %cst_43 {dimension_numbers = #tpu.dot_dimension_numbers<[1], [0], [0], [1], [0, 0, 1, 1], [], []>} : vector<2x64xf32>, vector<64x192xf32>, vector<2x192xf32> -> vector<2x192xf32>
    %123 = vector.broadcast %43 : vector<1x192xf32> to vector<2x192xf32>
    %124 = arith.addf %122, %123 : vector<2x192xf32>
    %125 = vector.extract_strided_slice %121 {offsets = [0, 0], sizes = [2, 128], strides = [1, 1]} : vector<2x192xf32> to vector<2x128xf32>
    %126 = vector.extract_strided_slice %124 {offsets = [0, 0], sizes = [2, 128], strides = [1, 1]} : vector<2x192xf32> to vector<2x128xf32>
    %127 = arith.addf %125, %126 : vector<2x128xf32>
    %128 = arith.negf %127 : vector<2x128xf32>
    %129 = math.exp %128 : vector<2x128xf32>
    %cst_44 = arith.constant 1.000000e+00 : f32
    %130 = vector.broadcast %cst_44 : f32 to vector<2x128xf32>
    %131 = arith.addf %130, %129 : vector<2x128xf32>
    %132 = arith.divf %130, %131 : vector<2x128xf32>
    %133 = vector.extract_strided_slice %132 {offsets = [0, 0], sizes = [2, 64], strides = [1, 1]} : vector<2x128xf32> to vector<2x64xf32>
    %134 = vector.extract_strided_slice %132 {offsets = [0, 64], sizes = [2, 64], strides = [1, 1]} : vector<2x128xf32> to vector<2x64xf32>
    %135 = vector.extract_strided_slice %121 {offsets = [0, 128], sizes = [2, 64], strides = [1, 1]} : vector<2x192xf32> to vector<2x64xf32>
    %136 = vector.extract_strided_slice %124 {offsets = [0, 128], sizes = [2, 64], strides = [1, 1]} : vector<2x192xf32> to vector<2x64xf32>
    %137 = arith.mulf %133, %136 : vector<2x64xf32>
    %138 = arith.addf %135, %137 : vector<2x64xf32>
    %139 = math.tanh %138 : vector<2x64xf32>
    %cst_45 = arith.constant 1.000000e+00 : f32
    %140 = vector.broadcast %cst_45 : f32 to vector<2x64xf32>
    %141 = arith.subf %140, %134 : vector<2x64xf32>
    %142 = arith.mulf %141, %139 : vector<2x64xf32>
    %143 = arith.mulf %134, %94 : vector<2x64xf32>
    %144 = arith.addf %142, %143 : vector<2x64xf32>
    %c28 = arith.constant 28 : index
    %c64_46 = arith.constant 64 : index
    %145 = vector.load %arg21[%c28, %c64_46] : memref<32x128xf32, #tpu.memory_space<vmem>>, vector<2x64xf32>
    tpu.vector_store %arg21[%c28, %c64_46], %144 {strides = array<i32>} : memref<32x128xf32, #tpu.memory_space<vmem>>, vector<2x64xf32>,
    %146 = vector.extract_strided_slice %34 {offsets = [4, 0], sizes = [2, 192], strides = [1, 1]} : vector<32x192xf32> to vector<2x192xf32>
    %cst_47 = arith.constant dense<0.000000e+00> : vector<2x192xf32>
    %147 = tpu.matmul %119, %40, %cst_47 {dimension_numbers = #tpu.dot_dimension_numbers<[1], [0], [0], [1], [0, 0, 1, 1], [], []>} : vector<2x64xf32>, vector<64x192xf32>, vector<2x192xf32> -> vector<2x192xf32>
    %148 = vector.broadcast %41 : vector<1x192xf32> to vector<2x192xf32>
    %149 = arith.addf %147, %148 : vector<2x192xf32>
    %150 = vector.extract_strided_slice %146 {offsets = [0, 0], sizes = [2, 128], strides = [1, 1]} : vector<2x192xf32> to vector<2x128xf32>
    %151 = vector.extract_strided_slice %149 {offsets = [0, 0], sizes = [2, 128], strides = [1, 1]} : vector<2x192xf32> to vector<2x128xf32>
    %152 = arith.addf %150, %151 : vector<2x128xf32>
    %153 = arith.negf %152 : vector<2x128xf32>
    %154 = math.exp %153 : vector<2x128xf32>
    %cst_48 = arith.constant 1.000000e+00 : f32
    %155 = vector.broadcast %cst_48 : f32 to vector<2x128xf32>
    %156 = arith.addf %155, %154 : vector<2x128xf32>
    %157 = arith.divf %155, %156 : vector<2x128xf32>
    %158 = vector.extract_strided_slice %157 {offsets = [0, 0], sizes = [2, 64], strides = [1, 1]} : vector<2x128xf32> to vector<2x64xf32>
    %159 = vector.extract_strided_slice %157 {offsets = [0, 64], sizes = [2, 64], strides = [1, 1]} : vector<2x128xf32> to vector<2x64xf32>
    %160 = vector.extract_strided_slice %146 {offsets = [0, 128], sizes = [2, 64], strides = [1, 1]} : vector<2x192xf32> to vector<2x64xf32>
    %161 = vector.extract_strided_slice %149 {offsets = [0, 128], sizes = [2, 64], strides = [1, 1]} : vector<2x192xf32> to vector<2x64xf32>
    %162 = arith.mulf %158, %161 : vector<2x64xf32>
    %163 = arith.addf %160, %162 : vector<2x64xf32>
    %164 = math.tanh %163 : vector<2x64xf32>
    %cst_49 = arith.constant 1.000000e+00 : f32
    %165 = vector.broadcast %cst_49 : f32 to vector<2x64xf32>
    %166 = arith.subf %165, %159 : vector<2x64xf32>
    %167 = arith.mulf %166, %164 : vector<2x64xf32>
    %168 = arith.mulf %159, %119 : vector<2x64xf32>
    %169 = arith.addf %167, %168 : vector<2x64xf32>
    %c4 = arith.constant 4 : index
    %c0_50 = arith.constant 0 : index
    %170 = vector.load %arg21[%c4, %c0_50] : memref<32x128xf32, #tpu.memory_space<vmem>>, vector<2x64xf32>
    tpu.vector_store %arg21[%c4, %c0_50], %169 {strides = array<i32>} : memref<32x128xf32, #tpu.memory_space<vmem>>, vector<2x64xf32>,
    %171 = vector.extract_strided_slice %39 {offsets = [26, 0], sizes = [2, 192], strides = [1, 1]} : vector<32x192xf32> to vector<2x192xf32>
    %cst_51 = arith.constant dense<0.000000e+00> : vector<2x192xf32>
    %172 = tpu.matmul %144, %42, %cst_51 {dimension_numbers = #tpu.dot_dimension_numbers<[1], [0], [0], [1], [0, 0, 1, 1], [], []>} : vector<2x64xf32>, vector<64x192xf32>, vector<2x192xf32> -> vector<2x192xf32>
    %173 = vector.broadcast %43 : vector<1x192xf32> to vector<2x192xf32>
    %174 = arith.addf %172, %173 : vector<2x192xf32>
    %175 = vector.extract_strided_slice %171 {offsets = [0, 0], sizes = [2, 128], strides = [1, 1]} : vector<2x192xf32> to vector<2x128xf32>
    %176 = vector.extract_strided_slice %174 {offsets = [0, 0], sizes = [2, 128], strides = [1, 1]} : vector<2x192xf32> to vector<2x128xf32>
    %177 = arith.addf %175, %176 : vector<2x128xf32>
    %178 = arith.negf %177 : vector<2x128xf32>
    %179 = math.exp %178 : vector<2x128xf32>
    %cst_52 = arith.constant 1.000000e+00 : f32
    %180 = vector.broadcast %cst_52 : f32 to vector<2x128xf32>
    %181 = arith.addf %180, %179 : vector<2x128xf32>
    %182 = arith.divf %180, %181 : vector<2x128xf32>
    %183 = vector.extract_strided_slice %182 {offsets = [0, 0], sizes = [2, 64], strides = [1, 1]} : vector<2x128xf32> to vector<2x64xf32>
    %184 = vector.extract_strided_slice %182 {offsets = [0, 64], sizes = [2, 64], strides = [1, 1]} : vector<2x128xf32> to vector<2x64xf32>
    %185 = vector.extract_strided_slice %171 {offsets = [0, 128], sizes = [2, 64], strides = [1, 1]} : vector<2x192xf32> to vector<2x64xf32>
    %186 = vector.extract_strided_slice %174 {offsets = [0, 128], sizes = [2, 64], strides = [1, 1]} : vector<2x192xf32> to vector<2x64xf32>
    %187 = arith.mulf %183, %186 : vector<2x64xf32>
    %188 = arith.addf %185, %187 : vector<2x64xf32>
    %189 = math.tanh %188 : vector<2x64xf32>
    %cst_53 = arith.constant 1.000000e+00 : f32
    %190 = vector.broadcast %cst_53 : f32 to vector<2x64xf32>
    %191 = arith.subf %190, %184 : vector<2x64xf32>
    %192 = arith.mulf %191, %189 : vector<2x64xf32>
    %193 = arith.mulf %184, %144 : vector<2x64xf32>
    %194 = arith.addf %192, %193 : vector<2x64xf32>
    %c26 = arith.constant 26 : index
    %c64_54 = arith.constant 64 : index
    %195 = vector.load %arg21[%c26, %c64_54] : memref<32x128xf32, #tpu.memory_space<vmem>>, vector<2x64xf32>
    tpu.vector_store %arg21[%c26, %c64_54], %194 {strides = array<i32>} : memref<32x128xf32, #tpu.memory_space<vmem>>, vector<2x64xf32>,
    %196 = vector.extract_strided_slice %34 {offsets = [6, 0], sizes = [2, 192], strides = [1, 1]} : vector<32x192xf32> to vector<2x192xf32>
    %cst_55 = arith.constant dense<0.000000e+00> : vector<2x192xf32>
    %197 = tpu.matmul %169, %40, %cst_55 {dimension_numbers = #tpu.dot_dimension_numbers<[1], [0], [0], [1], [0, 0, 1, 1], [], []>} : vector<2x64xf32>, vector<64x192xf32>, vector<2x192xf32> -> vector<2x192xf32>
    %198 = vector.broadcast %41 : vector<1x192xf32> to vector<2x192xf32>
    %199 = arith.addf %197, %198 : vector<2x192xf32>
    %200 = vector.extract_strided_slice %196 {offsets = [0, 0], sizes = [2, 128], strides = [1, 1]} : vector<2x192xf32> to vector<2x128xf32>
    %201 = vector.extract_strided_slice %199 {offsets = [0, 0], sizes = [2, 128], strides = [1, 1]} : vector<2x192xf32> to vector<2x128xf32>
    %202 = arith.addf %200, %201 : vector<2x128xf32>
    %203 = arith.negf %202 : vector<2x128xf32>
    %204 = math.exp %203 : vector<2x128xf32>
    %cst_56 = arith.constant 1.000000e+00 : f32
    %205 = vector.broadcast %cst_56 : f32 to vector<2x128xf32>
    %206 = arith.addf %205, %204 : vector<2x128xf32>
    %207 = arith.divf %205, %206 : vector<2x128xf32>
    %208 = vector.extract_strided_slice %207 {offsets = [0, 0], sizes = [2, 64], strides = [1, 1]} : vector<2x128xf32> to vector<2x64xf32>
    %209 = vector.extract_strided_slice %207 {offsets = [0, 64], sizes = [2, 64], strides = [1, 1]} : vector<2x128xf32> to vector<2x64xf32>
    %210 = vector.extract_strided_slice %196 {offsets = [0, 128], sizes = [2, 64], strides = [1, 1]} : vector<2x192xf32> to vector<2x64xf32>
    %211 = vector.extract_strided_slice %199 {offsets = [0, 128], sizes = [2, 64], strides = [1, 1]} : vector<2x192xf32> to vector<2x64xf32>
    %212 = arith.mulf %208, %211 : vector<2x64xf32>
    %213 = arith.addf %210, %212 : vector<2x64xf32>
    %214 = math.tanh %213 : vector<2x64xf32>
    %cst_57 = arith.constant 1.000000e+00 : f32
    %215 = vector.broadcast %cst_57 : f32 to vector<2x64xf32>
    %216 = arith.subf %215, %209 : vector<2x64xf32>
    %217 = arith.mulf %216, %214 : vector<2x64xf32>
    %218 = arith.mulf %209, %169 : vector<2x64xf32>
    %219 = arith.addf %217, %218 : vector<2x64xf32>
    %c6 = arith.constant 6 : index
    %c0_58 = arith.constant 0 : index
    %220 = vector.load %arg21[%c6, %c0_58] : memref<32x128xf32, #tpu.memory_space<vmem>>, vector<2x64xf32>
    tpu.vector_store %arg21[%c6, %c0_58], %219 {strides = array<i32>} : memref<32x128xf32, #tpu.memory_space<vmem>>, vector<2x64xf32>,
    %221 = vector.extract_strided_slice %39 {offsets = [24, 0], sizes = [2, 192], strides = [1, 1]} : vector<32x192xf32> to vector<2x192xf32>
    %cst_59 = arith.constant dense<0.000000e+00> : vector<2x192xf32>
    %222 = tpu.matmul %194, %42, %cst_59 {dimension_numbers = #tpu.dot_dimension_numbers<[1], [0], [0], [1], [0, 0, 1, 1], [], []>} : vector<2x64xf32>, vector<64x192xf32>, vector<2x192xf32> -> vector<2x192xf32>
    %223 = vector.broadcast %43 : vector<1x192xf32> to vector<2x192xf32>
    %224 = arith.addf %222, %223 : vector<2x192xf32>
    %225 = vector.extract_strided_slice %221 {offsets = [0, 0], sizes = [2, 128], strides = [1, 1]} : vector<2x192xf32> to vector<2x128xf32>
    %226 = vector.extract_strided_slice %224 {offsets = [0, 0], sizes = [2, 128], strides = [1, 1]} : vector<2x192xf32> to vector<2x128xf32>
    %227 = arith.addf %225, %226 : vector<2x128xf32>
    %228 = arith.negf %227 : vector<2x128xf32>
    %229 = math.exp %228 : vector<2x128xf32>
    %cst_60 = arith.constant 1.000000e+00 : f32
    %230 = vector.broadcast %cst_60 : f32 to vector<2x128xf32>
    %231 = arith.addf %230, %229 : vector<2x128xf32>
    %232 = arith.divf %230, %231 : vector<2x128xf32>
    %233 = vector.extract_strided_slice %232 {offsets = [0, 0], sizes = [2, 64], strides = [1, 1]} : vector<2x128xf32> to vector<2x64xf32>
    %234 = vector.extract_strided_slice %232 {offsets = [0, 64], sizes = [2, 64], strides = [1, 1]} : vector<2x128xf32> to vector<2x64xf32>
    %235 = vector.extract_strided_slice %221 {offsets = [0, 128], sizes = [2, 64], strides = [1, 1]} : vector<2x192xf32> to vector<2x64xf32>
    %236 = vector.extract_strided_slice %224 {offsets = [0, 128], sizes = [2, 64], strides = [1, 1]} : vector<2x192xf32> to vector<2x64xf32>
    %237 = arith.mulf %233, %236 : vector<2x64xf32>
    %238 = arith.addf %235, %237 : vector<2x64xf32>
    %239 = math.tanh %238 : vector<2x64xf32>
    %cst_61 = arith.constant 1.000000e+00 : f32
    %240 = vector.broadcast %cst_61 : f32 to vector<2x64xf32>
    %241 = arith.subf %240, %234 : vector<2x64xf32>
    %242 = arith.mulf %241, %239 : vector<2x64xf32>
    %243 = arith.mulf %234, %194 : vector<2x64xf32>
    %244 = arith.addf %242, %243 : vector<2x64xf32>
    %c24 = arith.constant 24 : index
    %c64_62 = arith.constant 64 : index
    %245 = vector.load %arg21[%c24, %c64_62] : memref<32x128xf32, #tpu.memory_space<vmem>>, vector<2x64xf32>
    tpu.vector_store %arg21[%c24, %c64_62], %244 {strides = array<i32>} : memref<32x128xf32, #tpu.memory_space<vmem>>, vector<2x64xf32>,
    %246 = vector.extract_strided_slice %34 {offsets = [8, 0], sizes = [2, 192], strides = [1, 1]} : vector<32x192xf32> to vector<2x192xf32>
    %cst_63 = arith.constant dense<0.000000e+00> : vector<2x192xf32>
    %247 = tpu.matmul %219, %40, %cst_63 {dimension_numbers = #tpu.dot_dimension_numbers<[1], [0], [0], [1], [0, 0, 1, 1], [], []>} : vector<2x64xf32>, vector<64x192xf32>, vector<2x192xf32> -> vector<2x192xf32>
    %248 = vector.broadcast %41 : vector<1x192xf32> to vector<2x192xf32>
    %249 = arith.addf %247, %248 : vector<2x192xf32>
    %250 = vector.extract_strided_slice %246 {offsets = [0, 0], sizes = [2, 128], strides = [1, 1]} : vector<2x192xf32> to vector<2x128xf32>
    %251 = vector.extract_strided_slice %249 {offsets = [0, 0], sizes = [2, 128], strides = [1, 1]} : vector<2x192xf32> to vector<2x128xf32>
    %252 = arith.addf %250, %251 : vector<2x128xf32>
    %253 = arith.negf %252 : vector<2x128xf32>
    %254 = math.exp %253 : vector<2x128xf32>
    %cst_64 = arith.constant 1.000000e+00 : f32
    %255 = vector.broadcast %cst_64 : f32 to vector<2x128xf32>
    %256 = arith.addf %255, %254 : vector<2x128xf32>
    %257 = arith.divf %255, %256 : vector<2x128xf32>
    %258 = vector.extract_strided_slice %257 {offsets = [0, 0], sizes = [2, 64], strides = [1, 1]} : vector<2x128xf32> to vector<2x64xf32>
    %259 = vector.extract_strided_slice %257 {offsets = [0, 64], sizes = [2, 64], strides = [1, 1]} : vector<2x128xf32> to vector<2x64xf32>
    %260 = vector.extract_strided_slice %246 {offsets = [0, 128], sizes = [2, 64], strides = [1, 1]} : vector<2x192xf32> to vector<2x64xf32>
    %261 = vector.extract_strided_slice %249 {offsets = [0, 128], sizes = [2, 64], strides = [1, 1]} : vector<2x192xf32> to vector<2x64xf32>
    %262 = arith.mulf %258, %261 : vector<2x64xf32>
    %263 = arith.addf %260, %262 : vector<2x64xf32>
    %264 = math.tanh %263 : vector<2x64xf32>
    %cst_65 = arith.constant 1.000000e+00 : f32
    %265 = vector.broadcast %cst_65 : f32 to vector<2x64xf32>
    %266 = arith.subf %265, %259 : vector<2x64xf32>
    %267 = arith.mulf %266, %264 : vector<2x64xf32>
    %268 = arith.mulf %259, %219 : vector<2x64xf32>
    %269 = arith.addf %267, %268 : vector<2x64xf32>
    %c8 = arith.constant 8 : index
    %c0_66 = arith.constant 0 : index
    %270 = vector.load %arg21[%c8, %c0_66] : memref<32x128xf32, #tpu.memory_space<vmem>>, vector<2x64xf32>
    tpu.vector_store %arg21[%c8, %c0_66], %269 {strides = array<i32>} : memref<32x128xf32, #tpu.memory_space<vmem>>, vector<2x64xf32>,
    %271 = vector.extract_strided_slice %39 {offsets = [22, 0], sizes = [2, 192], strides = [1, 1]} : vector<32x192xf32> to vector<2x192xf32>
    %cst_67 = arith.constant dense<0.000000e+00> : vector<2x192xf32>
    %272 = tpu.matmul %244, %42, %cst_67 {dimension_numbers = #tpu.dot_dimension_numbers<[1], [0], [0], [1], [0, 0, 1, 1], [], []>} : vector<2x64xf32>, vector<64x192xf32>, vector<2x192xf32> -> vector<2x192xf32>
    %273 = vector.broadcast %43 : vector<1x192xf32> to vector<2x192xf32>
    %274 = arith.addf %272, %273 : vector<2x192xf32>
    %275 = vector.extract_strided_slice %271 {offsets = [0, 0], sizes = [2, 128], strides = [1, 1]} : vector<2x192xf32> to vector<2x128xf32>
    %276 = vector.extract_strided_slice %274 {offsets = [0, 0], sizes = [2, 128], strides = [1, 1]} : vector<2x192xf32> to vector<2x128xf32>
    %277 = arith.addf %275, %276 : vector<2x128xf32>
    %278 = arith.negf %277 : vector<2x128xf32>
    %279 = math.exp %278 : vector<2x128xf32>
    %cst_68 = arith.constant 1.000000e+00 : f32
    %280 = vector.broadcast %cst_68 : f32 to vector<2x128xf32>
    %281 = arith.addf %280, %279 : vector<2x128xf32>
    %282 = arith.divf %280, %281 : vector<2x128xf32>
    %283 = vector.extract_strided_slice %282 {offsets = [0, 0], sizes = [2, 64], strides = [1, 1]} : vector<2x128xf32> to vector<2x64xf32>
    %284 = vector.extract_strided_slice %282 {offsets = [0, 64], sizes = [2, 64], strides = [1, 1]} : vector<2x128xf32> to vector<2x64xf32>
    %285 = vector.extract_strided_slice %271 {offsets = [0, 128], sizes = [2, 64], strides = [1, 1]} : vector<2x192xf32> to vector<2x64xf32>
    %286 = vector.extract_strided_slice %274 {offsets = [0, 128], sizes = [2, 64], strides = [1, 1]} : vector<2x192xf32> to vector<2x64xf32>
    %287 = arith.mulf %283, %286 : vector<2x64xf32>
    %288 = arith.addf %285, %287 : vector<2x64xf32>
    %289 = math.tanh %288 : vector<2x64xf32>
    %cst_69 = arith.constant 1.000000e+00 : f32
    %290 = vector.broadcast %cst_69 : f32 to vector<2x64xf32>
    %291 = arith.subf %290, %284 : vector<2x64xf32>
    %292 = arith.mulf %291, %289 : vector<2x64xf32>
    %293 = arith.mulf %284, %244 : vector<2x64xf32>
    %294 = arith.addf %292, %293 : vector<2x64xf32>
    %c22 = arith.constant 22 : index
    %c64_70 = arith.constant 64 : index
    %295 = vector.load %arg21[%c22, %c64_70] : memref<32x128xf32, #tpu.memory_space<vmem>>, vector<2x64xf32>
    tpu.vector_store %arg21[%c22, %c64_70], %294 {strides = array<i32>} : memref<32x128xf32, #tpu.memory_space<vmem>>, vector<2x64xf32>,
    %296 = vector.extract_strided_slice %34 {offsets = [10, 0], sizes = [2, 192], strides = [1, 1]} : vector<32x192xf32> to vector<2x192xf32>
    %cst_71 = arith.constant dense<0.000000e+00> : vector<2x192xf32>
    %297 = tpu.matmul %269, %40, %cst_71 {dimension_numbers = #tpu.dot_dimension_numbers<[1], [0], [0], [1], [0, 0, 1, 1], [], []>} : vector<2x64xf32>, vector<64x192xf32>, vector<2x192xf32> -> vector<2x192xf32>
    %298 = vector.broadcast %41 : vector<1x192xf32> to vector<2x192xf32>
    %299 = arith.addf %297, %298 : vector<2x192xf32>
    %300 = vector.extract_strided_slice %296 {offsets = [0, 0], sizes = [2, 128], strides = [1, 1]} : vector<2x192xf32> to vector<2x128xf32>
    %301 = vector.extract_strided_slice %299 {offsets = [0, 0], sizes = [2, 128], strides = [1, 1]} : vector<2x192xf32> to vector<2x128xf32>
    %302 = arith.addf %300, %301 : vector<2x128xf32>
    %303 = arith.negf %302 : vector<2x128xf32>
    %304 = math.exp %303 : vector<2x128xf32>
    %cst_72 = arith.constant 1.000000e+00 : f32
    %305 = vector.broadcast %cst_72 : f32 to vector<2x128xf32>
    %306 = arith.addf %305, %304 : vector<2x128xf32>
    %307 = arith.divf %305, %306 : vector<2x128xf32>
    %308 = vector.extract_strided_slice %307 {offsets = [0, 0], sizes = [2, 64], strides = [1, 1]} : vector<2x128xf32> to vector<2x64xf32>
    %309 = vector.extract_strided_slice %307 {offsets = [0, 64], sizes = [2, 64], strides = [1, 1]} : vector<2x128xf32> to vector<2x64xf32>
    %310 = vector.extract_strided_slice %296 {offsets = [0, 128], sizes = [2, 64], strides = [1, 1]} : vector<2x192xf32> to vector<2x64xf32>
    %311 = vector.extract_strided_slice %299 {offsets = [0, 128], sizes = [2, 64], strides = [1, 1]} : vector<2x192xf32> to vector<2x64xf32>
    %312 = arith.mulf %308, %311 : vector<2x64xf32>
    %313 = arith.addf %310, %312 : vector<2x64xf32>
    %314 = math.tanh %313 : vector<2x64xf32>
    %cst_73 = arith.constant 1.000000e+00 : f32
    %315 = vector.broadcast %cst_73 : f32 to vector<2x64xf32>
    %316 = arith.subf %315, %309 : vector<2x64xf32>
    %317 = arith.mulf %316, %314 : vector<2x64xf32>
    %318 = arith.mulf %309, %269 : vector<2x64xf32>
    %319 = arith.addf %317, %318 : vector<2x64xf32>
    %c10 = arith.constant 10 : index
    %c0_74 = arith.constant 0 : index
    %320 = vector.load %arg21[%c10, %c0_74] : memref<32x128xf32, #tpu.memory_space<vmem>>, vector<2x64xf32>
    tpu.vector_store %arg21[%c10, %c0_74], %319 {strides = array<i32>} : memref<32x128xf32, #tpu.memory_space<vmem>>, vector<2x64xf32>,
    %321 = vector.extract_strided_slice %39 {offsets = [20, 0], sizes = [2, 192], strides = [1, 1]} : vector<32x192xf32> to vector<2x192xf32>
    %cst_75 = arith.constant dense<0.000000e+00> : vector<2x192xf32>
    %322 = tpu.matmul %294, %42, %cst_75 {dimension_numbers = #tpu.dot_dimension_numbers<[1], [0], [0], [1], [0, 0, 1, 1], [], []>} : vector<2x64xf32>, vector<64x192xf32>, vector<2x192xf32> -> vector<2x192xf32>
    %323 = vector.broadcast %43 : vector<1x192xf32> to vector<2x192xf32>
    %324 = arith.addf %322, %323 : vector<2x192xf32>
    %325 = vector.extract_strided_slice %321 {offsets = [0, 0], sizes = [2, 128], strides = [1, 1]} : vector<2x192xf32> to vector<2x128xf32>
    %326 = vector.extract_strided_slice %324 {offsets = [0, 0], sizes = [2, 128], strides = [1, 1]} : vector<2x192xf32> to vector<2x128xf32>
    %327 = arith.addf %325, %326 : vector<2x128xf32>
    %328 = arith.negf %327 : vector<2x128xf32>
    %329 = math.exp %328 : vector<2x128xf32>
    %cst_76 = arith.constant 1.000000e+00 : f32
    %330 = vector.broadcast %cst_76 : f32 to vector<2x128xf32>
    %331 = arith.addf %330, %329 : vector<2x128xf32>
    %332 = arith.divf %330, %331 : vector<2x128xf32>
    %333 = vector.extract_strided_slice %332 {offsets = [0, 0], sizes = [2, 64], strides = [1, 1]} : vector<2x128xf32> to vector<2x64xf32>
    %334 = vector.extract_strided_slice %332 {offsets = [0, 64], sizes = [2, 64], strides = [1, 1]} : vector<2x128xf32> to vector<2x64xf32>
    %335 = vector.extract_strided_slice %321 {offsets = [0, 128], sizes = [2, 64], strides = [1, 1]} : vector<2x192xf32> to vector<2x64xf32>
    %336 = vector.extract_strided_slice %324 {offsets = [0, 128], sizes = [2, 64], strides = [1, 1]} : vector<2x192xf32> to vector<2x64xf32>
    %337 = arith.mulf %333, %336 : vector<2x64xf32>
    %338 = arith.addf %335, %337 : vector<2x64xf32>
    %339 = math.tanh %338 : vector<2x64xf32>
    %cst_77 = arith.constant 1.000000e+00 : f32
    %340 = vector.broadcast %cst_77 : f32 to vector<2x64xf32>
    %341 = arith.subf %340, %334 : vector<2x64xf32>
    %342 = arith.mulf %341, %339 : vector<2x64xf32>
    %343 = arith.mulf %334, %294 : vector<2x64xf32>
    %344 = arith.addf %342, %343 : vector<2x64xf32>
    %c20 = arith.constant 20 : index
    %c64_78 = arith.constant 64 : index
    %345 = vector.load %arg21[%c20, %c64_78] : memref<32x128xf32, #tpu.memory_space<vmem>>, vector<2x64xf32>
    tpu.vector_store %arg21[%c20, %c64_78], %344 {strides = array<i32>} : memref<32x128xf32, #tpu.memory_space<vmem>>, vector<2x64xf32>,
    %346 = vector.extract_strided_slice %34 {offsets = [12, 0], sizes = [2, 192], strides = [1, 1]} : vector<32x192xf32> to vector<2x192xf32>
    %cst_79 = arith.constant dense<0.000000e+00> : vector<2x192xf32>
    %347 = tpu.matmul %319, %40, %cst_79 {dimension_numbers = #tpu.dot_dimension_numbers<[1], [0], [0], [1], [0, 0, 1, 1], [], []>} : vector<2x64xf32>, vector<64x192xf32>, vector<2x192xf32> -> vector<2x192xf32>
    %348 = vector.broadcast %41 : vector<1x192xf32> to vector<2x192xf32>
    %349 = arith.addf %347, %348 : vector<2x192xf32>
    %350 = vector.extract_strided_slice %346 {offsets = [0, 0], sizes = [2, 128], strides = [1, 1]} : vector<2x192xf32> to vector<2x128xf32>
    %351 = vector.extract_strided_slice %349 {offsets = [0, 0], sizes = [2, 128], strides = [1, 1]} : vector<2x192xf32> to vector<2x128xf32>
    %352 = arith.addf %350, %351 : vector<2x128xf32>
    %353 = arith.negf %352 : vector<2x128xf32>
    %354 = math.exp %353 : vector<2x128xf32>
    %cst_80 = arith.constant 1.000000e+00 : f32
    %355 = vector.broadcast %cst_80 : f32 to vector<2x128xf32>
    %356 = arith.addf %355, %354 : vector<2x128xf32>
    %357 = arith.divf %355, %356 : vector<2x128xf32>
    %358 = vector.extract_strided_slice %357 {offsets = [0, 0], sizes = [2, 64], strides = [1, 1]} : vector<2x128xf32> to vector<2x64xf32>
    %359 = vector.extract_strided_slice %357 {offsets = [0, 64], sizes = [2, 64], strides = [1, 1]} : vector<2x128xf32> to vector<2x64xf32>
    %360 = vector.extract_strided_slice %346 {offsets = [0, 128], sizes = [2, 64], strides = [1, 1]} : vector<2x192xf32> to vector<2x64xf32>
    %361 = vector.extract_strided_slice %349 {offsets = [0, 128], sizes = [2, 64], strides = [1, 1]} : vector<2x192xf32> to vector<2x64xf32>
    %362 = arith.mulf %358, %361 : vector<2x64xf32>
    %363 = arith.addf %360, %362 : vector<2x64xf32>
    %364 = math.tanh %363 : vector<2x64xf32>
    %cst_81 = arith.constant 1.000000e+00 : f32
    %365 = vector.broadcast %cst_81 : f32 to vector<2x64xf32>
    %366 = arith.subf %365, %359 : vector<2x64xf32>
    %367 = arith.mulf %366, %364 : vector<2x64xf32>
    %368 = arith.mulf %359, %319 : vector<2x64xf32>
    %369 = arith.addf %367, %368 : vector<2x64xf32>
    %c12 = arith.constant 12 : index
    %c0_82 = arith.constant 0 : index
    %370 = vector.load %arg21[%c12, %c0_82] : memref<32x128xf32, #tpu.memory_space<vmem>>, vector<2x64xf32>
    tpu.vector_store %arg21[%c12, %c0_82], %369 {strides = array<i32>} : memref<32x128xf32, #tpu.memory_space<vmem>>, vector<2x64xf32>,
    %371 = vector.extract_strided_slice %39 {offsets = [18, 0], sizes = [2, 192], strides = [1, 1]} : vector<32x192xf32> to vector<2x192xf32>
    %cst_83 = arith.constant dense<0.000000e+00> : vector<2x192xf32>
    %372 = tpu.matmul %344, %42, %cst_83 {dimension_numbers = #tpu.dot_dimension_numbers<[1], [0], [0], [1], [0, 0, 1, 1], [], []>} : vector<2x64xf32>, vector<64x192xf32>, vector<2x192xf32> -> vector<2x192xf32>
    %373 = vector.broadcast %43 : vector<1x192xf32> to vector<2x192xf32>
    %374 = arith.addf %372, %373 : vector<2x192xf32>
    %375 = vector.extract_strided_slice %371 {offsets = [0, 0], sizes = [2, 128], strides = [1, 1]} : vector<2x192xf32> to vector<2x128xf32>
    %376 = vector.extract_strided_slice %374 {offsets = [0, 0], sizes = [2, 128], strides = [1, 1]} : vector<2x192xf32> to vector<2x128xf32>
    %377 = arith.addf %375, %376 : vector<2x128xf32>
    %378 = arith.negf %377 : vector<2x128xf32>
    %379 = math.exp %378 : vector<2x128xf32>
    %cst_84 = arith.constant 1.000000e+00 : f32
    %380 = vector.broadcast %cst_84 : f32 to vector<2x128xf32>
    %381 = arith.addf %380, %379 : vector<2x128xf32>
    %382 = arith.divf %380, %381 : vector<2x128xf32>
    %383 = vector.extract_strided_slice %382 {offsets = [0, 0], sizes = [2, 64], strides = [1, 1]} : vector<2x128xf32> to vector<2x64xf32>
    %384 = vector.extract_strided_slice %382 {offsets = [0, 64], sizes = [2, 64], strides = [1, 1]} : vector<2x128xf32> to vector<2x64xf32>
    %385 = vector.extract_strided_slice %371 {offsets = [0, 128], sizes = [2, 64], strides = [1, 1]} : vector<2x192xf32> to vector<2x64xf32>
    %386 = vector.extract_strided_slice %374 {offsets = [0, 128], sizes = [2, 64], strides = [1, 1]} : vector<2x192xf32> to vector<2x64xf32>
    %387 = arith.mulf %383, %386 : vector<2x64xf32>
    %388 = arith.addf %385, %387 : vector<2x64xf32>
    %389 = math.tanh %388 : vector<2x64xf32>
    %cst_85 = arith.constant 1.000000e+00 : f32
    %390 = vector.broadcast %cst_85 : f32 to vector<2x64xf32>
    %391 = arith.subf %390, %384 : vector<2x64xf32>
    %392 = arith.mulf %391, %389 : vector<2x64xf32>
    %393 = arith.mulf %384, %344 : vector<2x64xf32>
    %394 = arith.addf %392, %393 : vector<2x64xf32>
    %c18 = arith.constant 18 : index
    %c64_86 = arith.constant 64 : index
    %395 = vector.load %arg21[%c18, %c64_86] : memref<32x128xf32, #tpu.memory_space<vmem>>, vector<2x64xf32>
    tpu.vector_store %arg21[%c18, %c64_86], %394 {strides = array<i32>} : memref<32x128xf32, #tpu.memory_space<vmem>>, vector<2x64xf32>,
    %396 = vector.extract_strided_slice %34 {offsets = [14, 0], sizes = [2, 192], strides = [1, 1]} : vector<32x192xf32> to vector<2x192xf32>
    %cst_87 = arith.constant dense<0.000000e+00> : vector<2x192xf32>
    %397 = tpu.matmul %369, %40, %cst_87 {dimension_numbers = #tpu.dot_dimension_numbers<[1], [0], [0], [1], [0, 0, 1, 1], [], []>} : vector<2x64xf32>, vector<64x192xf32>, vector<2x192xf32> -> vector<2x192xf32>
    %398 = vector.broadcast %41 : vector<1x192xf32> to vector<2x192xf32>
    %399 = arith.addf %397, %398 : vector<2x192xf32>
    %400 = vector.extract_strided_slice %396 {offsets = [0, 0], sizes = [2, 128], strides = [1, 1]} : vector<2x192xf32> to vector<2x128xf32>
    %401 = vector.extract_strided_slice %399 {offsets = [0, 0], sizes = [2, 128], strides = [1, 1]} : vector<2x192xf32> to vector<2x128xf32>
    %402 = arith.addf %400, %401 : vector<2x128xf32>
    %403 = arith.negf %402 : vector<2x128xf32>
    %404 = math.exp %403 : vector<2x128xf32>
    %cst_88 = arith.constant 1.000000e+00 : f32
    %405 = vector.broadcast %cst_88 : f32 to vector<2x128xf32>
    %406 = arith.addf %405, %404 : vector<2x128xf32>
    %407 = arith.divf %405, %406 : vector<2x128xf32>
    %408 = vector.extract_strided_slice %407 {offsets = [0, 0], sizes = [2, 64], strides = [1, 1]} : vector<2x128xf32> to vector<2x64xf32>
    %409 = vector.extract_strided_slice %407 {offsets = [0, 64], sizes = [2, 64], strides = [1, 1]} : vector<2x128xf32> to vector<2x64xf32>
    %410 = vector.extract_strided_slice %396 {offsets = [0, 128], sizes = [2, 64], strides = [1, 1]} : vector<2x192xf32> to vector<2x64xf32>
    %411 = vector.extract_strided_slice %399 {offsets = [0, 128], sizes = [2, 64], strides = [1, 1]} : vector<2x192xf32> to vector<2x64xf32>
    %412 = arith.mulf %408, %411 : vector<2x64xf32>
    %413 = arith.addf %410, %412 : vector<2x64xf32>
    %414 = math.tanh %413 : vector<2x64xf32>
    %cst_89 = arith.constant 1.000000e+00 : f32
    %415 = vector.broadcast %cst_89 : f32 to vector<2x64xf32>
    %416 = arith.subf %415, %409 : vector<2x64xf32>
    %417 = arith.mulf %416, %414 : vector<2x64xf32>
    %418 = arith.mulf %409, %369 : vector<2x64xf32>
    %419 = arith.addf %417, %418 : vector<2x64xf32>
    %c14 = arith.constant 14 : index
    %c0_90 = arith.constant 0 : index
    %420 = vector.load %arg21[%c14, %c0_90] : memref<32x128xf32, #tpu.memory_space<vmem>>, vector<2x64xf32>
    tpu.vector_store %arg21[%c14, %c0_90], %419 {strides = array<i32>} : memref<32x128xf32, #tpu.memory_space<vmem>>, vector<2x64xf32>,
    %421 = vector.extract_strided_slice %39 {offsets = [16, 0], sizes = [2, 192], strides = [1, 1]} : vector<32x192xf32> to vector<2x192xf32>
    %cst_91 = arith.constant dense<0.000000e+00> : vector<2x192xf32>
    %422 = tpu.matmul %394, %42, %cst_91 {dimension_numbers = #tpu.dot_dimension_numbers<[1], [0], [0], [1], [0, 0, 1, 1], [], []>} : vector<2x64xf32>, vector<64x192xf32>, vector<2x192xf32> -> vector<2x192xf32>
    %423 = vector.broadcast %43 : vector<1x192xf32> to vector<2x192xf32>
    %424 = arith.addf %422, %423 : vector<2x192xf32>
    %425 = vector.extract_strided_slice %421 {offsets = [0, 0], sizes = [2, 128], strides = [1, 1]} : vector<2x192xf32> to vector<2x128xf32>
    %426 = vector.extract_strided_slice %424 {offsets = [0, 0], sizes = [2, 128], strides = [1, 1]} : vector<2x192xf32> to vector<2x128xf32>
    %427 = arith.addf %425, %426 : vector<2x128xf32>
    %428 = arith.negf %427 : vector<2x128xf32>
    %429 = math.exp %428 : vector<2x128xf32>
    %cst_92 = arith.constant 1.000000e+00 : f32
    %430 = vector.broadcast %cst_92 : f32 to vector<2x128xf32>
    %431 = arith.addf %430, %429 : vector<2x128xf32>
    %432 = arith.divf %430, %431 : vector<2x128xf32>
    %433 = vector.extract_strided_slice %432 {offsets = [0, 0], sizes = [2, 64], strides = [1, 1]} : vector<2x128xf32> to vector<2x64xf32>
    %434 = vector.extract_strided_slice %432 {offsets = [0, 64], sizes = [2, 64], strides = [1, 1]} : vector<2x128xf32> to vector<2x64xf32>
    %435 = vector.extract_strided_slice %421 {offsets = [0, 128], sizes = [2, 64], strides = [1, 1]} : vector<2x192xf32> to vector<2x64xf32>
    %436 = vector.extract_strided_slice %424 {offsets = [0, 128], sizes = [2, 64], strides = [1, 1]} : vector<2x192xf32> to vector<2x64xf32>
    %437 = arith.mulf %433, %436 : vector<2x64xf32>
    %438 = arith.addf %435, %437 : vector<2x64xf32>
    %439 = math.tanh %438 : vector<2x64xf32>
    %cst_93 = arith.constant 1.000000e+00 : f32
    %440 = vector.broadcast %cst_93 : f32 to vector<2x64xf32>
    %441 = arith.subf %440, %434 : vector<2x64xf32>
    %442 = arith.mulf %441, %439 : vector<2x64xf32>
    %443 = arith.mulf %434, %394 : vector<2x64xf32>
    %444 = arith.addf %442, %443 : vector<2x64xf32>
    %c16 = arith.constant 16 : index
    %c64_94 = arith.constant 64 : index
    %445 = vector.load %arg21[%c16, %c64_94] : memref<32x128xf32, #tpu.memory_space<vmem>>, vector<2x64xf32>
    tpu.vector_store %arg21[%c16, %c64_94], %444 {strides = array<i32>} : memref<32x128xf32, #tpu.memory_space<vmem>>, vector<2x64xf32>,
    %446 = vector.extract_strided_slice %34 {offsets = [16, 0], sizes = [2, 192], strides = [1, 1]} : vector<32x192xf32> to vector<2x192xf32>
    %cst_95 = arith.constant dense<0.000000e+00> : vector<2x192xf32>
    %447 = tpu.matmul %419, %40, %cst_95 {dimension_numbers = #tpu.dot_dimension_numbers<[1], [0], [0], [1], [0, 0, 1, 1], [], []>} : vector<2x64xf32>, vector<64x192xf32>, vector<2x192xf32> -> vector<2x192xf32>
    %448 = vector.broadcast %41 : vector<1x192xf32> to vector<2x192xf32>
    %449 = arith.addf %447, %448 : vector<2x192xf32>
    %450 = vector.extract_strided_slice %446 {offsets = [0, 0], sizes = [2, 128], strides = [1, 1]} : vector<2x192xf32> to vector<2x128xf32>
    %451 = vector.extract_strided_slice %449 {offsets = [0, 0], sizes = [2, 128], strides = [1, 1]} : vector<2x192xf32> to vector<2x128xf32>
    %452 = arith.addf %450, %451 : vector<2x128xf32>
    %453 = arith.negf %452 : vector<2x128xf32>
    %454 = math.exp %453 : vector<2x128xf32>
    %cst_96 = arith.constant 1.000000e+00 : f32
    %455 = vector.broadcast %cst_96 : f32 to vector<2x128xf32>
    %456 = arith.addf %455, %454 : vector<2x128xf32>
    %457 = arith.divf %455, %456 : vector<2x128xf32>
    %458 = vector.extract_strided_slice %457 {offsets = [0, 0], sizes = [2, 64], strides = [1, 1]} : vector<2x128xf32> to vector<2x64xf32>
    %459 = vector.extract_strided_slice %457 {offsets = [0, 64], sizes = [2, 64], strides = [1, 1]} : vector<2x128xf32> to vector<2x64xf32>
    %460 = vector.extract_strided_slice %446 {offsets = [0, 128], sizes = [2, 64], strides = [1, 1]} : vector<2x192xf32> to vector<2x64xf32>
    %461 = vector.extract_strided_slice %449 {offsets = [0, 128], sizes = [2, 64], strides = [1, 1]} : vector<2x192xf32> to vector<2x64xf32>
    %462 = arith.mulf %458, %461 : vector<2x64xf32>
    %463 = arith.addf %460, %462 : vector<2x64xf32>
    %464 = math.tanh %463 : vector<2x64xf32>
    %cst_97 = arith.constant 1.000000e+00 : f32
    %465 = vector.broadcast %cst_97 : f32 to vector<2x64xf32>
    %466 = arith.subf %465, %459 : vector<2x64xf32>
    %467 = arith.mulf %466, %464 : vector<2x64xf32>
    %468 = arith.mulf %459, %419 : vector<2x64xf32>
    %469 = arith.addf %467, %468 : vector<2x64xf32>
    %c16_98 = arith.constant 16 : index
    %c0_99 = arith.constant 0 : index
    %470 = vector.load %arg21[%c16_98, %c0_99] : memref<32x128xf32, #tpu.memory_space<vmem>>, vector<2x64xf32>
    tpu.vector_store %arg21[%c16_98, %c0_99], %469 {strides = array<i32>} : memref<32x128xf32, #tpu.memory_space<vmem>>, vector<2x64xf32>,
    %471 = vector.extract_strided_slice %39 {offsets = [14, 0], sizes = [2, 192], strides = [1, 1]} : vector<32x192xf32> to vector<2x192xf32>
    %cst_100 = arith.constant dense<0.000000e+00> : vector<2x192xf32>
    %472 = tpu.matmul %444, %42, %cst_100 {dimension_numbers = #tpu.dot_dimension_numbers<[1], [0], [0], [1], [0, 0, 1, 1], [], []>} : vector<2x64xf32>, vector<64x192xf32>, vector<2x192xf32> -> vector<2x192xf32>
    %473 = vector.broadcast %43 : vector<1x192xf32> to vector<2x192xf32>
    %474 = arith.addf %472, %473 : vector<2x192xf32>
    %475 = vector.extract_strided_slice %471 {offsets = [0, 0], sizes = [2, 128], strides = [1, 1]} : vector<2x192xf32> to vector<2x128xf32>
    %476 = vector.extract_strided_slice %474 {offsets = [0, 0], sizes = [2, 128], strides = [1, 1]} : vector<2x192xf32> to vector<2x128xf32>
    %477 = arith.addf %475, %476 : vector<2x128xf32>
    %478 = arith.negf %477 : vector<2x128xf32>
    %479 = math.exp %478 : vector<2x128xf32>
    %cst_101 = arith.constant 1.000000e+00 : f32
    %480 = vector.broadcast %cst_101 : f32 to vector<2x128xf32>
    %481 = arith.addf %480, %479 : vector<2x128xf32>
    %482 = arith.divf %480, %481 : vector<2x128xf32>
    %483 = vector.extract_strided_slice %482 {offsets = [0, 0], sizes = [2, 64], strides = [1, 1]} : vector<2x128xf32> to vector<2x64xf32>
    %484 = vector.extract_strided_slice %482 {offsets = [0, 64], sizes = [2, 64], strides = [1, 1]} : vector<2x128xf32> to vector<2x64xf32>
    %485 = vector.extract_strided_slice %471 {offsets = [0, 128], sizes = [2, 64], strides = [1, 1]} : vector<2x192xf32> to vector<2x64xf32>
    %486 = vector.extract_strided_slice %474 {offsets = [0, 128], sizes = [2, 64], strides = [1, 1]} : vector<2x192xf32> to vector<2x64xf32>
    %487 = arith.mulf %483, %486 : vector<2x64xf32>
    %488 = arith.addf %485, %487 : vector<2x64xf32>
    %489 = math.tanh %488 : vector<2x64xf32>
    %cst_102 = arith.constant 1.000000e+00 : f32
    %490 = vector.broadcast %cst_102 : f32 to vector<2x64xf32>
    %491 = arith.subf %490, %484 : vector<2x64xf32>
    %492 = arith.mulf %491, %489 : vector<2x64xf32>
    %493 = arith.mulf %484, %444 : vector<2x64xf32>
    %494 = arith.addf %492, %493 : vector<2x64xf32>
    %c14_103 = arith.constant 14 : index
    %c64_104 = arith.constant 64 : index
    %495 = vector.load %arg21[%c14_103, %c64_104] : memref<32x128xf32, #tpu.memory_space<vmem>>, vector<2x64xf32>
    tpu.vector_store %arg21[%c14_103, %c64_104], %494 {strides = array<i32>} : memref<32x128xf32, #tpu.memory_space<vmem>>, vector<2x64xf32>,
    %496 = vector.extract_strided_slice %34 {offsets = [18, 0], sizes = [2, 192], strides = [1, 1]} : vector<32x192xf32> to vector<2x192xf32>
    %cst_105 = arith.constant dense<0.000000e+00> : vector<2x192xf32>
    %497 = tpu.matmul %469, %40, %cst_105 {dimension_numbers = #tpu.dot_dimension_numbers<[1], [0], [0], [1], [0, 0, 1, 1], [], []>} : vector<2x64xf32>, vector<64x192xf32>, vector<2x192xf32> -> vector<2x192xf32>
    %498 = vector.broadcast %41 : vector<1x192xf32> to vector<2x192xf32>
    %499 = arith.addf %497, %498 : vector<2x192xf32>
    %500 = vector.extract_strided_slice %496 {offsets = [0, 0], sizes = [2, 128], strides = [1, 1]} : vector<2x192xf32> to vector<2x128xf32>
    %501 = vector.extract_strided_slice %499 {offsets = [0, 0], sizes = [2, 128], strides = [1, 1]} : vector<2x192xf32> to vector<2x128xf32>
    %502 = arith.addf %500, %501 : vector<2x128xf32>
    %503 = arith.negf %502 : vector<2x128xf32>
    %504 = math.exp %503 : vector<2x128xf32>
    %cst_106 = arith.constant 1.000000e+00 : f32
    %505 = vector.broadcast %cst_106 : f32 to vector<2x128xf32>
    %506 = arith.addf %505, %504 : vector<2x128xf32>
    %507 = arith.divf %505, %506 : vector<2x128xf32>
    %508 = vector.extract_strided_slice %507 {offsets = [0, 0], sizes = [2, 64], strides = [1, 1]} : vector<2x128xf32> to vector<2x64xf32>
    %509 = vector.extract_strided_slice %507 {offsets = [0, 64], sizes = [2, 64], strides = [1, 1]} : vector<2x128xf32> to vector<2x64xf32>
    %510 = vector.extract_strided_slice %496 {offsets = [0, 128], sizes = [2, 64], strides = [1, 1]} : vector<2x192xf32> to vector<2x64xf32>
    %511 = vector.extract_strided_slice %499 {offsets = [0, 128], sizes = [2, 64], strides = [1, 1]} : vector<2x192xf32> to vector<2x64xf32>
    %512 = arith.mulf %508, %511 : vector<2x64xf32>
    %513 = arith.addf %510, %512 : vector<2x64xf32>
    %514 = math.tanh %513 : vector<2x64xf32>
    %cst_107 = arith.constant 1.000000e+00 : f32
    %515 = vector.broadcast %cst_107 : f32 to vector<2x64xf32>
    %516 = arith.subf %515, %509 : vector<2x64xf32>
    %517 = arith.mulf %516, %514 : vector<2x64xf32>
    %518 = arith.mulf %509, %469 : vector<2x64xf32>
    %519 = arith.addf %517, %518 : vector<2x64xf32>
    %c18_108 = arith.constant 18 : index
    %c0_109 = arith.constant 0 : index
    %520 = vector.load %arg21[%c18_108, %c0_109] : memref<32x128xf32, #tpu.memory_space<vmem>>, vector<2x64xf32>
    tpu.vector_store %arg21[%c18_108, %c0_109], %519 {strides = array<i32>} : memref<32x128xf32, #tpu.memory_space<vmem>>, vector<2x64xf32>,
    %521 = vector.extract_strided_slice %39 {offsets = [12, 0], sizes = [2, 192], strides = [1, 1]} : vector<32x192xf32> to vector<2x192xf32>
    %cst_110 = arith.constant dense<0.000000e+00> : vector<2x192xf32>
    %522 = tpu.matmul %494, %42, %cst_110 {dimension_numbers = #tpu.dot_dimension_numbers<[1], [0], [0], [1], [0, 0, 1, 1], [], []>} : vector<2x64xf32>, vector<64x192xf32>, vector<2x192xf32> -> vector<2x192xf32>
    %523 = vector.broadcast %43 : vector<1x192xf32> to vector<2x192xf32>
    %524 = arith.addf %522, %523 : vector<2x192xf32>
    %525 = vector.extract_strided_slice %521 {offsets = [0, 0], sizes = [2, 128], strides = [1, 1]} : vector<2x192xf32> to vector<2x128xf32>
    %526 = vector.extract_strided_slice %524 {offsets = [0, 0], sizes = [2, 128], strides = [1, 1]} : vector<2x192xf32> to vector<2x128xf32>
    %527 = arith.addf %525, %526 : vector<2x128xf32>
    %528 = arith.negf %527 : vector<2x128xf32>
    %529 = math.exp %528 : vector<2x128xf32>
    %cst_111 = arith.constant 1.000000e+00 : f32
    %530 = vector.broadcast %cst_111 : f32 to vector<2x128xf32>
    %531 = arith.addf %530, %529 : vector<2x128xf32>
    %532 = arith.divf %530, %531 : vector<2x128xf32>
    %533 = vector.extract_strided_slice %532 {offsets = [0, 0], sizes = [2, 64], strides = [1, 1]} : vector<2x128xf32> to vector<2x64xf32>
    %534 = vector.extract_strided_slice %532 {offsets = [0, 64], sizes = [2, 64], strides = [1, 1]} : vector<2x128xf32> to vector<2x64xf32>
    %535 = vector.extract_strided_slice %521 {offsets = [0, 128], sizes = [2, 64], strides = [1, 1]} : vector<2x192xf32> to vector<2x64xf32>
    %536 = vector.extract_strided_slice %524 {offsets = [0, 128], sizes = [2, 64], strides = [1, 1]} : vector<2x192xf32> to vector<2x64xf32>
    %537 = arith.mulf %533, %536 : vector<2x64xf32>
    %538 = arith.addf %535, %537 : vector<2x64xf32>
    %539 = math.tanh %538 : vector<2x64xf32>
    %cst_112 = arith.constant 1.000000e+00 : f32
    %540 = vector.broadcast %cst_112 : f32 to vector<2x64xf32>
    %541 = arith.subf %540, %534 : vector<2x64xf32>
    %542 = arith.mulf %541, %539 : vector<2x64xf32>
    %543 = arith.mulf %534, %494 : vector<2x64xf32>
    %544 = arith.addf %542, %543 : vector<2x64xf32>
    %c12_113 = arith.constant 12 : index
    %c64_114 = arith.constant 64 : index
    %545 = vector.load %arg21[%c12_113, %c64_114] : memref<32x128xf32, #tpu.memory_space<vmem>>, vector<2x64xf32>
    tpu.vector_store %arg21[%c12_113, %c64_114], %544 {strides = array<i32>} : memref<32x128xf32, #tpu.memory_space<vmem>>, vector<2x64xf32>,
    %546 = vector.extract_strided_slice %34 {offsets = [20, 0], sizes = [2, 192], strides = [1, 1]} : vector<32x192xf32> to vector<2x192xf32>
    %cst_115 = arith.constant dense<0.000000e+00> : vector<2x192xf32>
    %547 = tpu.matmul %519, %40, %cst_115 {dimension_numbers = #tpu.dot_dimension_numbers<[1], [0], [0], [1], [0, 0, 1, 1], [], []>} : vector<2x64xf32>, vector<64x192xf32>, vector<2x192xf32> -> vector<2x192xf32>
    %548 = vector.broadcast %41 : vector<1x192xf32> to vector<2x192xf32>
    %549 = arith.addf %547, %548 : vector<2x192xf32>
    %550 = vector.extract_strided_slice %546 {offsets = [0, 0], sizes = [2, 128], strides = [1, 1]} : vector<2x192xf32> to vector<2x128xf32>
    %551 = vector.extract_strided_slice %549 {offsets = [0, 0], sizes = [2, 128], strides = [1, 1]} : vector<2x192xf32> to vector<2x128xf32>
    %552 = arith.addf %550, %551 : vector<2x128xf32>
    %553 = arith.negf %552 : vector<2x128xf32>
    %554 = math.exp %553 : vector<2x128xf32>
    %cst_116 = arith.constant 1.000000e+00 : f32
    %555 = vector.broadcast %cst_116 : f32 to vector<2x128xf32>
    %556 = arith.addf %555, %554 : vector<2x128xf32>
    %557 = arith.divf %555, %556 : vector<2x128xf32>
    %558 = vector.extract_strided_slice %557 {offsets = [0, 0], sizes = [2, 64], strides = [1, 1]} : vector<2x128xf32> to vector<2x64xf32>
    %559 = vector.extract_strided_slice %557 {offsets = [0, 64], sizes = [2, 64], strides = [1, 1]} : vector<2x128xf32> to vector<2x64xf32>
    %560 = vector.extract_strided_slice %546 {offsets = [0, 128], sizes = [2, 64], strides = [1, 1]} : vector<2x192xf32> to vector<2x64xf32>
    %561 = vector.extract_strided_slice %549 {offsets = [0, 128], sizes = [2, 64], strides = [1, 1]} : vector<2x192xf32> to vector<2x64xf32>
    %562 = arith.mulf %558, %561 : vector<2x64xf32>
    %563 = arith.addf %560, %562 : vector<2x64xf32>
    %564 = math.tanh %563 : vector<2x64xf32>
    %cst_117 = arith.constant 1.000000e+00 : f32
    %565 = vector.broadcast %cst_117 : f32 to vector<2x64xf32>
    %566 = arith.subf %565, %559 : vector<2x64xf32>
    %567 = arith.mulf %566, %564 : vector<2x64xf32>
    %568 = arith.mulf %559, %519 : vector<2x64xf32>
    %569 = arith.addf %567, %568 : vector<2x64xf32>
    %c20_118 = arith.constant 20 : index
    %c0_119 = arith.constant 0 : index
    %570 = vector.load %arg21[%c20_118, %c0_119] : memref<32x128xf32, #tpu.memory_space<vmem>>, vector<2x64xf32>
    tpu.vector_store %arg21[%c20_118, %c0_119], %569 {strides = array<i32>} : memref<32x128xf32, #tpu.memory_space<vmem>>, vector<2x64xf32>,
    %571 = vector.extract_strided_slice %39 {offsets = [10, 0], sizes = [2, 192], strides = [1, 1]} : vector<32x192xf32> to vector<2x192xf32>
    %cst_120 = arith.constant dense<0.000000e+00> : vector<2x192xf32>
    %572 = tpu.matmul %544, %42, %cst_120 {dimension_numbers = #tpu.dot_dimension_numbers<[1], [0], [0], [1], [0, 0, 1, 1], [], []>} : vector<2x64xf32>, vector<64x192xf32>, vector<2x192xf32> -> vector<2x192xf32>
    %573 = vector.broadcast %43 : vector<1x192xf32> to vector<2x192xf32>
    %574 = arith.addf %572, %573 : vector<2x192xf32>
    %575 = vector.extract_strided_slice %571 {offsets = [0, 0], sizes = [2, 128], strides = [1, 1]} : vector<2x192xf32> to vector<2x128xf32>
    %576 = vector.extract_strided_slice %574 {offsets = [0, 0], sizes = [2, 128], strides = [1, 1]} : vector<2x192xf32> to vector<2x128xf32>
    %577 = arith.addf %575, %576 : vector<2x128xf32>
    %578 = arith.negf %577 : vector<2x128xf32>
    %579 = math.exp %578 : vector<2x128xf32>
    %cst_121 = arith.constant 1.000000e+00 : f32
    %580 = vector.broadcast %cst_121 : f32 to vector<2x128xf32>
    %581 = arith.addf %580, %579 : vector<2x128xf32>
    %582 = arith.divf %580, %581 : vector<2x128xf32>
    %583 = vector.extract_strided_slice %582 {offsets = [0, 0], sizes = [2, 64], strides = [1, 1]} : vector<2x128xf32> to vector<2x64xf32>
    %584 = vector.extract_strided_slice %582 {offsets = [0, 64], sizes = [2, 64], strides = [1, 1]} : vector<2x128xf32> to vector<2x64xf32>
    %585 = vector.extract_strided_slice %571 {offsets = [0, 128], sizes = [2, 64], strides = [1, 1]} : vector<2x192xf32> to vector<2x64xf32>
    %586 = vector.extract_strided_slice %574 {offsets = [0, 128], sizes = [2, 64], strides = [1, 1]} : vector<2x192xf32> to vector<2x64xf32>
    %587 = arith.mulf %583, %586 : vector<2x64xf32>
    %588 = arith.addf %585, %587 : vector<2x64xf32>
    %589 = math.tanh %588 : vector<2x64xf32>
    %cst_122 = arith.constant 1.000000e+00 : f32
    %590 = vector.broadcast %cst_122 : f32 to vector<2x64xf32>
    %591 = arith.subf %590, %584 : vector<2x64xf32>
    %592 = arith.mulf %591, %589 : vector<2x64xf32>
    %593 = arith.mulf %584, %544 : vector<2x64xf32>
    %594 = arith.addf %592, %593 : vector<2x64xf32>
    %c10_123 = arith.constant 10 : index
    %c64_124 = arith.constant 64 : index
    %595 = vector.load %arg21[%c10_123, %c64_124] : memref<32x128xf32, #tpu.memory_space<vmem>>, vector<2x64xf32>
    tpu.vector_store %arg21[%c10_123, %c64_124], %594 {strides = array<i32>} : memref<32x128xf32, #tpu.memory_space<vmem>>, vector<2x64xf32>,
    %596 = vector.extract_strided_slice %34 {offsets = [22, 0], sizes = [2, 192], strides = [1, 1]} : vector<32x192xf32> to vector<2x192xf32>
    %cst_125 = arith.constant dense<0.000000e+00> : vector<2x192xf32>
    %597 = tpu.matmul %569, %40, %cst_125 {dimension_numbers = #tpu.dot_dimension_numbers<[1], [0], [0], [1], [0, 0, 1, 1], [], []>} : vector<2x64xf32>, vector<64x192xf32>, vector<2x192xf32> -> vector<2x192xf32>
    %598 = vector.broadcast %41 : vector<1x192xf32> to vector<2x192xf32>
    %599 = arith.addf %597, %598 : vector<2x192xf32>
    %600 = vector.extract_strided_slice %596 {offsets = [0, 0], sizes = [2, 128], strides = [1, 1]} : vector<2x192xf32> to vector<2x128xf32>
    %601 = vector.extract_strided_slice %599 {offsets = [0, 0], sizes = [2, 128], strides = [1, 1]} : vector<2x192xf32> to vector<2x128xf32>
    %602 = arith.addf %600, %601 : vector<2x128xf32>
    %603 = arith.negf %602 : vector<2x128xf32>
    %604 = math.exp %603 : vector<2x128xf32>
    %cst_126 = arith.constant 1.000000e+00 : f32
    %605 = vector.broadcast %cst_126 : f32 to vector<2x128xf32>
    %606 = arith.addf %605, %604 : vector<2x128xf32>
    %607 = arith.divf %605, %606 : vector<2x128xf32>
    %608 = vector.extract_strided_slice %607 {offsets = [0, 0], sizes = [2, 64], strides = [1, 1]} : vector<2x128xf32> to vector<2x64xf32>
    %609 = vector.extract_strided_slice %607 {offsets = [0, 64], sizes = [2, 64], strides = [1, 1]} : vector<2x128xf32> to vector<2x64xf32>
    %610 = vector.extract_strided_slice %596 {offsets = [0, 128], sizes = [2, 64], strides = [1, 1]} : vector<2x192xf32> to vector<2x64xf32>
    %611 = vector.extract_strided_slice %599 {offsets = [0, 128], sizes = [2, 64], strides = [1, 1]} : vector<2x192xf32> to vector<2x64xf32>
    %612 = arith.mulf %608, %611 : vector<2x64xf32>
    %613 = arith.addf %610, %612 : vector<2x64xf32>
    %614 = math.tanh %613 : vector<2x64xf32>
    %cst_127 = arith.constant 1.000000e+00 : f32
    %615 = vector.broadcast %cst_127 : f32 to vector<2x64xf32>
    %616 = arith.subf %615, %609 : vector<2x64xf32>
    %617 = arith.mulf %616, %614 : vector<2x64xf32>
    %618 = arith.mulf %609, %569 : vector<2x64xf32>
    %619 = arith.addf %617, %618 : vector<2x64xf32>
    %c22_128 = arith.constant 22 : index
    %c0_129 = arith.constant 0 : index
    %620 = vector.load %arg21[%c22_128, %c0_129] : memref<32x128xf32, #tpu.memory_space<vmem>>, vector<2x64xf32>
    tpu.vector_store %arg21[%c22_128, %c0_129], %619 {strides = array<i32>} : memref<32x128xf32, #tpu.memory_space<vmem>>, vector<2x64xf32>,
    %621 = vector.extract_strided_slice %39 {offsets = [8, 0], sizes = [2, 192], strides = [1, 1]} : vector<32x192xf32> to vector<2x192xf32>
    %cst_130 = arith.constant dense<0.000000e+00> : vector<2x192xf32>
    %622 = tpu.matmul %594, %42, %cst_130 {dimension_numbers = #tpu.dot_dimension_numbers<[1], [0], [0], [1], [0, 0, 1, 1], [], []>} : vector<2x64xf32>, vector<64x192xf32>, vector<2x192xf32> -> vector<2x192xf32>
    %623 = vector.broadcast %43 : vector<1x192xf32> to vector<2x192xf32>
    %624 = arith.addf %622, %623 : vector<2x192xf32>
    %625 = vector.extract_strided_slice %621 {offsets = [0, 0], sizes = [2, 128], strides = [1, 1]} : vector<2x192xf32> to vector<2x128xf32>
    %626 = vector.extract_strided_slice %624 {offsets = [0, 0], sizes = [2, 128], strides = [1, 1]} : vector<2x192xf32> to vector<2x128xf32>
    %627 = arith.addf %625, %626 : vector<2x128xf32>
    %628 = arith.negf %627 : vector<2x128xf32>
    %629 = math.exp %628 : vector<2x128xf32>
    %cst_131 = arith.constant 1.000000e+00 : f32
    %630 = vector.broadcast %cst_131 : f32 to vector<2x128xf32>
    %631 = arith.addf %630, %629 : vector<2x128xf32>
    %632 = arith.divf %630, %631 : vector<2x128xf32>
    %633 = vector.extract_strided_slice %632 {offsets = [0, 0], sizes = [2, 64], strides = [1, 1]} : vector<2x128xf32> to vector<2x64xf32>
    %634 = vector.extract_strided_slice %632 {offsets = [0, 64], sizes = [2, 64], strides = [1, 1]} : vector<2x128xf32> to vector<2x64xf32>
    %635 = vector.extract_strided_slice %621 {offsets = [0, 128], sizes = [2, 64], strides = [1, 1]} : vector<2x192xf32> to vector<2x64xf32>
    %636 = vector.extract_strided_slice %624 {offsets = [0, 128], sizes = [2, 64], strides = [1, 1]} : vector<2x192xf32> to vector<2x64xf32>
    %637 = arith.mulf %633, %636 : vector<2x64xf32>
    %638 = arith.addf %635, %637 : vector<2x64xf32>
    %639 = math.tanh %638 : vector<2x64xf32>
    %cst_132 = arith.constant 1.000000e+00 : f32
    %640 = vector.broadcast %cst_132 : f32 to vector<2x64xf32>
    %641 = arith.subf %640, %634 : vector<2x64xf32>
    %642 = arith.mulf %641, %639 : vector<2x64xf32>
    %643 = arith.mulf %634, %594 : vector<2x64xf32>
    %644 = arith.addf %642, %643 : vector<2x64xf32>
    %c8_133 = arith.constant 8 : index
    %c64_134 = arith.constant 64 : index
    %645 = vector.load %arg21[%c8_133, %c64_134] : memref<32x128xf32, #tpu.memory_space<vmem>>, vector<2x64xf32>
    tpu.vector_store %arg21[%c8_133, %c64_134], %644 {strides = array<i32>} : memref<32x128xf32, #tpu.memory_space<vmem>>, vector<2x64xf32>,
    %646 = vector.extract_strided_slice %34 {offsets = [24, 0], sizes = [2, 192], strides = [1, 1]} : vector<32x192xf32> to vector<2x192xf32>
    %cst_135 = arith.constant dense<0.000000e+00> : vector<2x192xf32>
    %647 = tpu.matmul %619, %40, %cst_135 {dimension_numbers = #tpu.dot_dimension_numbers<[1], [0], [0], [1], [0, 0, 1, 1], [], []>} : vector<2x64xf32>, vector<64x192xf32>, vector<2x192xf32> -> vector<2x192xf32>
    %648 = vector.broadcast %41 : vector<1x192xf32> to vector<2x192xf32>
    %649 = arith.addf %647, %648 : vector<2x192xf32>
    %650 = vector.extract_strided_slice %646 {offsets = [0, 0], sizes = [2, 128], strides = [1, 1]} : vector<2x192xf32> to vector<2x128xf32>
    %651 = vector.extract_strided_slice %649 {offsets = [0, 0], sizes = [2, 128], strides = [1, 1]} : vector<2x192xf32> to vector<2x128xf32>
    %652 = arith.addf %650, %651 : vector<2x128xf32>
    %653 = arith.negf %652 : vector<2x128xf32>
    %654 = math.exp %653 : vector<2x128xf32>
    %cst_136 = arith.constant 1.000000e+00 : f32
    %655 = vector.broadcast %cst_136 : f32 to vector<2x128xf32>
    %656 = arith.addf %655, %654 : vector<2x128xf32>
    %657 = arith.divf %655, %656 : vector<2x128xf32>
    %658 = vector.extract_strided_slice %657 {offsets = [0, 0], sizes = [2, 64], strides = [1, 1]} : vector<2x128xf32> to vector<2x64xf32>
    %659 = vector.extract_strided_slice %657 {offsets = [0, 64], sizes = [2, 64], strides = [1, 1]} : vector<2x128xf32> to vector<2x64xf32>
    %660 = vector.extract_strided_slice %646 {offsets = [0, 128], sizes = [2, 64], strides = [1, 1]} : vector<2x192xf32> to vector<2x64xf32>
    %661 = vector.extract_strided_slice %649 {offsets = [0, 128], sizes = [2, 64], strides = [1, 1]} : vector<2x192xf32> to vector<2x64xf32>
    %662 = arith.mulf %658, %661 : vector<2x64xf32>
    %663 = arith.addf %660, %662 : vector<2x64xf32>
    %664 = math.tanh %663 : vector<2x64xf32>
    %cst_137 = arith.constant 1.000000e+00 : f32
    %665 = vector.broadcast %cst_137 : f32 to vector<2x64xf32>
    %666 = arith.subf %665, %659 : vector<2x64xf32>
    %667 = arith.mulf %666, %664 : vector<2x64xf32>
    %668 = arith.mulf %659, %619 : vector<2x64xf32>
    %669 = arith.addf %667, %668 : vector<2x64xf32>
    %c24_138 = arith.constant 24 : index
    %c0_139 = arith.constant 0 : index
    %670 = vector.load %arg21[%c24_138, %c0_139] : memref<32x128xf32, #tpu.memory_space<vmem>>, vector<2x64xf32>
    tpu.vector_store %arg21[%c24_138, %c0_139], %669 {strides = array<i32>} : memref<32x128xf32, #tpu.memory_space<vmem>>, vector<2x64xf32>,
    %671 = vector.extract_strided_slice %39 {offsets = [6, 0], sizes = [2, 192], strides = [1, 1]} : vector<32x192xf32> to vector<2x192xf32>
    %cst_140 = arith.constant dense<0.000000e+00> : vector<2x192xf32>
    %672 = tpu.matmul %644, %42, %cst_140 {dimension_numbers = #tpu.dot_dimension_numbers<[1], [0], [0], [1], [0, 0, 1, 1], [], []>} : vector<2x64xf32>, vector<64x192xf32>, vector<2x192xf32> -> vector<2x192xf32>
    %673 = vector.broadcast %43 : vector<1x192xf32> to vector<2x192xf32>
    %674 = arith.addf %672, %673 : vector<2x192xf32>
    %675 = vector.extract_strided_slice %671 {offsets = [0, 0], sizes = [2, 128], strides = [1, 1]} : vector<2x192xf32> to vector<2x128xf32>
    %676 = vector.extract_strided_slice %674 {offsets = [0, 0], sizes = [2, 128], strides = [1, 1]} : vector<2x192xf32> to vector<2x128xf32>
    %677 = arith.addf %675, %676 : vector<2x128xf32>
    %678 = arith.negf %677 : vector<2x128xf32>
    %679 = math.exp %678 : vector<2x128xf32>
    %cst_141 = arith.constant 1.000000e+00 : f32
    %680 = vector.broadcast %cst_141 : f32 to vector<2x128xf32>
    %681 = arith.addf %680, %679 : vector<2x128xf32>
    %682 = arith.divf %680, %681 : vector<2x128xf32>
    %683 = vector.extract_strided_slice %682 {offsets = [0, 0], sizes = [2, 64], strides = [1, 1]} : vector<2x128xf32> to vector<2x64xf32>
    %684 = vector.extract_strided_slice %682 {offsets = [0, 64], sizes = [2, 64], strides = [1, 1]} : vector<2x128xf32> to vector<2x64xf32>
    %685 = vector.extract_strided_slice %671 {offsets = [0, 128], sizes = [2, 64], strides = [1, 1]} : vector<2x192xf32> to vector<2x64xf32>
    %686 = vector.extract_strided_slice %674 {offsets = [0, 128], sizes = [2, 64], strides = [1, 1]} : vector<2x192xf32> to vector<2x64xf32>
    %687 = arith.mulf %683, %686 : vector<2x64xf32>
    %688 = arith.addf %685, %687 : vector<2x64xf32>
    %689 = math.tanh %688 : vector<2x64xf32>
    %cst_142 = arith.constant 1.000000e+00 : f32
    %690 = vector.broadcast %cst_142 : f32 to vector<2x64xf32>
    %691 = arith.subf %690, %684 : vector<2x64xf32>
    %692 = arith.mulf %691, %689 : vector<2x64xf32>
    %693 = arith.mulf %684, %644 : vector<2x64xf32>
    %694 = arith.addf %692, %693 : vector<2x64xf32>
    %c6_143 = arith.constant 6 : index
    %c64_144 = arith.constant 64 : index
    %695 = vector.load %arg21[%c6_143, %c64_144] : memref<32x128xf32, #tpu.memory_space<vmem>>, vector<2x64xf32>
    tpu.vector_store %arg21[%c6_143, %c64_144], %694 {strides = array<i32>} : memref<32x128xf32, #tpu.memory_space<vmem>>, vector<2x64xf32>,
    %696 = vector.extract_strided_slice %34 {offsets = [26, 0], sizes = [2, 192], strides = [1, 1]} : vector<32x192xf32> to vector<2x192xf32>
    %cst_145 = arith.constant dense<0.000000e+00> : vector<2x192xf32>
    %697 = tpu.matmul %669, %40, %cst_145 {dimension_numbers = #tpu.dot_dimension_numbers<[1], [0], [0], [1], [0, 0, 1, 1], [], []>} : vector<2x64xf32>, vector<64x192xf32>, vector<2x192xf32> -> vector<2x192xf32>
    %698 = vector.broadcast %41 : vector<1x192xf32> to vector<2x192xf32>
    %699 = arith.addf %697, %698 : vector<2x192xf32>
    %700 = vector.extract_strided_slice %696 {offsets = [0, 0], sizes = [2, 128], strides = [1, 1]} : vector<2x192xf32> to vector<2x128xf32>
    %701 = vector.extract_strided_slice %699 {offsets = [0, 0], sizes = [2, 128], strides = [1, 1]} : vector<2x192xf32> to vector<2x128xf32>
    %702 = arith.addf %700, %701 : vector<2x128xf32>
    %703 = arith.negf %702 : vector<2x128xf32>
    %704 = math.exp %703 : vector<2x128xf32>
    %cst_146 = arith.constant 1.000000e+00 : f32
    %705 = vector.broadcast %cst_146 : f32 to vector<2x128xf32>
    %706 = arith.addf %705, %704 : vector<2x128xf32>
    %707 = arith.divf %705, %706 : vector<2x128xf32>
    %708 = vector.extract_strided_slice %707 {offsets = [0, 0], sizes = [2, 64], strides = [1, 1]} : vector<2x128xf32> to vector<2x64xf32>
    %709 = vector.extract_strided_slice %707 {offsets = [0, 64], sizes = [2, 64], strides = [1, 1]} : vector<2x128xf32> to vector<2x64xf32>
    %710 = vector.extract_strided_slice %696 {offsets = [0, 128], sizes = [2, 64], strides = [1, 1]} : vector<2x192xf32> to vector<2x64xf32>
    %711 = vector.extract_strided_slice %699 {offsets = [0, 128], sizes = [2, 64], strides = [1, 1]} : vector<2x192xf32> to vector<2x64xf32>
    %712 = arith.mulf %708, %711 : vector<2x64xf32>
    %713 = arith.addf %710, %712 : vector<2x64xf32>
    %714 = math.tanh %713 : vector<2x64xf32>
    %cst_147 = arith.constant 1.000000e+00 : f32
    %715 = vector.broadcast %cst_147 : f32 to vector<2x64xf32>
    %716 = arith.subf %715, %709 : vector<2x64xf32>
    %717 = arith.mulf %716, %714 : vector<2x64xf32>
    %718 = arith.mulf %709, %669 : vector<2x64xf32>
    %719 = arith.addf %717, %718 : vector<2x64xf32>
    %c26_148 = arith.constant 26 : index
    %c0_149 = arith.constant 0 : index
    %720 = vector.load %arg21[%c26_148, %c0_149] : memref<32x128xf32, #tpu.memory_space<vmem>>, vector<2x64xf32>
    tpu.vector_store %arg21[%c26_148, %c0_149], %719 {strides = array<i32>} : memref<32x128xf32, #tpu.memory_space<vmem>>, vector<2x64xf32>,
    %721 = vector.extract_strided_slice %39 {offsets = [4, 0], sizes = [2, 192], strides = [1, 1]} : vector<32x192xf32> to vector<2x192xf32>
    %cst_150 = arith.constant dense<0.000000e+00> : vector<2x192xf32>
    %722 = tpu.matmul %694, %42, %cst_150 {dimension_numbers = #tpu.dot_dimension_numbers<[1], [0], [0], [1], [0, 0, 1, 1], [], []>} : vector<2x64xf32>, vector<64x192xf32>, vector<2x192xf32> -> vector<2x192xf32>
    %723 = vector.broadcast %43 : vector<1x192xf32> to vector<2x192xf32>
    %724 = arith.addf %722, %723 : vector<2x192xf32>
    %725 = vector.extract_strided_slice %721 {offsets = [0, 0], sizes = [2, 128], strides = [1, 1]} : vector<2x192xf32> to vector<2x128xf32>
    %726 = vector.extract_strided_slice %724 {offsets = [0, 0], sizes = [2, 128], strides = [1, 1]} : vector<2x192xf32> to vector<2x128xf32>
    %727 = arith.addf %725, %726 : vector<2x128xf32>
    %728 = arith.negf %727 : vector<2x128xf32>
    %729 = math.exp %728 : vector<2x128xf32>
    %cst_151 = arith.constant 1.000000e+00 : f32
    %730 = vector.broadcast %cst_151 : f32 to vector<2x128xf32>
    %731 = arith.addf %730, %729 : vector<2x128xf32>
    %732 = arith.divf %730, %731 : vector<2x128xf32>
    %733 = vector.extract_strided_slice %732 {offsets = [0, 0], sizes = [2, 64], strides = [1, 1]} : vector<2x128xf32> to vector<2x64xf32>
    %734 = vector.extract_strided_slice %732 {offsets = [0, 64], sizes = [2, 64], strides = [1, 1]} : vector<2x128xf32> to vector<2x64xf32>
    %735 = vector.extract_strided_slice %721 {offsets = [0, 128], sizes = [2, 64], strides = [1, 1]} : vector<2x192xf32> to vector<2x64xf32>
    %736 = vector.extract_strided_slice %724 {offsets = [0, 128], sizes = [2, 64], strides = [1, 1]} : vector<2x192xf32> to vector<2x64xf32>
    %737 = arith.mulf %733, %736 : vector<2x64xf32>
    %738 = arith.addf %735, %737 : vector<2x64xf32>
    %739 = math.tanh %738 : vector<2x64xf32>
    %cst_152 = arith.constant 1.000000e+00 : f32
    %740 = vector.broadcast %cst_152 : f32 to vector<2x64xf32>
    %741 = arith.subf %740, %734 : vector<2x64xf32>
    %742 = arith.mulf %741, %739 : vector<2x64xf32>
    %743 = arith.mulf %734, %694 : vector<2x64xf32>
    %744 = arith.addf %742, %743 : vector<2x64xf32>
    %c4_153 = arith.constant 4 : index
    %c64_154 = arith.constant 64 : index
    %745 = vector.load %arg21[%c4_153, %c64_154] : memref<32x128xf32, #tpu.memory_space<vmem>>, vector<2x64xf32>
    tpu.vector_store %arg21[%c4_153, %c64_154], %744 {strides = array<i32>} : memref<32x128xf32, #tpu.memory_space<vmem>>, vector<2x64xf32>,
    %746 = vector.extract_strided_slice %34 {offsets = [28, 0], sizes = [2, 192], strides = [1, 1]} : vector<32x192xf32> to vector<2x192xf32>
    %cst_155 = arith.constant dense<0.000000e+00> : vector<2x192xf32>
    %747 = tpu.matmul %719, %40, %cst_155 {dimension_numbers = #tpu.dot_dimension_numbers<[1], [0], [0], [1], [0, 0, 1, 1], [], []>} : vector<2x64xf32>, vector<64x192xf32>, vector<2x192xf32> -> vector<2x192xf32>
    %748 = vector.broadcast %41 : vector<1x192xf32> to vector<2x192xf32>
    %749 = arith.addf %747, %748 : vector<2x192xf32>
    %750 = vector.extract_strided_slice %746 {offsets = [0, 0], sizes = [2, 128], strides = [1, 1]} : vector<2x192xf32> to vector<2x128xf32>
    %751 = vector.extract_strided_slice %749 {offsets = [0, 0], sizes = [2, 128], strides = [1, 1]} : vector<2x192xf32> to vector<2x128xf32>
    %752 = arith.addf %750, %751 : vector<2x128xf32>
    %753 = arith.negf %752 : vector<2x128xf32>
    %754 = math.exp %753 : vector<2x128xf32>
    %cst_156 = arith.constant 1.000000e+00 : f32
    %755 = vector.broadcast %cst_156 : f32 to vector<2x128xf32>
    %756 = arith.addf %755, %754 : vector<2x128xf32>
    %757 = arith.divf %755, %756 : vector<2x128xf32>
    %758 = vector.extract_strided_slice %757 {offsets = [0, 0], sizes = [2, 64], strides = [1, 1]} : vector<2x128xf32> to vector<2x64xf32>
    %759 = vector.extract_strided_slice %757 {offsets = [0, 64], sizes = [2, 64], strides = [1, 1]} : vector<2x128xf32> to vector<2x64xf32>
    %760 = vector.extract_strided_slice %746 {offsets = [0, 128], sizes = [2, 64], strides = [1, 1]} : vector<2x192xf32> to vector<2x64xf32>
    %761 = vector.extract_strided_slice %749 {offsets = [0, 128], sizes = [2, 64], strides = [1, 1]} : vector<2x192xf32> to vector<2x64xf32>
    %762 = arith.mulf %758, %761 : vector<2x64xf32>
    %763 = arith.addf %760, %762 : vector<2x64xf32>
    %764 = math.tanh %763 : vector<2x64xf32>
    %cst_157 = arith.constant 1.000000e+00 : f32
    %765 = vector.broadcast %cst_157 : f32 to vector<2x64xf32>
    %766 = arith.subf %765, %759 : vector<2x64xf32>
    %767 = arith.mulf %766, %764 : vector<2x64xf32>
    %768 = arith.mulf %759, %719 : vector<2x64xf32>
    %769 = arith.addf %767, %768 : vector<2x64xf32>
    %c28_158 = arith.constant 28 : index
    %c0_159 = arith.constant 0 : index
    %770 = vector.load %arg21[%c28_158, %c0_159] : memref<32x128xf32, #tpu.memory_space<vmem>>, vector<2x64xf32>
    tpu.vector_store %arg21[%c28_158, %c0_159], %769 {strides = array<i32>} : memref<32x128xf32, #tpu.memory_space<vmem>>, vector<2x64xf32>,
    %771 = vector.extract_strided_slice %39 {offsets = [2, 0], sizes = [2, 192], strides = [1, 1]} : vector<32x192xf32> to vector<2x192xf32>
    %cst_160 = arith.constant dense<0.000000e+00> : vector<2x192xf32>
    %772 = tpu.matmul %744, %42, %cst_160 {dimension_numbers = #tpu.dot_dimension_numbers<[1], [0], [0], [1], [0, 0, 1, 1], [], []>} : vector<2x64xf32>, vector<64x192xf32>, vector<2x192xf32> -> vector<2x192xf32>
    %773 = vector.broadcast %43 : vector<1x192xf32> to vector<2x192xf32>
    %774 = arith.addf %772, %773 : vector<2x192xf32>
    %775 = vector.extract_strided_slice %771 {offsets = [0, 0], sizes = [2, 128], strides = [1, 1]} : vector<2x192xf32> to vector<2x128xf32>
    %776 = vector.extract_strided_slice %774 {offsets = [0, 0], sizes = [2, 128], strides = [1, 1]} : vector<2x192xf32> to vector<2x128xf32>
    %777 = arith.addf %775, %776 : vector<2x128xf32>
    %778 = arith.negf %777 : vector<2x128xf32>
    %779 = math.exp %778 : vector<2x128xf32>
    %cst_161 = arith.constant 1.000000e+00 : f32
    %780 = vector.broadcast %cst_161 : f32 to vector<2x128xf32>
    %781 = arith.addf %780, %779 : vector<2x128xf32>
    %782 = arith.divf %780, %781 : vector<2x128xf32>
    %783 = vector.extract_strided_slice %782 {offsets = [0, 0], sizes = [2, 64], strides = [1, 1]} : vector<2x128xf32> to vector<2x64xf32>
    %784 = vector.extract_strided_slice %782 {offsets = [0, 64], sizes = [2, 64], strides = [1, 1]} : vector<2x128xf32> to vector<2x64xf32>
    %785 = vector.extract_strided_slice %771 {offsets = [0, 128], sizes = [2, 64], strides = [1, 1]} : vector<2x192xf32> to vector<2x64xf32>
    %786 = vector.extract_strided_slice %774 {offsets = [0, 128], sizes = [2, 64], strides = [1, 1]} : vector<2x192xf32> to vector<2x64xf32>
    %787 = arith.mulf %783, %786 : vector<2x64xf32>
    %788 = arith.addf %785, %787 : vector<2x64xf32>
    %789 = math.tanh %788 : vector<2x64xf32>
    %cst_162 = arith.constant 1.000000e+00 : f32
    %790 = vector.broadcast %cst_162 : f32 to vector<2x64xf32>
    %791 = arith.subf %790, %784 : vector<2x64xf32>
    %792 = arith.mulf %791, %789 : vector<2x64xf32>
    %793 = arith.mulf %784, %744 : vector<2x64xf32>
    %794 = arith.addf %792, %793 : vector<2x64xf32>
    %c2_163 = arith.constant 2 : index
    %c64_164 = arith.constant 64 : index
    %795 = vector.load %arg21[%c2_163, %c64_164] : memref<32x128xf32, #tpu.memory_space<vmem>>, vector<2x64xf32>
    tpu.vector_store %arg21[%c2_163, %c64_164], %794 {strides = array<i32>} : memref<32x128xf32, #tpu.memory_space<vmem>>, vector<2x64xf32>,
    %796 = vector.extract_strided_slice %34 {offsets = [30, 0], sizes = [2, 192], strides = [1, 1]} : vector<32x192xf32> to vector<2x192xf32>
    %cst_165 = arith.constant dense<0.000000e+00> : vector<2x192xf32>
    %797 = tpu.matmul %769, %40, %cst_165 {dimension_numbers = #tpu.dot_dimension_numbers<[1], [0], [0], [1], [0, 0, 1, 1], [], []>} : vector<2x64xf32>, vector<64x192xf32>, vector<2x192xf32> -> vector<2x192xf32>
    %798 = vector.broadcast %41 : vector<1x192xf32> to vector<2x192xf32>
    %799 = arith.addf %797, %798 : vector<2x192xf32>
    %800 = vector.extract_strided_slice %796 {offsets = [0, 0], sizes = [2, 128], strides = [1, 1]} : vector<2x192xf32> to vector<2x128xf32>
    %801 = vector.extract_strided_slice %799 {offsets = [0, 0], sizes = [2, 128], strides = [1, 1]} : vector<2x192xf32> to vector<2x128xf32>
    %802 = arith.addf %800, %801 : vector<2x128xf32>
    %803 = arith.negf %802 : vector<2x128xf32>
    %804 = math.exp %803 : vector<2x128xf32>
    %cst_166 = arith.constant 1.000000e+00 : f32
    %805 = vector.broadcast %cst_166 : f32 to vector<2x128xf32>
    %806 = arith.addf %805, %804 : vector<2x128xf32>
    %807 = arith.divf %805, %806 : vector<2x128xf32>
    %808 = vector.extract_strided_slice %807 {offsets = [0, 0], sizes = [2, 64], strides = [1, 1]} : vector<2x128xf32> to vector<2x64xf32>
    %809 = vector.extract_strided_slice %807 {offsets = [0, 64], sizes = [2, 64], strides = [1, 1]} : vector<2x128xf32> to vector<2x64xf32>
    %810 = vector.extract_strided_slice %796 {offsets = [0, 128], sizes = [2, 64], strides = [1, 1]} : vector<2x192xf32> to vector<2x64xf32>
    %811 = vector.extract_strided_slice %799 {offsets = [0, 128], sizes = [2, 64], strides = [1, 1]} : vector<2x192xf32> to vector<2x64xf32>
    %812 = arith.mulf %808, %811 : vector<2x64xf32>
    %813 = arith.addf %810, %812 : vector<2x64xf32>
    %814 = math.tanh %813 : vector<2x64xf32>
    %cst_167 = arith.constant 1.000000e+00 : f32
    %815 = vector.broadcast %cst_167 : f32 to vector<2x64xf32>
    %816 = arith.subf %815, %809 : vector<2x64xf32>
    %817 = arith.mulf %816, %814 : vector<2x64xf32>
    %818 = arith.mulf %809, %769 : vector<2x64xf32>
    %819 = arith.addf %817, %818 : vector<2x64xf32>
    %c30_168 = arith.constant 30 : index
    %c0_169 = arith.constant 0 : index
    %820 = vector.load %arg21[%c30_168, %c0_169] : memref<32x128xf32, #tpu.memory_space<vmem>>, vector<2x64xf32>
    tpu.vector_store %arg21[%c30_168, %c0_169], %819 {strides = array<i32>} : memref<32x128xf32, #tpu.memory_space<vmem>>, vector<2x64xf32>,
    %821 = vector.extract_strided_slice %39 {offsets = [0, 0], sizes = [2, 192], strides = [1, 1]} : vector<32x192xf32> to vector<2x192xf32>
    %cst_170 = arith.constant dense<0.000000e+00> : vector<2x192xf32>
    %822 = tpu.matmul %794, %42, %cst_170 {dimension_numbers = #tpu.dot_dimension_numbers<[1], [0], [0], [1], [0, 0, 1, 1], [], []>} : vector<2x64xf32>, vector<64x192xf32>, vector<2x192xf32> -> vector<2x192xf32>
    %823 = vector.broadcast %43 : vector<1x192xf32> to vector<2x192xf32>
    %824 = arith.addf %822, %823 : vector<2x192xf32>
    %825 = vector.extract_strided_slice %821 {offsets = [0, 0], sizes = [2, 128], strides = [1, 1]} : vector<2x192xf32> to vector<2x128xf32>
    %826 = vector.extract_strided_slice %824 {offsets = [0, 0], sizes = [2, 128], strides = [1, 1]} : vector<2x192xf32> to vector<2x128xf32>
    %827 = arith.addf %825, %826 : vector<2x128xf32>
    %828 = arith.negf %827 : vector<2x128xf32>
    %829 = math.exp %828 : vector<2x128xf32>
    %cst_171 = arith.constant 1.000000e+00 : f32
    %830 = vector.broadcast %cst_171 : f32 to vector<2x128xf32>
    %831 = arith.addf %830, %829 : vector<2x128xf32>
    %832 = arith.divf %830, %831 : vector<2x128xf32>
    %833 = vector.extract_strided_slice %832 {offsets = [0, 0], sizes = [2, 64], strides = [1, 1]} : vector<2x128xf32> to vector<2x64xf32>
    %834 = vector.extract_strided_slice %832 {offsets = [0, 64], sizes = [2, 64], strides = [1, 1]} : vector<2x128xf32> to vector<2x64xf32>
    %835 = vector.extract_strided_slice %821 {offsets = [0, 128], sizes = [2, 64], strides = [1, 1]} : vector<2x192xf32> to vector<2x64xf32>
    %836 = vector.extract_strided_slice %824 {offsets = [0, 128], sizes = [2, 64], strides = [1, 1]} : vector<2x192xf32> to vector<2x64xf32>
    %837 = arith.mulf %833, %836 : vector<2x64xf32>
    %838 = arith.addf %835, %837 : vector<2x64xf32>
    %839 = math.tanh %838 : vector<2x64xf32>
    %cst_172 = arith.constant 1.000000e+00 : f32
    %840 = vector.broadcast %cst_172 : f32 to vector<2x64xf32>
    %841 = arith.subf %840, %834 : vector<2x64xf32>
    %842 = arith.mulf %841, %839 : vector<2x64xf32>
    %843 = arith.mulf %834, %794 : vector<2x64xf32>
    %844 = arith.addf %842, %843 : vector<2x64xf32>
    %c0_173 = arith.constant 0 : index
    %c64_174 = arith.constant 64 : index
    %845 = vector.load %arg21[%c0_173, %c64_174] : memref<32x128xf32, #tpu.memory_space<vmem>>, vector<2x64xf32>
    tpu.vector_store %arg21[%c0_173, %c64_174], %844 {strides = array<i32>} : memref<32x128xf32, #tpu.memory_space<vmem>>, vector<2x64xf32>,
    %c0_175 = arith.constant 0 : index
    %c0_176 = arith.constant 0 : index
    %846 = vector.load %arg21[%c0_175, %c0_176] : memref<32x128xf32, #tpu.memory_space<vmem>>, vector<32x128xf32>
    %c0_177 = arith.constant 0 : index
    %c0_178 = arith.constant 0 : index
    %847 = vector.load %arg10[%c0_177, %c0_178] : memref<128x192xf32, #tpu.memory_space<vmem>>, vector<128x192xf32>
    %cst_179 = arith.constant dense<0.000000e+00> : vector<32x192xf32>
    %848 = tpu.matmul %846, %847, %cst_179 {dimension_numbers = #tpu.dot_dimension_numbers<[1], [0], [0], [1], [0, 0, 1, 1], [], []>} : vector<32x128xf32>, vector<128x192xf32>, vector<32x192xf32> -> vector<32x192xf32>
    %c0_180 = arith.constant 0 : index
    %c0_181 = arith.constant 0 : index
    %849 = vector.load %arg12[%c0_180, %c0_181] : memref<1x192xf32, #tpu.memory_space<vmem>>, vector<1x192xf32>
    %850 = vector.broadcast %849 : vector<1x192xf32> to vector<32x192xf32>
    %851 = arith.addf %848, %850 : vector<32x192xf32>
    %c0_182 = arith.constant 0 : index
    %c0_183 = arith.constant 0 : index
    %852 = vector.load %arg11[%c0_182, %c0_183] : memref<64x192xf32, #tpu.memory_space<vmem>>, vector<64x192xf32>
    %c0_184 = arith.constant 0 : index
    %c0_185 = arith.constant 0 : index
    %853 = vector.load %arg13[%c0_184, %c0_185] : memref<1x192xf32, #tpu.memory_space<vmem>>, vector<1x192xf32>
    %cst_186 = arith.constant 0.000000e+00 : f32
    %854 = vector.broadcast %cst_186 : f32 to vector<2x64xf32>
    %855 = vector.extract_strided_slice %851 {offsets = [0, 0], sizes = [2, 192], strides = [1, 1]} : vector<32x192xf32> to vector<2x192xf32>
    %cst_187 = arith.constant dense<0.000000e+00> : vector<2x192xf32>
    %856 = tpu.matmul %854, %852, %cst_187 {dimension_numbers = #tpu.dot_dimension_numbers<[1], [0], [0], [1], [0, 0, 1, 1], [], []>} : vector<2x64xf32>, vector<64x192xf32>, vector<2x192xf32> -> vector<2x192xf32>
    %857 = vector.broadcast %853 : vector<1x192xf32> to vector<2x192xf32>
    %858 = arith.addf %856, %857 : vector<2x192xf32>
    %859 = vector.extract_strided_slice %855 {offsets = [0, 0], sizes = [2, 128], strides = [1, 1]} : vector<2x192xf32> to vector<2x128xf32>
    %860 = vector.extract_strided_slice %858 {offsets = [0, 0], sizes = [2, 128], strides = [1, 1]} : vector<2x192xf32> to vector<2x128xf32>
    %861 = arith.addf %859, %860 : vector<2x128xf32>
    %862 = arith.negf %861 : vector<2x128xf32>
    %863 = math.exp %862 : vector<2x128xf32>
    %cst_188 = arith.constant 1.000000e+00 : f32
    %864 = vector.broadcast %cst_188 : f32 to vector<2x128xf32>
    %865 = arith.addf %864, %863 : vector<2x128xf32>
    %866 = arith.divf %864, %865 : vector<2x128xf32>
    %867 = vector.extract_strided_slice %866 {offsets = [0, 0], sizes = [2, 64], strides = [1, 1]} : vector<2x128xf32> to vector<2x64xf32>
    %868 = vector.extract_strided_slice %866 {offsets = [0, 64], sizes = [2, 64], strides = [1, 1]} : vector<2x128xf32> to vector<2x64xf32>
    %869 = vector.extract_strided_slice %855 {offsets = [0, 128], sizes = [2, 64], strides = [1, 1]} : vector<2x192xf32> to vector<2x64xf32>
    %870 = vector.extract_strided_slice %858 {offsets = [0, 128], sizes = [2, 64], strides = [1, 1]} : vector<2x192xf32> to vector<2x64xf32>
    %871 = arith.mulf %867, %870 : vector<2x64xf32>
    %872 = arith.addf %869, %871 : vector<2x64xf32>
    %873 = math.tanh %872 : vector<2x64xf32>
    %cst_189 = arith.constant 1.000000e+00 : f32
    %874 = vector.broadcast %cst_189 : f32 to vector<2x64xf32>
    %875 = arith.subf %874, %868 : vector<2x64xf32>
    %876 = arith.mulf %875, %873 : vector<2x64xf32>
    %877 = arith.mulf %868, %854 : vector<2x64xf32>
    %878 = arith.addf %876, %877 : vector<2x64xf32>
    %879 = vector.extract_strided_slice %851 {offsets = [2, 0], sizes = [2, 192], strides = [1, 1]} : vector<32x192xf32> to vector<2x192xf32>
    %cst_190 = arith.constant dense<0.000000e+00> : vector<2x192xf32>
    %880 = tpu.matmul %878, %852, %cst_190 {dimension_numbers = #tpu.dot_dimension_numbers<[1], [0], [0], [1], [0, 0, 1, 1], [], []>} : vector<2x64xf32>, vector<64x192xf32>, vector<2x192xf32> -> vector<2x192xf32>
    %881 = vector.broadcast %853 : vector<1x192xf32> to vector<2x192xf32>
    %882 = arith.addf %880, %881 : vector<2x192xf32>
    %883 = vector.extract_strided_slice %879 {offsets = [0, 0], sizes = [2, 128], strides = [1, 1]} : vector<2x192xf32> to vector<2x128xf32>
    %884 = vector.extract_strided_slice %882 {offsets = [0, 0], sizes = [2, 128], strides = [1, 1]} : vector<2x192xf32> to vector<2x128xf32>
    %885 = arith.addf %883, %884 : vector<2x128xf32>
    %886 = arith.negf %885 : vector<2x128xf32>
    %887 = math.exp %886 : vector<2x128xf32>
    %cst_191 = arith.constant 1.000000e+00 : f32
    %888 = vector.broadcast %cst_191 : f32 to vector<2x128xf32>
    %889 = arith.addf %888, %887 : vector<2x128xf32>
    %890 = arith.divf %888, %889 : vector<2x128xf32>
    %891 = vector.extract_strided_slice %890 {offsets = [0, 0], sizes = [2, 64], strides = [1, 1]} : vector<2x128xf32> to vector<2x64xf32>
    %892 = vector.extract_strided_slice %890 {offsets = [0, 64], sizes = [2, 64], strides = [1, 1]} : vector<2x128xf32> to vector<2x64xf32>
    %893 = vector.extract_strided_slice %879 {offsets = [0, 128], sizes = [2, 64], strides = [1, 1]} : vector<2x192xf32> to vector<2x64xf32>
    %894 = vector.extract_strided_slice %882 {offsets = [0, 128], sizes = [2, 64], strides = [1, 1]} : vector<2x192xf32> to vector<2x64xf32>
    %895 = arith.mulf %891, %894 : vector<2x64xf32>
    %896 = arith.addf %893, %895 : vector<2x64xf32>
    %897 = math.tanh %896 : vector<2x64xf32>
    %cst_192 = arith.constant 1.000000e+00 : f32
    %898 = vector.broadcast %cst_192 : f32 to vector<2x64xf32>
    %899 = arith.subf %898, %892 : vector<2x64xf32>
    %900 = arith.mulf %899, %897 : vector<2x64xf32>
    %901 = arith.mulf %892, %878 : vector<2x64xf32>
    %902 = arith.addf %900, %901 : vector<2x64xf32>
    %903 = vector.extract_strided_slice %851 {offsets = [4, 0], sizes = [2, 192], strides = [1, 1]} : vector<32x192xf32> to vector<2x192xf32>
    %cst_193 = arith.constant dense<0.000000e+00> : vector<2x192xf32>
    %904 = tpu.matmul %902, %852, %cst_193 {dimension_numbers = #tpu.dot_dimension_numbers<[1], [0], [0], [1], [0, 0, 1, 1], [], []>} : vector<2x64xf32>, vector<64x192xf32>, vector<2x192xf32> -> vector<2x192xf32>
    %905 = vector.broadcast %853 : vector<1x192xf32> to vector<2x192xf32>
    %906 = arith.addf %904, %905 : vector<2x192xf32>
    %907 = vector.extract_strided_slice %903 {offsets = [0, 0], sizes = [2, 128], strides = [1, 1]} : vector<2x192xf32> to vector<2x128xf32>
    %908 = vector.extract_strided_slice %906 {offsets = [0, 0], sizes = [2, 128], strides = [1, 1]} : vector<2x192xf32> to vector<2x128xf32>
    %909 = arith.addf %907, %908 : vector<2x128xf32>
    %910 = arith.negf %909 : vector<2x128xf32>
    %911 = math.exp %910 : vector<2x128xf32>
    %cst_194 = arith.constant 1.000000e+00 : f32
    %912 = vector.broadcast %cst_194 : f32 to vector<2x128xf32>
    %913 = arith.addf %912, %911 : vector<2x128xf32>
    %914 = arith.divf %912, %913 : vector<2x128xf32>
    %915 = vector.extract_strided_slice %914 {offsets = [0, 0], sizes = [2, 64], strides = [1, 1]} : vector<2x128xf32> to vector<2x64xf32>
    %916 = vector.extract_strided_slice %914 {offsets = [0, 64], sizes = [2, 64], strides = [1, 1]} : vector<2x128xf32> to vector<2x64xf32>
    %917 = vector.extract_strided_slice %903 {offsets = [0, 128], sizes = [2, 64], strides = [1, 1]} : vector<2x192xf32> to vector<2x64xf32>
    %918 = vector.extract_strided_slice %906 {offsets = [0, 128], sizes = [2, 64], strides = [1, 1]} : vector<2x192xf32> to vector<2x64xf32>
    %919 = arith.mulf %915, %918 : vector<2x64xf32>
    %920 = arith.addf %917, %919 : vector<2x64xf32>
    %921 = math.tanh %920 : vector<2x64xf32>
    %cst_195 = arith.constant 1.000000e+00 : f32
    %922 = vector.broadcast %cst_195 : f32 to vector<2x64xf32>
    %923 = arith.subf %922, %916 : vector<2x64xf32>
    %924 = arith.mulf %923, %921 : vector<2x64xf32>
    %925 = arith.mulf %916, %902 : vector<2x64xf32>
    %926 = arith.addf %924, %925 : vector<2x64xf32>
    %927 = vector.extract_strided_slice %851 {offsets = [6, 0], sizes = [2, 192], strides = [1, 1]} : vector<32x192xf32> to vector<2x192xf32>
    %cst_196 = arith.constant dense<0.000000e+00> : vector<2x192xf32>
    %928 = tpu.matmul %926, %852, %cst_196 {dimension_numbers = #tpu.dot_dimension_numbers<[1], [0], [0], [1], [0, 0, 1, 1], [], []>} : vector<2x64xf32>, vector<64x192xf32>, vector<2x192xf32> -> vector<2x192xf32>
    %929 = vector.broadcast %853 : vector<1x192xf32> to vector<2x192xf32>
    %930 = arith.addf %928, %929 : vector<2x192xf32>
    %931 = vector.extract_strided_slice %927 {offsets = [0, 0], sizes = [2, 128], strides = [1, 1]} : vector<2x192xf32> to vector<2x128xf32>
    %932 = vector.extract_strided_slice %930 {offsets = [0, 0], sizes = [2, 128], strides = [1, 1]} : vector<2x192xf32> to vector<2x128xf32>
    %933 = arith.addf %931, %932 : vector<2x128xf32>
    %934 = arith.negf %933 : vector<2x128xf32>
    %935 = math.exp %934 : vector<2x128xf32>
    %cst_197 = arith.constant 1.000000e+00 : f32
    %936 = vector.broadcast %cst_197 : f32 to vector<2x128xf32>
    %937 = arith.addf %936, %935 : vector<2x128xf32>
    %938 = arith.divf %936, %937 : vector<2x128xf32>
    %939 = vector.extract_strided_slice %938 {offsets = [0, 0], sizes = [2, 64], strides = [1, 1]} : vector<2x128xf32> to vector<2x64xf32>
    %940 = vector.extract_strided_slice %938 {offsets = [0, 64], sizes = [2, 64], strides = [1, 1]} : vector<2x128xf32> to vector<2x64xf32>
    %941 = vector.extract_strided_slice %927 {offsets = [0, 128], sizes = [2, 64], strides = [1, 1]} : vector<2x192xf32> to vector<2x64xf32>
    %942 = vector.extract_strided_slice %930 {offsets = [0, 128], sizes = [2, 64], strides = [1, 1]} : vector<2x192xf32> to vector<2x64xf32>
    %943 = arith.mulf %939, %942 : vector<2x64xf32>
    %944 = arith.addf %941, %943 : vector<2x64xf32>
    %945 = math.tanh %944 : vector<2x64xf32>
    %cst_198 = arith.constant 1.000000e+00 : f32
    %946 = vector.broadcast %cst_198 : f32 to vector<2x64xf32>
    %947 = arith.subf %946, %940 : vector<2x64xf32>
    %948 = arith.mulf %947, %945 : vector<2x64xf32>
    %949 = arith.mulf %940, %926 : vector<2x64xf32>
    %950 = arith.addf %948, %949 : vector<2x64xf32>
    %951 = vector.extract_strided_slice %851 {offsets = [8, 0], sizes = [2, 192], strides = [1, 1]} : vector<32x192xf32> to vector<2x192xf32>
    %cst_199 = arith.constant dense<0.000000e+00> : vector<2x192xf32>
    %952 = tpu.matmul %950, %852, %cst_199 {dimension_numbers = #tpu.dot_dimension_numbers<[1], [0], [0], [1], [0, 0, 1, 1], [], []>} : vector<2x64xf32>, vector<64x192xf32>, vector<2x192xf32> -> vector<2x192xf32>
    %953 = vector.broadcast %853 : vector<1x192xf32> to vector<2x192xf32>
    %954 = arith.addf %952, %953 : vector<2x192xf32>
    %955 = vector.extract_strided_slice %951 {offsets = [0, 0], sizes = [2, 128], strides = [1, 1]} : vector<2x192xf32> to vector<2x128xf32>
    %956 = vector.extract_strided_slice %954 {offsets = [0, 0], sizes = [2, 128], strides = [1, 1]} : vector<2x192xf32> to vector<2x128xf32>
    %957 = arith.addf %955, %956 : vector<2x128xf32>
    %958 = arith.negf %957 : vector<2x128xf32>
    %959 = math.exp %958 : vector<2x128xf32>
    %cst_200 = arith.constant 1.000000e+00 : f32
    %960 = vector.broadcast %cst_200 : f32 to vector<2x128xf32>
    %961 = arith.addf %960, %959 : vector<2x128xf32>
    %962 = arith.divf %960, %961 : vector<2x128xf32>
    %963 = vector.extract_strided_slice %962 {offsets = [0, 0], sizes = [2, 64], strides = [1, 1]} : vector<2x128xf32> to vector<2x64xf32>
    %964 = vector.extract_strided_slice %962 {offsets = [0, 64], sizes = [2, 64], strides = [1, 1]} : vector<2x128xf32> to vector<2x64xf32>
    %965 = vector.extract_strided_slice %951 {offsets = [0, 128], sizes = [2, 64], strides = [1, 1]} : vector<2x192xf32> to vector<2x64xf32>
    %966 = vector.extract_strided_slice %954 {offsets = [0, 128], sizes = [2, 64], strides = [1, 1]} : vector<2x192xf32> to vector<2x64xf32>
    %967 = arith.mulf %963, %966 : vector<2x64xf32>
    %968 = arith.addf %965, %967 : vector<2x64xf32>
    %969 = math.tanh %968 : vector<2x64xf32>
    %cst_201 = arith.constant 1.000000e+00 : f32
    %970 = vector.broadcast %cst_201 : f32 to vector<2x64xf32>
    %971 = arith.subf %970, %964 : vector<2x64xf32>
    %972 = arith.mulf %971, %969 : vector<2x64xf32>
    %973 = arith.mulf %964, %950 : vector<2x64xf32>
    %974 = arith.addf %972, %973 : vector<2x64xf32>
    %975 = vector.extract_strided_slice %851 {offsets = [10, 0], sizes = [2, 192], strides = [1, 1]} : vector<32x192xf32> to vector<2x192xf32>
    %cst_202 = arith.constant dense<0.000000e+00> : vector<2x192xf32>
    %976 = tpu.matmul %974, %852, %cst_202 {dimension_numbers = #tpu.dot_dimension_numbers<[1], [0], [0], [1], [0, 0, 1, 1], [], []>} : vector<2x64xf32>, vector<64x192xf32>, vector<2x192xf32> -> vector<2x192xf32>
    %977 = vector.broadcast %853 : vector<1x192xf32> to vector<2x192xf32>
    %978 = arith.addf %976, %977 : vector<2x192xf32>
    %979 = vector.extract_strided_slice %975 {offsets = [0, 0], sizes = [2, 128], strides = [1, 1]} : vector<2x192xf32> to vector<2x128xf32>
    %980 = vector.extract_strided_slice %978 {offsets = [0, 0], sizes = [2, 128], strides = [1, 1]} : vector<2x192xf32> to vector<2x128xf32>
    %981 = arith.addf %979, %980 : vector<2x128xf32>
    %982 = arith.negf %981 : vector<2x128xf32>
    %983 = math.exp %982 : vector<2x128xf32>
    %cst_203 = arith.constant 1.000000e+00 : f32
    %984 = vector.broadcast %cst_203 : f32 to vector<2x128xf32>
    %985 = arith.addf %984, %983 : vector<2x128xf32>
    %986 = arith.divf %984, %985 : vector<2x128xf32>
    %987 = vector.extract_strided_slice %986 {offsets = [0, 0], sizes = [2, 64], strides = [1, 1]} : vector<2x128xf32> to vector<2x64xf32>
    %988 = vector.extract_strided_slice %986 {offsets = [0, 64], sizes = [2, 64], strides = [1, 1]} : vector<2x128xf32> to vector<2x64xf32>
    %989 = vector.extract_strided_slice %975 {offsets = [0, 128], sizes = [2, 64], strides = [1, 1]} : vector<2x192xf32> to vector<2x64xf32>
    %990 = vector.extract_strided_slice %978 {offsets = [0, 128], sizes = [2, 64], strides = [1, 1]} : vector<2x192xf32> to vector<2x64xf32>
    %991 = arith.mulf %987, %990 : vector<2x64xf32>
    %992 = arith.addf %989, %991 : vector<2x64xf32>
    %993 = math.tanh %992 : vector<2x64xf32>
    %cst_204 = arith.constant 1.000000e+00 : f32
    %994 = vector.broadcast %cst_204 : f32 to vector<2x64xf32>
    %995 = arith.subf %994, %988 : vector<2x64xf32>
    %996 = arith.mulf %995, %993 : vector<2x64xf32>
    %997 = arith.mulf %988, %974 : vector<2x64xf32>
    %998 = arith.addf %996, %997 : vector<2x64xf32>
    %999 = vector.extract_strided_slice %851 {offsets = [12, 0], sizes = [2, 192], strides = [1, 1]} : vector<32x192xf32> to vector<2x192xf32>
    %cst_205 = arith.constant dense<0.000000e+00> : vector<2x192xf32>
    %1000 = tpu.matmul %998, %852, %cst_205 {dimension_numbers = #tpu.dot_dimension_numbers<[1], [0], [0], [1], [0, 0, 1, 1], [], []>} : vector<2x64xf32>, vector<64x192xf32>, vector<2x192xf32> -> vector<2x192xf32>
    %1001 = vector.broadcast %853 : vector<1x192xf32> to vector<2x192xf32>
    %1002 = arith.addf %1000, %1001 : vector<2x192xf32>
    %1003 = vector.extract_strided_slice %999 {offsets = [0, 0], sizes = [2, 128], strides = [1, 1]} : vector<2x192xf32> to vector<2x128xf32>
    %1004 = vector.extract_strided_slice %1002 {offsets = [0, 0], sizes = [2, 128], strides = [1, 1]} : vector<2x192xf32> to vector<2x128xf32>
    %1005 = arith.addf %1003, %1004 : vector<2x128xf32>
    %1006 = arith.negf %1005 : vector<2x128xf32>
    %1007 = math.exp %1006 : vector<2x128xf32>
    %cst_206 = arith.constant 1.000000e+00 : f32
    %1008 = vector.broadcast %cst_206 : f32 to vector<2x128xf32>
    %1009 = arith.addf %1008, %1007 : vector<2x128xf32>
    %1010 = arith.divf %1008, %1009 : vector<2x128xf32>
    %1011 = vector.extract_strided_slice %1010 {offsets = [0, 0], sizes = [2, 64], strides = [1, 1]} : vector<2x128xf32> to vector<2x64xf32>
    %1012 = vector.extract_strided_slice %1010 {offsets = [0, 64], sizes = [2, 64], strides = [1, 1]} : vector<2x128xf32> to vector<2x64xf32>
    %1013 = vector.extract_strided_slice %999 {offsets = [0, 128], sizes = [2, 64], strides = [1, 1]} : vector<2x192xf32> to vector<2x64xf32>
    %1014 = vector.extract_strided_slice %1002 {offsets = [0, 128], sizes = [2, 64], strides = [1, 1]} : vector<2x192xf32> to vector<2x64xf32>
    %1015 = arith.mulf %1011, %1014 : vector<2x64xf32>
    %1016 = arith.addf %1013, %1015 : vector<2x64xf32>
    %1017 = math.tanh %1016 : vector<2x64xf32>
    %cst_207 = arith.constant 1.000000e+00 : f32
    %1018 = vector.broadcast %cst_207 : f32 to vector<2x64xf32>
    %1019 = arith.subf %1018, %1012 : vector<2x64xf32>
    %1020 = arith.mulf %1019, %1017 : vector<2x64xf32>
    %1021 = arith.mulf %1012, %998 : vector<2x64xf32>
    %1022 = arith.addf %1020, %1021 : vector<2x64xf32>
    %1023 = vector.extract_strided_slice %851 {offsets = [14, 0], sizes = [2, 192], strides = [1, 1]} : vector<32x192xf32> to vector<2x192xf32>
    %cst_208 = arith.constant dense<0.000000e+00> : vector<2x192xf32>
    %1024 = tpu.matmul %1022, %852, %cst_208 {dimension_numbers = #tpu.dot_dimension_numbers<[1], [0], [0], [1], [0, 0, 1, 1], [], []>} : vector<2x64xf32>, vector<64x192xf32>, vector<2x192xf32> -> vector<2x192xf32>
    %1025 = vector.broadcast %853 : vector<1x192xf32> to vector<2x192xf32>
    %1026 = arith.addf %1024, %1025 : vector<2x192xf32>
    %1027 = vector.extract_strided_slice %1023 {offsets = [0, 0], sizes = [2, 128], strides = [1, 1]} : vector<2x192xf32> to vector<2x128xf32>
    %1028 = vector.extract_strided_slice %1026 {offsets = [0, 0], sizes = [2, 128], strides = [1, 1]} : vector<2x192xf32> to vector<2x128xf32>
    %1029 = arith.addf %1027, %1028 : vector<2x128xf32>
    %1030 = arith.negf %1029 : vector<2x128xf32>
    %1031 = math.exp %1030 : vector<2x128xf32>
    %cst_209 = arith.constant 1.000000e+00 : f32
    %1032 = vector.broadcast %cst_209 : f32 to vector<2x128xf32>
    %1033 = arith.addf %1032, %1031 : vector<2x128xf32>
    %1034 = arith.divf %1032, %1033 : vector<2x128xf32>
    %1035 = vector.extract_strided_slice %1034 {offsets = [0, 0], sizes = [2, 64], strides = [1, 1]} : vector<2x128xf32> to vector<2x64xf32>
    %1036 = vector.extract_strided_slice %1034 {offsets = [0, 64], sizes = [2, 64], strides = [1, 1]} : vector<2x128xf32> to vector<2x64xf32>
    %1037 = vector.extract_strided_slice %1023 {offsets = [0, 128], sizes = [2, 64], strides = [1, 1]} : vector<2x192xf32> to vector<2x64xf32>
    %1038 = vector.extract_strided_slice %1026 {offsets = [0, 128], sizes = [2, 64], strides = [1, 1]} : vector<2x192xf32> to vector<2x64xf32>
    %1039 = arith.mulf %1035, %1038 : vector<2x64xf32>
    %1040 = arith.addf %1037, %1039 : vector<2x64xf32>
    %1041 = math.tanh %1040 : vector<2x64xf32>
    %cst_210 = arith.constant 1.000000e+00 : f32
    %1042 = vector.broadcast %cst_210 : f32 to vector<2x64xf32>
    %1043 = arith.subf %1042, %1036 : vector<2x64xf32>
    %1044 = arith.mulf %1043, %1041 : vector<2x64xf32>
    %1045 = arith.mulf %1036, %1022 : vector<2x64xf32>
    %1046 = arith.addf %1044, %1045 : vector<2x64xf32>
    %1047 = vector.extract_strided_slice %851 {offsets = [16, 0], sizes = [2, 192], strides = [1, 1]} : vector<32x192xf32> to vector<2x192xf32>
    %cst_211 = arith.constant dense<0.000000e+00> : vector<2x192xf32>
    %1048 = tpu.matmul %1046, %852, %cst_211 {dimension_numbers = #tpu.dot_dimension_numbers<[1], [0], [0], [1], [0, 0, 1, 1], [], []>} : vector<2x64xf32>, vector<64x192xf32>, vector<2x192xf32> -> vector<2x192xf32>
    %1049 = vector.broadcast %853 : vector<1x192xf32> to vector<2x192xf32>
    %1050 = arith.addf %1048, %1049 : vector<2x192xf32>
    %1051 = vector.extract_strided_slice %1047 {offsets = [0, 0], sizes = [2, 128], strides = [1, 1]} : vector<2x192xf32> to vector<2x128xf32>
    %1052 = vector.extract_strided_slice %1050 {offsets = [0, 0], sizes = [2, 128], strides = [1, 1]} : vector<2x192xf32> to vector<2x128xf32>
    %1053 = arith.addf %1051, %1052 : vector<2x128xf32>
    %1054 = arith.negf %1053 : vector<2x128xf32>
    %1055 = math.exp %1054 : vector<2x128xf32>
    %cst_212 = arith.constant 1.000000e+00 : f32
    %1056 = vector.broadcast %cst_212 : f32 to vector<2x128xf32>
    %1057 = arith.addf %1056, %1055 : vector<2x128xf32>
    %1058 = arith.divf %1056, %1057 : vector<2x128xf32>
    %1059 = vector.extract_strided_slice %1058 {offsets = [0, 0], sizes = [2, 64], strides = [1, 1]} : vector<2x128xf32> to vector<2x64xf32>
    %1060 = vector.extract_strided_slice %1058 {offsets = [0, 64], sizes = [2, 64], strides = [1, 1]} : vector<2x128xf32> to vector<2x64xf32>
    %1061 = vector.extract_strided_slice %1047 {offsets = [0, 128], sizes = [2, 64], strides = [1, 1]} : vector<2x192xf32> to vector<2x64xf32>
    %1062 = vector.extract_strided_slice %1050 {offsets = [0, 128], sizes = [2, 64], strides = [1, 1]} : vector<2x192xf32> to vector<2x64xf32>
    %1063 = arith.mulf %1059, %1062 : vector<2x64xf32>
    %1064 = arith.addf %1061, %1063 : vector<2x64xf32>
    %1065 = math.tanh %1064 : vector<2x64xf32>
    %cst_213 = arith.constant 1.000000e+00 : f32
    %1066 = vector.broadcast %cst_213 : f32 to vector<2x64xf32>
    %1067 = arith.subf %1066, %1060 : vector<2x64xf32>
    %1068 = arith.mulf %1067, %1065 : vector<2x64xf32>
    %1069 = arith.mulf %1060, %1046 : vector<2x64xf32>
    %1070 = arith.addf %1068, %1069 : vector<2x64xf32>
    %1071 = vector.extract_strided_slice %851 {offsets = [18, 0], sizes = [2, 192], strides = [1, 1]} : vector<32x192xf32> to vector<2x192xf32>
    %cst_214 = arith.constant dense<0.000000e+00> : vector<2x192xf32>
    %1072 = tpu.matmul %1070, %852, %cst_214 {dimension_numbers = #tpu.dot_dimension_numbers<[1], [0], [0], [1], [0, 0, 1, 1], [], []>} : vector<2x64xf32>, vector<64x192xf32>, vector<2x192xf32> -> vector<2x192xf32>
    %1073 = vector.broadcast %853 : vector<1x192xf32> to vector<2x192xf32>
    %1074 = arith.addf %1072, %1073 : vector<2x192xf32>
    %1075 = vector.extract_strided_slice %1071 {offsets = [0, 0], sizes = [2, 128], strides = [1, 1]} : vector<2x192xf32> to vector<2x128xf32>
    %1076 = vector.extract_strided_slice %1074 {offsets = [0, 0], sizes = [2, 128], strides = [1, 1]} : vector<2x192xf32> to vector<2x128xf32>
    %1077 = arith.addf %1075, %1076 : vector<2x128xf32>
    %1078 = arith.negf %1077 : vector<2x128xf32>
    %1079 = math.exp %1078 : vector<2x128xf32>
    %cst_215 = arith.constant 1.000000e+00 : f32
    %1080 = vector.broadcast %cst_215 : f32 to vector<2x128xf32>
    %1081 = arith.addf %1080, %1079 : vector<2x128xf32>
    %1082 = arith.divf %1080, %1081 : vector<2x128xf32>
    %1083 = vector.extract_strided_slice %1082 {offsets = [0, 0], sizes = [2, 64], strides = [1, 1]} : vector<2x128xf32> to vector<2x64xf32>
    %1084 = vector.extract_strided_slice %1082 {offsets = [0, 64], sizes = [2, 64], strides = [1, 1]} : vector<2x128xf32> to vector<2x64xf32>
    %1085 = vector.extract_strided_slice %1071 {offsets = [0, 128], sizes = [2, 64], strides = [1, 1]} : vector<2x192xf32> to vector<2x64xf32>
    %1086 = vector.extract_strided_slice %1074 {offsets = [0, 128], sizes = [2, 64], strides = [1, 1]} : vector<2x192xf32> to vector<2x64xf32>
    %1087 = arith.mulf %1083, %1086 : vector<2x64xf32>
    %1088 = arith.addf %1085, %1087 : vector<2x64xf32>
    %1089 = math.tanh %1088 : vector<2x64xf32>
    %cst_216 = arith.constant 1.000000e+00 : f32
    %1090 = vector.broadcast %cst_216 : f32 to vector<2x64xf32>
    %1091 = arith.subf %1090, %1084 : vector<2x64xf32>
    %1092 = arith.mulf %1091, %1089 : vector<2x64xf32>
    %1093 = arith.mulf %1084, %1070 : vector<2x64xf32>
    %1094 = arith.addf %1092, %1093 : vector<2x64xf32>
    %1095 = vector.extract_strided_slice %851 {offsets = [20, 0], sizes = [2, 192], strides = [1, 1]} : vector<32x192xf32> to vector<2x192xf32>
    %cst_217 = arith.constant dense<0.000000e+00> : vector<2x192xf32>
    %1096 = tpu.matmul %1094, %852, %cst_217 {dimension_numbers = #tpu.dot_dimension_numbers<[1], [0], [0], [1], [0, 0, 1, 1], [], []>} : vector<2x64xf32>, vector<64x192xf32>, vector<2x192xf32> -> vector<2x192xf32>
    %1097 = vector.broadcast %853 : vector<1x192xf32> to vector<2x192xf32>
    %1098 = arith.addf %1096, %1097 : vector<2x192xf32>
    %1099 = vector.extract_strided_slice %1095 {offsets = [0, 0], sizes = [2, 128], strides = [1, 1]} : vector<2x192xf32> to vector<2x128xf32>
    %1100 = vector.extract_strided_slice %1098 {offsets = [0, 0], sizes = [2, 128], strides = [1, 1]} : vector<2x192xf32> to vector<2x128xf32>
    %1101 = arith.addf %1099, %1100 : vector<2x128xf32>
    %1102 = arith.negf %1101 : vector<2x128xf32>
    %1103 = math.exp %1102 : vector<2x128xf32>
    %cst_218 = arith.constant 1.000000e+00 : f32
    %1104 = vector.broadcast %cst_218 : f32 to vector<2x128xf32>
    %1105 = arith.addf %1104, %1103 : vector<2x128xf32>
    %1106 = arith.divf %1104, %1105 : vector<2x128xf32>
    %1107 = vector.extract_strided_slice %1106 {offsets = [0, 0], sizes = [2, 64], strides = [1, 1]} : vector<2x128xf32> to vector<2x64xf32>
    %1108 = vector.extract_strided_slice %1106 {offsets = [0, 64], sizes = [2, 64], strides = [1, 1]} : vector<2x128xf32> to vector<2x64xf32>
    %1109 = vector.extract_strided_slice %1095 {offsets = [0, 128], sizes = [2, 64], strides = [1, 1]} : vector<2x192xf32> to vector<2x64xf32>
    %1110 = vector.extract_strided_slice %1098 {offsets = [0, 128], sizes = [2, 64], strides = [1, 1]} : vector<2x192xf32> to vector<2x64xf32>
    %1111 = arith.mulf %1107, %1110 : vector<2x64xf32>
    %1112 = arith.addf %1109, %1111 : vector<2x64xf32>
    %1113 = math.tanh %1112 : vector<2x64xf32>
    %cst_219 = arith.constant 1.000000e+00 : f32
    %1114 = vector.broadcast %cst_219 : f32 to vector<2x64xf32>
    %1115 = arith.subf %1114, %1108 : vector<2x64xf32>
    %1116 = arith.mulf %1115, %1113 : vector<2x64xf32>
    %1117 = arith.mulf %1108, %1094 : vector<2x64xf32>
    %1118 = arith.addf %1116, %1117 : vector<2x64xf32>
    %1119 = vector.extract_strided_slice %851 {offsets = [22, 0], sizes = [2, 192], strides = [1, 1]} : vector<32x192xf32> to vector<2x192xf32>
    %cst_220 = arith.constant dense<0.000000e+00> : vector<2x192xf32>
    %1120 = tpu.matmul %1118, %852, %cst_220 {dimension_numbers = #tpu.dot_dimension_numbers<[1], [0], [0], [1], [0, 0, 1, 1], [], []>} : vector<2x64xf32>, vector<64x192xf32>, vector<2x192xf32> -> vector<2x192xf32>
    %1121 = vector.broadcast %853 : vector<1x192xf32> to vector<2x192xf32>
    %1122 = arith.addf %1120, %1121 : vector<2x192xf32>
    %1123 = vector.extract_strided_slice %1119 {offsets = [0, 0], sizes = [2, 128], strides = [1, 1]} : vector<2x192xf32> to vector<2x128xf32>
    %1124 = vector.extract_strided_slice %1122 {offsets = [0, 0], sizes = [2, 128], strides = [1, 1]} : vector<2x192xf32> to vector<2x128xf32>
    %1125 = arith.addf %1123, %1124 : vector<2x128xf32>
    %1126 = arith.negf %1125 : vector<2x128xf32>
    %1127 = math.exp %1126 : vector<2x128xf32>
    %cst_221 = arith.constant 1.000000e+00 : f32
    %1128 = vector.broadcast %cst_221 : f32 to vector<2x128xf32>
    %1129 = arith.addf %1128, %1127 : vector<2x128xf32>
    %1130 = arith.divf %1128, %1129 : vector<2x128xf32>
    %1131 = vector.extract_strided_slice %1130 {offsets = [0, 0], sizes = [2, 64], strides = [1, 1]} : vector<2x128xf32> to vector<2x64xf32>
    %1132 = vector.extract_strided_slice %1130 {offsets = [0, 64], sizes = [2, 64], strides = [1, 1]} : vector<2x128xf32> to vector<2x64xf32>
    %1133 = vector.extract_strided_slice %1119 {offsets = [0, 128], sizes = [2, 64], strides = [1, 1]} : vector<2x192xf32> to vector<2x64xf32>
    %1134 = vector.extract_strided_slice %1122 {offsets = [0, 128], sizes = [2, 64], strides = [1, 1]} : vector<2x192xf32> to vector<2x64xf32>
    %1135 = arith.mulf %1131, %1134 : vector<2x64xf32>
    %1136 = arith.addf %1133, %1135 : vector<2x64xf32>
    %1137 = math.tanh %1136 : vector<2x64xf32>
    %cst_222 = arith.constant 1.000000e+00 : f32
    %1138 = vector.broadcast %cst_222 : f32 to vector<2x64xf32>
    %1139 = arith.subf %1138, %1132 : vector<2x64xf32>
    %1140 = arith.mulf %1139, %1137 : vector<2x64xf32>
    %1141 = arith.mulf %1132, %1118 : vector<2x64xf32>
    %1142 = arith.addf %1140, %1141 : vector<2x64xf32>
    %1143 = vector.extract_strided_slice %851 {offsets = [24, 0], sizes = [2, 192], strides = [1, 1]} : vector<32x192xf32> to vector<2x192xf32>
    %cst_223 = arith.constant dense<0.000000e+00> : vector<2x192xf32>
    %1144 = tpu.matmul %1142, %852, %cst_223 {dimension_numbers = #tpu.dot_dimension_numbers<[1], [0], [0], [1], [0, 0, 1, 1], [], []>} : vector<2x64xf32>, vector<64x192xf32>, vector<2x192xf32> -> vector<2x192xf32>
    %1145 = vector.broadcast %853 : vector<1x192xf32> to vector<2x192xf32>
    %1146 = arith.addf %1144, %1145 : vector<2x192xf32>
    %1147 = vector.extract_strided_slice %1143 {offsets = [0, 0], sizes = [2, 128], strides = [1, 1]} : vector<2x192xf32> to vector<2x128xf32>
    %1148 = vector.extract_strided_slice %1146 {offsets = [0, 0], sizes = [2, 128], strides = [1, 1]} : vector<2x192xf32> to vector<2x128xf32>
    %1149 = arith.addf %1147, %1148 : vector<2x128xf32>
    %1150 = arith.negf %1149 : vector<2x128xf32>
    %1151 = math.exp %1150 : vector<2x128xf32>
    %cst_224 = arith.constant 1.000000e+00 : f32
    %1152 = vector.broadcast %cst_224 : f32 to vector<2x128xf32>
    %1153 = arith.addf %1152, %1151 : vector<2x128xf32>
    %1154 = arith.divf %1152, %1153 : vector<2x128xf32>
    %1155 = vector.extract_strided_slice %1154 {offsets = [0, 0], sizes = [2, 64], strides = [1, 1]} : vector<2x128xf32> to vector<2x64xf32>
    %1156 = vector.extract_strided_slice %1154 {offsets = [0, 64], sizes = [2, 64], strides = [1, 1]} : vector<2x128xf32> to vector<2x64xf32>
    %1157 = vector.extract_strided_slice %1143 {offsets = [0, 128], sizes = [2, 64], strides = [1, 1]} : vector<2x192xf32> to vector<2x64xf32>
    %1158 = vector.extract_strided_slice %1146 {offsets = [0, 128], sizes = [2, 64], strides = [1, 1]} : vector<2x192xf32> to vector<2x64xf32>
    %1159 = arith.mulf %1155, %1158 : vector<2x64xf32>
    %1160 = arith.addf %1157, %1159 : vector<2x64xf32>
    %1161 = math.tanh %1160 : vector<2x64xf32>
    %cst_225 = arith.constant 1.000000e+00 : f32
    %1162 = vector.broadcast %cst_225 : f32 to vector<2x64xf32>
    %1163 = arith.subf %1162, %1156 : vector<2x64xf32>
    %1164 = arith.mulf %1163, %1161 : vector<2x64xf32>
    %1165 = arith.mulf %1156, %1142 : vector<2x64xf32>
    %1166 = arith.addf %1164, %1165 : vector<2x64xf32>
    %1167 = vector.extract_strided_slice %851 {offsets = [26, 0], sizes = [2, 192], strides = [1, 1]} : vector<32x192xf32> to vector<2x192xf32>
    %cst_226 = arith.constant dense<0.000000e+00> : vector<2x192xf32>
    %1168 = tpu.matmul %1166, %852, %cst_226 {dimension_numbers = #tpu.dot_dimension_numbers<[1], [0], [0], [1], [0, 0, 1, 1], [], []>} : vector<2x64xf32>, vector<64x192xf32>, vector<2x192xf32> -> vector<2x192xf32>
    %1169 = vector.broadcast %853 : vector<1x192xf32> to vector<2x192xf32>
    %1170 = arith.addf %1168, %1169 : vector<2x192xf32>
    %1171 = vector.extract_strided_slice %1167 {offsets = [0, 0], sizes = [2, 128], strides = [1, 1]} : vector<2x192xf32> to vector<2x128xf32>
    %1172 = vector.extract_strided_slice %1170 {offsets = [0, 0], sizes = [2, 128], strides = [1, 1]} : vector<2x192xf32> to vector<2x128xf32>
    %1173 = arith.addf %1171, %1172 : vector<2x128xf32>
    %1174 = arith.negf %1173 : vector<2x128xf32>
    %1175 = math.exp %1174 : vector<2x128xf32>
    %cst_227 = arith.constant 1.000000e+00 : f32
    %1176 = vector.broadcast %cst_227 : f32 to vector<2x128xf32>
    %1177 = arith.addf %1176, %1175 : vector<2x128xf32>
    %1178 = arith.divf %1176, %1177 : vector<2x128xf32>
    %1179 = vector.extract_strided_slice %1178 {offsets = [0, 0], sizes = [2, 64], strides = [1, 1]} : vector<2x128xf32> to vector<2x64xf32>
    %1180 = vector.extract_strided_slice %1178 {offsets = [0, 64], sizes = [2, 64], strides = [1, 1]} : vector<2x128xf32> to vector<2x64xf32>
    %1181 = vector.extract_strided_slice %1167 {offsets = [0, 128], sizes = [2, 64], strides = [1, 1]} : vector<2x192xf32> to vector<2x64xf32>
    %1182 = vector.extract_strided_slice %1170 {offsets = [0, 128], sizes = [2, 64], strides = [1, 1]} : vector<2x192xf32> to vector<2x64xf32>
    %1183 = arith.mulf %1179, %1182 : vector<2x64xf32>
    %1184 = arith.addf %1181, %1183 : vector<2x64xf32>
    %1185 = math.tanh %1184 : vector<2x64xf32>
    %cst_228 = arith.constant 1.000000e+00 : f32
    %1186 = vector.broadcast %cst_228 : f32 to vector<2x64xf32>
    %1187 = arith.subf %1186, %1180 : vector<2x64xf32>
    %1188 = arith.mulf %1187, %1185 : vector<2x64xf32>
    %1189 = arith.mulf %1180, %1166 : vector<2x64xf32>
    %1190 = arith.addf %1188, %1189 : vector<2x64xf32>
    %1191 = vector.extract_strided_slice %851 {offsets = [28, 0], sizes = [2, 192], strides = [1, 1]} : vector<32x192xf32> to vector<2x192xf32>
    %cst_229 = arith.constant dense<0.000000e+00> : vector<2x192xf32>
    %1192 = tpu.matmul %1190, %852, %cst_229 {dimension_numbers = #tpu.dot_dimension_numbers<[1], [0], [0], [1], [0, 0, 1, 1], [], []>} : vector<2x64xf32>, vector<64x192xf32>, vector<2x192xf32> -> vector<2x192xf32>
    %1193 = vector.broadcast %853 : vector<1x192xf32> to vector<2x192xf32>
    %1194 = arith.addf %1192, %1193 : vector<2x192xf32>
    %1195 = vector.extract_strided_slice %1191 {offsets = [0, 0], sizes = [2, 128], strides = [1, 1]} : vector<2x192xf32> to vector<2x128xf32>
    %1196 = vector.extract_strided_slice %1194 {offsets = [0, 0], sizes = [2, 128], strides = [1, 1]} : vector<2x192xf32> to vector<2x128xf32>
    %1197 = arith.addf %1195, %1196 : vector<2x128xf32>
    %1198 = arith.negf %1197 : vector<2x128xf32>
    %1199 = math.exp %1198 : vector<2x128xf32>
    %cst_230 = arith.constant 1.000000e+00 : f32
    %1200 = vector.broadcast %cst_230 : f32 to vector<2x128xf32>
    %1201 = arith.addf %1200, %1199 : vector<2x128xf32>
    %1202 = arith.divf %1200, %1201 : vector<2x128xf32>
    %1203 = vector.extract_strided_slice %1202 {offsets = [0, 0], sizes = [2, 64], strides = [1, 1]} : vector<2x128xf32> to vector<2x64xf32>
    %1204 = vector.extract_strided_slice %1202 {offsets = [0, 64], sizes = [2, 64], strides = [1, 1]} : vector<2x128xf32> to vector<2x64xf32>
    %1205 = vector.extract_strided_slice %1191 {offsets = [0, 128], sizes = [2, 64], strides = [1, 1]} : vector<2x192xf32> to vector<2x64xf32>
    %1206 = vector.extract_strided_slice %1194 {offsets = [0, 128], sizes = [2, 64], strides = [1, 1]} : vector<2x192xf32> to vector<2x64xf32>
    %1207 = arith.mulf %1203, %1206 : vector<2x64xf32>
    %1208 = arith.addf %1205, %1207 : vector<2x64xf32>
    %1209 = math.tanh %1208 : vector<2x64xf32>
    %cst_231 = arith.constant 1.000000e+00 : f32
    %1210 = vector.broadcast %cst_231 : f32 to vector<2x64xf32>
    %1211 = arith.subf %1210, %1204 : vector<2x64xf32>
    %1212 = arith.mulf %1211, %1209 : vector<2x64xf32>
    %1213 = arith.mulf %1204, %1190 : vector<2x64xf32>
    %1214 = arith.addf %1212, %1213 : vector<2x64xf32>
    %1215 = vector.extract_strided_slice %851 {offsets = [30, 0], sizes = [2, 192], strides = [1, 1]} : vector<32x192xf32> to vector<2x192xf32>
    %cst_232 = arith.constant dense<0.000000e+00> : vector<2x192xf32>
    %1216 = tpu.matmul %1214, %852, %cst_232 {dimension_numbers = #tpu.dot_dimension_numbers<[1], [0], [0], [1], [0, 0, 1, 1], [], []>} : vector<2x64xf32>, vector<64x192xf32>, vector<2x192xf32> -> vector<2x192xf32>
    %1217 = vector.broadcast %853 : vector<1x192xf32> to vector<2x192xf32>
    %1218 = arith.addf %1216, %1217 : vector<2x192xf32>
    %1219 = vector.extract_strided_slice %1215 {offsets = [0, 0], sizes = [2, 128], strides = [1, 1]} : vector<2x192xf32> to vector<2x128xf32>
    %1220 = vector.extract_strided_slice %1218 {offsets = [0, 0], sizes = [2, 128], strides = [1, 1]} : vector<2x192xf32> to vector<2x128xf32>
    %1221 = arith.addf %1219, %1220 : vector<2x128xf32>
    %1222 = arith.negf %1221 : vector<2x128xf32>
    %1223 = math.exp %1222 : vector<2x128xf32>
    %cst_233 = arith.constant 1.000000e+00 : f32
    %1224 = vector.broadcast %cst_233 : f32 to vector<2x128xf32>
    %1225 = arith.addf %1224, %1223 : vector<2x128xf32>
    %1226 = arith.divf %1224, %1225 : vector<2x128xf32>
    %1227 = vector.extract_strided_slice %1226 {offsets = [0, 0], sizes = [2, 64], strides = [1, 1]} : vector<2x128xf32> to vector<2x64xf32>
    %1228 = vector.extract_strided_slice %1226 {offsets = [0, 64], sizes = [2, 64], strides = [1, 1]} : vector<2x128xf32> to vector<2x64xf32>
    %1229 = vector.extract_strided_slice %1215 {offsets = [0, 128], sizes = [2, 64], strides = [1, 1]} : vector<2x192xf32> to vector<2x64xf32>
    %1230 = vector.extract_strided_slice %1218 {offsets = [0, 128], sizes = [2, 64], strides = [1, 1]} : vector<2x192xf32> to vector<2x64xf32>
    %1231 = arith.mulf %1227, %1230 : vector<2x64xf32>
    %1232 = arith.addf %1229, %1231 : vector<2x64xf32>
    %1233 = math.tanh %1232 : vector<2x64xf32>
    %cst_234 = arith.constant 1.000000e+00 : f32
    %1234 = vector.broadcast %cst_234 : f32 to vector<2x64xf32>
    %1235 = arith.subf %1234, %1228 : vector<2x64xf32>
    %1236 = arith.mulf %1235, %1233 : vector<2x64xf32>
    %1237 = arith.mulf %1228, %1214 : vector<2x64xf32>
    %1238 = arith.addf %1236, %1237 : vector<2x64xf32>
    %1239 = vector.extract_strided_slice %846 {offsets = [30, 0], sizes = [2, 128], strides = [1, 1]} : vector<32x128xf32> to vector<2x128xf32>
    %c0_235 = arith.constant 0 : index
    %c0_236 = arith.constant 0 : index
    %1240 = vector.load %arg14[%c0_235, %c0_236] : memref<128x192xf32, #tpu.memory_space<vmem>>, vector<128x192xf32>
    %cst_237 = arith.constant dense<0.000000e+00> : vector<2x192xf32>
    %1241 = tpu.matmul %1239, %1240, %cst_237 {dimension_numbers = #tpu.dot_dimension_numbers<[1], [0], [0], [1], [0, 0, 1, 1], [], []>} : vector<2x128xf32>, vector<128x192xf32>, vector<2x192xf32> -> vector<2x192xf32>
    %c0_238 = arith.constant 0 : index
    %c0_239 = arith.constant 0 : index
    %1242 = vector.load %arg16[%c0_238, %c0_239] : memref<1x192xf32, #tpu.memory_space<vmem>>, vector<1x192xf32>
    %1243 = vector.broadcast %1242 : vector<1x192xf32> to vector<2x192xf32>
    %1244 = arith.addf %1241, %1243 : vector<2x192xf32>
    %cst_240 = arith.constant 0.000000e+00 : f32
    %1245 = vector.broadcast %cst_240 : f32 to vector<2x64xf32>
    %c0_241 = arith.constant 0 : index
    %c0_242 = arith.constant 0 : index
    %1246 = vector.load %arg15[%c0_241, %c0_242] : memref<64x192xf32, #tpu.memory_space<vmem>>, vector<64x192xf32>
    %c0_243 = arith.constant 0 : index
    %c0_244 = arith.constant 0 : index
    %1247 = vector.load %arg17[%c0_243, %c0_244] : memref<1x192xf32, #tpu.memory_space<vmem>>, vector<1x192xf32>
    %cst_245 = arith.constant dense<0.000000e+00> : vector<2x192xf32>
    %1248 = tpu.matmul %1245, %1246, %cst_245 {dimension_numbers = #tpu.dot_dimension_numbers<[1], [0], [0], [1], [0, 0, 1, 1], [], []>} : vector<2x64xf32>, vector<64x192xf32>, vector<2x192xf32> -> vector<2x192xf32>
    %1249 = vector.broadcast %1247 : vector<1x192xf32> to vector<2x192xf32>
    %1250 = arith.addf %1248, %1249 : vector<2x192xf32>
    %1251 = vector.extract_strided_slice %1244 {offsets = [0, 0], sizes = [2, 128], strides = [1, 1]} : vector<2x192xf32> to vector<2x128xf32>
    %1252 = vector.extract_strided_slice %1250 {offsets = [0, 0], sizes = [2, 128], strides = [1, 1]} : vector<2x192xf32> to vector<2x128xf32>
    %1253 = arith.addf %1251, %1252 : vector<2x128xf32>
    %1254 = arith.negf %1253 : vector<2x128xf32>
    %1255 = math.exp %1254 : vector<2x128xf32>
    %cst_246 = arith.constant 1.000000e+00 : f32
    %1256 = vector.broadcast %cst_246 : f32 to vector<2x128xf32>
    %1257 = arith.addf %1256, %1255 : vector<2x128xf32>
    %1258 = arith.divf %1256, %1257 : vector<2x128xf32>
    %1259 = vector.extract_strided_slice %1258 {offsets = [0, 0], sizes = [2, 64], strides = [1, 1]} : vector<2x128xf32> to vector<2x64xf32>
    %1260 = vector.extract_strided_slice %1258 {offsets = [0, 64], sizes = [2, 64], strides = [1, 1]} : vector<2x128xf32> to vector<2x64xf32>
    %1261 = vector.extract_strided_slice %1244 {offsets = [0, 128], sizes = [2, 64], strides = [1, 1]} : vector<2x192xf32> to vector<2x64xf32>
    %1262 = vector.extract_strided_slice %1250 {offsets = [0, 128], sizes = [2, 64], strides = [1, 1]} : vector<2x192xf32> to vector<2x64xf32>
    %1263 = arith.mulf %1259, %1262 : vector<2x64xf32>
    %1264 = arith.addf %1261, %1263 : vector<2x64xf32>
    %1265 = math.tanh %1264 : vector<2x64xf32>
    %cst_247 = arith.constant 1.000000e+00 : f32
    %1266 = vector.broadcast %cst_247 : f32 to vector<2x64xf32>
    %1267 = arith.subf %1266, %1260 : vector<2x64xf32>
    %1268 = arith.mulf %1267, %1265 : vector<2x64xf32>
    %1269 = arith.mulf %1260, %1245 : vector<2x64xf32>
    %1270 = arith.addf %1268, %1269 : vector<2x64xf32>
    %1271 = tpu.concatenate %1238, %1270 in 1 : vector<2x64xf32>, vector<2x64xf32> -> vector<2x128xf32>
    %c0_248 = arith.constant 0 : index
    %c0_249 = arith.constant 0 : index
    %1272 = vector.load %arg18[%c0_248, %c0_249] : memref<128x128xf32, #tpu.memory_space<vmem>>, vector<128x128xf32>
    %cst_250 = arith.constant dense<0.000000e+00> : vector<2x128xf32>
    %1273 = tpu.matmul %1271, %1272, %cst_250 {dimension_numbers = #tpu.dot_dimension_numbers<[1], [0], [0], [1], [0, 0, 1, 1], [], []>} : vector<2x128xf32>, vector<128x128xf32>, vector<2x128xf32> -> vector<2x128xf32>
    %1274 = math.tanh %1273 : vector<2x128xf32>
    %c0_251 = arith.constant 0 : index
    %c0_252 = arith.constant 0 : index
    %1275 = vector.load %arg19[%c0_251, %c0_252] : memref<128x3xf32, #tpu.memory_space<vmem>>, vector<128x3xf32>
    %cst_253 = arith.constant dense<0.000000e+00> : vector<2x3xf32>
    %1276 = tpu.matmul %1274, %1275, %cst_253 {dimension_numbers = #tpu.dot_dimension_numbers<[1], [0], [0], [1], [0, 0, 1, 1], [], []>} : vector<2x128xf32>, vector<128x3xf32>, vector<2x3xf32> -> vector<2x3xf32>
    %c0_254 = arith.constant 0 : index
    %c0_255 = arith.constant 0 : index
    %1277 = vector.load %arg20[%c0_254, %c0_255] : memref<2x3xf32, #tpu.memory_space<vmem>>, vector<2x3xf32>
    tpu.vector_store %arg20[%c0_254, %c0_255], %1276 {strides = array<i32>} : memref<2x3xf32, #tpu.memory_space<vmem>>, vector<2x3xf32>,
    return
  }
}

</mosaic_0001>

<bundles_post_ra>
// kernel: convgru_forward.1
= control target key start
LH: loop header
LB: loop body
LE: loop exit
PB: predicated region body
PF: predicated region fallthrough
CT: control target
= control target key end

     0   :  { %s8254_s0 = inlined_call_operand.vmem [shape: f32[38,1], index: 0, kind: input, shape index: {}]   ;;  %s8255_s1 = inlined_call_operand.vmem [shape: f32[4,1,16], index: 1, kind: input, shape index: {}]   ;;  %s8256_s2 = inlined_call_operand.vmem [shape: f32[16,192], index: 2, kind: input, shape index: {}]   ;;  %s8257_s3 = inlined_call_operand.vmem [shape: f32[64,192], index: 3, kind: input, shape index: {}]   ;;  %s8258_s4 = inlined_call_operand.vmem [shape: f32[1,192], index: 4, kind: input, shape index: {}]   ;;  %s8259_s5 = inlined_call_operand.vmem [shape: f32[1,192], index: 5, kind: input, shape index: {}]   ;;  %s8260_s6 = inlined_call_operand.vmem [shape: f32[16,192], index: 6, kind: input, shape index: {}]   ;;  %s8261_s7 = inlined_call_operand.vmem [shape: f32[64,192], index: 7, kind: input, shape index: {}]   ;;  %s8262_s8 = inlined_call_operand.vmem [shape: f32[1,192], index: 8, kind: input, shape index: {}]   ;;  %s8263_s9 = inlined_call_operand.vmem [shape: f32[1,192], index: 9, kind: input, shape index: {}]   ;;  %s8264_s10 = inlined_call_operand.vmem [shape: f32[128,192], index: 10, kind: input, shape index: {}]   ;;  %s8265_s11 = inlined_call_operand.vmem [shape: f32[64,192], index: 11, kind: input, shape index: {}]   ;;  %s8266_s12 = inlined_call_operand.vmem [shape: f32[1,192], index: 12, kind: input, shape index: {}]   ;;  %s8267_s13 = inlined_call_operand.vmem [shape: f32[1,192], index: 13, kind: input, shape index: {}]   ;;  %s8268_s14 = inlined_call_operand.vmem [shape: f32[128,192], index: 14, kind: input, shape index: {}]   ;;  %s8269_s15 = inlined_call_operand.vmem [shape: f32[64,192], index: 15, kind: input, shape index: {}]   ;;  %s8270_s16 = inlined_call_operand.vmem [shape: f32[1,192], index: 16, kind: input, shape index: {}]   ;;  %s8271_s17 = inlined_call_operand.vmem [shape: f32[1,192], index: 17, kind: input, shape index: {}]   ;;  %s8272_s18 = inlined_call_operand.vmem [shape: f32[128,128], index: 18, kind: input, shape index: {}]   ;;  %s8273_s19 = inlined_call_operand.vmem [shape: f32[128,3], index: 19, kind: input, shape index: {}]   ;;  %s8274_s20 = inlined_call_operand.hbm [shape: f32[2,3], index: 20, kind: output, shape index: {}]  }
   0x1   :  { %8297 = sst [smem:[#allocation23_spill]] %s8254_s0 }
   0x2   :  { %8298 = sst [smem:[#allocation24_spill]] %s8255_s1 }
   0x3   :  { %8299 = sst [smem:[#allocation25_spill]] %s8256_s2 }
   0x4   :  { %8300 = sst [smem:[#allocation26_spill]] %s8257_s3 }
   0x5   :  { %8301 = sst [smem:[#allocation27_spill]] %s8258_s4 }
   0x6   :  { %s8302_s23 = sld [smem:[#allocation23_spill]]  ;;  %v5437_v2 = vmov 0  }
   0x7   :  { %5013 = vset.pattern.permute.xlu1 %v5437_v2  ;;  %5012 = vset.pattern.permute.xlu0 %v5437_v2 }
   0x8   :  { %5014 = vset.pattern.permute.xlu2 %v5437_v2 }
   0xc   :  { %v70_v0 = vld [vmem:[%s8302_s23 + $0x20] sm:$0x3f]  ;;  %v68_v1 = vld [vmem:[%s8302_s23 + $0x10] sm:$0xff]  ;;  %v67_v3 = vld [vmem:[%s8302_s23 + $0x8] sm:$0xff] }
   0xd   :  { %107 = vperm.xlu1 %5013, %v70_v0   ;;  %84 = vperm.xlu0 %5012, %v68_v1  }
   0xe   :  { %79 = vperm.xlu2 %5014, %v67_v3  }
   0xf   :  { %25 = vsyncpa [#allocation4], 0  ;;  %v69_v4 = vld [vmem:[%s8302_s23 + $0x18] sm:$0xff]  ;;  %v66_v5 = vld [vmem:[%s8302_s23] sm:$0xff]  ;;  %s8303_s0 = sld [smem:[#allocation25_spill]]  ;;  %vm123_vm0 = vcmask 1045504  }
  0x10   :  { %v290_v10 = vld [vmem:[%s8260_s6 + $0x10] sm:$0xff]  ;;  %s8304_s28 = sld [smem:[#allocation26_spill]]  ;;  %v288_v15 = vld [vmem:[%s8260_s6] sm:$0xff]  ;;  %v291_v18 = vld [vmem:[%s8260_s6 + $0x18] sm:$0xff]  ;;  %vm156_vm1 = vcmask 1043456   ;;  %vm189_vm2 = vcmask 1041408  }
  0x11   :  { %v289_v19 = vld [vmem:[%s8260_s6 + $0x8] sm:$0xff]  ;;  %s8305_s21 = sld [smem:[#allocation24_spill]]  ;;  %vm217_vm3 = vcmask 130048   ;;  %vm558_vm12 = vcmask 1048070   ;;  %vm395_vm13 = vcmask 523264   ;;  %s5440_s27 = smov [#allocation3]  }
  0x12   :  { %s8313_s24 = sld [smem:[#allocation27_spill]] }
  0x15   :  { %89 = vperm.xlu0 %5012, %v69_v4   ;;  %74 = vperm.xlu1 %5013, %v66_v5   ;;  %v209_v6 = vld [vmem:[%s8303_s0 + $0x10] sm:$0xff]  ;;  %v210_v7 = vld [vmem:[%s8303_s0 + $0x18] sm:$0xff]  ;;  %v207_v8 = vld [vmem:[%s8303_s0] sm:$0xff] }
  0x16   :  { %244 = vmatpush.msra.mxu0 %v209_v6  ;;  %5004 = vmatpush.msra.mxu2 %v209_v6  ;;  %v208_v9 = vld [vmem:[%s8303_s0 + $0x8] sm:$0xff]  ;;  %v5579_v11 = vld [vmem:[%s8304_s28 + $0x70] sm:$0xff]  ;;  %v5584_v12 = vld [vmem:[%s8304_s28 + $0x60] sm:$0xff] }
  0x17   :  { %273 = vmatpush.msra.mxu1 %v210_v7  ;;  %5006 = vmatpush.msra.mxu3 %v210_v7  ;;  %v5590_v13 = vld [vmem:[%s8304_s28 + $0x50] sm:$0xff]  ;;  %v5596_v14 = vld [vmem:[%s8304_s28 + $0x40] sm:$0xff]  ;;  %v5662_v62 = vld [vmem:[%s8304_s28 + $0x78] sm:$0xff] }
  0x18   :  { %245 = vmatpush.msra.mxu0 %v207_v8  ;;  %5005 = vmatpush.msra.mxu2 %v207_v8  ;;  %v5606_v16 = vld [vmem:[%s8304_s28 + $0x30] sm:$0xff]  ;;  %v5611_v17 = vld [vmem:[%s8304_s28 + $0x20] sm:$0xff] }
  0x19   :  { %274 = vmatpush.msra.mxu1 %v208_v9  ;;  %5007 = vmatpush.msra.mxu3 %v208_v9  ;;  %v5015_v20 = vld [vmem:[%s8305_s21 + $0x1] ss:$0 sm:$0xff]  ;;  %v5016_v21 = vld [vmem:[%s8305_s21 + $0x2] ss:$0 sm:$0xff]  ;;  %v5629_v24 = vld [vmem:[%s8304_s28 + $0x10] sm:$0xff] }
  0x1a   :  { %312 = vmatpush.msrb.mxu2 %v290_v10  ;;  %407 = vmatpush.msrb.mxu0 %v5579_v11  ;;  %v5635_v26 = vld [vmem:[%s8304_s28] sm:$0xff] }
  0x1b   :  { %341 = vmatpush.msrb.mxu3 %v291_v18  ;;  %v5017_v27 = vld [vmem:[%s8305_s21 + $0x3] ss:$0 sm:$0xff]  ;;  %v5018_v37 = vld [vmem:[%s8305_s21] ss:$0 sm:$0xff]  ;;  %427 = vmatpush.msrb.mxu1 %v5662_v62 }
  0x1c   :  { %408 = vmatpush.msrb.mxu0 %v5584_v12  ;;  %313 = vmatpush.msrb.mxu2 %v288_v15 }
  0x1d   :  { %342 = vmatpush.msrb.mxu3 %v289_v19 }
  0x1e   :  { %409 = vmatpush.msrb.mxu0 %v5590_v13 }
  0x20   :  { %410 = vmatpush.msrb.mxu0 %v5596_v14 }
  0x22   :  { %411 = vmatpush.msrb.mxu0 %v5606_v16 }
  0x24   :  { %412 = vmatpush.msrb.mxu0 %v5611_v17 }
  0x26   :  { %413 = vmatpush.msrb.mxu0 %v5629_v24 }
  0x28   :  { %414 = vmatpush.msrb.mxu0 %v5635_v26 }
  0x68   :  { %v80_v25 = vpop.permute.xlu2 %79 }
  0x69   :  { %v114_v28 = vmul.f32 %v5015_v20, %v80_v25  ;;  %v5641_v29 = vmul.f32 %v5016_v21, %v80_v25  ;;  %v5645_v34 = vmul.f32 %v5017_v27, %v80_v25  ;;  %v96_v0 = vmul.f32 %v5018_v37, %v80_v25  ;;  %v5676_v25 = vld [vmem:[%s8261_s7 + $0x70] sm:$0xff] }
  0x6b   :  { %v125_v32 = vrot.slane %v114_v28, 2  ;;  %v158_v33 = vrot.slane %v5641_v29, 4  ;;  %v191_v56 = vrot.slane %v5645_v34, 6  ;;  %v5689_v29 = vld [vmem:[%s8261_s7 + $0x60] sm:$0xff] }
  0x7f   :  { %v108_v22 = vpop.permute.xlu1 %107  ;;  %v85_v23 = vpop.permute.xlu0 %84 }
  0x80   :  { %v117_v30 = vmul.f32 %v5015_v20, %v108_v22  ;;  %v115_v31 = vmul.f32 %v5015_v20, %v85_v23  ;;  %v148_v38 = vmul.f32 %v5016_v21, %v85_v23  ;;  %v5650_v39 = vmul.f32 %v5017_v27, %v85_v23 }
  0x81   :  { %v150_v54 = vmul.f32 %v5016_v21, %v108_v22  ;;  %v97_v55 = vmul.f32 %v5018_v37, %v85_v23  ;;  %v183_v15 = vmul.f32 %v5017_v27, %v108_v22 }
  0x82   :  { %v131_v46 = vrot.slane %v117_v30, 2  ;;  %v127_v47 = vrot.slane %v115_v31, 2  ;;  %v160_v58 = vrot.slane %v148_v38, 4  ;;  %v193_v63 = vrot.slane %v5650_v39, 6  ;;  %v5694_v30 = vld [vmem:[%s8304_s28 + $0x68] sm:$0xff]  ;;  %v5699_v31 = vld [vmem:[%s8304_s28 + $0x58] sm:$0xff] }
  0x83   :  { %v164_v10 = vrot.slane %v150_v54, 4  ;;  %v197_v28 = vrot.slane %v183_v15, 6  ;;  %428 = vmatpush.msrb.mxu1 %v5694_v30  ;;  %v5818_v54 = vld [vmem:[%s8261_s7 + $0x38] sm:$0xff] }
  0x84   :  { %v128_v3 = vsel %vm123_vm0, %v125_v32, %v127_v47  ;;  %v161_v22 = vsel %vm156_vm1, %v158_v33, %v160_v58 }
  0x85   :  { %v138_v19 = vadd.f32 %v128_v3, %v96_v0  ;;  %429 = vmatpush.msrb.mxu1 %v5699_v31 }
  0x87   :  { %v90_v35 = vpop.permute.xlu0 %89  ;;  %v75_v36 = vpop.permute.xlu1 %74 }
  0x88   :  { %v116_v40 = vmul.f32 %v5015_v20, %v90_v35  ;;  %v149_v41 = vmul.f32 %v5016_v21, %v90_v35  ;;  %v5652_v42 = vmul.f32 %v5017_v27, %v90_v35  ;;  %v113_v43 = vmul.f32 %v5015_v20, %v75_v36 }
  0x89   :  { %v146_v44 = vmul.f32 %v5016_v21, %v75_v36  ;;  %v179_v45 = vmul.f32 %v5017_v27, %v75_v36  ;;  %v95_v49 = vmul.f32 %v5018_v37, %v75_v36  ;;  %v98_v7 = vmul.f32 %v5018_v37, %v90_v35  ;;  %v5711_v35 = vld [vmem:[%s8304_s28 + $0x48] sm:$0xff] }
  0x8a   :  { %v129_v48 = vrot.slane %v116_v40, 2  ;;  %v162_v50 = vrot.slane %v149_v41, 4  ;;  %v124_v51 = vrot.slane %v113_v43, 2  ;;  %v195_v59 = vrot.slane %v5652_v42, 6  ;;  %430 = vmatpush.msrb.mxu1 %v5711_v35  ;;  %v5726_v40 = vld [vmem:[%s8261_s7 + $0x40] sm:$0xff]  ;;  %v5731_v41 = vld [vmem:[%s8304_s28 + $0x38] sm:$0xff] }
  0x8b   :  { %v157_v52 = vrot.slane %v146_v44, 4  ;;  %v190_v53 = vrot.slane %v179_v45, 6  ;;  %v194_v36 = vsel %vm189_vm2, %v191_v56, %v193_v63  ;;  %v5743_v42 = vld [vmem:[%s8261_s7 + $0x30] sm:$0xff]  ;;  %v5748_v43 = vld [vmem:[%s8304_s28 + $0x28] sm:$0xff]  ;;  %v5755_v44 = vld [vmem:[%s8261_s7 + $0x78] sm:$0xff] }
  0x8c   :  { %v130_v57 = vsel %vm123_vm0, %v127_v47, %v129_v48  ;;  %v126_v60 = vsel %vm123_vm0, %v124_v51, %v125_v32  ;;  %v132_v4 = vsel %vm123_vm0, %v129_v48, %v131_v46  ;;  %v163_v6 = vsel %vm156_vm1, %v160_v58, %v162_v50  ;;  %431 = vmatpush.msrb.mxu1 %v5731_v41  ;;  %v5760_v45 = vld [vmem:[%s8261_s7 + $0x20] sm:$0xff]  ;;  %v5765_v46 = vld [vmem:[%s8304_s28 + $0x18] sm:$0xff]  ;;  %v5776_v47 = vld [vmem:[%s8261_s7 + $0x10] sm:$0xff] }
  0x8d   :  { %v159_v61 = vsel %vm156_vm1, %v157_v52, %v158_v33  ;;  %v137_v1 = vadd.f32 %v126_v60, %v95_v49  ;;  %v139_v2 = vadd.f32 %v130_v57, %v97_v55  ;;  %v192_v5 = vsel %vm189_vm2, %v190_v53, %v191_v56  ;;  %v5706_v33 = vld [vmem:[%s8261_s7 + $0x50] sm:$0xff]  ;;  %v5782_v48 = vld [vmem:[%s8304_s28 + $0x8] sm:$0xff]  ;;  %v5802_v52 = vld [vmem:[%s8261_s7 + $0x58] sm:$0xff] }
  0x8e   :  { %v196_v18 = vsel %vm189_vm2, %v193_v63, %v195_v59  ;;  %v140_v20 = vadd.f32 %v132_v4, %v98_v7  ;;  %v165_v27 = vsel %vm156_vm1, %v162_v50, %v164_v10  ;;  %v171_v32 = vadd.f32 %v161_v22, %v138_v19  ;;  %432 = vmatpush.msrb.mxu1 %v5748_v43  ;;  %v5790_v50 = vld [vmem:[%s8261_s7] sm:$0xff]  ;;  %v5795_v51 = vld [vmem:[%s8261_s7 + $0x68] sm:$0xff]  ;;  %v5837_v56 = vld [vmem:[%s8261_s7 + $0x18] sm:$0xff] }
  0x8f   :  { %v170_v8 = vadd.f32 %v159_v61, %v137_v1  ;;  %v172_v9 = vadd.f32 %v163_v6, %v139_v2  ;;  %v198_v37 = vsel %vm189_vm2, %v195_v59, %v197_v28  ;;  %v8279_v49 = vmov 0.0   ;;  %v5811_v53 = vld [vmem:[%s8261_s7 + $0x48] sm:$0xff]  ;;  %v372_v2 = vld [vmem:[%s8259_s5] sm:$0x3] }
  0x90   :  { %v173_v34 = vadd.f32 %v165_v27, %v140_v20  ;;  %v204_v38 = vadd.f32 %v194_v36, %v171_v32  ;;  %433 = vmatpush.msrb.mxu1 %v5765_v46  ;;  %v5827_v55 = vld [vmem:[%s8261_s7 + $0x28] sm:$0xff]  ;;  %v5929_v4 = vld [vmem:[%s8313_s24] sm:$0x3]  ;;  %vm732_vm2 = vcmask 1046020  }
  0x91   :  { %v203_v21 = vadd.f32 %v192_v5, %v170_v8  ;;  %v5671_v23 = vadd.f32 %v196_v18, %v172_v9  ;;  %v5845_v57 = vld [vmem:[%s8261_s7 + $0x8] sm:$0xff]  ;;  %v5931_v5 = vperm.slane %v372_v2, 0  ;;  %v5934_v7 = vperm.slane %v5929_v4, 0  ;;  %v292_v22 = vld [vmem:[%s8262_s8] sm:$0x3]  ;;  %s5439_s8 = smov 64  }
  0x92   :  { %v5719_v39 = vadd.f32 %v198_v37, %v173_v34  ;;  %434 = vmatpush.msrb.mxu1 %v5782_v48  ;;  %v5955_v34 = vperm.slane %v292_v22, 0 }
  0x93   :  { %4849 = vmatmul.msk.f32.vlgmr.msra.gmra.mxu0 %vm217_vm3, %v203_v21  ;;  %4851 = vmatmul.msk.f32.vlgmr.msra.gmra.mxu2 %vm217_vm3, %v5671_v23  ;;  %8314 = vst [vmem:[#allocation13_spill] sm:$0xff] %v5934_v7 }
  0x94   :  { %4853 = vmatmul.msk.f32.vlgmr.msra.gmra.mxu1 %vm217_vm3, %v203_v21  ;;  %4855 = vmatmul.msk.f32.vlgmr.msra.gmra.mxu3 %vm217_vm3, %v5671_v23  ;;  %8318 = vst [vmem:[#allocation17_spill] sm:$0xff] %v5955_v34 }
  0x95   :  { %489 = vmatpush.msra.mxu2 %v5676_v25  ;;  %570 = vmatpush.msra.mxu0 %v5579_v11 }
  0x96   :  { %509 = vmatpush.msra.mxu3 %v5755_v44  ;;  %590 = vmatpush.msra.mxu1 %v5662_v62 }
  0x97   :  { %490 = vmatpush.msra.mxu2 %v5689_v29  ;;  %571 = vmatpush.msra.mxu0 %v5584_v12 }
  0x98   :  { %510 = vmatpush.msra.mxu3 %v5795_v51  ;;  %591 = vmatpush.msra.mxu1 %v5694_v30 }
  0x99   :  { %491 = vmatpush.msra.mxu2 %v5706_v33  ;;  %572 = vmatpush.msra.mxu0 %v5590_v13 }
  0x9a   :  { %511 = vmatpush.msra.mxu3 %v5802_v52  ;;  %592 = vmatpush.msra.mxu1 %v5699_v31 }
  0x9b   :  { %4850 = vmatmul.msk.f32.gmra.mxu0 %vm217_vm3, %v204_v38  ;;  %4852 = vmatmul.msk.f32.gmra.mxu2 %vm217_vm3, %v5719_v39 }
  0x9c   :  { %4854 = vmatmul.msk.f32.gmra.mxu1 %vm217_vm3, %v204_v38  ;;  %4856 = vmatmul.msk.f32.gmra.mxu3 %vm217_vm3, %v5719_v39 }
  0x9d   :  { %492 = vmatpush.msra.mxu2 %v5726_v40  ;;  %573 = vmatpush.msra.mxu0 %v5596_v14 }
  0x9e   :  { %512 = vmatpush.msra.mxu3 %v5811_v53  ;;  %593 = vmatpush.msra.mxu1 %v5711_v35 }
  0x9f   :  { %493 = vmatpush.msra.mxu2 %v5743_v42  ;;  %574 = vmatpush.msra.mxu0 %v5606_v16 }
  0xa0   :  { %513 = vmatpush.msra.mxu3 %v5818_v54  ;;  %594 = vmatpush.msra.mxu1 %v5731_v41 }
  0xa1   :  { %494 = vmatpush.msra.mxu2 %v5760_v45  ;;  %575 = vmatpush.msra.mxu0 %v5611_v17 }
  0xa2   :  { %514 = vmatpush.msra.mxu3 %v5827_v55  ;;  %595 = vmatpush.msra.mxu1 %v5748_v43 }
  0xa3   :  { %4857 = vmatmul.msk.f32.vlgmr.msrb.gmra.mxu2 %vm217_vm3, %v203_v21  ;;  %415 = vmatmul.f32.vlgmr.msrb.gmra.mxu0 %v8279_v49 }
  0xa4   :  { %4861 = vmatmul.msk.f32.vlgmr.msrb.gmra.mxu3 %vm217_vm3, %v203_v21  ;;  %495 = vmatpush.msra.mxu2 %v5776_v47  ;;  %v389_v21 = vld [vmem:[%s8263_s9] sm:$0x3] }
  0xa5   :  { %435 = vmatmul.f32.vlgmr.msrb.gmra.mxu1 %v8279_v49  ;;  %576 = vmatpush.msra.mxu0 %v5629_v24  ;;  %v5950_v28 = vperm.slane %v389_v21, 0 }
  0xa6   :  { %496 = vmatpush.msra.mxu2 %v5790_v50  ;;  %515 = vmatpush.msra.mxu3 %v5837_v56 }
  0xa7   :  { %577 = vmatpush.msra.mxu0 %v5635_v26  ;;  %596 = vmatpush.msra.mxu1 %v5765_v46 }
  0xa8   :  { %661 = vmatpush.msrb.mxu2 %v5676_v25  ;;  %516 = vmatpush.msra.mxu3 %v5845_v57 }
  0xa9   :  { %747 = vmatpush.msrb.mxu0 %v5579_v11  ;;  %597 = vmatpush.msra.mxu1 %v5782_v48 }
  0xaa   :  { %662 = vmatpush.msrb.mxu2 %v5689_v29  ;;  %681 = vmatpush.msrb.mxu3 %v5755_v44 }
  0xab   :  { %4858 = vmatmul.msk.f32.gmra.mxu2 %vm217_vm3, %v204_v38  ;;  %748 = vmatpush.msrb.mxu0 %v5584_v12 }
  0xac   :  { %4862 = vmatmul.msk.f32.gmra.mxu3 %vm217_vm3, %v204_v38  ;;  %663 = vmatpush.msrb.mxu2 %v5706_v33 }
  0xad   :  { %682 = vmatpush.msrb.mxu3 %v5795_v51  ;;  %749 = vmatpush.msrb.mxu0 %v5590_v13 }
  0xae   :  { %664 = vmatpush.msrb.mxu2 %v5726_v40  ;;  %767 = vmatpush.msrb.mxu1 %v5662_v62 }
  0xaf   :  { %683 = vmatpush.msrb.mxu3 %v5802_v52  ;;  %750 = vmatpush.msrb.mxu0 %v5596_v14 }
  0xb0   :  { %665 = vmatpush.msrb.mxu2 %v5743_v42  ;;  %768 = vmatpush.msrb.mxu1 %v5694_v30 }
  0xb1   :  { %684 = vmatpush.msrb.mxu3 %v5811_v53  ;;  %751 = vmatpush.msrb.mxu0 %v5606_v16 }
  0xb2   :  { %666 = vmatpush.msrb.mxu2 %v5760_v45  ;;  %769 = vmatpush.msrb.mxu1 %v5699_v31 }
  0xb3   :  { %4859 = vmatmul.msk.f32.gmra.mxu2 %vm217_vm3, %v5671_v23  ;;  %685 = vmatpush.msrb.mxu3 %v5818_v54 }
  0xb4   :  { %4863 = vmatmul.msk.f32.gmra.mxu3 %vm217_vm3, %v5671_v23  ;;  %667 = vmatpush.msrb.mxu2 %v5776_v47 }
  0xb5   :  { %686 = vmatpush.msrb.mxu3 %v5827_v55  ;;  %752 = vmatpush.msrb.mxu0 %v5611_v17 }
  0xb6   :  { %668 = vmatpush.msrb.mxu2 %v5790_v50  ;;  %770 = vmatpush.msrb.mxu1 %v5711_v35 }
  0xb7   :  { %687 = vmatpush.msrb.mxu3 %v5837_v56  ;;  %753 = vmatpush.msrb.mxu0 %v5629_v24 }
  0xb8   :  { %771 = vmatpush.msrb.mxu1 %v5731_v41 }
  0xb9   :  { %688 = vmatpush.msrb.mxu3 %v5845_v57  ;;  %754 = vmatpush.msrb.mxu0 %v5635_v26 }
  0xba   :  { %772 = vmatpush.msrb.mxu1 %v5748_v43 }
  0xbb   :  { %4860 = vmatmul.msk.f32.gmra.mxu2 %vm217_vm3, %v5719_v39 }
  0xbc   :  { %4864 = vmatmul.msk.f32.gmra.mxu3 %vm217_vm3, %v5719_v39  ;;  %773 = vmatpush.msrb.mxu1 %v5765_v46  ;;  %vm474_vm3 = vcmask 517120  }
  0xbe   :  { %774 = vmatpush.msrb.mxu1 %v5782_v48 }
  0xc3   :  { %497 = vmatmul.f32.vlgmr.msra.gmra.mxu2 %v8279_v49 }
  0xc4   :  { %517 = vmatmul.f32.vlgmr.msra.gmra.mxu3 %v8279_v49  ;;  %838 = vmatpush.msra.mxu2 %v5676_v25 }
  0xc5   :  { %858 = vmatpush.msra.mxu3 %v5755_v44 }
  0xc6   :  { %839 = vmatpush.msra.mxu2 %v5689_v29 }
  0xc7   :  { %859 = vmatpush.msra.mxu3 %v5795_v51 }
  0xc8   :  { %840 = vmatpush.msra.mxu2 %v5706_v33 }
  0xc9   :  { %860 = vmatpush.msra.mxu3 %v5802_v52 }
  0xca   :  { %841 = vmatpush.msra.mxu2 %v5726_v40 }
  0xcb   :  { %861 = vmatpush.msra.mxu3 %v5811_v53 }
  0xcc   :  { %842 = vmatpush.msra.mxu2 %v5743_v42 }
  0xcd   :  { %862 = vmatpush.msra.mxu3 %v5818_v54 }
  0xce   :  { %843 = vmatpush.msra.mxu2 %v5760_v45 }
  0xcf   :  { %863 = vmatpush.msra.mxu3 %v5827_v55 }
  0xd0   :  { %844 = vmatpush.msra.mxu2 %v5776_v47 }
  0xd1   :  { %864 = vmatpush.msra.mxu3 %v5837_v56 }
  0xd2   :  { %845 = vmatpush.msra.mxu2 %v5790_v50 }
  0xd3   :  { %865 = vmatpush.msra.mxu3 %v5845_v57 }
 0x110   :  { %v247_v59 = vpop.f32.mrf.mxu0 }
 0x111   :  { %v5940_v10 = vadd.f32 %v247_v59, %v5934_v7 }
 0x116   :  { %v5909_v58 = vpop.f32.mrf.mxu2 }
 0x117   :  { %8306 = vst [vmem:[#allocation6_spill] sm:$0xff] %v5909_v58  ;;  %v5913_v61 = vpop.f32.mrf.mxu3 }
 0x118   :  { %8308 = vst [vmem:[#allocation8_spill] sm:$0xff] %v5913_v61  ;;  %v5917_v0 = vpop.f32.mrf.mxu0 }
 0x119   :  { %8310 = vst [vmem:[#allocation10_spill] sm:$0xff] %v5917_v0  ;;  %v5969_v0 = vperm.slane %v372_v2, 1 }
 0x11e   :  { %v5911_v60 = vpop.f32.mrf.mxu2 }
 0x11f   :  { %8307 = vst [vmem:[#allocation7_spill] sm:$0xff] %v5911_v60  ;;  %v5919_v1 = vpop.f32.mrf.mxu3 }
 0x120   :  { %8311 = vst [vmem:[#allocation11_spill] sm:$0xff] %v5919_v1  ;;  %v416_v6 = vpop.f32.mrf.mxu0 }
 0x121   :  { %v417_v8 = vadd.f32 %v416_v6, %v5931_v5 }
 0x123   :  { %v439_v18 = vadd.f32 %v417_v8, %v5940_v10 }
 0x125   :  { %v4865_v19 = vmul.f32 -1.442695, %v439_v18 }
 0x126   :  { %v5915_v63 = vpop.f32.mrf.mxu2 }
 0x127   :  { %8309 = vst [vmem:[#allocation9_spill] sm:$0xff] %v5915_v63  ;;  %v5942_v15 = vpop.f32.mrf.mxu3  ;;  %5019 = vpow2.f32 %v4865_v19  ;;  %v276_v19 = vpop.f32.mrf.mxu1  ;;  %v5964_v63 = vperm.slane %v389_v21, 1 }
 0x128   :  { %8316 = vst [vmem:[#allocation15_spill] sm:$0xff] %v5942_v15 }
 0x12d   :  { %v5020_v32 = vpop.eup %5019 }
 0x12e   :  { %v5924_v3 = vpop.f32.mrf.mxu2  ;;  %v443_v39 = vadd.f32 1.0, %v5020_v32 }
 0x12f   :  { %8312 = vst [vmem:[#allocation12_spill] sm:$0xff] %v5924_v3  ;;  %v5948_v23 = vpop.f32.mrf.mxu3 }
 0x130   :  { %8317 = vst [vmem:[#allocation16_spill] sm:$0xff] %v5948_v23  ;;  %5021 = vrcp.f32 %v443_v39  ;;  %vm449_vm6 = vweird.f32 %v443_v39 }
 0x136   :  { %v5937_v9 = vpop.f32.mrf.mxu2  ;;  %v5022_v18 = vpop.eup %5021 }
 0x137   :  { %8315 = vst [vmem:[#allocation14_spill] sm:$0xff] %v5937_v9  ;;  %v5962_v6 = vpop.f32.mrf.mxu3  ;;  %v445_v15 = vmul.f32 %v5022_v18, %v443_v39  ;;  %vm450_vm4 = vweird.f32 %v5022_v18 }
 0x138   :  { %8319 = vst [vmem:[#allocation18_spill] sm:$0xff] %v5962_v6  ;;  %vm5971_vm7 = vmor %vm449_vm6, %vm450_vm4  ;;  %v5975_v6 = vperm.slane %v292_v22, 1 }
 0x13e   :  { %v324_v20 = vpop.f32.mrf.mxu2 }
 0x13f   :  { %v5959_v37 = vadd.f32 %v324_v20, %v5955_v34  ;;  %v353_v1 = vpop.f32.mrf.mxu3 }
 0x140   :  { %v5980_v34 = vadd.f32 %v353_v1, %v5975_v6 }
 0x146   :  { %v498_v27 = vpop.f32.mrf.mxu2 }
 0x147   :  { %v499_v36 = vadd.f32 %v498_v27, %v5950_v28  ;;  %v446_v27 = vsub.f32 1.0, %v445_v15  ;;  %v518_v32 = vpop.f32.mrf.mxu3  ;;  %v455_v15 = vand.u32 2147483648, %v443_v39 }
 0x149   :  { %v522_v38 = vrot.slane %v499_v36, 2  ;;  %v5966_v36 = vpop.f32.mrf.mxu1 }
 0x14a   :  { %8320 = vst [vmem:[#allocation19_spill] sm:$0xff] %v5966_v36  ;;  %v453_v36 = vand.u32 2147483647, %v443_v39 }
 0x14b   :  { %v524_v59 = vadd.f32 %v522_v38, %v5959_v37  ;;  %v447_v38 = vmul.f32 %v5022_v18, %v446_v27 }
 0x14c   :  { %vm454_vm11 = vcmp.eq.f32.partialorder %v453_v36, 8.507059e+37 }
 0x14d   :  { %v4866_v8 = vmul.f32 -1.442695, %v524_v59  ;;  %v519_v59 = vadd.f32 %v518_v32, %v5964_v63  ;;  %v448_v23 = vadd.f32 %v5022_v18, %v447_v38  ;;  %v456_v38 = vor.u32 1.1754944e-38, %v455_v15 }
 0x14f   :  { %5023 = vpow2.f32 %v4866_v8  ;;  %v545_v7 = vrot.slane %v519_v59, 2  ;;  %v5986_v59 = vperm.slane %v5929_v4, 1 }
 0x151   :  { %v436_v32 = vpop.f32.mrf.mxu1  ;;  %8323 = vst [vmem:[#allocation20_spill] sm:$0xff] %v5986_v59 }
 0x152   :  { %v437_v39 = vadd.f32 %v436_v32, %v5969_v0 }
 0x155   :  { %v5024_v49 = vpop.eup %5023 }
 0x156   :  { %v528_v60 = vadd.f32 1.0, %v5024_v49 }
 0x158   :  { %5025 = vrcp.f32 %v528_v60  ;;  %v540_v8 = vand.u32 2147483648, %v528_v60  ;;  %v538_v49 = vand.u32 2147483647, %v528_v60  ;;  %vm534_vm8 = vweird.f32 %v528_v60 }
 0x15a   :  { %vm539_vm10 = vcmp.eq.f32.partialorder %v538_v49, 8.507059e+37 }
 0x15e   :  { %v5026_v20 = vpop.eup %5025 }
 0x15f   :  { %v530_v61 = vmul.f32 %v5026_v20, %v528_v60  ;;  %vm535_vm5 = vweird.f32 %v5026_v20 }
 0x160   :  { %vm536_vm9 = vmor %vm534_vm8, %vm535_vm5 }
 0x161   :  { %v531_v58 = vsub.f32 1.0, %v530_v61  ;;  %v541_v61 = vor.u32 1.1754944e-38, %v540_v8 }
 0x163   :  { %v532_v3 = vmul.f32 %v5026_v20, %v531_v58  ;;  %v452_v58 = vsel %vm5971_vm7, %v5022_v18, %v448_v23  ;;  %v5991_v18 = vadd.f32 %v276_v19, %v5986_v59 }
 0x165   :  { %v533_v27 = vadd.f32 %v5026_v20, %v532_v3  ;;  %v5983_v3 = vsel %vm454_vm11, %v456_v38, %v452_v58 }
 0x166   :  { %v459_v23 = vmul.f32 %v5983_v3, %v437_v39 }
 0x167   :  { %v537_v2 = vsel %vm536_vm9, %v5026_v20, %v533_v27 }
 0x168   :  { %v542_v9 = vsel %vm539_vm10, %v541_v61, %v537_v2  ;;  %v460_v1 = vadd.f32 %v459_v23, %v5991_v18 }
 0x169   :  { %v547_v60 = vmul.f32 %v545_v7, %v542_v9  ;;  %v550_v4 = vsub.f32 1.0, %v542_v9  ;;  %v556_v8 = vmul.f32 0.0, %v542_v9 }
 0x16b   :  { %v548_v22 = vadd.f32 %v547_v60, %v5980_v34 }
 0x16d   :  { %5027 = vtanh.f32 %v548_v22 }
 0x16e   :  { %5029 = vtanh.f32 %v460_v1 }
 0x173   :  { %v5028_v20 = vpop.eup %5027 }
 0x174   :  { %552 = vrot.lane.b32.xlu2 %v5028_v20, %s5439_s8  ;;  %v5030_v7 = vpop.eup %5029 }
 0x17c   :  { %464 = vrot.lane.b32.xlu2 %v5030_v7, %s5439_s8 }
 0x1ce   :  { %v553_v36 = vpop.permute.xlu2 %552 }
 0x1cf   :  { %v555_v49 = vmul.f32 %v553_v36, %v550_v4 }
 0x1d1   :  { %v557_v15 = vadd.f32 %v556_v8, %v555_v49 }
 0x1d3   :  { %v648_v21 = vrot.slane %v557_v15, 6  ;;  %559 = vst.msk [vmem:[#allocation2 + $0x18] sm:$0xc0] %vm558_vm12, %v557_v15 }
 0x1d5   :  { %649 = vrot.lane.b32.xlu0 %v648_v21, %s5439_s8 }
 0x247   :  { %v650_v19 = vpop.permute.xlu0 %649 }
 0x248   :  { %4870 = vmatmul.msk.f32.vlgmr.msrb.gmra.mxu2 %vm395_vm13, %v650_v19  ;;  %4871 = vmatmul.msk.f32.vlgmr.msrb.gmra.mxu3 %vm395_vm13, %v650_v19  ;;  %v728_v19 = vrot.slane %v557_v15, 2 }
 0x249   :  { %1015 = vmatpush.msrb.mxu2 %v5676_v25  ;;  %1035 = vmatpush.msrb.mxu3 %v5755_v44 }
 0x24b   :  { %1016 = vmatpush.msrb.mxu2 %v5689_v29  ;;  %1036 = vmatpush.msrb.mxu3 %v5795_v51 }
 0x24d   :  { %1017 = vmatpush.msrb.mxu2 %v5706_v33  ;;  %1037 = vmatpush.msrb.mxu3 %v5802_v52 }
 0x24f   :  { %1018 = vmatpush.msrb.mxu2 %v5726_v40  ;;  %1038 = vmatpush.msrb.mxu3 %v5811_v53 }
 0x251   :  { %1019 = vmatpush.msrb.mxu2 %v5743_v42  ;;  %1039 = vmatpush.msrb.mxu3 %v5818_v54 }
 0x253   :  { %1020 = vmatpush.msrb.mxu2 %v5760_v45  ;;  %1040 = vmatpush.msrb.mxu3 %v5827_v55 }
 0x255   :  { %1021 = vmatpush.msrb.mxu2 %v5776_v47  ;;  %1041 = vmatpush.msrb.mxu3 %v5837_v56 }
 0x257   :  { %1022 = vmatpush.msrb.mxu2 %v5790_v50  ;;  %1042 = vmatpush.msrb.mxu3 %v5845_v57 }
 0x2cb   :  { %v670_v9 = vpop.f32.mrf.mxu2  ;;  %v690_v22 = vpop.f32.mrf.mxu3 }
 0x2cc   :  { %v671_v27 = vadd.f32 %v670_v9, %v5950_v28  ;;  %v691_v20 = vadd.f32 %v690_v22, %v5964_v63 }
 0x2ce   :  { %v694_v32 = vrot.slane %v671_v27, 4  ;;  %v717_v21 = vrot.slane %v691_v20, 4 }
 0x2d0   :  { %v696_v61 = vadd.f32 %v694_v32, %v5959_v37 }
 0x2d2   :  { %v4872_v58 = vmul.f32 -1.442695, %v696_v61 }
 0x2d4   :  { %5031 = vpow2.f32 %v4872_v58 }
 0x2da   :  { %v5032_v2 = vpop.eup %5031 }
 0x2db   :  { %v700_v38 = vadd.f32 1.0, %v5032_v2  ;;  %v465_v2 = vpop.permute.xlu2 %464 }
 0x2dd   :  { %5033 = vrcp.f32 %v700_v38  ;;  %v712_v1 = vand.u32 2147483648, %v700_v38  ;;  %v710_v4 = vand.u32 2147483647, %v700_v38  ;;  %vm706_vm15 = vweird.f32 %v700_v38 }
 0x2df   :  { %v713_v8 = vor.u32 1.1754944e-38, %v712_v1  ;;  %vm711_vm1 = vcmp.eq.f32.partialorder %v710_v4, 8.507059e+37 }
 0x2e3   :  { %v5034_v39 = vpop.eup %5033 }
 0x2e4   :  { %v702_v60 = vmul.f32 %v5034_v39, %v700_v38  ;;  %vm707_vm14 = vweird.f32 %v5034_v39  ;;  %v468_v38 = vmul.f32 0.0, %v5983_v3 }
 0x2e5   :  { %vm708_vm0 = vmor %vm706_vm15, %vm707_vm14  ;;  %vm909_vm14 = vcmask 1043970  }
 0x2e6   :  { %v703_v23 = vsub.f32 1.0, %v702_v60  ;;  %v462_v60 = vsub.f32 1.0, %v5983_v3 }
 0x2e8   :  { %v704_v7 = vmul.f32 %v5034_v39, %v703_v23  ;;  %v467_v22 = vmul.f32 %v465_v2, %v462_v60 }
 0x2ea   :  { %v705_v36 = vadd.f32 %v5034_v39, %v704_v7  ;;  %v6023_v23 = vadd.f32 %v468_v38, %v467_v22 }
 0x2ec   :  { %v709_v49 = vsel %vm708_vm0, %v5034_v39, %v705_v36 }
 0x2ed   :  { %v714_v9 = vsel %vm711_vm1, %v713_v8, %v709_v49 }
 0x2ee   :  { %v719_v27 = vmul.f32 %v717_v21, %v714_v9  ;;  %v730_v32 = vmul.f32 %v728_v19, %v714_v9  ;;  %v722_v15 = vsub.f32 1.0, %v714_v9 }
 0x2f0   :  { %v720_v61 = vadd.f32 %v719_v27, %v5980_v34 }
 0x2f2   :  { %5035 = vtanh.f32 %v720_v61 }
 0x2f8   :  { %v5036_v58 = vpop.eup %5035 }
 0x2f9   :  { %724 = vrot.lane.b32.xlu1 %v5036_v58, %s5439_s8 }
 0x301   :  { %471 = vrot.lane.b32.xlu1 %v6023_v23, %s5439_s8 }
 0x36b   :  { %v725_v39 = vpop.permute.xlu1 %724 }
 0x36c   :  { %v727_v1 = vmul.f32 %v725_v39, %v722_v15 }
 0x36e   :  { %v6027_v20 = vadd.f32 %v730_v32, %v727_v1 }
 0x370   :  { %v825_v7 = vrot.slane %v6027_v20, 4  ;;  %733 = vst.msk [vmem:[#allocation2 + $0x18] sm:$0x30] %vm732_vm2, %v6027_v20 }
 0x372   :  { %826 = vrot.lane.b32.xlu0 %v825_v7, %s5439_s8 }
 0x373   :  { %v472_v3 = vpop.permute.xlu1 %471 }
 0x374   :  { %475 = vst.msk [vmem:[#allocation2] sm:$0x3] %vm474_vm3, %v472_v3  ;;  %4867 = vmatmul.msk.f32.vlgmr.msra.gmra.mxu0 %vm395_vm13, %v472_v3  ;;  %4868 = vmatmul.msk.f32.vlgmr.msra.gmra.mxu1 %vm395_vm13, %v472_v3 }
 0x375   :  { %924 = vmatpush.msra.mxu0 %v5579_v11  ;;  %944 = vmatpush.msra.mxu1 %v5662_v62 }
 0x377   :  { %925 = vmatpush.msra.mxu0 %v5584_v12  ;;  %945 = vmatpush.msra.mxu1 %v5694_v30 }
 0x379   :  { %926 = vmatpush.msra.mxu0 %v5590_v13  ;;  %946 = vmatpush.msra.mxu1 %v5699_v31 }
 0x37b   :  { %927 = vmatpush.msra.mxu0 %v5596_v14  ;;  %947 = vmatpush.msra.mxu1 %v5711_v35 }
 0x37d   :  { %928 = vmatpush.msra.mxu0 %v5606_v16  ;;  %948 = vmatpush.msra.mxu1 %v5731_v41 }
 0x37f   :  { %929 = vmatpush.msra.mxu0 %v5611_v17  ;;  %949 = vmatpush.msra.mxu1 %v5748_v43 }
 0x381   :  { %930 = vmatpush.msra.mxu0 %v5629_v24  ;;  %950 = vmatpush.msra.mxu1 %v5765_v46 }
 0x383   :  { %931 = vmatpush.msra.mxu0 %v5635_v26  ;;  %951 = vmatpush.msra.mxu1 %v5782_v48 }
 0x3e4   :  { %v827_v11 = vpop.permute.xlu0 %826 }
 0x3e5   :  { %4876 = vmatmul.msk.f32.vlgmr.msra.gmra.mxu2 %vm395_vm13, %v827_v11  ;;  %4877 = vmatmul.msk.f32.vlgmr.msra.gmra.mxu3 %vm395_vm13, %v827_v11 }
 0x3e6   :  { %1176 = vmatpush.msra.mxu2 %v5676_v25  ;;  %1196 = vmatpush.msra.mxu3 %v5755_v44 }
 0x3e8   :  { %1177 = vmatpush.msra.mxu2 %v5689_v29  ;;  %1197 = vmatpush.msra.mxu3 %v5795_v51 }
 0x3ea   :  { %1178 = vmatpush.msra.mxu2 %v5706_v33  ;;  %1198 = vmatpush.msra.mxu3 %v5802_v52 }
 0x3ec   :  { %1179 = vmatpush.msra.mxu2 %v5726_v40  ;;  %1199 = vmatpush.msra.mxu3 %v5811_v53 }
 0x3ee   :  { %1180 = vmatpush.msra.mxu2 %v5743_v42  ;;  %1200 = vmatpush.msra.mxu3 %v5818_v54 }
 0x3f0   :  { %1181 = vmatpush.msra.mxu2 %v5760_v45  ;;  %1201 = vmatpush.msra.mxu3 %v5827_v55 }
 0x3f1   :  { %v579_v12 = vpop.f32.mrf.mxu0  ;;  %v599_v21 = vpop.f32.mrf.mxu1 }
 0x3f2   :  { %v580_v13 = vadd.f32 %v579_v12, %v5931_v5  ;;  %1182 = vmatpush.msra.mxu2 %v5776_v47  ;;  %1202 = vmatpush.msra.mxu3 %v5837_v56  ;;  %v600_v27 = vadd.f32 %v599_v21, %v5969_v0 }
 0x3f4   :  { %v603_v14 = vrot.slane %v580_v13, 6  ;;  %1183 = vmatpush.msra.mxu2 %v5790_v50  ;;  %1203 = vmatpush.msra.mxu3 %v5845_v57  ;;  %v626_v22 = vrot.slane %v600_v27, 6 }
 0x3f6   :  { %v605_v16 = vadd.f32 %v603_v14, %v5940_v10 }
 0x3f8   :  { %v4869_v17 = vmul.f32 -1.442695, %v605_v16 }
 0x3fa   :  { %5037 = vpow2.f32 %v4869_v17 }
 0x400   :  { %v5038_v4 = vpop.eup %5037 }
 0x401   :  { %v609_v36 = vadd.f32 1.0, %v5038_v4 }
 0x403   :  { %5039 = vrcp.f32 %v609_v36  ;;  %v621_v9 = vand.u32 2147483648, %v609_v36  ;;  %v619_v61 = vand.u32 2147483647, %v609_v36  ;;  %vm615_vm5 = vweird.f32 %v609_v36 }
 0x405   :  { %v622_v2 = vor.u32 1.1754944e-38, %v621_v9  ;;  %vm620_vm7 = vcmp.eq.f32.partialorder %v619_v61, 8.507059e+37 }
 0x409   :  { %v5040_v8 = vpop.eup %5039 }
 0x40a   :  { %v611_v49 = vmul.f32 %v5040_v8, %v609_v36  ;;  %vm616_vm4 = vweird.f32 %v5040_v8 }
 0x40b   :  { %vm617_vm6 = vmor %vm615_vm5, %vm616_vm4 }
 0x40c   :  { %v612_v19 = vsub.f32 1.0, %v611_v49 }
 0x40e   :  { %v613_v32 = vmul.f32 %v5040_v8, %v612_v19 }
 0x410   :  { %v614_v58 = vadd.f32 %v5040_v8, %v613_v32 }
 0x412   :  { %v618_v60 = vsel %vm617_vm6, %v5040_v8, %v614_v58 }
 0x413   :  { %v623_v38 = vsel %vm620_vm7, %v622_v2, %v618_v60  ;;  %v905_v2 = vrot.slane %v6027_v20, 2 }
 0x414   :  { %v628_v15 = vmul.f32 %v626_v22, %v623_v38 }
 0x416   :  { %v629_v39 = vadd.f32 %v628_v15, %v5991_v18 }
 0x418   :  { %5041 = vtanh.f32 %v629_v39 }
 0x41e   :  { %v5042_v1 = vpop.eup %5041 }
 0x41f   :  { %633 = vrot.lane.b32.xlu0 %v5042_v1, %s5439_s8 }
 0x468   :  { %v847_v7 = vpop.f32.mrf.mxu2  ;;  %v867_v36 = vpop.f32.mrf.mxu3 }
 0x469   :  { %v848_v3 = vadd.f32 %v847_v7, %v5950_v28  ;;  %v868_v21 = vadd.f32 %v867_v36, %v5964_v63  ;;  %v631_v7 = vsub.f32 1.0, %v623_v38 }
 0x46b   :  { %v871_v11 = vrot.slane %v848_v3, 6  ;;  %v894_v58 = vrot.slane %v868_v21, 6  ;;  %v637_v3 = vrot.slane %v6023_v23, 6  ;;  %v6113_v21 = vld [vmem:[%s8304_s28 + $0x50] sm:$0xff] }
 0x46d   :  { %v873_v12 = vadd.f32 %v871_v11, %v5959_v37 }
 0x46f   :  { %v4878_v13 = vmul.f32 -1.442695, %v873_v12 }
 0x471   :  { %5043 = vpow2.f32 %v4878_v13  ;;  %v639_v13 = vmul.f32 %v637_v3, %v623_v38  ;;  %v6099_v38 = vld [vmem:[%s8304_s28 + $0x70] sm:$0xff] }
 0x477   :  { %v5044_v14 = vpop.eup %5043 }
 0x478   :  { %v877_v16 = vadd.f32 1.0, %v5044_v14 }
 0x47a   :  { %5045 = vrcp.f32 %v877_v16  ;;  %v889_v49 = vand.u32 2147483648, %v877_v16  ;;  %v887_v9 = vand.u32 2147483647, %v877_v16  ;;  %vm883_vm9 = vweird.f32 %v877_v16 }
 0x47c   :  { %v890_v32 = vor.u32 1.1754944e-38, %v889_v49  ;;  %vm888_vm11 = vcmp.eq.f32.partialorder %v887_v9, 8.507059e+37  ;;  %v6106_v49 = vld [vmem:[%s8304_s28 + $0x60] sm:$0xff] }
 0x480   :  { %v5046_v17 = vpop.eup %5045 }
 0x481   :  { %v879_v4 = vmul.f32 %v5046_v17, %v877_v16  ;;  %vm884_vm8 = vweird.f32 %v5046_v17 }
 0x482   :  { %vm885_vm10 = vmor %vm883_vm9, %vm884_vm8  ;;  %vm1079_vm9 = vcmask 1041920  }
 0x483   :  { %v880_v8 = vsub.f32 1.0, %v879_v4 }
 0x485   :  { %v881_v19 = vmul.f32 %v5046_v17, %v880_v8 }
 0x487   :  { %v882_v27 = vadd.f32 %v5046_v17, %v881_v19 }
 0x489   :  { %v886_v61 = vsel %vm885_vm10, %v5046_v17, %v882_v27 }
 0x48a   :  { %v891_v60 = vsel %vm888_vm11, %v890_v32, %v886_v61 }
 0x48b   :  { %v896_v22 = vmul.f32 %v894_v58, %v891_v60  ;;  %v907_v15 = vmul.f32 %v905_v2, %v891_v60  ;;  %v899_v20 = vsub.f32 1.0, %v891_v60 }
 0x48d   :  { %v897_v39 = vadd.f32 %v896_v22, %v5980_v34 }
 0x48f   :  { %5047 = vtanh.f32 %v897_v39 }
 0x491   :  { %v634_v1 = vpop.permute.xlu0 %633 }
 0x492   :  { %v636_v11 = vmul.f32 %v634_v1, %v631_v7 }
 0x494   :  { %v6082_v14 = vadd.f32 %v639_v13, %v636_v11 }
 0x495   :  { %v5048_v12 = vpop.eup %5047 }
 0x496   :  { %901 = vrot.lane.b32.xlu2 %v5048_v12, %s5439_s8  ;;  %8324 = vst [vmem:[#allocation21_spill] sm:$0xff] %v6082_v14  ;;  %v734_v16 = vrot.slane %v6082_v14, 2 }
 0x49e   :  { %735 = vrot.lane.b32.xlu2 %v734_v16, %s5439_s8 }
 0x4f0   :  { %v902_v17 = vpop.permute.xlu2 %901 }
 0x4f1   :  { %v904_v4 = vmul.f32 %v902_v17, %v899_v20 }
 0x4f3   :  { %v6086_v36 = vadd.f32 %v907_v15, %v904_v4 }
 0x4f5   :  { %v1002_v8 = vrot.slane %v6086_v36, 2  ;;  %910 = vst.msk [vmem:[#allocation2 + $0x18] sm:$0xc] %vm909_vm14, %v6086_v36  ;;  %v6189_v36 = vld [vmem:[%s8304_s28 + $0x78] sm:$0xff] }
 0x4f7   :  { %1003 = vrot.lane.b32.xlu1 %v1002_v8, %s5439_s8 }
 0x4f8   :  { %v736_v23 = vpop.permute.xlu2 %735 }
 0x4f9   :  { %4873 = vmatmul.msk.f32.vlgmr.msrb.gmra.mxu0 %vm395_vm13, %v736_v23  ;;  %4874 = vmatmul.msk.f32.vlgmr.msrb.gmra.mxu1 %vm395_vm13, %v736_v23 }
 0x4fa   :  { %1094 = vmatpush.msrb.mxu0 %v6099_v38  ;;  %1114 = vmatpush.msrb.mxu1 %v5662_v62  ;;  %v6120_v62 = vld [vmem:[%s8304_s28 + $0x40] sm:$0xff] }
 0x4fc   :  { %1095 = vmatpush.msrb.mxu0 %v6106_v49  ;;  %1115 = vmatpush.msrb.mxu1 %v5694_v30  ;;  %v6127_v30 = vld [vmem:[%s8304_s28 + $0x30] sm:$0xff] }
 0x4fe   :  { %1096 = vmatpush.msrb.mxu0 %v6113_v21  ;;  %1116 = vmatpush.msrb.mxu1 %v5699_v31  ;;  %v6134_v31 = vld [vmem:[%s8304_s28 + $0x20] sm:$0xff] }
 0x500   :  { %1097 = vmatpush.msrb.mxu0 %v6120_v62  ;;  %1117 = vmatpush.msrb.mxu1 %v5711_v35 }
 0x502   :  { %1098 = vmatpush.msrb.mxu0 %v6127_v30  ;;  %1118 = vmatpush.msrb.mxu1 %v5731_v41 }
 0x504   :  { %1099 = vmatpush.msrb.mxu0 %v6134_v31  ;;  %1119 = vmatpush.msrb.mxu1 %v5748_v43 }
 0x506   :  { %1100 = vmatpush.msrb.mxu0 %v5629_v24  ;;  %1120 = vmatpush.msrb.mxu1 %v5765_v46 }
 0x508   :  { %1101 = vmatpush.msrb.mxu0 %v5635_v26  ;;  %1121 = vmatpush.msrb.mxu1 %v5782_v48 }
 0x569   :  { %v1004_v35 = vpop.permute.xlu1 %1003 }
 0x56a   :  { %4882 = vmatmul.msk.f32.vlgmr.msrb.gmra.mxu2 %vm395_vm13, %v1004_v35  ;;  %4883 = vmatmul.msk.f32.vlgmr.msrb.gmra.mxu3 %vm395_vm13, %v1004_v35 }
 0x56b   :  { %1348 = vmatpush.msrb.mxu2 %v5676_v25  ;;  %1368 = vmatpush.msrb.mxu3 %v5755_v44 }
 0x56d   :  { %1349 = vmatpush.msrb.mxu2 %v5689_v29  ;;  %1369 = vmatpush.msrb.mxu3 %v5795_v51 }
 0x56f   :  { %1350 = vmatpush.msrb.mxu2 %v5706_v33  ;;  %1370 = vmatpush.msrb.mxu3 %v5802_v52 }
 0x571   :  { %1351 = vmatpush.msrb.mxu2 %v5726_v40  ;;  %1371 = vmatpush.msrb.mxu3 %v5811_v53 }
 0x573   :  { %1352 = vmatpush.msrb.mxu2 %v5743_v42  ;;  %1372 = vmatpush.msrb.mxu3 %v5818_v54 }
 0x575   :  { %1353 = vmatpush.msrb.mxu2 %v5760_v45  ;;  %1373 = vmatpush.msrb.mxu3 %v5827_v55 }
 0x576   :  { %v756_v24 = vpop.f32.mrf.mxu0  ;;  %v776_v44 = vpop.f32.mrf.mxu1 }
 0x577   :  { %v757_v26 = vadd.f32 %v756_v24, %v5931_v5  ;;  %1354 = vmatpush.msrb.mxu2 %v5776_v47  ;;  %1374 = vmatpush.msrb.mxu3 %v5837_v56  ;;  %v777_v47 = vadd.f32 %v776_v44, %v5969_v0 }
 0x579   :  { %v780_v25 = vrot.slane %v757_v26, 4  ;;  %1355 = vmatpush.msrb.mxu2 %v5790_v50  ;;  %1375 = vmatpush.msrb.mxu3 %v5845_v57  ;;  %v803_v27 = vrot.slane %v777_v47, 4 }
 0x57b   :  { %v782_v29 = vadd.f32 %v780_v25, %v5940_v10 }
 0x57d   :  { %v4875_v33 = vmul.f32 -1.442695, %v782_v29 }
 0x57f   :  { %5049 = vpow2.f32 %v4875_v33 }
 0x585   :  { %v5050_v40 = vpop.eup %5049 }
 0x586   :  { %v786_v41 = vadd.f32 1.0, %v5050_v40  ;;  %v814_v40 = vrot.slane %v6082_v14, 6 }
 0x588   :  { %5051 = vrcp.f32 %v786_v41  ;;  %v798_v46 = vand.u32 2147483648, %v786_v41  ;;  %v796_v52 = vand.u32 2147483647, %v786_v41  ;;  %vm792_vm0 = vweird.f32 %v786_v41 }
 0x58a   :  { %v799_v19 = vor.u32 1.1754944e-38, %v798_v46  ;;  %vm797_vm4 = vcmp.eq.f32.partialorder %v796_v52, 8.507059e+37 }
 0x58e   :  { %v5052_v42 = vpop.eup %5051 }
 0x58f   :  { %v788_v43 = vmul.f32 %v5052_v42, %v786_v41  ;;  %vm793_vm15 = vweird.f32 %v5052_v42 }
 0x590   :  { %vm794_vm1 = vmor %vm792_vm0, %vm793_vm15 }
 0x591   :  { %v789_v45 = vsub.f32 1.0, %v788_v43 }
 0x593   :  { %v790_v51 = vmul.f32 %v5052_v42, %v789_v45 }
 0x595   :  { %v791_v50 = vadd.f32 %v5052_v42, %v790_v51 }
 0x597   :  { %v795_v9 = vsel %vm794_vm1, %v5052_v42, %v791_v50 }
 0x598   :  { %v800_v32 = vsel %vm797_vm4, %v799_v19, %v795_v9  ;;  %v6203_v19 = vld [vmem:[%s8304_s28 + $0x58] sm:$0xff]  ;;  %v6210_v9 = vld [vmem:[%s8304_s28 + $0x48] sm:$0xff] }
 0x599   :  { %v805_v61 = vmul.f32 %v803_v27, %v800_v32  ;;  %v808_v29 = vsub.f32 1.0, %v800_v32  ;;  %v816_v43 = vmul.f32 %v814_v40, %v800_v32  ;;  %v6217_v27 = vld [vmem:[%s8304_s28 + $0x38] sm:$0xff]  ;;  %v6224_v32 = vld [vmem:[%s8304_s28 + $0x28] sm:$0xff] }
 0x59b   :  { %v806_v58 = vadd.f32 %v805_v61, %v5991_v18  ;;  %v6230_v61 = vld [vmem:[%s8304_s28 + $0x10] sm:$0xff] }
 0x59d   :  { %5053 = vtanh.f32 %v806_v58  ;;  %v6236_v58 = vld [vmem:[%s8304_s28 + $0x18] sm:$0xff] }
 0x5a3   :  { %v5054_v2 = vpop.eup %5053 }
 0x5a4   :  { %810 = vrot.lane.b32.xlu1 %v5054_v2, %s5439_s8  ;;  %v6242_v2 = vld [vmem:[%s8304_s28] sm:$0xff] }
 0x5ed   :  { %v1024_v60 = vpop.f32.mrf.mxu2  ;;  %v1044_v17 = vpop.f32.mrf.mxu3 }
 0x5ee   :  { %v1025_v22 = vadd.f32 %v1024_v60, %v5950_v28  ;;  %v1045_v35 = vadd.f32 %v1044_v17, %v5964_v63 }
 0x5f0   :  { %v1047_v15 = vadd.f32 %v1025_v22, %v5959_v37  ;;  %v6251_v22 = vld [vmem:[%s8261_s7 + $0x70] sm:$0xff] }
 0x5f2   :  { %v4884_v39 = vmul.f32 -1.442695, %v1047_v15  ;;  %v6257_v15 = vld [vmem:[%s8261_s7 + $0x78] sm:$0xff] }
 0x5f4   :  { %5055 = vpow2.f32 %v4884_v39  ;;  %v6269_v39 = vld [vmem:[%s8261_s7 + $0x68] sm:$0xff] }
 0x5fa   :  { %v5056_v1 = vpop.eup %5055 }
 0x5fb   :  { %v1051_v7 = vadd.f32 1.0, %v5056_v1  ;;  %v6275_v1 = vld [vmem:[%s8261_s7 + $0x50] sm:$0xff] }
 0x5fd   :  { %5057 = vrcp.f32 %v1051_v7  ;;  %v1063_v13 = vand.u32 2147483648, %v1051_v7  ;;  %v1061_v20 = vand.u32 2147483647, %v1051_v7  ;;  %vm1057_vm6 = vweird.f32 %v1051_v7 }
 0x5ff   :  { %v1064_v23 = vor.u32 1.1754944e-38, %v1063_v13  ;;  %vm1062_vm8 = vcmp.eq.f32.partialorder %v1061_v20, 8.507059e+37 }
 0x603   :  { %v5058_v3 = vpop.eup %5057 }
 0x604   :  { %v1053_v11 = vmul.f32 %v5058_v3, %v1051_v7  ;;  %vm1058_vm5 = vweird.f32 %v5058_v3  ;;  %v6281_v7 = vld [vmem:[%s8261_s7 + $0x58] sm:$0xff] }
 0x605   :  { %vm1059_vm7 = vmor %vm1057_vm6, %vm1058_vm5 }
 0x606   :  { %v1054_v12 = vsub.f32 1.0, %v1053_v11  ;;  %v6294_v11 = vld [vmem:[%s8261_s7 + $0x30] sm:$0xff] }
 0x608   :  { %v1055_v16 = vmul.f32 %v5058_v3, %v1054_v12  ;;  %v6301_v12 = vld [vmem:[%s8261_s7 + $0x20] sm:$0xff] }
 0x60a   :  { %v1056_v4 = vadd.f32 %v5058_v3, %v1055_v16 }
 0x60c   :  { %v1060_v37 = vsel %vm1059_vm7, %v5058_v3, %v1056_v4  ;;  %v6287_v3 = vld [vmem:[%s8261_s7 + $0x40] sm:$0xff] }
 0x60d   :  { %v1065_v24 = vsel %vm1062_vm8, %v1064_v23, %v1060_v37 }
 0x60e   :  { %v1067_v26 = vmul.f32 %v1065_v24, %v1045_v35  ;;  %v1070_v46 = vsub.f32 1.0, %v1065_v24 }
 0x610   :  { %v1068_v25 = vadd.f32 %v1067_v26, %v5980_v34  ;;  %v1077_v34 = vmul.f32 %v1065_v24, %v1002_v8  ;;  %v6196_v8 = vld [vmem:[%s8304_s28 + $0x68] sm:$0xff] }
 0x612   :  { %5059 = vtanh.f32 %v1068_v25 }
 0x616   :  { %v811_v33 = vpop.permute.xlu1 %810 }
 0x617   :  { %v813_v41 = vmul.f32 %v811_v33, %v808_v29 }
 0x618   :  { %v5060_v42 = vpop.eup %5059 }
 0x619   :  { %1072 = vrot.lane.b32.xlu0 %v5060_v42, %s5439_s8  ;;  %v6171_v44 = vadd.f32 %v816_v43, %v813_v41 }
 0x61b   :  { %8325 = vst [vmem:[#allocation22_spill] sm:$0xff] %v6171_v44  ;;  %v911_v45 = vrot.slane %v6171_v44, 4 }
 0x621   :  { %912 = vrot.lane.b32.xlu0 %v911_v45, %s5439_s8 }
 0x68b   :  { %v1073_v47 = vpop.permute.xlu0 %1072 }
 0x68c   :  { %v1075_v51 = vmul.f32 %v1073_v47, %v1070_v46 }
 0x68e   :  { %v6177_v52 = vadd.f32 %v1077_v34, %v1075_v51  ;;  %v8326_v51 = vld [vmem:[#allocation17_spill] sm:$0xff] }
 0x690   :  { %1164 = vrot.lane.b32.xlu2 %v6177_v52, %s5439_s8  ;;  %1080 = vst.msk [vmem:[#allocation2 + $0x18] sm:$0x3] %vm1079_vm9, %v6177_v52 }
 0x693   :  { %v913_v50 = vpop.permute.xlu0 %912 }
 0x694   :  { %4879 = vmatmul.msk.f32.vlgmr.msra.gmra.mxu0 %vm395_vm13, %v913_v50  ;;  %4880 = vmatmul.msk.f32.vlgmr.msra.gmra.mxu1 %vm395_vm13, %v913_v50  ;;  %v8327_v50 = vld [vmem:[#allocation14_spill] sm:$0xff] }
 0x695   :  { %1258 = vmatpush.msra.mxu0 %v6099_v38  ;;  %1278 = vmatpush.msra.mxu1 %v6189_v36 }
 0x697   :  { %1259 = vmatpush.msra.mxu0 %v6106_v49  ;;  %1279 = vmatpush.msra.mxu1 %v6196_v8 }
 0x699   :  { %1260 = vmatpush.msra.mxu0 %v6113_v21  ;;  %1280 = vmatpush.msra.mxu1 %v6203_v19 }
 0x69b   :  { %1261 = vmatpush.msra.mxu0 %v6120_v62  ;;  %1281 = vmatpush.msra.mxu1 %v6210_v9 }
 0x69d   :  { %1262 = vmatpush.msra.mxu0 %v6127_v30  ;;  %1282 = vmatpush.msra.mxu1 %v6217_v27 }
 0x69f   :  { %1263 = vmatpush.msra.mxu0 %v6134_v31  ;;  %1283 = vmatpush.msra.mxu1 %v6224_v32 }
 0x6a1   :  { %1264 = vmatpush.msra.mxu0 %v6230_v61  ;;  %1284 = vmatpush.msra.mxu1 %v6236_v58 }
 0x6a3   :  { %1265 = vmatpush.msra.mxu0 %v6242_v2  ;;  %1285 = vmatpush.msra.mxu1 %v5782_v48  ;;  %v6263_v48 = vld [vmem:[%s8261_s7 + $0x60] sm:$0xff] }
 0x6ea   :  { %v1165_v60 = vpop.permute.xlu2 %1164 }
 0x6eb   :  { %4888 = vmatmul.msk.f32.vlgmr.msra.gmra.mxu2 %vm395_vm13, %v1165_v60  ;;  %4889 = vmatmul.msk.f32.vlgmr.msra.gmra.mxu3 %vm395_vm13, %v1165_v60  ;;  %v6327_v60 = vadd.f32 %v8327_v50, %v8326_v51 }
 0x6ec   :  { %1523 = vmatpush.msra.mxu2 %v6251_v22  ;;  %1543 = vmatpush.msra.mxu3 %v6257_v15 }
 0x6ee   :  { %1524 = vmatpush.msra.mxu2 %v6263_v48  ;;  %1544 = vmatpush.msra.mxu3 %v6269_v39 }
 0x6f0   :  { %1525 = vmatpush.msra.mxu2 %v6275_v1  ;;  %1545 = vmatpush.msra.mxu3 %v6281_v7 }
 0x6f2   :  { %1526 = vmatpush.msra.mxu2 %v6287_v3  ;;  %1546 = vmatpush.msra.mxu3 %v5811_v53  ;;  %v6308_v53 = vld [vmem:[%s8261_s7 + $0x10] sm:$0xff] }
 0x6f4   :  { %1527 = vmatpush.msra.mxu2 %v6294_v11  ;;  %1547 = vmatpush.msra.mxu3 %v5818_v54  ;;  %v6315_v54 = vld [vmem:[%s8261_s7] sm:$0xff] }
 0x6f6   :  { %1528 = vmatpush.msra.mxu2 %v6301_v12  ;;  %1548 = vmatpush.msra.mxu3 %v5827_v55 }
 0x6f8   :  { %1529 = vmatpush.msra.mxu2 %v6308_v53  ;;  %1549 = vmatpush.msra.mxu3 %v5837_v56 }
 0x6fa   :  { %1530 = vmatpush.msra.mxu2 %v6315_v54  ;;  %1550 = vmatpush.msra.mxu3 %v5845_v57 }
 0x711   :  { %v933_v13 = vpop.f32.mrf.mxu0  ;;  %v953_v37 = vpop.f32.mrf.mxu1 }
 0x712   :  { %v934_v55 = vadd.f32 %v933_v13, %v5931_v5  ;;  %v954_v25 = vadd.f32 %v953_v37, %v5969_v0 }
 0x714   :  { %v957_v16 = vrot.slane %v934_v55, 2  ;;  %v980_v41 = vrot.slane %v954_v25, 2 }
 0x716   :  { %v959_v20 = vadd.f32 %v957_v16, %v5940_v10 }
 0x718   :  { %v4881_v17 = vmul.f32 -1.442695, %v959_v20 }
 0x71a   :  { %5061 = vpow2.f32 %v4881_v17 }
 0x720   :  { %v5062_v4 = vpop.eup %5061 }
 0x721   :  { %v963_v23 = vadd.f32 1.0, %v5062_v4 }
 0x723   :  { %5063 = vrcp.f32 %v963_v23  ;;  %v975_v26 = vand.u32 2147483648, %v963_v23  ;;  %v973_v57 = vand.u32 2147483647, %v963_v23  ;;  %vm969_vm11 = vweird.f32 %v963_v23 }
 0x725   :  { %v976_v40 = vor.u32 1.1754944e-38, %v975_v26  ;;  %vm974_vm0 = vcmp.eq.f32.partialorder %v973_v57, 8.507059e+37 }
 0x729   :  { %v5064_v56 = vpop.eup %5063 }
 0x72a   :  { %v965_v35 = vmul.f32 %v5064_v56, %v963_v23  ;;  %vm970_vm10 = vweird.f32 %v5064_v56 }
 0x72b   :  { %vm971_vm15 = vmor %vm969_vm11, %vm970_vm10 }
 0x72c   :  { %v966_v24 = vsub.f32 1.0, %v965_v35 }
 0x72e   :  { %v967_v29 = vmul.f32 %v5064_v56, %v966_v24 }
 0x730   :  { %v968_v33 = vadd.f32 %v5064_v56, %v967_v29 }
 0x732   :  { %v972_v10 = vsel %vm971_vm15, %v5064_v56, %v968_v33 }
 0x733   :  { %v977_v42 = vsel %vm974_vm0, %v976_v40, %v972_v10  ;;  %v1243_v40 = vrot.slane %v6177_v52, 2 }
 0x734   :  { %v982_v43 = vmul.f32 %v980_v41, %v977_v42  ;;  %v8328_v41 = vld [vmem:[#allocation18_spill] sm:$0xff] }
 0x736   :  { %v983_v45 = vadd.f32 %v982_v43, %v5991_v18  ;;  %v6334_v43 = vadd.f32 %v8328_v41, %v5975_v6 }
 0x738   :  { %5065 = vtanh.f32 %v983_v45 }
 0x73e   :  { %v5066_v46 = vpop.eup %5065 }
 0x73f   :  { %987 = vrot.lane.b32.xlu2 %v5066_v46, %s5439_s8 }
 0x76e   :  { %v1185_v47 = vpop.f32.mrf.mxu2  ;;  %v1205_v23 = vpop.f32.mrf.mxu3 }
 0x76f   :  { %v1186_v34 = vadd.f32 %v1185_v47, %v5950_v28  ;;  %v1206_v37 = vadd.f32 %v1205_v23, %v5964_v63 }
 0x771   :  { %v1209_v13 = vrot.slane %v1186_v34, 2  ;;  %v1232_v33 = vrot.slane %v1206_v37, 2  ;;  %v985_v34 = vsub.f32 1.0, %v977_v42  ;;  %v6371_v37 = vld [vmem:[%s8304_s28 + $0x8] sm:$0xff] }
 0x773   :  { %v1211_v55 = vadd.f32 %v1209_v13, %v6327_v60  ;;  %v991_v13 = vrot.slane %v6171_v44, 6 }
 0x775   :  { %v4890_v16 = vmul.f32 -1.442695, %v1211_v55 }
 0x777   :  { %5067 = vpow2.f32 %v4890_v16 }
 0x77d   :  { %v5068_v20 = vpop.eup %5067 }
 0x77e   :  { %v1215_v17 = vadd.f32 1.0, %v5068_v20  ;;  %v993_v20 = vmul.f32 %v991_v13, %v977_v42 }
 0x780   :  { %5069 = vrcp.f32 %v1215_v17  ;;  %v1227_v35 = vand.u32 2147483648, %v1215_v17  ;;  %v1225_v26 = vand.u32 2147483647, %v1215_v17  ;;  %vm1221_vm4 = vweird.f32 %v1215_v17 }
 0x782   :  { %v1228_v29 = vor.u32 1.1754944e-38, %v1227_v35  ;;  %vm1226_vm6 = vcmp.eq.f32.partialorder %v1225_v26, 8.507059e+37  ;;  %v6386_v26 = vld [vmem:[%s8261_s7 + $0x48] sm:$0xff] }
 0x786   :  { %v5070_v18 = vpop.eup %5069 }
 0x787   :  { %v1217_v4 = vmul.f32 %v5070_v18, %v1215_v17  ;;  %vm1222_vm1 = vweird.f32 %v5070_v18 }
 0x788   :  { %vm1223_vm5 = vmor %vm1221_vm4, %vm1222_vm1 }
 0x789   :  { %v1218_v56 = vsub.f32 1.0, %v1217_v4 }
 0x78b   :  { %v1219_v24 = vmul.f32 %v5070_v18, %v1218_v56 }
 0x78d   :  { %v1220_v25 = vadd.f32 %v5070_v18, %v1219_v24 }
 0x78f   :  { %v1224_v57 = vsel %vm1223_vm5, %v5070_v18, %v1220_v25  ;;  %v6393_v25 = vld [vmem:[%s8261_s7 + $0x38] sm:$0xff] }
 0x790   :  { %v1229_v10 = vsel %vm1226_vm6, %v1228_v29, %v1224_v57  ;;  %v6400_v29 = vld [vmem:[%s8261_s7 + $0x28] sm:$0xff] }
 0x791   :  { %v1234_v45 = vmul.f32 %v1232_v33, %v1229_v10  ;;  %v1245_v46 = vmul.f32 %v1243_v40, %v1229_v10  ;;  %v1237_v18 = vsub.f32 1.0, %v1229_v10  ;;  %v8330_v33 = vld [vmem:[#allocation13_spill] sm:$0xff]  ;;  %v8331_v40 = vld [vmem:[#allocation10_spill] sm:$0xff] }
 0x792   :  { %v6405_v10 = vadd.f32 %v8331_v40, %v8330_v33 }
 0x793   :  { %v1235_v47 = vadd.f32 %v1234_v45, %v6334_v43  ;;  %v6412_v45 = vld [vmem:[%s8261_s7 + $0x18] sm:$0xff] }
 0x795   :  { %5071 = vtanh.f32 %v1235_v47  ;;  %v6420_v47 = vld [vmem:[%s8261_s7 + $0x8] sm:$0xff] }
 0x799   :  { %v988_v50 = vpop.permute.xlu2 %987 }
 0x79a   :  { %v990_v55 = vmul.f32 %v988_v50, %v985_v34 }
 0x79b   :  { %v5072_v16 = vpop.eup %5071 }
 0x79c   :  { %1239 = vrot.lane.b32.xlu1 %v5072_v16, %s5439_s8  ;;  %v6339_v52 = vadd.f32 %v993_v20, %v990_v55 }
 0x79e   :  { %8329 = vst [vmem:[#allocation17_spill] sm:$0xff] %v6339_v52  ;;  %v8285_v17 = vrot.slane %v6339_v52, 6 }
 0x7a4   :  { %1082 = vrot.lane.b32.xlu1 %v8285_v17, %s5439_s8 }
 0x80e   :  { %v1240_v4 = vpop.permute.xlu1 %1239 }
 0x80f   :  { %v1242_v23 = vmul.f32 %v1240_v4, %v1237_v18 }
 0x811   :  { %v6345_v56 = vadd.f32 %v1245_v46, %v1242_v23 }
 0x813   :  { %v1335_v35 = vrot.slane %v6345_v56, 6  ;;  %1247 = vst.msk [vmem:[#allocation2 + $0x10] sm:$0xc0] %vm558_vm12, %v6345_v56 }
 0x815   :  { %1336 = vrot.lane.b32.xlu0 %v1335_v35, %s5439_s8 }
 0x816   :  { %v1083_v42 = vpop.permute.xlu1 %1082 }
 0x817   :  { %4885 = vmatmul.msk.f32.vlgmr.msrb.gmra.mxu0 %vm395_vm13, %v1083_v42  ;;  %4886 = vmatmul.msk.f32.vlgmr.msrb.gmra.mxu1 %vm395_vm13, %v1083_v42 }
 0x818   :  { %1433 = vmatpush.msrb.mxu0 %v6099_v38  ;;  %1453 = vmatpush.msrb.mxu1 %v6189_v36 }
 0x81a   :  { %1434 = vmatpush.msrb.mxu0 %v6106_v49  ;;  %1454 = vmatpush.msrb.mxu1 %v6196_v8 }
 0x81c   :  { %1435 = vmatpush.msrb.mxu0 %v6113_v21  ;;  %1455 = vmatpush.msrb.mxu1 %v6203_v19 }
 0x81e   :  { %1436 = vmatpush.msrb.mxu0 %v6120_v62  ;;  %1456 = vmatpush.msrb.mxu1 %v6210_v9 }
 0x820   :  { %1437 = vmatpush.msrb.mxu0 %v6127_v30  ;;  %1457 = vmatpush.msrb.mxu1 %v6217_v27 }
 0x822   :  { %1438 = vmatpush.msrb.mxu0 %v6134_v31  ;;  %1458 = vmatpush.msrb.mxu1 %v6224_v32 }
 0x824   :  { %1439 = vmatpush.msrb.mxu0 %v6230_v61  ;;  %1459 = vmatpush.msrb.mxu1 %v6236_v58 }
 0x826   :  { %1440 = vmatpush.msrb.mxu0 %v6242_v2  ;;  %1460 = vmatpush.msrb.mxu1 %v6371_v37 }
 0x887   :  { %v1337_v24 = vpop.permute.xlu0 %1336 }
 0x888   :  { %4894 = vmatmul.msk.f32.vlgmr.msrb.gmra.mxu2 %vm395_vm13, %v1337_v24  ;;  %4895 = vmatmul.msk.f32.vlgmr.msrb.gmra.mxu3 %vm395_vm13, %v1337_v24 }
 0x889   :  { %1698 = vmatpush.msrb.mxu2 %v6251_v22  ;;  %1718 = vmatpush.msrb.mxu3 %v6257_v15 }
 0x88b   :  { %1699 = vmatpush.msrb.mxu2 %v6263_v48  ;;  %1719 = vmatpush.msrb.mxu3 %v6269_v39 }
 0x88d   :  { %1700 = vmatpush.msrb.mxu2 %v6275_v1  ;;  %1720 = vmatpush.msrb.mxu3 %v6281_v7 }
 0x88f   :  { %1701 = vmatpush.msrb.mxu2 %v6287_v3  ;;  %1721 = vmatpush.msrb.mxu3 %v6386_v26 }
 0x891   :  { %1702 = vmatpush.msrb.mxu2 %v6294_v11  ;;  %1722 = vmatpush.msrb.mxu3 %v6393_v25 }
 0x893   :  { %1703 = vmatpush.msrb.mxu2 %v6301_v12  ;;  %1723 = vmatpush.msrb.mxu3 %v6400_v29 }
 0x894   :  { %v1103_v57 = vpop.f32.mrf.mxu0  ;;  %v1123_v35 = vpop.f32.mrf.mxu1 }
 0x895   :  { %v1104_v41 = vadd.f32 %v1103_v57, %v5931_v5  ;;  %1704 = vmatpush.msrb.mxu2 %v6308_v53  ;;  %1724 = vmatpush.msrb.mxu3 %v6412_v45  ;;  %v1124_v57 = vadd.f32 %v1123_v35, %v5969_v0 }
 0x897   :  { %v1126_v46 = vadd.f32 %v1104_v41, %v6405_v10  ;;  %1705 = vmatpush.msrb.mxu2 %v6315_v54  ;;  %1725 = vmatpush.msrb.mxu3 %v6420_v47 }
 0x899   :  { %v4887_v34 = vmul.f32 -1.442695, %v1126_v46  ;;  %v8332_v46 = vld [vmem:[#allocation19_spill] sm:$0xff] }
 0x89b   :  { %5073 = vpow2.f32 %v4887_v34  ;;  %v6426_v34 = vadd.f32 %v8332_v46, %v5986_v59 }
 0x8a1   :  { %v5074_v50 = vpop.eup %5073 }
 0x8a2   :  { %v1130_v13 = vadd.f32 1.0, %v5074_v50 }
 0x8a4   :  { %5075 = vrcp.f32 %v1130_v13  ;;  %v1142_v18 = vand.u32 2147483648, %v1130_v13  ;;  %v1140_v23 = vand.u32 2147483647, %v1130_v13  ;;  %vm1136_vm8 = vweird.f32 %v1130_v13 }
 0x8a6   :  { %v1143_v24 = vor.u32 1.1754944e-38, %v1142_v18  ;;  %vm1141_vm11 = vcmp.eq.f32.partialorder %v1140_v23, 8.507059e+37 }
 0x8aa   :  { %v5076_v55 = vpop.eup %5075 }
 0x8ab   :  { %v1132_v16 = vmul.f32 %v5076_v55, %v1130_v13  ;;  %vm1137_vm7 = vweird.f32 %v5076_v55 }
 0x8ac   :  { %vm1138_vm10 = vmor %vm1136_vm8, %vm1137_vm7 }
 0x8ad   :  { %v1133_v20 = vsub.f32 1.0, %v1132_v16 }
 0x8af   :  { %v1134_v4 = vmul.f32 %v5076_v55, %v1133_v20 }
 0x8b1   :  { %v1135_v42 = vadd.f32 %v5076_v55, %v1134_v4 }
 0x8b3   :  { %v1139_v40 = vsel %vm1138_vm10, %v5076_v55, %v1135_v42 }
 0x8b4   :  { %v1144_v41 = vsel %vm1141_vm11, %v1143_v24, %v1139_v40 }
 0x8b5   :  { %v1146_v50 = vmul.f32 %v1144_v41, %v1124_v57 }
 0x8b7   :  { %v1147_v16 = vadd.f32 %v1146_v50, %v6426_v34 }
 0x8b9   :  { %5077 = vtanh.f32 %v1147_v16 }
 0x8bf   :  { %v5078_v20 = vpop.eup %5077 }
 0x8c0   :  { %1151 = vrot.lane.b32.xlu0 %v5078_v20, %s5439_s8 }
 0x90b   :  { %v1357_v4 = vpop.f32.mrf.mxu2  ;;  %v1377_v57 = vpop.f32.mrf.mxu3 }
 0x90c   :  { %v1358_v13 = vadd.f32 %v1357_v4, %v5950_v28  ;;  %v1378_v16 = vadd.f32 %v1377_v57, %v5964_v63 }
 0x90e   :  { %v1381_v18 = vrot.slane %v1358_v13, 4 }
 0x910   :  { %v1383_v35 = vadd.f32 %v1381_v18, %v6327_v60  ;;  %v1404_v18 = vrot.slane %v1378_v16, 4 }
 0x912   :  { %v4896_v55 = vmul.f32 -1.442695, %v1383_v35  ;;  %v1415_v35 = vrot.slane %v6345_v56, 2 }
 0x914   :  { %5079 = vpow2.f32 %v4896_v55 }
 0x91a   :  { %v5080_v23 = vpop.eup %5079 }
 0x91b   :  { %v1387_v42 = vadd.f32 1.0, %v5080_v23 }
 0x91d   :  { %5081 = vrcp.f32 %v1387_v42  ;;  %v1399_v50 = vand.u32 2147483648, %v1387_v42  ;;  %v1397_v20 = vand.u32 2147483647, %v1387_v42  ;;  %vm1393_vm0 = vweird.f32 %v1387_v42 }
 0x91f   :  { %v1400_v4 = vor.u32 1.1754944e-38, %v1399_v50  ;;  %vm1398_vm4 = vcmp.eq.f32.partialorder %v1397_v20, 8.507059e+37 }
 0x923   :  { %v5082_v24 = vpop.eup %5081 }
 0x924   :  { %v1389_v40 = vmul.f32 %v5082_v24, %v1387_v42  ;;  %vm1394_vm15 = vweird.f32 %v5082_v24  ;;  %v8333_v42 = vrot.slane %v6339_v52, 6 }
 0x925   :  { %vm1395_vm1 = vmor %vm1393_vm0, %vm1394_vm15 }
 0x926   :  { %v1390_v46 = vsub.f32 1.0, %v1389_v40  ;;  %v1156_v50 = vmul.f32 %v1144_v41, %v8333_v42 }
 0x928   :  { %v1391_v17 = vmul.f32 %v5082_v24, %v1390_v46  ;;  %v1149_v46 = vsub.f32 1.0, %v1144_v41 }
 0x92a   :  { %v1392_v44 = vadd.f32 %v5082_v24, %v1391_v17 }
 0x92c   :  { %v1396_v13 = vsel %vm1395_vm1, %v5082_v24, %v1392_v44 }
 0x92d   :  { %v1401_v55 = vsel %vm1398_vm4, %v1400_v4, %v1396_v13 }
 0x92e   :  { %v1406_v23 = vmul.f32 %v1404_v18, %v1401_v55  ;;  %v1417_v14 = vmul.f32 %v1415_v35, %v1401_v55  ;;  %v1409_v56 = vsub.f32 1.0, %v1401_v55 }
 0x930   :  { %v1407_v40 = vadd.f32 %v1406_v23, %v6334_v43 }
 0x932   :  { %5083 = vtanh.f32 %v1407_v40  ;;  %v1152_v57 = vpop.permute.xlu0 %1151 }
 0x933   :  { %v1154_v17 = vmul.f32 %v1152_v57, %v1149_v46 }
 0x935   :  { %v6438_v44 = vadd.f32 %v1156_v50, %v1154_v17 }
 0x938   :  { %v5084_v59 = vpop.eup %5083 }
 0x939   :  { %1411 = vrot.lane.b32.xlu2 %v5084_v59, %s5439_s8 }
 0x941   :  { %1159 = vrot.lane.b32.xlu2 %v6438_v44, %s5439_s8 }
 0x993   :  { %v1412_v24 = vpop.permute.xlu2 %1411 }
 0x994   :  { %v1414_v16 = vmul.f32 %v1412_v24, %v1409_v56 }
 0x996   :  { %v6442_v20 = vadd.f32 %v1417_v14, %v1414_v16 }
 0x998   :  { %v1510_v4 = vrot.slane %v6442_v20, 4  ;;  %1419 = vst.msk [vmem:[#allocation2 + $0x10] sm:$0x30] %vm732_vm2, %v6442_v20 }
 0x99a   :  { %1511 = vrot.lane.b32.xlu1 %v1510_v4, %s5439_s8 }
 0x99b   :  { %v1160_v59 = vpop.permute.xlu2 %1159 }
 0x99c   :  { %1162 = vst.msk [vmem:[#allocation2 + $0x8] sm:$0x3] %vm474_vm3, %v1160_v59  ;;  %4891 = vmatmul.msk.f32.vlgmr.msra.gmra.mxu0 %vm395_vm13, %v1160_v59  ;;  %4892 = vmatmul.msk.f32.vlgmr.msra.gmra.mxu1 %vm395_vm13, %v1160_v59 }
 0x99d   :  { %1608 = vmatpush.msra.mxu0 %v6099_v38  ;;  %1628 = vmatpush.msra.mxu1 %v6189_v36 }
 0x99f   :  { %1609 = vmatpush.msra.mxu0 %v6106_v49  ;;  %1629 = vmatpush.msra.mxu1 %v6196_v8 }
 0x9a1   :  { %1610 = vmatpush.msra.mxu0 %v6113_v21  ;;  %1630 = vmatpush.msra.mxu1 %v6203_v19 }
 0x9a3   :  { %1611 = vmatpush.msra.mxu0 %v6120_v62  ;;  %1631 = vmatpush.msra.mxu1 %v6210_v9 }
 0x9a5   :  { %1612 = vmatpush.msra.mxu0 %v6127_v30  ;;  %1632 = vmatpush.msra.mxu1 %v6217_v27 }
 0x9a7   :  { %1613 = vmatpush.msra.mxu0 %v6134_v31  ;;  %1633 = vmatpush.msra.mxu1 %v6224_v32 }
 0x9a9   :  { %1614 = vmatpush.msra.mxu0 %v6230_v61  ;;  %1634 = vmatpush.msra.mxu1 %v6236_v58 }
 0x9ab   :  { %1615 = vmatpush.msra.mxu0 %v6242_v2  ;;  %1635 = vmatpush.msra.mxu1 %v6371_v37 }
 0xa0c   :  { %v1512_v14 = vpop.permute.xlu1 %1511 }
 0xa0d   :  { %4900 = vmatmul.msk.f32.vlgmr.msra.gmra.mxu2 %vm395_vm13, %v1512_v14  ;;  %4901 = vmatmul.msk.f32.vlgmr.msra.gmra.mxu3 %vm395_vm13, %v1512_v14  ;;  %v1325_v14 = vrot.slane %v6438_v44, 6 }
 0xa0e   :  { %1858 = vmatpush.msra.mxu2 %v6251_v22  ;;  %1878 = vmatpush.msra.mxu3 %v6257_v15 }
 0xa10   :  { %1859 = vmatpush.msra.mxu2 %v6263_v48  ;;  %1879 = vmatpush.msra.mxu3 %v6269_v39 }
 0xa12   :  { %1860 = vmatpush.msra.mxu2 %v6275_v1  ;;  %1880 = vmatpush.msra.mxu3 %v6281_v7 }
 0xa14   :  { %1861 = vmatpush.msra.mxu2 %v6287_v3  ;;  %1881 = vmatpush.msra.mxu3 %v6386_v26 }
 0xa16   :  { %1862 = vmatpush.msra.mxu2 %v6294_v11  ;;  %1882 = vmatpush.msra.mxu3 %v6393_v25 }
 0xa18   :  { %1863 = vmatpush.msra.mxu2 %v6301_v12  ;;  %1883 = vmatpush.msra.mxu3 %v6400_v29 }
 0xa19   :  { %v1267_v41 = vpop.f32.mrf.mxu0  ;;  %v1287_v17 = vpop.f32.mrf.mxu1 }
 0xa1a   :  { %v1268_v13 = vadd.f32 %v1267_v41, %v5931_v5  ;;  %1864 = vmatpush.msra.mxu2 %v6308_v53  ;;  %1884 = vmatpush.msra.mxu3 %v6412_v45  ;;  %v1288_v56 = vadd.f32 %v1287_v17, %v5969_v0 }
 0xa1c   :  { %v1291_v18 = vrot.slane %v1268_v13, 6  ;;  %1865 = vmatpush.msra.mxu2 %v6315_v54  ;;  %1885 = vmatpush.msra.mxu3 %v6420_v47  ;;  %v1314_v13 = vrot.slane %v1288_v56, 6 }
 0xa1e   :  { %v1293_v35 = vadd.f32 %v1291_v18, %v6405_v10 }
 0xa20   :  { %v4893_v55 = vmul.f32 -1.442695, %v1293_v35 }
 0xa22   :  { %5085 = vpow2.f32 %v4893_v55 }
 0xa28   :  { %v5086_v23 = vpop.eup %5085 }
 0xa29   :  { %v1297_v40 = vadd.f32 1.0, %v5086_v23 }
 0xa2b   :  { %5087 = vrcp.f32 %v1297_v40  ;;  %v1309_v50 = vand.u32 2147483648, %v1297_v40  ;;  %v1307_v16 = vand.u32 2147483647, %v1297_v40  ;;  %vm1303_vm6 = vweird.f32 %v1297_v40 }
 0xa2d   :  { %v1310_v59 = vor.u32 1.1754944e-38, %v1309_v50  ;;  %vm1308_vm8 = vcmp.eq.f32.partialorder %v1307_v16, 8.507059e+37 }
 0xa31   :  { %v5088_v57 = vpop.eup %5087 }
 0xa32   :  { %v1299_v46 = vmul.f32 %v5088_v57, %v1297_v40  ;;  %vm1304_vm5 = vweird.f32 %v5088_v57 }
 0xa33   :  { %vm1305_vm7 = vmor %vm1303_vm6, %vm1304_vm5 }
 0xa34   :  { %v1300_v42 = vsub.f32 1.0, %v1299_v46 }
 0xa36   :  { %v1301_v24 = vmul.f32 %v5088_v57, %v1300_v42 }
 0xa38   :  { %v1302_v4 = vadd.f32 %v5088_v57, %v1301_v24 }
 0xa3a   :  { %v1306_v41 = vsel %vm1305_vm7, %v5088_v57, %v1302_v4 }
 0xa3b   :  { %v1311_v18 = vsel %vm1308_vm8, %v1310_v59, %v1306_v41 }
 0xa3c   :  { %v1316_v35 = vmul.f32 %v1314_v13, %v1311_v18  ;;  %v1327_v55 = vmul.f32 %v1325_v14, %v1311_v18  ;;  %v1319_v52 = vsub.f32 1.0, %v1311_v18 }
 0xa3e   :  { %v1317_v23 = vadd.f32 %v1316_v35, %v6426_v34 }
 0xa40   :  { %5089 = vtanh.f32 %v1317_v23 }
 0xa46   :  { %v5090_v46 = vpop.eup %5089 }
 0xa47   :  { %1321 = vrot.lane.b32.xlu1 %v5090_v46, %s5439_s8 }
 0xa90   :  { %v1532_v17 = vpop.f32.mrf.mxu2  ;;  %v1552_v4 = vpop.f32.mrf.mxu3 }
 0xa91   :  { %v1533_v42 = vadd.f32 %v1532_v17, %v5950_v28  ;;  %v1553_v41 = vadd.f32 %v1552_v4, %v5964_v63 }
 0xa93   :  { %v1556_v40 = vrot.slane %v1533_v42, 6  ;;  %v1579_v42 = vrot.slane %v1553_v41, 6 }
 0xa95   :  { %v1558_v50 = vadd.f32 %v1556_v40, %v6327_v60  ;;  %v1590_v40 = vrot.slane %v6442_v20, 2 }
 0xa97   :  { %v4902_v24 = vmul.f32 -1.442695, %v1558_v50 }
 0xa99   :  { %5091 = vpow2.f32 %v4902_v24 }
 0xa9f   :  { %v5092_v44 = vpop.eup %5091 }
 0xaa0   :  { %v1562_v57 = vadd.f32 1.0, %v5092_v44 }
 0xaa2   :  { %5093 = vrcp.f32 %v1562_v57  ;;  %v1574_v14 = vand.u32 2147483648, %v1562_v57  ;;  %v1572_v35 = vand.u32 2147483647, %v1562_v57  ;;  %vm1568_vm11 = vweird.f32 %v1562_v57 }
 0xaa4   :  { %v1575_v46 = vor.u32 1.1754944e-38, %v1574_v14  ;;  %vm1573_vm0 = vcmp.eq.f32.partialorder %v1572_v35, 8.507059e+37 }
 0xaa8   :  { %v5094_v56 = vpop.eup %5093 }
 0xaa9   :  { %v1564_v16 = vmul.f32 %v5094_v56, %v1562_v57  ;;  %vm1569_vm10 = vweird.f32 %v5094_v56 }
 0xaaa   :  { %vm1570_vm15 = vmor %vm1568_vm11, %vm1569_vm10 }
 0xaab   :  { %v1565_v59 = vsub.f32 1.0, %v1564_v16 }
 0xaad   :  { %v1566_v13 = vmul.f32 %v5094_v56, %v1565_v59 }
 0xaaf   :  { %v1567_v23 = vadd.f32 %v5094_v56, %v1566_v13 }
 0xab1   :  { %v1571_v17 = vsel %vm1570_vm15, %v5094_v56, %v1567_v23 }
 0xab2   :  { %v1576_v50 = vsel %vm1573_vm0, %v1575_v46, %v1571_v17 }
 0xab3   :  { %v1581_v24 = vmul.f32 %v1579_v42, %v1576_v50  ;;  %v1592_v44 = vmul.f32 %v1590_v40, %v1576_v50  ;;  %v1584_v56 = vsub.f32 1.0, %v1576_v50 }
 0xab5   :  { %v1582_v16 = vadd.f32 %v1581_v24, %v6334_v43 }
 0xab7   :  { %5095 = vtanh.f32 %v1582_v16 }
 0xab9   :  { %v1322_v4 = vpop.permute.xlu1 %1321 }
 0xaba   :  { %v1324_v59 = vmul.f32 %v1322_v4, %v1319_v52 }
 0xabc   :  { %v6496_v33 = vadd.f32 %v1327_v55, %v1324_v59 }
 0xabd   :  { %v5096_v13 = vpop.eup %5095 }
 0xabe   :  { %8334 = vst [vmem:[#allocation14_spill] sm:$0xff] %v6496_v33  ;;  %1586 = vrot.lane.b32.xlu0 %v5096_v13, %s5439_s8  ;;  %v1420_v57 = vrot.slane %v6496_v33, 2 }
 0xac6   :  { %1421 = vrot.lane.b32.xlu0 %v1420_v57, %s5439_s8 }
 0xb30   :  { %v1587_v20 = vpop.permute.xlu0 %1586 }
 0xb31   :  { %v1589_v14 = vmul.f32 %v1587_v20, %v1584_v56 }
 0xb33   :  { %v6501_v41 = vadd.f32 %v1592_v44, %v1589_v14 }
 0xb35   :  { %v1685_v35 = vrot.slane %v6501_v41, 2  ;;  %1594 = vst.msk [vmem:[#allocation2 + $0x10] sm:$0xc] %vm909_vm14, %v6501_v41  ;;  %v6580_v41 = vld [vmem:[%s8304_s28 + $0x60] sm:$0xff] }
 0xb37   :  { %1686 = vrot.lane.b32.xlu2 %v1685_v35, %s5439_s8 }
 0xb38   :  { %v1422_v52 = vpop.permute.xlu0 %1421 }
 0xb39   :  { %4897 = vmatmul.msk.f32.vlgmr.msrb.gmra.mxu0 %vm395_vm13, %v1422_v52  ;;  %4898 = vmatmul.msk.f32.vlgmr.msrb.gmra.mxu1 %vm395_vm13, %v1422_v52 }
 0xb3a   :  { %1776 = vmatpush.msrb.mxu0 %v6099_v38  ;;  %1796 = vmatpush.msrb.mxu1 %v6189_v36 }
 0xb3c   :  { %1777 = vmatpush.msrb.mxu0 %v6106_v49  ;;  %1797 = vmatpush.msrb.mxu1 %v6196_v8 }
 0xb3e   :  { %1778 = vmatpush.msrb.mxu0 %v6113_v21  ;;  %1798 = vmatpush.msrb.mxu1 %v6203_v19 }
 0xb40   :  { %1779 = vmatpush.msrb.mxu0 %v6120_v62  ;;  %1799 = vmatpush.msrb.mxu1 %v6210_v9 }
 0xb42   :  { %1780 = vmatpush.msrb.mxu0 %v6127_v30  ;;  %1800 = vmatpush.msrb.mxu1 %v6217_v27 }
 0xb44   :  { %1781 = vmatpush.msrb.mxu0 %v6134_v31  ;;  %1801 = vmatpush.msrb.mxu1 %v6224_v32 }
 0xb46   :  { %1782 = vmatpush.msrb.mxu0 %v6230_v61  ;;  %1802 = vmatpush.msrb.mxu1 %v6236_v58 }
 0xb48   :  { %1783 = vmatpush.msrb.mxu0 %v6242_v2  ;;  %1803 = vmatpush.msrb.mxu1 %v6371_v37 }
 0xb91   :  { %v1687_v38 = vpop.permute.xlu2 %1686 }
 0xb92   :  { %4906 = vmatmul.msk.f32.vlgmr.msrb.gmra.mxu2 %vm395_vm13, %v1687_v38  ;;  %4907 = vmatmul.msk.f32.vlgmr.msrb.gmra.mxu3 %vm395_vm13, %v1687_v38 }
 0xb93   :  { %2030 = vmatpush.msrb.mxu2 %v6251_v22  ;;  %2050 = vmatpush.msrb.mxu3 %v6257_v15 }
 0xb95   :  { %2031 = vmatpush.msrb.mxu2 %v6263_v48  ;;  %2051 = vmatpush.msrb.mxu3 %v6269_v39 }
 0xb97   :  { %2032 = vmatpush.msrb.mxu2 %v6275_v1  ;;  %2052 = vmatpush.msrb.mxu3 %v6281_v7 }
 0xb99   :  { %2033 = vmatpush.msrb.mxu2 %v6287_v3  ;;  %2053 = vmatpush.msrb.mxu3 %v6386_v26 }
 0xb9b   :  { %2034 = vmatpush.msrb.mxu2 %v6294_v11  ;;  %2054 = vmatpush.msrb.mxu3 %v6393_v25 }
 0xb9d   :  { %2035 = vmatpush.msrb.mxu2 %v6301_v12  ;;  %2055 = vmatpush.msrb.mxu3 %v6400_v29 }
 0xb9f   :  { %2036 = vmatpush.msrb.mxu2 %v6308_v53  ;;  %2056 = vmatpush.msrb.mxu3 %v6412_v45 }
 0xba1   :  { %2037 = vmatpush.msrb.mxu2 %v6315_v54  ;;  %2057 = vmatpush.msrb.mxu3 %v6420_v47 }
 0xbb6   :  { %v1442_v49 = vpop.f32.mrf.mxu0  ;;  %v1462_v17 = vpop.f32.mrf.mxu1 }
 0xbb7   :  { %v1443_v21 = vadd.f32 %v1442_v49, %v5931_v5  ;;  %v1463_v50 = vadd.f32 %v1462_v17, %v5969_v0 }
 0xbb9   :  { %v1466_v62 = vrot.slane %v1443_v21, 4  ;;  %v1489_v13 = vrot.slane %v1463_v50, 4 }
 0xbbb   :  { %v1468_v30 = vadd.f32 %v1466_v62, %v6405_v10 }
 0xbbd   :  { %v4899_v31 = vmul.f32 -1.442695, %v1468_v30 }
 0xbbf   :  { %5097 = vpow2.f32 %v4899_v31 }
 0xbc5   :  { %v5098_v18 = vpop.eup %5097 }
 0xbc6   :  { %v1472_v55 = vadd.f32 1.0, %v5098_v18 }
 0xbc8   :  { %5099 = vrcp.f32 %v1472_v55  ;;  %v1484_v40 = vand.u32 2147483648, %v1472_v55  ;;  %v1482_v44 = vand.u32 2147483647, %v1472_v55  ;;  %vm1478_vm4 = vweird.f32 %v1472_v55 }
 0xbca   :  { %v1485_v4 = vor.u32 1.1754944e-38, %v1484_v40  ;;  %vm1483_vm6 = vcmp.eq.f32.partialorder %v1482_v44, 8.507059e+37 }
 0xbce   :  { %v5100_v23 = vpop.eup %5099 }
 0xbcf   :  { %v1474_v46 = vmul.f32 %v5100_v23, %v1472_v55  ;;  %vm1479_vm1 = vweird.f32 %v5100_v23 }
 0xbd0   :  { %vm1480_vm5 = vmor %vm1478_vm4, %vm1479_vm1 }
 0xbd1   :  { %v1475_v42 = vsub.f32 1.0, %v1474_v46 }
 0xbd3   :  { %v1476_v24 = vmul.f32 %v5100_v23, %v1475_v42 }
 0xbd5   :  { %v1477_v16 = vadd.f32 %v5100_v23, %v1476_v24 }
 0xbd7   :  { %v1481_v59 = vsel %vm1480_vm5, %v5100_v23, %v1477_v16 }
 0xbd8   :  { %v1486_v57 = vsel %vm1483_vm6, %v1485_v4, %v1481_v59 }
 0xbd9   :  { %v1491_v56 = vmul.f32 %v1489_v13, %v1486_v57  ;;  %v1494_v59 = vsub.f32 1.0, %v1486_v57 }
 0xbdb   :  { %v1492_v20 = vadd.f32 %v1491_v56, %v6426_v34  ;;  %v1500_v56 = vrot.slane %v6496_v33, 6 }
 0xbdd   :  { %5101 = vtanh.f32 %v1492_v20 }
 0xbe3   :  { %v5102_v14 = vpop.eup %5101 }
 0xbe4   :  { %1496 = vrot.lane.b32.xlu2 %v5102_v14, %s5439_s8 }
 0xc15   :  { %v1707_v52 = vpop.f32.mrf.mxu2  ;;  %v1727_v42 = vpop.f32.mrf.mxu3 }
 0xc16   :  { %v1708_v38 = vadd.f32 %v1707_v52, %v5950_v28  ;;  %v1728_v24 = vadd.f32 %v1727_v42, %v5964_v63  ;;  %v1502_v52 = vmul.f32 %v1500_v56, %v1486_v57 }
 0xc18   :  { %v1730_v49 = vadd.f32 %v1708_v38, %v6327_v60 }
 0xc1a   :  { %v4908_v21 = vmul.f32 -1.442695, %v1730_v49 }
 0xc1c   :  { %5103 = vpow2.f32 %v4908_v21 }
 0xc22   :  { %v5104_v62 = vpop.eup %5103 }
 0xc23   :  { %v1734_v30 = vadd.f32 1.0, %v5104_v62 }
 0xc25   :  { %5105 = vrcp.f32 %v1734_v30  ;;  %v1746_v23 = vand.u32 2147483648, %v1734_v30  ;;  %v1744_v17 = vand.u32 2147483647, %v1734_v30  ;;  %vm1740_vm8 = vweird.f32 %v1734_v30 }
 0xc27   :  { %v1747_v50 = vor.u32 1.1754944e-38, %v1746_v23  ;;  %vm1745_vm11 = vcmp.eq.f32.partialorder %v1744_v17, 8.507059e+37 }
 0xc2b   :  { %v5106_v31 = vpop.eup %5105 }
 0xc2c   :  { %v1736_v18 = vmul.f32 %v5106_v31, %v1734_v30  ;;  %vm1741_vm7 = vweird.f32 %v5106_v31 }
 0xc2d   :  { %vm1742_vm10 = vmor %vm1740_vm8, %vm1741_vm7 }
 0xc2e   :  { %v1737_v55 = vsub.f32 1.0, %v1736_v18  ;;  %v6573_v18 = vld [vmem:[%s8304_s28 + $0x70] sm:$0xff] }
 0xc30   :  { %v1738_v46 = vmul.f32 %v5106_v31, %v1737_v55 }
 0xc32   :  { %v1739_v40 = vadd.f32 %v5106_v31, %v1738_v46 }
 0xc34   :  { %v1743_v60 = vsel %vm1742_vm10, %v5106_v31, %v1739_v40 }
 0xc35   :  { %v1748_v44 = vsel %vm1745_vm11, %v1747_v50, %v1743_v60  ;;  %v8336_v60 = vld [vmem:[#allocation12_spill] sm:$0xff] }
 0xc36   :  { %v1750_v16 = vmul.f32 %v1748_v44, %v1728_v24  ;;  %v1753_v21 = vsub.f32 1.0, %v1748_v44 }
 0xc38   :  { %v1751_v4 = vadd.f32 %v1750_v16, %v6334_v43  ;;  %v1760_v43 = vmul.f32 %v1748_v44, %v1685_v35  ;;  %v6587_v35 = vld [vmem:[%s8304_s28 + $0x50] sm:$0xff]  ;;  %v6642_v44 = vadd.f32 %v8336_v60, %v8326_v51  ;;  %v6698_v60 = vld [vmem:[%s8304_s28 + $0x38] sm:$0xff] }
 0xc3a   :  { %5107 = vtanh.f32 %v1751_v4 }
 0xc3e   :  { %v1497_v13 = vpop.permute.xlu2 %1496 }
 0xc3f   :  { %v1499_v20 = vmul.f32 %v1497_v13, %v1494_v59 }
 0xc40   :  { %v5108_v14 = vpop.eup %5107 }
 0xc41   :  { %1755 = vrot.lane.b32.xlu1 %v5108_v14, %s5439_s8  ;;  %v6556_v38 = vadd.f32 %v1502_v52, %v1499_v20 }
 0xc43   :  { %8335 = vst [vmem:[#allocation18_spill] sm:$0xff] %v6556_v38  ;;  %v1595_v49 = vrot.slane %v6556_v38, 4 }
 0xc49   :  { %1596 = vrot.lane.b32.xlu1 %v1595_v49, %s5439_s8 }
 0xcb3   :  { %v1756_v62 = vpop.permute.xlu1 %1755 }
 0xcb4   :  { %v1758_v30 = vmul.f32 %v1756_v62, %v1753_v21 }
 0xcb6   :  { %v6562_v31 = vadd.f32 %v1760_v43, %v1758_v30 }
 0xcb8   :  { %1846 = vrot.lane.b32.xlu0 %v6562_v31, %s5439_s8  ;;  %1762 = vst.msk [vmem:[#allocation2 + $0x10] sm:$0x3] %vm1079_vm9, %v6562_v31 }
 0xcbb   :  { %v1597_v57 = vpop.permute.xlu1 %1596 }
 0xcbc   :  { %4903 = vmatmul.msk.f32.vlgmr.msra.gmra.mxu0 %vm395_vm13, %v1597_v57  ;;  %4904 = vmatmul.msk.f32.vlgmr.msra.gmra.mxu1 %vm395_vm13, %v1597_v57 }
 0xcbd   :  { %1940 = vmatpush.msra.mxu0 %v6573_v18  ;;  %1960 = vmatpush.msra.mxu1 %v6189_v36  ;;  %v6594_v36 = vld [vmem:[%s8304_s28 + $0x40] sm:$0xff] }
 0xcbf   :  { %1941 = vmatpush.msra.mxu0 %v6580_v41  ;;  %1961 = vmatpush.msra.mxu1 %v6196_v8  ;;  %v6601_v8 = vld [vmem:[%s8304_s28 + $0x30] sm:$0xff] }
 0xcc1   :  { %1942 = vmatpush.msra.mxu0 %v6587_v35  ;;  %1962 = vmatpush.msra.mxu1 %v6203_v19  ;;  %v6608_v19 = vld [vmem:[%s8304_s28 + $0x20] sm:$0xff] }
 0xcc3   :  { %1943 = vmatpush.msra.mxu0 %v6594_v36  ;;  %1963 = vmatpush.msra.mxu1 %v6210_v9 }
 0xcc5   :  { %1944 = vmatpush.msra.mxu0 %v6601_v8  ;;  %1964 = vmatpush.msra.mxu1 %v6217_v27 }
 0xcc7   :  { %1945 = vmatpush.msra.mxu0 %v6608_v19  ;;  %1965 = vmatpush.msra.mxu1 %v6224_v32 }
 0xcc9   :  { %1946 = vmatpush.msra.mxu0 %v6230_v61  ;;  %1966 = vmatpush.msra.mxu1 %v6236_v58 }
 0xccb   :  { %1947 = vmatpush.msra.mxu0 %v6242_v2  ;;  %1967 = vmatpush.msra.mxu1 %v6371_v37 }
 0xd2a   :  { %v1847_v9 = vpop.permute.xlu0 %1846 }
 0xd2b   :  { %4912 = vmatmul.msk.f32.vlgmr.msra.gmra.mxu2 %vm395_vm13, %v1847_v9  ;;  %4913 = vmatmul.msk.f32.vlgmr.msra.gmra.mxu3 %vm395_vm13, %v1847_v9 }
 0xd2c   :  { %2205 = vmatpush.msra.mxu2 %v6251_v22  ;;  %2225 = vmatpush.msra.mxu3 %v6257_v15 }
 0xd2e   :  { %2206 = vmatpush.msra.mxu2 %v6263_v48  ;;  %2226 = vmatpush.msra.mxu3 %v6269_v39 }
 0xd30   :  { %2207 = vmatpush.msra.mxu2 %v6275_v1  ;;  %2227 = vmatpush.msra.mxu3 %v6281_v7 }
 0xd32   :  { %2208 = vmatpush.msra.mxu2 %v6287_v3  ;;  %2228 = vmatpush.msra.mxu3 %v6386_v26 }
 0xd34   :  { %2209 = vmatpush.msra.mxu2 %v6294_v11  ;;  %2229 = vmatpush.msra.mxu3 %v6393_v25 }
 0xd36   :  { %2210 = vmatpush.msra.mxu2 %v6301_v12  ;;  %2230 = vmatpush.msra.mxu3 %v6400_v29 }
 0xd38   :  { %2211 = vmatpush.msra.mxu2 %v6308_v53  ;;  %2231 = vmatpush.msra.mxu3 %v6412_v45 }
 0xd39   :  { %v1617_v27 = vpop.f32.mrf.mxu0  ;;  %v1637_v1 = vpop.f32.mrf.mxu1 }
 0xd3a   :  { %v1618_v32 = vadd.f32 %v1617_v27, %v5931_v5  ;;  %2212 = vmatpush.msra.mxu2 %v6315_v54  ;;  %2232 = vmatpush.msra.mxu3 %v6420_v47  ;;  %v1638_v11 = vadd.f32 %v1637_v1, %v5969_v0 }
 0xd3c   :  { %v1641_v61 = vrot.slane %v1618_v32, 2  ;;  %v1664_v23 = vrot.slane %v1638_v11, 2  ;;  %v1925_v32 = vrot.slane %v6562_v31, 2 }
 0xd3e   :  { %v1643_v58 = vadd.f32 %v1641_v61, %v6405_v10 }
 0xd40   :  { %v4905_v2 = vmul.f32 -1.442695, %v1643_v58  ;;  %v8337_v58 = vld [vmem:[#allocation16_spill] sm:$0xff] }
 0xd42   :  { %5109 = vpow2.f32 %v4905_v2  ;;  %v6649_v2 = vadd.f32 %v8337_v58, %v5975_v6 }
 0xd48   :  { %v5110_v22 = vpop.eup %5109 }
 0xd49   :  { %v1647_v15 = vadd.f32 1.0, %v5110_v22 }
 0xd4b   :  { %5111 = vrcp.f32 %v1647_v15  ;;  %v1659_v3 = vand.u32 2147483648, %v1647_v15  ;;  %v1657_v53 = vand.u32 2147483647, %v1647_v15  ;;  %vm1653_vm0 = vweird.f32 %v1647_v15 }
 0xd4d   :  { %v1660_v55 = vor.u32 1.1754944e-38, %v1659_v3  ;;  %vm1658_vm4 = vcmp.eq.f32.partialorder %v1657_v53, 8.507059e+37 }
 0xd51   :  { %v5112_v48 = vpop.eup %5111 }
 0xd52   :  { %v1649_v39 = vmul.f32 %v5112_v48, %v1647_v15  ;;  %vm1654_vm15 = vweird.f32 %v5112_v48 }
 0xd53   :  { %vm1655_vm1 = vmor %vm1653_vm0, %vm1654_vm15 }
 0xd54   :  { %v1650_v7 = vsub.f32 1.0, %v1649_v39 }
 0xd56   :  { %v1651_v12 = vmul.f32 %v5112_v48, %v1650_v7  ;;  %v1675_v7 = vrot.slane %v6556_v38, 6 }
 0xd58   :  { %v1652_v54 = vadd.f32 %v5112_v48, %v1651_v12 }
 0xd5a   :  { %v1656_v10 = vsel %vm1655_vm1, %v5112_v48, %v1652_v54 }
 0xd5b   :  { %v1661_v46 = vsel %vm1658_vm4, %v1660_v55, %v1656_v10 }
 0xd5c   :  { %v1666_v17 = vmul.f32 %v1664_v23, %v1661_v46  ;;  %v1669_v39 = vsub.f32 1.0, %v1661_v46  ;;  %v1677_v12 = vmul.f32 %v1675_v7, %v1661_v46 }
 0xd5e   :  { %v1667_v42 = vadd.f32 %v1666_v17, %v6426_v34 }
 0xd60   :  { %5113 = vtanh.f32 %v1667_v42  ;;  %v6670_v42 = vld [vmem:[%s8304_s28 + $0x78] sm:$0xff] }
 0xd66   :  { %v5114_v40 = vpop.eup %5113 }
 0xd67   :  { %1671 = vrot.lane.b32.xlu0 %v5114_v40, %s5439_s8  ;;  %v6677_v40 = vld [vmem:[%s8304_s28 + $0x68] sm:$0xff] }
 0xdae   :  { %v1867_v50 = vpop.f32.mrf.mxu2  ;;  %v1887_v14 = vpop.f32.mrf.mxu3 }
 0xdaf   :  { %v1868_v24 = vadd.f32 %v1867_v50, %v5950_v28  ;;  %v1888_v21 = vadd.f32 %v1887_v14, %v5964_v63  ;;  %v6684_v50 = vld [vmem:[%s8304_s28 + $0x58] sm:$0xff]  ;;  %v6750_v14 = vld [vmem:[%s8261_s7 + $0x68] sm:$0xff] }
 0xdb1   :  { %v1891_v16 = vrot.slane %v1868_v24, 2  ;;  %v1914_v27 = vrot.slane %v1888_v21, 2  ;;  %v6691_v24 = vld [vmem:[%s8304_s28 + $0x48] sm:$0xff]  ;;  %v6768_v21 = vld [vmem:[%s8261_s7 + $0x40] sm:$0xff] }
 0xdb3   :  { %v1893_v4 = vadd.f32 %v1891_v16, %v6642_v44  ;;  %v6705_v16 = vld [vmem:[%s8304_s28 + $0x28] sm:$0xff] }
 0xdb5   :  { %v4914_v59 = vmul.f32 -1.442695, %v1893_v4  ;;  %v6711_v4 = vld [vmem:[%s8304_s28 + $0x10] sm:$0xff] }
 0xdb7   :  { %5115 = vpow2.f32 %v4914_v59  ;;  %v6717_v59 = vld [vmem:[%s8304_s28 + $0x18] sm:$0xff] }
 0xdbd   :  { %v5116_v13 = vpop.eup %5115 }
 0xdbe   :  { %v1897_v56 = vadd.f32 1.0, %v5116_v13  ;;  %v6723_v13 = vld [vmem:[%s8304_s28] sm:$0xff] }
 0xdc0   :  { %5117 = vrcp.f32 %v1897_v56  ;;  %v1909_v49 = vand.u32 2147483648, %v1897_v56  ;;  %v1907_v43 = vand.u32 2147483647, %v1897_v56  ;;  %vm1903_vm6 = vweird.f32 %v1897_v56 }
 0xdc2   :  { %v1910_v57 = vor.u32 1.1754944e-38, %v1909_v49  ;;  %vm1908_vm8 = vcmp.eq.f32.partialorder %v1907_v43, 8.507059e+37  ;;  %v6762_v49 = vld [vmem:[%s8261_s7 + $0x58] sm:$0xff]  ;;  %v6782_v43 = vld [vmem:[%s8261_s7 + $0x20] sm:$0xff] }
 0xdc6   :  { %v5118_v34 = vpop.eup %5117 }
 0xdc7   :  { %v1899_v20 = vmul.f32 %v5118_v34, %v1897_v56  ;;  %vm1904_vm5 = vweird.f32 %v5118_v34 }
 0xdc8   :  { %vm1905_vm7 = vmor %vm1903_vm6, %vm1904_vm5 }
 0xdc9   :  { %v1900_v52 = vsub.f32 1.0, %v1899_v20  ;;  %v6738_v20 = vld [vmem:[%s8261_s7 + $0x78] sm:$0xff] }
 0xdcb   :  { %v1901_v62 = vmul.f32 %v5118_v34, %v1900_v52  ;;  %v6756_v52 = vld [vmem:[%s8261_s7 + $0x50] sm:$0xff] }
 0xdcd   :  { %v1902_v30 = vadd.f32 %v5118_v34, %v1901_v62  ;;  %v6775_v62 = vld [vmem:[%s8261_s7 + $0x30] sm:$0xff] }
 0xdcf   :  { %v1906_v9 = vsel %vm1905_vm7, %v5118_v34, %v1902_v30  ;;  %v6732_v34 = vld [vmem:[%s8261_s7 + $0x70] sm:$0xff] }
 0xdd0   :  { %v1911_v61 = vsel %vm1908_vm8, %v1910_v57, %v1906_v9  ;;  %v8341_v57 = vld [vmem:[#allocation6_spill] sm:$0xff] }
 0xdd1   :  { %v1916_v22 = vmul.f32 %v1914_v27, %v1911_v61  ;;  %v1927_v15 = vmul.f32 %v1925_v32, %v1911_v61  ;;  %v1919_v54 = vsub.f32 1.0, %v1911_v61 }
 0xdd3   :  { %v1917_v48 = vadd.f32 %v1916_v22, %v6649_v2 }
 0xdd5   :  { %5119 = vtanh.f32 %v1917_v48 }
 0xdd9   :  { %v1672_v1 = vpop.permute.xlu0 %1671 }
 0xdda   :  { %v1674_v3 = vmul.f32 %v1672_v1, %v1669_v39 }
 0xddb   :  { %v5120_v11 = vpop.eup %5119 }
 0xddc   :  { %1921 = vrot.lane.b32.xlu2 %v5120_v11, %s5439_s8  ;;  %v6654_v31 = vadd.f32 %v1677_v12, %v1674_v3 }
 0xdde   :  { %8338 = vst [vmem:[#allocation10_spill] sm:$0xff] %v6654_v31  ;;  %v1763_v53 = vrot.slane %v6654_v31, 6 }
 0xde4   :  { %1764 = vrot.lane.b32.xlu2 %v1763_v53, %s5439_s8 }
 0xe36   :  { %v1922_v55 = vpop.permute.xlu2 %1921 }
 0xe37   :  { %v1924_v10 = vmul.f32 %v1922_v55, %v1919_v54 }
 0xe39   :  { %v6660_v23 = vadd.f32 %v1927_v15, %v1924_v10  ;;  %v8342_v10 = vld [vmem:[#allocation20_spill] sm:$0xff] }
 0xe3b   :  { %8339 = vst [vmem:[#allocation19_spill] sm:$0xff] %v6660_v23  ;;  %v2017_v17 = vrot.slane %v6660_v23, 6 }
 0xe3d   :  { %2018 = vrot.lane.b32.xlu1 %v2017_v17, %s5439_s8  ;;  %v8343_v17 = vld [vmem:[#allocation8_spill] sm:$0xff] }
 0xe3e   :  { %v1765_v46 = vpop.permute.xlu2 %1764 }
 0xe3f   :  { %4909 = vmatmul.msk.f32.vlgmr.msrb.gmra.mxu0 %vm395_vm13, %v1765_v46  ;;  %4910 = vmatmul.msk.f32.vlgmr.msrb.gmra.mxu1 %vm395_vm13, %v1765_v46  ;;  %v6809_v46 = vadd.f32 %v8343_v17, %v8342_v10 }
 0xe40   :  { %2115 = vmatpush.msrb.mxu0 %v6573_v18  ;;  %2135 = vmatpush.msrb.mxu1 %v6670_v42 }
 0xe42   :  { %2116 = vmatpush.msrb.mxu0 %v6580_v41  ;;  %2136 = vmatpush.msrb.mxu1 %v6677_v40 }
 0xe44   :  { %2117 = vmatpush.msrb.mxu0 %v6587_v35  ;;  %2137 = vmatpush.msrb.mxu1 %v6684_v50 }
 0xe46   :  { %2118 = vmatpush.msrb.mxu0 %v6594_v36  ;;  %2138 = vmatpush.msrb.mxu1 %v6691_v24 }
 0xe48   :  { %2119 = vmatpush.msrb.mxu0 %v6601_v8  ;;  %2139 = vmatpush.msrb.mxu1 %v6698_v60 }
 0xe4a   :  { %2120 = vmatpush.msrb.mxu0 %v6608_v19  ;;  %2140 = vmatpush.msrb.mxu1 %v6705_v16 }
 0xe4c   :  { %2121 = vmatpush.msrb.mxu0 %v6711_v4  ;;  %2141 = vmatpush.msrb.mxu1 %v6717_v59 }
 0xe4e   :  { %2122 = vmatpush.msrb.mxu0 %v6723_v13  ;;  %2142 = vmatpush.msrb.mxu1 %v6371_v37  ;;  %v6744_v37 = vld [vmem:[%s8261_s7 + $0x60] sm:$0xff] }
 0xeaf   :  { %v2019_v56 = vpop.permute.xlu1 %2018 }
 0xeb0   :  { %4918 = vmatmul.msk.f32.vlgmr.msrb.gmra.mxu2 %vm395_vm13, %v2019_v56  ;;  %4919 = vmatmul.msk.f32.vlgmr.msrb.gmra.mxu3 %vm395_vm13, %v2019_v56 }
 0xeb1   :  { %2380 = vmatpush.msrb.mxu2 %v6732_v34  ;;  %2400 = vmatpush.msrb.mxu3 %v6738_v20 }
 0xeb3   :  { %2381 = vmatpush.msrb.mxu2 %v6744_v37  ;;  %2401 = vmatpush.msrb.mxu3 %v6750_v14 }
 0xeb5   :  { %2382 = vmatpush.msrb.mxu2 %v6756_v52  ;;  %2402 = vmatpush.msrb.mxu3 %v6762_v49 }
 0xeb7   :  { %2383 = vmatpush.msrb.mxu2 %v6768_v21  ;;  %2403 = vmatpush.msrb.mxu3 %v6386_v26  ;;  %v8340_v26 = vld [vmem:[#allocation13_spill] sm:$0xff] }
 0xeb8   :  { %v6788_v9 = vadd.f32 %v8341_v57, %v8340_v26 }
 0xeb9   :  { %2384 = vmatpush.msrb.mxu2 %v6775_v62  ;;  %2404 = vmatpush.msrb.mxu3 %v6393_v25  ;;  %v6794_v25 = vld [vmem:[%s8261_s7 + $0x10] sm:$0xff] }
 0xebb   :  { %2385 = vmatpush.msrb.mxu2 %v6782_v43  ;;  %2405 = vmatpush.msrb.mxu3 %v6400_v29  ;;  %v6802_v29 = vld [vmem:[%s8261_s7] sm:$0xff] }
 0xebc   :  { %v1785_v30 = vpop.f32.mrf.mxu0  ;;  %v1805_v3 = vpop.f32.mrf.mxu1 }
 0xebd   :  { %v1786_v27 = vadd.f32 %v1785_v30, %v5931_v5  ;;  %2386 = vmatpush.msrb.mxu2 %v6794_v25  ;;  %2406 = vmatpush.msrb.mxu3 %v6412_v45  ;;  %v1806_v54 = vadd.f32 %v1805_v3, %v5969_v0 }
 0xebf   :  { %v1808_v32 = vadd.f32 %v1786_v27, %v6788_v9  ;;  %2387 = vmatpush.msrb.mxu2 %v6802_v29  ;;  %2407 = vmatpush.msrb.mxu3 %v6420_v47 }
 0xec1   :  { %v4911_v61 = vmul.f32 -1.442695, %v1808_v32 }
 0xec3   :  { %5121 = vpow2.f32 %v4911_v61 }
 0xec9   :  { %v5122_v58 = vpop.eup %5121 }
 0xeca   :  { %v1812_v22 = vadd.f32 1.0, %v5122_v58 }
 0xecc   :  { %5123 = vrcp.f32 %v1812_v22  ;;  %v1824_v45 = vand.u32 2147483648, %v1812_v22  ;;  %v1822_v7 = vand.u32 2147483647, %v1812_v22  ;;  %vm1818_vm11 = vweird.f32 %v1812_v22 }
 0xece   :  { %v1825_v12 = vor.u32 1.1754944e-38, %v1824_v45  ;;  %vm1823_vm0 = vcmp.eq.f32.partialorder %v1822_v7, 8.507059e+37 }
 0xed2   :  { %v5124_v15 = vpop.eup %5123 }
 0xed3   :  { %v1814_v48 = vmul.f32 %v5124_v15, %v1812_v22  ;;  %vm1819_vm10 = vweird.f32 %v5124_v15 }
 0xed4   :  { %vm1820_vm15 = vmor %vm1818_vm11, %vm1819_vm10 }
 0xed5   :  { %v1815_v39 = vsub.f32 1.0, %v1814_v48 }
 0xed7   :  { %v1816_v1 = vmul.f32 %v5124_v15, %v1815_v39 }
 0xed9   :  { %v1817_v11 = vadd.f32 %v5124_v15, %v1816_v1 }
 0xedb   :  { %v1821_v47 = vsel %vm1820_vm15, %v5124_v15, %v1817_v11 }
 0xedc   :  { %v1826_v55 = vsel %vm1823_vm0, %v1825_v12, %v1821_v47 }
 0xedd   :  { %v1828_v56 = vmul.f32 %v1826_v55, %v1806_v54 }
 0xedf   :  { %v1829_v30 = vadd.f32 %v1828_v56, %v6809_v46 }
 0xee1   :  { %5125 = vtanh.f32 %v1829_v30 }
 0xee7   :  { %v5126_v57 = vpop.eup %5125 }
 0xee8   :  { %1833 = vrot.lane.b32.xlu0 %v5126_v57, %s5439_s8 }
 0xf33   :  { %v2039_v27 = vpop.f32.mrf.mxu2  ;;  %v2059_v1 = vpop.f32.mrf.mxu3 }
 0xf34   :  { %v2040_v32 = vadd.f32 %v2039_v27, %v5950_v28  ;;  %v2060_v11 = vadd.f32 %v2059_v1, %v5964_v63  ;;  %v2097_v1 = vrot.slane %v6660_v23, 2 }
 0xf36   :  { %v2063_v61 = vrot.slane %v2040_v32, 4  ;;  %v2086_v30 = vrot.slane %v2060_v11, 4 }
 0xf38   :  { %v2065_v58 = vadd.f32 %v2063_v61, %v6642_v44  ;;  %v1831_v61 = vsub.f32 1.0, %v1826_v55 }
 0xf3a   :  { %v4920_v22 = vmul.f32 -1.442695, %v2065_v58 }
 0xf3c   :  { %5127 = vpow2.f32 %v4920_v22  ;;  %v1838_v22 = vmul.f32 %v1826_v55, %v1763_v53  ;;  %v6845_v53 = vld [vmem:[%s8304_s28 + $0x8] sm:$0xff] }
 0xf42   :  { %v5128_v15 = vpop.eup %5127 }
 0xf43   :  { %v2069_v48 = vadd.f32 1.0, %v5128_v15 }
 0xf45   :  { %5129 = vrcp.f32 %v2069_v48  ;;  %v2081_v3 = vand.u32 2147483648, %v2069_v48  ;;  %v2079_v54 = vand.u32 2147483647, %v2069_v48  ;;  %vm2075_vm4 = vweird.f32 %v2069_v48 }
 0xf47   :  { %v2082_v17 = vor.u32 1.1754944e-38, %v2081_v3  ;;  %vm2080_vm6 = vcmp.eq.f32.partialorder %v2079_v54, 8.507059e+37 }
 0xf4b   :  { %v5130_v39 = vpop.eup %5129 }
 0xf4c   :  { %v2071_v45 = vmul.f32 %v5130_v39, %v2069_v48  ;;  %vm2076_vm1 = vweird.f32 %v5130_v39 }
 0xf4d   :  { %vm2077_vm5 = vmor %vm2075_vm4, %vm2076_vm1 }
 0xf4e   :  { %v2072_v7 = vsub.f32 1.0, %v2071_v45 }
 0xf50   :  { %v2073_v12 = vmul.f32 %v5130_v39, %v2072_v7 }
 0xf52   :  { %v2074_v47 = vadd.f32 %v5130_v39, %v2073_v12 }
 0xf54   :  { %v2078_v56 = vsel %vm2077_vm5, %v5130_v39, %v2074_v47 }
 0xf55   :  { %v2083_v57 = vsel %vm2080_vm6, %v2082_v17, %v2078_v56 }
 0xf56   :  { %v2088_v27 = vmul.f32 %v2086_v30, %v2083_v57  ;;  %v2091_v55 = vsub.f32 1.0, %v2083_v57  ;;  %v2099_v3 = vmul.f32 %v2097_v1, %v2083_v57 }
 0xf58   :  { %v2089_v32 = vadd.f32 %v2088_v27, %v6649_v2 }
 0xf5a   :  { %5131 = vtanh.f32 %v2089_v32  ;;  %v1834_v58 = vpop.permute.xlu0 %1833 }
 0xf5b   :  { %v1836_v15 = vmul.f32 %v1834_v58, %v1831_v61 }
 0xf5d   :  { %v6819_v45 = vadd.f32 %v1838_v22, %v1836_v15 }
 0xf5f   :  { %1841 = vrot.lane.b32.xlu2 %v6819_v45, %s5439_s8 }
 0xf60   :  { %v5132_v48 = vpop.eup %5131 }
 0xf61   :  { %2093 = vrot.lane.b32.xlu1 %v5132_v48, %s5439_s8 }
 0xfb9   :  { %v1842_v39 = vpop.permute.xlu2 %1841 }
 0xfba   :  { %1844 = vst.msk [vmem:[#allocation2 + $0x10] sm:$0x3] %vm474_vm3, %v1842_v39  ;;  %4915 = vmatmul.msk.f32.vlgmr.msra.gmra.mxu0 %vm395_vm13, %v1842_v39  ;;  %4916 = vmatmul.msk.f32.vlgmr.msra.gmra.mxu1 %vm395_vm13, %v1842_v39 }
 0xfbb   :  { %2290 = vmatpush.msra.mxu0 %v6573_v18  ;;  %2310 = vmatpush.msra.mxu1 %v6670_v42 }
 0xfbd   :  { %2291 = vmatpush.msra.mxu0 %v6580_v41  ;;  %2311 = vmatpush.msra.mxu1 %v6677_v40 }
 0xfbf   :  { %2292 = vmatpush.msra.mxu0 %v6587_v35  ;;  %2312 = vmatpush.msra.mxu1 %v6684_v50 }
 0xfc1   :  { %2293 = vmatpush.msra.mxu0 %v6594_v36  ;;  %2313 = vmatpush.msra.mxu1 %v6691_v24 }
 0xfc3   :  { %2294 = vmatpush.msra.mxu0 %v6601_v8  ;;  %2314 = vmatpush.msra.mxu1 %v6698_v60 }
 0xfc5   :  { %2295 = vmatpush.msra.mxu0 %v6608_v19  ;;  %2315 = vmatpush.msra.mxu1 %v6705_v16 }
 0xfc7   :  { %2296 = vmatpush.msra.mxu0 %v6711_v4  ;;  %2316 = vmatpush.msra.mxu1 %v6717_v59 }
 0xfc9   :  { %2297 = vmatpush.msra.mxu0 %v6723_v13  ;;  %2317 = vmatpush.msra.mxu1 %v6845_v53 }
 0xfd3   :  { %v2094_v7 = vpop.permute.xlu1 %2093 }
 0xfd4   :  { %v2096_v11 = vmul.f32 %v2094_v7, %v2091_v55 }
 0xfd6   :  { %v6849_v12 = vadd.f32 %v2099_v3, %v2096_v11  ;;  %v6868_v3 = vld [vmem:[%s8261_s7 + $0x48] sm:$0xff] }
 0xfd8   :  { %8344 = vst [vmem:[#allocation12_spill] sm:$0xff] %v6849_v12  ;;  %v2192_v54 = vrot.slane %v6849_v12, 4 }
 0xfda   :  { %2193 = vrot.lane.b32.xlu0 %v2192_v54, %s5439_s8  ;;  %v6875_v54 = vld [vmem:[%s8261_s7 + $0x38] sm:$0xff] }
0x1037   :  { %v1949_v47 = vpop.f32.mrf.mxu0  ;;  %v1969_v15 = vpop.f32.mrf.mxu1 }
0x1038   :  { %v1950_v17 = vadd.f32 %v1949_v47, %v5931_v5  ;;  %v1970_v55 = vadd.f32 %v1969_v15, %v5969_v0 }
0x103a   :  { %v1973_v56 = vrot.slane %v1950_v17, 6  ;;  %v2007_v17 = vrot.slane %v6819_v45, 6  ;;  %v6890_v45 = vld [vmem:[%s8261_s7 + $0x18] sm:$0xff] }
0x103c   :  { %v1975_v30 = vadd.f32 %v1973_v56, %v6788_v9 }
0x103e   :  { %v4917_v27 = vmul.f32 -1.442695, %v1975_v30  ;;  %v1996_v30 = vrot.slane %v1970_v55, 6 }
0x1040   :  { %5133 = vpow2.f32 %v4917_v27  ;;  %v6883_v27 = vld [vmem:[%s8261_s7 + $0x28] sm:$0xff] }
0x1046   :  { %v5134_v32 = vpop.eup %5133 }
0x1047   :  { %v1979_v61 = vadd.f32 1.0, %v5134_v32 }
0x1049   :  { %5135 = vrcp.f32 %v1979_v61  ;;  %v1991_v39 = vand.u32 2147483648, %v1979_v61  ;;  %v1989_v7 = vand.u32 2147483647, %v1979_v61  ;;  %vm1985_vm8 = vweird.f32 %v1979_v61 }
0x104b   :  { %v1992_v47 = vor.u32 1.1754944e-38, %v1991_v39  ;;  %vm1990_vm11 = vcmp.eq.f32.partialorder %v1989_v7, 8.507059e+37 }
0x104c   :  { %v2194_v58 = vpop.permute.xlu0 %2193 }
0x104d   :  { %4924 = vmatmul.msk.f32.vlgmr.msra.gmra.mxu2 %vm395_vm13, %v2194_v58  ;;  %4925 = vmatmul.msk.f32.vlgmr.msra.gmra.mxu3 %vm395_vm13, %v2194_v58 }
0x104e   :  { %2540 = vmatpush.msra.mxu2 %v6732_v34  ;;  %2560 = vmatpush.msra.mxu3 %v6738_v20 }
0x104f   :  { %v5136_v57 = vpop.eup %5135 }
0x1050   :  { %v1981_v22 = vmul.f32 %v5136_v57, %v1979_v61  ;;  %2541 = vmatpush.msra.mxu2 %v6744_v37  ;;  %2561 = vmatpush.msra.mxu3 %v6750_v14  ;;  %vm1986_vm7 = vweird.f32 %v5136_v57 }
0x1051   :  { %vm1987_vm10 = vmor %vm1985_vm8, %vm1986_vm7 }
0x1052   :  { %v1982_v48 = vsub.f32 1.0, %v1981_v22  ;;  %2542 = vmatpush.msra.mxu2 %v6756_v52  ;;  %2562 = vmatpush.msra.mxu3 %v6762_v49  ;;  %v6898_v22 = vld [vmem:[%s8261_s7 + $0x8] sm:$0xff] }
0x1054   :  { %v1983_v1 = vmul.f32 %v5136_v57, %v1982_v48  ;;  %2543 = vmatpush.msra.mxu2 %v6768_v21  ;;  %2563 = vmatpush.msra.mxu3 %v6868_v3 }
0x1056   :  { %v1984_v11 = vadd.f32 %v5136_v57, %v1983_v1  ;;  %2544 = vmatpush.msra.mxu2 %v6775_v62  ;;  %2564 = vmatpush.msra.mxu3 %v6875_v54 }
0x1058   :  { %v1988_v56 = vsel %vm1987_vm10, %v5136_v57, %v1984_v11  ;;  %2545 = vmatpush.msra.mxu2 %v6782_v43  ;;  %2565 = vmatpush.msra.mxu3 %v6883_v27 }
0x1059   :  { %v1993_v32 = vsel %vm1990_vm11, %v1992_v47, %v1988_v56 }
0x105a   :  { %v1998_v61 = vmul.f32 %v1996_v30, %v1993_v32  ;;  %v2009_v58 = vmul.f32 %v2007_v17, %v1993_v32  ;;  %2546 = vmatpush.msra.mxu2 %v6794_v25  ;;  %2566 = vmatpush.msra.mxu3 %v6890_v45  ;;  %v2001_v7 = vsub.f32 1.0, %v1993_v32 }
0x105c   :  { %v1999_v57 = vadd.f32 %v1998_v61, %v6809_v46  ;;  %2547 = vmatpush.msra.mxu2 %v6802_v29  ;;  %2567 = vmatpush.msra.mxu3 %v6898_v22 }
0x105e   :  { %5137 = vtanh.f32 %v1999_v57 }
0x1064   :  { %v5138_v15 = vpop.eup %5137 }
0x1065   :  { %2003 = vrot.lane.b32.xlu1 %v5138_v15, %s5439_s8 }
0x10d0   :  { %v2214_v48 = vpop.f32.mrf.mxu2 }
0x10d1   :  { %v2215_v39 = vadd.f32 %v2214_v48, %v5950_v28  ;;  %v2234_v48 = vpop.f32.mrf.mxu3 }
0x10d2   :  { %v2235_v32 = vadd.f32 %v2234_v48, %v5964_v63 }
0x10d3   :  { %v2238_v55 = vrot.slane %v2215_v39, 6 }
0x10d5   :  { %v2240_v1 = vadd.f32 %v2238_v55, %v6642_v44 }
0x10d7   :  { %v4926_v11 = vmul.f32 -1.442695, %v2240_v1  ;;  %v2004_v47 = vpop.permute.xlu1 %2003 }
0x10d8   :  { %v2006_v17 = vmul.f32 %v2004_v47, %v2001_v7  ;;  %v2261_v47 = vrot.slane %v2235_v32, 6 }
0x10d9   :  { %5139 = vpow2.f32 %v4926_v11 }
0x10da   :  { %v6904_v56 = vadd.f32 %v2009_v58, %v2006_v17 }
0x10dc   :  { %v2102_v30 = vrot.slane %v6904_v56, 2 }
0x10de   :  { %2103 = vrot.lane.b32.xlu0 %v2102_v30, %s5439_s8 }
0x10df   :  { %v5140_v61 = vpop.eup %5139 }
0x10e0   :  { %v2244_v57 = vadd.f32 1.0, %v5140_v61 }
0x10e2   :  { %5141 = vrcp.f32 %v2244_v57  ;;  %v2256_v31 = vand.u32 2147483648, %v2244_v57  ;;  %v2254_v1 = vand.u32 2147483647, %v2244_v57  ;;  %vm2250_vm0 = vweird.f32 %v2244_v57 }
0x10e4   :  { %v2257_v58 = vor.u32 1.1754944e-38, %v2256_v31  ;;  %vm2255_vm4 = vcmp.eq.f32.partialorder %v2254_v1, 8.507059e+37 }
0x10e8   :  { %v5142_v15 = vpop.eup %5141 }
0x10e9   :  { %v2246_v23 = vmul.f32 %v5142_v15, %v2244_v57  ;;  %vm2251_vm15 = vweird.f32 %v5142_v15 }
0x10ea   :  { %vm2252_vm1 = vmor %vm2250_vm0, %vm2251_vm15 }
0x10eb   :  { %v2247_v39 = vsub.f32 1.0, %v2246_v23 }
0x10ed   :  { %v2248_v55 = vmul.f32 %v5142_v15, %v2247_v39 }
0x10ef   :  { %v2249_v7 = vadd.f32 %v5142_v15, %v2248_v55 }
0x10f1   :  { %v2253_v11 = vsel %vm2252_vm1, %v5142_v15, %v2249_v7 }
0x10f2   :  { %v2258_v17 = vsel %vm2255_vm4, %v2257_v58, %v2253_v11 }
0x10f3   :  { %v2263_v30 = vmul.f32 %v2261_v47, %v2258_v17  ;;  %v2266_v31 = vsub.f32 1.0, %v2258_v17 }
0x10f5   :  { %v2264_v61 = vadd.f32 %v2263_v30, %v6649_v2 }
0x10f7   :  { %5143 = vtanh.f32 %v2264_v61 }
0x10fd   :  { %v5144_v33 = vpop.eup %5143 }
0x10fe   :  { %2268 = vrot.lane.b32.xlu2 %v5144_v33, %s5439_s8  ;;  %v2272_v33 = vrot.slane %v6849_v12, 2 }
0x1100   :  { %v2274_v15 = vmul.f32 %v2272_v33, %v2258_v17 }
0x1150   :  { %v2104_v23 = vpop.permute.xlu0 %2103 }
0x1151   :  { %4921 = vmatmul.msk.f32.vlgmr.msrb.gmra.mxu0 %vm395_vm13, %v2104_v23  ;;  %4922 = vmatmul.msk.f32.vlgmr.msrb.gmra.mxu1 %vm395_vm13, %v2104_v23 }
0x1152   :  { %2458 = vmatpush.msrb.mxu0 %v6573_v18  ;;  %2478 = vmatpush.msrb.mxu1 %v6670_v42 }
0x1154   :  { %2459 = vmatpush.msrb.mxu0 %v6580_v41  ;;  %2479 = vmatpush.msrb.mxu1 %v6677_v40 }
0x1156   :  { %2460 = vmatpush.msrb.mxu0 %v6587_v35  ;;  %2480 = vmatpush.msrb.mxu1 %v6684_v50 }
0x1158   :  { %v2269_v57 = vpop.permute.xlu2 %2268  ;;  %2461 = vmatpush.msrb.mxu0 %v6594_v36  ;;  %2481 = vmatpush.msrb.mxu1 %v6691_v24 }
0x1159   :  { %v2271_v48 = vmul.f32 %v2269_v57, %v2266_v31 }
0x115a   :  { %2462 = vmatpush.msrb.mxu0 %v6601_v8  ;;  %2482 = vmatpush.msrb.mxu1 %v6698_v60 }
0x115b   :  { %v6924_v39 = vadd.f32 %v2274_v15, %v2271_v48 }
0x115c   :  { %2463 = vmatpush.msrb.mxu0 %v6608_v19  ;;  %2483 = vmatpush.msrb.mxu1 %v6705_v16 }
0x115d   :  { %v8294_v32 = vrot.slane %v6924_v39, 2 }
0x115e   :  { %2464 = vmatpush.msrb.mxu0 %v6711_v4  ;;  %2484 = vmatpush.msrb.mxu1 %v6717_v59 }
0x115f   :  { %2368 = vrot.lane.b32.xlu1 %v8294_v32, %s5439_s8 }
0x1160   :  { %2465 = vmatpush.msrb.mxu0 %v6723_v13  ;;  %2485 = vmatpush.msrb.mxu1 %v6845_v53 }
0x11ce   :  { %v2124_v55 = vpop.f32.mrf.mxu0  ;;  %v2144_v31 = vpop.f32.mrf.mxu1 }
0x11cf   :  { %v2125_v1 = vadd.f32 %v2124_v55, %v5931_v5  ;;  %v2145_v15 = vadd.f32 %v2144_v31, %v5969_v0 }
0x11d1   :  { %v2148_v7 = vrot.slane %v2125_v1, 4  ;;  %v2369_v58 = vpop.permute.xlu1 %2368 }
0x11d2   :  { %4930 = vmatmul.msk.f32.vlgmr.msrb.gmra.mxu2 %vm395_vm13, %v2369_v58  ;;  %4931 = vmatmul.msk.f32.vlgmr.msrb.gmra.mxu3 %vm395_vm13, %v2369_v58 }
0x11d3   :  { %v2150_v11 = vadd.f32 %v2148_v7, %v6788_v9  ;;  %2712 = vmatpush.msrb.mxu2 %v6732_v34  ;;  %2732 = vmatpush.msrb.mxu3 %v6738_v20 }
0x11d5   :  { %v4923_v47 = vmul.f32 -1.442695, %v2150_v11  ;;  %2713 = vmatpush.msrb.mxu2 %v6744_v37  ;;  %2733 = vmatpush.msrb.mxu3 %v6750_v14  ;;  %v2171_v11 = vrot.slane %v2145_v15, 4 }
0x11d7   :  { %5145 = vpow2.f32 %v4923_v47  ;;  %2714 = vmatpush.msrb.mxu2 %v6756_v52  ;;  %2734 = vmatpush.msrb.mxu3 %v6762_v49 }
0x11d9   :  { %2715 = vmatpush.msrb.mxu2 %v6768_v21  ;;  %2735 = vmatpush.msrb.mxu3 %v6868_v3 }
0x11db   :  { %2716 = vmatpush.msrb.mxu2 %v6775_v62  ;;  %2736 = vmatpush.msrb.mxu3 %v6875_v54 }
0x11dd   :  { %v5146_v17 = vpop.eup %5145  ;;  %2717 = vmatpush.msrb.mxu2 %v6782_v43  ;;  %2737 = vmatpush.msrb.mxu3 %v6883_v27 }
0x11de   :  { %v2154_v30 = vadd.f32 1.0, %v5146_v17 }
0x11df   :  { %2718 = vmatpush.msrb.mxu2 %v6794_v25  ;;  %2738 = vmatpush.msrb.mxu3 %v6890_v45 }
0x11e0   :  { %5147 = vrcp.f32 %v2154_v30  ;;  %v2166_v57 = vand.u32 2147483648, %v2154_v30  ;;  %v2164_v55 = vand.u32 2147483647, %v2154_v30  ;;  %vm2160_vm6 = vweird.f32 %v2154_v30 }
0x11e1   :  { %2719 = vmatpush.msrb.mxu2 %v6802_v29  ;;  %2739 = vmatpush.msrb.mxu3 %v6898_v22 }
0x11e2   :  { %v2167_v7 = vor.u32 1.1754944e-38, %v2166_v57  ;;  %vm2165_vm8 = vcmp.eq.f32.partialorder %v2164_v55, 8.507059e+37 }
0x11e6   :  { %v5148_v61 = vpop.eup %5147 }
0x11e7   :  { %v2156_v23 = vmul.f32 %v5148_v61, %v2154_v30  ;;  %vm2161_vm5 = vweird.f32 %v5148_v61 }
0x11e8   :  { %vm2162_vm7 = vmor %vm2160_vm6, %vm2161_vm5 }
0x11e9   :  { %v2157_v33 = vsub.f32 1.0, %v2156_v23 }
0x11eb   :  { %v2158_v48 = vmul.f32 %v5148_v61, %v2157_v33  ;;  %v2182_v33 = vrot.slane %v6904_v56, 6 }
0x11ed   :  { %v2159_v1 = vadd.f32 %v5148_v61, %v2158_v48 }
0x11ef   :  { %v2163_v58 = vsel %vm2162_vm7, %v5148_v61, %v2159_v1 }
0x11f0   :  { %v2168_v47 = vsel %vm2165_vm8, %v2167_v7, %v2163_v58 }
0x11f1   :  { %v2173_v17 = vmul.f32 %v2171_v11, %v2168_v47  ;;  %v2176_v31 = vsub.f32 1.0, %v2168_v47  ;;  %v2184_v38 = vmul.f32 %v2182_v33, %v2168_v47 }
0x11f3   :  { %v2174_v32 = vadd.f32 %v2173_v17, %v6809_v46 }
0x11f5   :  { %5149 = vtanh.f32 %v2174_v32 }
0x11fb   :  { %v5150_v12 = vpop.eup %5149 }
0x11fc   :  { %2178 = vrot.lane.b32.xlu2 %v5150_v12, %s5439_s8 }
0x1255   :  { %v2389_v23 = vpop.f32.mrf.mxu2 }
0x1256   :  { %v2390_v48 = vadd.f32 %v2389_v23, %v5950_v28  ;;  %v2179_v30 = vpop.permute.xlu2 %2178 }
0x1257   :  { %v2181_v57 = vmul.f32 %v2179_v30, %v2176_v31  ;;  %v2409_v31 = vpop.f32.mrf.mxu3 }
0x1258   :  { %v2412_v61 = vadd.f32 %v2390_v48, %v6642_v44  ;;  %v2410_v33 = vadd.f32 %v2409_v31, %v5964_v63 }
0x1259   :  { %v6962_v15 = vadd.f32 %v2184_v38, %v2181_v57 }
0x125a   :  { %v4932_v55 = vmul.f32 -1.442695, %v2412_v61 }
0x125b   :  { %v2277_v1 = vrot.slane %v6962_v15, 4 }
0x125c   :  { %5151 = vpow2.f32 %v4932_v55 }
0x125d   :  { %2278 = vrot.lane.b32.xlu1 %v2277_v1, %s5439_s8 }
0x1262   :  { %v5152_v12 = vpop.eup %5151 }
0x1263   :  { %v2416_v32 = vadd.f32 1.0, %v5152_v12 }
0x1265   :  { %5153 = vrcp.f32 %v2416_v32  ;;  %v2428_v17 = vand.u32 2147483648, %v2416_v32  ;;  %v2426_v47 = vand.u32 2147483647, %v2416_v32  ;;  %vm2422_vm11 = vweird.f32 %v2416_v32 }
0x1267   :  { %v2429_v38 = vor.u32 1.1754944e-38, %v2428_v17  ;;  %vm2427_vm0 = vcmp.eq.f32.partialorder %v2426_v47, 8.507059e+37 }
0x126b   :  { %v5154_v7 = vpop.eup %5153 }
0x126c   :  { %v2418_v58 = vmul.f32 %v5154_v7, %v2416_v32  ;;  %vm2423_vm10 = vweird.f32 %v5154_v7 }
0x126d   :  { %vm2424_vm15 = vmor %vm2422_vm11, %vm2423_vm10 }
0x126e   :  { %v2419_v11 = vsub.f32 1.0, %v2418_v58 }
0x1270   :  { %v2420_v23 = vmul.f32 %v5154_v7, %v2419_v11 }
0x1272   :  { %v2421_v44 = vadd.f32 %v5154_v7, %v2420_v23 }
0x1274   :  { %v2425_v48 = vsel %vm2424_vm15, %v5154_v7, %v2421_v44 }
0x1275   :  { %v2430_v30 = vsel %vm2427_vm0, %v2429_v38, %v2425_v48 }
0x1276   :  { %v2432_v57 = vmul.f32 %v2430_v30, %v2410_v33 }
0x1278   :  { %v2433_v61 = vadd.f32 %v2432_v57, %v6649_v2 }
0x127a   :  { %5155 = vtanh.f32 %v2433_v61 }
0x1280   :  { %v5156_v55 = vpop.eup %5155 }
0x1281   :  { %2437 = vrot.lane.b32.xlu0 %v5156_v55, %s5439_s8 }
0x12cf   :  { %v2279_v1 = vpop.permute.xlu1 %2278 }
0x12d0   :  { %4927 = vmatmul.msk.f32.vlgmr.msra.gmra.mxu0 %vm395_vm13, %v2279_v1  ;;  %4928 = vmatmul.msk.f32.vlgmr.msra.gmra.mxu1 %vm395_vm13, %v2279_v1 }
0x12d1   :  { %2622 = vmatpush.msra.mxu0 %v6573_v18  ;;  %2642 = vmatpush.msra.mxu1 %v6670_v42  ;;  %v2435_v18 = vsub.f32 1.0, %v2430_v30 }
0x12d3   :  { %2623 = vmatpush.msra.mxu0 %v6580_v41  ;;  %2643 = vmatpush.msra.mxu1 %v6677_v40 }
0x12d5   :  { %2624 = vmatpush.msra.mxu0 %v6587_v35  ;;  %2644 = vmatpush.msra.mxu1 %v6684_v50  ;;  %v8345_v35 = vrot.slane %v6924_v39, 2 }
0x12d7   :  { %2625 = vmatpush.msra.mxu0 %v6594_v36  ;;  %2645 = vmatpush.msra.mxu1 %v6691_v24  ;;  %v2442_v36 = vmul.f32 %v2430_v30, %v8345_v35 }
0x12d9   :  { %2626 = vmatpush.msra.mxu0 %v6601_v8  ;;  %2646 = vmatpush.msra.mxu1 %v6698_v60 }
0x12db   :  { %2627 = vmatpush.msra.mxu0 %v6608_v19  ;;  %2647 = vmatpush.msra.mxu1 %v6705_v16 }
0x12dd   :  { %2628 = vmatpush.msra.mxu0 %v6711_v4  ;;  %2648 = vmatpush.msra.mxu1 %v6717_v59 }
0x12df   :  { %2629 = vmatpush.msra.mxu0 %v6723_v13  ;;  %2649 = vmatpush.msra.mxu1 %v6845_v53 }
0x12f3   :  { %v2438_v41 = vpop.permute.xlu0 %2437 }
0x12f4   :  { %v2440_v8 = vmul.f32 %v2438_v41, %v2435_v18 }
0x12f6   :  { %v6989_v2 = vadd.f32 %v2442_v36, %v2440_v8 }
0x12f8   :  { %2444 = vst.msk [vmem:[#allocation2 + $0x8] sm:$0x3] %vm1079_vm9, %v6989_v2  ;;  %2528 = vrot.lane.b32.xlu2 %v6989_v2, %s5439_s8 }
0x134d   :  { %v2299_v19 = vpop.f32.mrf.mxu0  ;;  %v2319_v31 = vpop.f32.mrf.mxu1 }
0x134e   :  { %v2300_v12 = vadd.f32 %v2299_v19, %v5931_v5  ;;  %v2320_v33 = vadd.f32 %v2319_v31, %v5969_v0 }
0x1350   :  { %v2323_v32 = vrot.slane %v2300_v12, 2  ;;  %v2346_v1 = vrot.slane %v2320_v33, 2  ;;  %v8346_v12 = vld [vmem:[#allocation9_spill] sm:$0xff] }
0x1352   :  { %v2325_v7 = vadd.f32 %v2323_v32, %v6788_v9  ;;  %v2529_v58 = vpop.permute.xlu2 %2528  ;;  %v7021_v32 = vadd.f32 %v8346_v12, %v8326_v51 }
0x1353   :  { %4936 = vmatmul.msk.f32.vlgmr.msra.gmra.mxu2 %vm395_vm13, %v2529_v58  ;;  %4937 = vmatmul.msk.f32.vlgmr.msra.gmra.mxu3 %vm395_vm13, %v2529_v58 }
0x1354   :  { %v4929_v11 = vmul.f32 -1.442695, %v2325_v7  ;;  %2887 = vmatpush.msra.mxu2 %v6732_v34  ;;  %2907 = vmatpush.msra.mxu3 %v6738_v20 }
0x1356   :  { %5157 = vpow2.f32 %v4929_v11  ;;  %2888 = vmatpush.msra.mxu2 %v6744_v37  ;;  %2908 = vmatpush.msra.mxu3 %v6750_v14 }
0x1358   :  { %2889 = vmatpush.msra.mxu2 %v6756_v52  ;;  %2909 = vmatpush.msra.mxu3 %v6762_v49 }
0x135a   :  { %2890 = vmatpush.msra.mxu2 %v6768_v21  ;;  %2910 = vmatpush.msra.mxu3 %v6868_v3 }
0x135c   :  { %v5158_v9 = vpop.eup %5157  ;;  %2891 = vmatpush.msra.mxu2 %v6775_v62  ;;  %2911 = vmatpush.msra.mxu3 %v6875_v54 }
0x135d   :  { %v2329_v17 = vadd.f32 1.0, %v5158_v9 }
0x135e   :  { %2892 = vmatpush.msra.mxu2 %v6782_v43  ;;  %2912 = vmatpush.msra.mxu3 %v6883_v27 }
0x135f   :  { %5159 = vrcp.f32 %v2329_v17  ;;  %v2341_v38 = vand.u32 2147483648, %v2329_v17  ;;  %v2339_v30 = vand.u32 2147483647, %v2329_v17  ;;  %vm2335_vm4 = vweird.f32 %v2329_v17 }
0x1360   :  { %2893 = vmatpush.msra.mxu2 %v6794_v25  ;;  %2913 = vmatpush.msra.mxu3 %v6890_v45 }
0x1361   :  { %v2342_v61 = vor.u32 1.1754944e-38, %v2341_v38  ;;  %vm2340_vm6 = vcmp.eq.f32.partialorder %v2339_v30, 8.507059e+37 }
0x1362   :  { %2894 = vmatpush.msra.mxu2 %v6802_v29  ;;  %2914 = vmatpush.msra.mxu3 %v6898_v22 }
0x1365   :  { %v5160_v23 = vpop.eup %5159 }
0x1366   :  { %v2331_v47 = vmul.f32 %v5160_v23, %v2329_v17  ;;  %vm2336_vm1 = vweird.f32 %v5160_v23 }
0x1367   :  { %vm2337_vm5 = vmor %vm2335_vm4, %vm2336_vm1 }
0x1368   :  { %v2332_v44 = vsub.f32 1.0, %v2331_v47 }
0x136a   :  { %v2333_v48 = vmul.f32 %v5160_v23, %v2332_v44 }
0x136c   :  { %v2334_v57 = vadd.f32 %v5160_v23, %v2333_v48 }
0x136e   :  { %v2338_v55 = vsel %vm2337_vm5, %v5160_v23, %v2334_v57  ;;  %v2357_v23 = vrot.slane %v6962_v15, 6 }
0x136f   :  { %v2343_v18 = vsel %vm2340_vm6, %v2342_v61, %v2338_v55 }
0x1370   :  { %v2348_v41 = vmul.f32 %v2346_v1, %v2343_v18  ;;  %v2359_v44 = vmul.f32 %v2357_v23, %v2343_v18 }
0x1372   :  { %v2349_v35 = vadd.f32 %v2348_v41, %v6809_v46  ;;  %v2351_v46 = vsub.f32 1.0, %v2343_v18 }
0x1374   :  { %5161 = vtanh.f32 %v2349_v35 }
0x137a   :  { %v5162_v36 = vpop.eup %5161 }
0x137b   :  { %2353 = vrot.lane.b32.xlu0 %v5162_v36, %s5439_s8 }
0x13d6   :  { %v2549_v8 = vpop.f32.mrf.mxu2  ;;  %v2569_v48 = vpop.f32.mrf.mxu3 }
0x13d7   :  { %v2550_v19 = vadd.f32 %v2549_v8, %v5950_v28  ;;  %v2570_v55 = vadd.f32 %v2569_v48, %v5964_v63 }
0x13d9   :  { %v2573_v7 = vrot.slane %v2550_v19, 2  ;;  %v2596_v8 = vrot.slane %v2570_v55, 2  ;;  %v2607_v19 = vrot.slane %v6989_v2, 2  ;;  %v7044_v2 = vld [vmem:[%s8304_s28 + $0x70] sm:$0xff] }
0x13db   :  { %v2575_v58 = vadd.f32 %v2573_v7, %v7021_v32  ;;  %v8347_v7 = vld [vmem:[#allocation15_spill] sm:$0xff] }
0x13dd   :  { %v4938_v11 = vmul.f32 -1.442695, %v2575_v58  ;;  %v7035_v58 = vadd.f32 %v8347_v7, %v5975_v6  ;;  %v7051_v6 = vld [vmem:[%s8304_s28 + $0x60] sm:$0xff] }
0x13df   :  { %5163 = vpow2.f32 %v4938_v11 }
0x13e5   :  { %v5164_v9 = vpop.eup %5163 }
0x13e6   :  { %v2579_v17 = vadd.f32 1.0, %v5164_v9 }
0x13e8   :  { %5165 = vrcp.f32 %v2579_v17  ;;  %v2591_v57 = vand.u32 2147483648, %v2579_v17  ;;  %v2589_v41 = vand.u32 2147483647, %v2579_v17  ;;  %vm2585_vm8 = vweird.f32 %v2579_v17 }
0x13ea   :  { %v2592_v18 = vor.u32 1.1754944e-38, %v2591_v57  ;;  %vm2590_vm11 = vcmp.eq.f32.partialorder %v2589_v41, 8.507059e+37 }
0x13ed   :  { %v2354_v47 = vpop.permute.xlu0 %2353 }
0x13ee   :  { %v5166_v31 = vpop.eup %5165  ;;  %v2356_v38 = vmul.f32 %v2354_v47, %v2351_v46  ;;  %v7058_v47 = vld [vmem:[%s8304_s28 + $0x50] sm:$0xff] }
0x13ef   :  { %v2581_v33 = vmul.f32 %v5166_v31, %v2579_v17  ;;  %vm2586_vm7 = vweird.f32 %v5166_v31 }
0x13f0   :  { %v7025_v30 = vadd.f32 %v2359_v44, %v2356_v38  ;;  %vm2587_vm10 = vmor %vm2585_vm8, %vm2586_vm7 }
0x13f1   :  { %v2582_v51 = vsub.f32 1.0, %v2581_v33 }
0x13f2   :  { %v2445_v61 = vrot.slane %v7025_v30, 6 }
0x13f3   :  { %v2583_v1 = vmul.f32 %v5166_v31, %v2582_v51 }
0x13f4   :  { %2446 = vrot.lane.b32.xlu2 %v2445_v61, %s5439_s8 }
0x13f5   :  { %v2584_v35 = vadd.f32 %v5166_v31, %v2583_v1 }
0x13f7   :  { %v2588_v36 = vsel %vm2587_vm10, %v5166_v31, %v2584_v35 }
0x13f8   :  { %v2593_v12 = vsel %vm2590_vm11, %v2592_v18, %v2588_v36 }
0x13f9   :  { %v2598_v11 = vmul.f32 %v2596_v8, %v2593_v12  ;;  %v2609_v9 = vmul.f32 %v2607_v19, %v2593_v12 }
0x13fb   :  { %v2599_v46 = vadd.f32 %v2598_v11, %v7035_v58 }
0x13fd   :  { %5167 = vtanh.f32 %v2599_v46 }
0x1403   :  { %v5168_v23 = vpop.eup %5167 }
0x1404   :  { %2603 = vrot.lane.b32.xlu1 %v5168_v23, %s5439_s8 }
0x144e   :  { %v2447_v17 = vpop.permute.xlu2 %2446 }
0x144f   :  { %4933 = vmatmul.msk.f32.vlgmr.msrb.gmra.mxu0 %vm395_vm13, %v2447_v17  ;;  %4934 = vmatmul.msk.f32.vlgmr.msrb.gmra.mxu1 %vm395_vm13, %v2447_v17 }
0x1450   :  { %2797 = vmatpush.msrb.mxu0 %v7044_v2  ;;  %2817 = vmatpush.msrb.mxu1 %v6670_v42  ;;  %v7065_v42 = vld [vmem:[%s8304_s28 + $0x40] sm:$0xff] }
0x1452   :  { %2798 = vmatpush.msrb.mxu0 %v7051_v6  ;;  %2818 = vmatpush.msrb.mxu1 %v6677_v40  ;;  %v7072_v40 = vld [vmem:[%s8304_s28 + $0x30] sm:$0xff] }
0x1454   :  { %2799 = vmatpush.msrb.mxu0 %v7058_v47  ;;  %2819 = vmatpush.msrb.mxu1 %v6684_v50  ;;  %v7079_v50 = vld [vmem:[%s8304_s28 + $0x20] sm:$0xff] }
0x1456   :  { %2800 = vmatpush.msrb.mxu0 %v7065_v42  ;;  %2820 = vmatpush.msrb.mxu1 %v6691_v24  ;;  %v2601_v24 = vsub.f32 1.0, %v2593_v12 }
0x1458   :  { %2801 = vmatpush.msrb.mxu0 %v7072_v40  ;;  %2821 = vmatpush.msrb.mxu1 %v6698_v60 }
0x145a   :  { %2802 = vmatpush.msrb.mxu0 %v7079_v50  ;;  %2822 = vmatpush.msrb.mxu1 %v6705_v16  ;;  %v8348_v16 = vld [vmem:[#allocation7_spill] sm:$0xff] }
0x145b   :  { %v7093_v48 = vadd.f32 %v8348_v16, %v8340_v26 }
0x145c   :  { %2803 = vmatpush.msrb.mxu0 %v6711_v4  ;;  %2823 = vmatpush.msrb.mxu1 %v6717_v59 }
0x145e   :  { %2804 = vmatpush.msrb.mxu0 %v6723_v13  ;;  %2824 = vmatpush.msrb.mxu1 %v6845_v53 }
0x1476   :  { %v2604_v31 = vpop.permute.xlu1 %2603 }
0x1477   :  { %v2606_v60 = vmul.f32 %v2604_v31, %v2601_v24 }
0x1479   :  { %v7087_v44 = vadd.f32 %v2609_v9, %v2606_v60  ;;  %v8349_v9 = vld [vmem:[#allocation11_spill] sm:$0xff] }
0x147a   :  { %v7100_v46 = vadd.f32 %v8349_v9, %v8342_v10 }
0x147b   :  { %v2699_v38 = vrot.slane %v7087_v44, 6 }
0x147d   :  { %2700 = vrot.lane.b32.xlu0 %v2699_v38, %s5439_s8 }
0x14cc   :  { %v2467_v33 = vpop.f32.mrf.mxu0  ;;  %v2487_v8 = vpop.f32.mrf.mxu1 }
0x14cd   :  { %v2468_v4 = vadd.f32 %v2467_v33, %v5931_v5  ;;  %v2488_v12 = vadd.f32 %v2487_v8, %v5969_v0  ;;  %v2779_v8 = vrot.slane %v7087_v44, 2 }
0x14cf   :  { %v2490_v59 = vadd.f32 %v2468_v4, %v7093_v48 }
0x14d1   :  { %v4935_v13 = vmul.f32 -1.442695, %v2490_v59 }
0x14d3   :  { %5169 = vpow2.f32 %v4935_v13 }
0x14d9   :  { %v5170_v51 = vpop.eup %5169 }
0x14da   :  { %v2494_v57 = vadd.f32 1.0, %v5170_v51 }
0x14dc   :  { %5171 = vrcp.f32 %v2494_v57  ;;  %v2506_v35 = vand.u32 2147483648, %v2494_v57  ;;  %v2504_v36 = vand.u32 2147483647, %v2494_v57  ;;  %vm2500_vm0 = vweird.f32 %v2494_v57 }
0x14de   :  { %v2507_v26 = vor.u32 1.1754944e-38, %v2506_v35  ;;  %vm2505_vm4 = vcmp.eq.f32.partialorder %v2504_v36, 8.507059e+37  ;;  %v5386_v35 = vld [vmem:[%s8304_s28 + $0x68] sm:$0xff]  ;;  %v5393_v36 = vld [vmem:[%s8304_s28] sm:$0xff] }
0x14e2   :  { %v5172_v55 = vpop.eup %5171 }
0x14e3   :  { %v2496_v1 = vmul.f32 %v5172_v55, %v2494_v57  ;;  %vm2501_vm15 = vweird.f32 %v5172_v55 }
0x14e4   :  { %vm2502_vm1 = vmor %vm2500_vm0, %vm2501_vm15 }
0x14e5   :  { %v2497_v41 = vsub.f32 1.0, %v2496_v1 }
0x14e7   :  { %v2498_v18 = vmul.f32 %v5172_v55, %v2497_v41  ;;  %v5385_v41 = vld [vmem:[%s8304_s28 + $0x78] sm:$0xff] }
0x14e9   :  { %v2499_v19 = vadd.f32 %v5172_v55, %v2498_v18  ;;  %v5387_v18 = vld [vmem:[%s8304_s28 + $0x58] sm:$0xff] }
0x14eb   :  { %v2503_v7 = vsel %vm2502_vm1, %v5172_v55, %v2499_v19 }
0x14ec   :  { %v2508_v11 = vsel %vm2505_vm4, %v2507_v26, %v2503_v7 }
0x14ed   :  { %v2510_v23 = vmul.f32 %v2508_v11, %v2488_v12 }
0x14ef   :  { %v2511_v17 = vadd.f32 %v2510_v23, %v7100_v46  ;;  %v2701_v24 = vpop.permute.xlu0 %2700 }
0x14f0   :  { %4942 = vmatmul.msk.f32.vlgmr.msrb.gmra.mxu2 %vm395_vm13, %v2701_v24  ;;  %4943 = vmatmul.msk.f32.vlgmr.msrb.gmra.mxu3 %vm395_vm13, %v2701_v24 }
0x14f1   :  { %5173 = vtanh.f32 %v2511_v17  ;;  %3062 = vmatpush.msrb.mxu2 %v6732_v34  ;;  %3082 = vmatpush.msrb.mxu3 %v6738_v20  ;;  %v2513_v34 = vsub.f32 1.0, %v2508_v11 }
0x14f3   :  { %3063 = vmatpush.msrb.mxu2 %v6744_v37  ;;  %3083 = vmatpush.msrb.mxu3 %v6750_v14  ;;  %v2520_v37 = vmul.f32 %v2508_v11, %v2445_v61 }
0x14f5   :  { %3064 = vmatpush.msrb.mxu2 %v6756_v52  ;;  %3084 = vmatpush.msrb.mxu3 %v6762_v49 }
0x14f7   :  { %v5174_v10 = vpop.eup %5173  ;;  %3065 = vmatpush.msrb.mxu2 %v6768_v21  ;;  %3085 = vmatpush.msrb.mxu3 %v6868_v3 }
0x14f8   :  { %2515 = vrot.lane.b32.xlu1 %v5174_v10, %s5439_s8 }
0x14f9   :  { %3066 = vmatpush.msrb.mxu2 %v6775_v62  ;;  %3086 = vmatpush.msrb.mxu3 %v6875_v54 }
0x14fb   :  { %3067 = vmatpush.msrb.mxu2 %v6782_v43  ;;  %3087 = vmatpush.msrb.mxu3 %v6883_v27 }
0x14fd   :  { %3068 = vmatpush.msrb.mxu2 %v6794_v25  ;;  %3088 = vmatpush.msrb.mxu3 %v6890_v45 }
0x14ff   :  { %3069 = vmatpush.msrb.mxu2 %v6802_v29  ;;  %3089 = vmatpush.msrb.mxu3 %v6898_v22 }
0x156a   :  { %v2516_v20 = vpop.permute.xlu1 %2515 }
0x156b   :  { %v2518_v14 = vmul.f32 %v2516_v20, %v2513_v34 }
0x156d   :  { %v7124_v52 = vadd.f32 %v2520_v37, %v2518_v14 }
0x156f   :  { %2523 = vrot.lane.b32.xlu0 %v7124_v52, %s5439_s8 }
0x1573   :  { %v2721_v49 = vpop.f32.mrf.mxu2  ;;  %v2741_v45 = vpop.f32.mrf.mxu3 }
0x1574   :  { %v2722_v21 = vadd.f32 %v2721_v49, %v5950_v28  ;;  %v2742_v31 = vadd.f32 %v2741_v45, %v5964_v63 }
0x1576   :  { %v2745_v62 = vrot.slane %v2722_v21, 4  ;;  %v2768_v59 = vrot.slane %v2742_v31, 4 }
0x1578   :  { %v2747_v43 = vadd.f32 %v2745_v62, %v7021_v32 }
0x157a   :  { %v4944_v25 = vmul.f32 -1.442695, %v2747_v43 }
0x157c   :  { %5175 = vpow2.f32 %v4944_v25 }
0x1582   :  { %v5176_v29 = vpop.eup %5175 }
0x1583   :  { %v2751_v3 = vadd.f32 1.0, %v5176_v29 }
0x1585   :  { %5177 = vrcp.f32 %v2751_v3  ;;  %v2763_v61 = vand.u32 2147483648, %v2751_v3  ;;  %v2761_v38 = vand.u32 2147483647, %v2751_v3  ;;  %vm2757_vm6 = vweird.f32 %v2751_v3 }
0x1587   :  { %v2764_v16 = vor.u32 1.1754944e-38, %v2763_v61  ;;  %vm2762_vm8 = vcmp.eq.f32.partialorder %v2761_v38, 8.507059e+37 }
0x158b   :  { %v5178_v54 = vpop.eup %5177 }
0x158c   :  { %v2753_v27 = vmul.f32 %v5178_v54, %v2751_v3  ;;  %vm2758_vm5 = vweird.f32 %v5178_v54 }
0x158d   :  { %vm2759_vm7 = vmor %vm2757_vm6, %vm2758_vm5 }
0x158e   :  { %v2754_v22 = vsub.f32 1.0, %v2753_v27  ;;  %v2689_v27 = vrot.slane %v7124_v52, 6 }
0x1590   :  { %v2755_v60 = vmul.f32 %v5178_v54, %v2754_v22 }
0x1592   :  { %v2756_v33 = vadd.f32 %v5178_v54, %v2755_v60 }
0x1594   :  { %v2760_v4 = vsel %vm2759_vm7, %v5178_v54, %v2756_v33 }
0x1595   :  { %v2765_v13 = vsel %vm2762_vm8, %v2764_v16, %v2760_v4 }
0x1596   :  { %v2770_v51 = vmul.f32 %v2768_v59, %v2765_v13  ;;  %v2781_v26 = vmul.f32 %v2779_v8, %v2765_v13 }
0x1598   :  { %v2771_v57 = vadd.f32 %v2770_v51, %v7035_v58 }
0x159a   :  { %5179 = vtanh.f32 %v2771_v57 }
0x15a0   :  { %v5180_v55 = vpop.eup %5179 }
0x15a1   :  { %2775 = vrot.lane.b32.xlu2 %v5180_v55, %s5439_s8 }
0x15e1   :  { %v2524_v1 = vpop.permute.xlu0 %2523 }
0x15e2   :  { %2526 = vst.msk [vmem:[#allocation2 + $0x18] sm:$0x3] %vm474_vm3, %v2524_v1  ;;  %4939 = vmatmul.msk.f32.vlgmr.msra.gmra.mxu0 %vm395_vm13, %v2524_v1  ;;  %4940 = vmatmul.msk.f32.vlgmr.msra.gmra.mxu1 %vm395_vm13, %v2524_v1 }
0x15e3   :  { %2972 = vmatpush.msra.mxu0 %v7044_v2  ;;  %2992 = vmatpush.msra.mxu1 %v5385_v41  ;;  %v5388_v2 = vld [vmem:[%s8304_s28 + $0x48] sm:$0xff] }
0x15e5   :  { %2973 = vmatpush.msra.mxu0 %v7051_v6  ;;  %2993 = vmatpush.msra.mxu1 %v5386_v35  ;;  %v5389_v6 = vld [vmem:[%s8304_s28 + $0x38] sm:$0xff] }
0x15e7   :  { %2974 = vmatpush.msra.mxu0 %v7058_v47  ;;  %2994 = vmatpush.msra.mxu1 %v5387_v18  ;;  %v5390_v47 = vld [vmem:[%s8304_s28 + $0x28] sm:$0xff] }
0x15e9   :  { %2975 = vmatpush.msra.mxu0 %v7065_v42  ;;  %2995 = vmatpush.msra.mxu1 %v5388_v2  ;;  %v5391_v42 = vld [vmem:[%s8304_s28 + $0x10] sm:$0xff] }
0x15eb   :  { %2976 = vmatpush.msra.mxu0 %v7072_v40  ;;  %2996 = vmatpush.msra.mxu1 %v5389_v6  ;;  %v5392_v40 = vld [vmem:[%s8304_s28 + $0x18] sm:$0xff] }
0x15ed   :  { %2977 = vmatpush.msra.mxu0 %v7079_v50  ;;  %2997 = vmatpush.msra.mxu1 %v5390_v47  ;;  %v2773_v50 = vsub.f32 1.0, %v2765_v13 }
0x15ef   :  { %2978 = vmatpush.msra.mxu0 %v5391_v42  ;;  %2998 = vmatpush.msra.mxu1 %v5392_v40 }
0x15f1   :  { %2979 = vmatpush.msra.mxu0 %v5393_v36  ;;  %2999 = vmatpush.msra.mxu1 %v6845_v53 }
0x15fb   :  { %v2776_v19 = vpop.permute.xlu2 %2775 }
0x15fc   :  { %v2778_v12 = vmul.f32 %v2776_v19, %v2773_v50 }
0x15fe   :  { %v7171_v7 = vadd.f32 %v2781_v26, %v2778_v12 }
0x1600   :  { %v2874_v11 = vrot.slane %v7171_v7, 4 }
0x1602   :  { %2875 = vrot.lane.b32.xlu1 %v2874_v11, %s5439_s8 }
0x165f   :  { %v2631_v9 = vpop.f32.mrf.mxu0  ;;  %v2651_v49 = vpop.f32.mrf.mxu1 }
0x1660   :  { %v2632_v23 = vadd.f32 %v2631_v9, %v5931_v5  ;;  %v2652_v43 = vadd.f32 %v2651_v49, %v5969_v0 }
0x1662   :  { %v2655_v17 = vrot.slane %v2632_v23, 6  ;;  %v2678_v22 = vrot.slane %v2652_v43, 6 }
0x1664   :  { %v2657_v24 = vadd.f32 %v2655_v17, %v7093_v48 }
0x1666   :  { %v4941_v10 = vmul.f32 -1.442695, %v2657_v24 }
0x1668   :  { %5181 = vpow2.f32 %v4941_v10 }
0x166e   :  { %v5182_v53 = vpop.eup %5181 }
0x166f   :  { %v2661_v34 = vadd.f32 1.0, %v5182_v53 }
0x1671   :  { %5183 = vrcp.f32 %v2661_v34  ;;  %v2673_v62 = vand.u32 2147483648, %v2661_v34  ;;  %v2671_v29 = vand.u32 2147483647, %v2661_v34  ;;  %vm2667_vm10 = vweird.f32 %v2661_v34 }
0x1673   :  { %v2674_v54 = vor.u32 1.1754944e-38, %v2673_v62  ;;  %vm2672_vm15 = vcmp.eq.f32.partialorder %v2671_v29, 8.507059e+37  ;;  %v8350_v62 = vld [vmem:[#allocation21_spill] sm:$0xff] }
0x1674   :  { %v2876_v20 = vpop.permute.xlu1 %2875 }
0x1675   :  { %4948 = vmatmul.msk.f32.vlgmr.msra.gmra.mxu2 %vm395_vm13, %v2876_v20  ;;  %4949 = vmatmul.msk.f32.vlgmr.msra.gmra.mxu3 %vm395_vm13, %v2876_v20 }
0x1677   :  { %v5184_v37 = vpop.eup %5183 }
0x1678   :  { %v2663_v14 = vmul.f32 %v5184_v37, %v2661_v34  ;;  %vm2668_vm3 = vweird.f32 %v5184_v37  ;;  %v2954_v34 = vrot.slane %v7171_v7, 2 }
0x1679   :  { %vm2669_vm11 = vmor %vm2667_vm10, %vm2668_vm3  ;;  %vm645_vm10 = vcmask 519170  }
0x167a   :  { %v2664_v21 = vsub.f32 1.0, %v2663_v14 }
0x167c   :  { %v2665_v25 = vmul.f32 %v5184_v37, %v2664_v21 }
0x167e   :  { %v2666_v3 = vadd.f32 %v5184_v37, %v2665_v25 }
0x1680   :  { %v2670_v45 = vsel %vm2669_vm11, %v5184_v37, %v2666_v3  ;;  %vm822_vm11 = vcmask 521220  }
0x1681   :  { %v2675_v61 = vsel %vm2672_vm15, %v2674_v54, %v2670_v45 }
0x1682   :  { %v2680_v31 = vmul.f32 %v2678_v22, %v2675_v61  ;;  %v2691_v60 = vmul.f32 %v2689_v27, %v2675_v61  ;;  %v2683_v16 = vsub.f32 1.0, %v2675_v61 }
0x1684   :  { %v2681_v38 = vadd.f32 %v2680_v31, %v7100_v46 }
0x1686   :  { %5185 = vtanh.f32 %v2681_v38 }
0x168c   :  { %v5186_v33 = vpop.eup %5185 }
0x168d   :  { %2685 = vrot.lane.b32.xlu2 %v5186_v33, %s5439_s8 }
0x16e7   :  { %v2686_v4 = vpop.permute.xlu2 %2685 }
0x16e8   :  { %v2688_v59 = vmul.f32 %v2686_v4, %v2683_v16 }
0x16ea   :  { %v7183_v13 = vadd.f32 %v2691_v60, %v2688_v59 }
0x16ec   :  { %v2784_v51 = vrot.slane %v7183_v13, 2 }
0x16ee   :  { %2785 = vrot.lane.b32.xlu1 %v2784_v51, %s5439_s8 }
0x16f8   :  { %v2896_v52 = vpop.f32.mrf.mxu2  ;;  %v2916_v47 = vpop.f32.mrf.mxu3 }
0x16f9   :  { %v2897_v57 = vadd.f32 %v2896_v52, %v5950_v28  ;;  %v2917_v36 = vadd.f32 %v2916_v47, %v5964_v63 }
0x16fb   :  { %v2920_v55 = vrot.slane %v2897_v57, 6  ;;  %v2943_v11 = vrot.slane %v2917_v36, 6 }
0x16fd   :  { %v2922_v1 = vadd.f32 %v2920_v55, %v7021_v32 }
0x16ff   :  { %v4950_v41 = vmul.f32 -1.442695, %v2922_v1 }
0x1701   :  { %5187 = vpow2.f32 %v4950_v41 }
0x1707   :  { %v5188_v35 = vpop.eup %5187 }
0x1708   :  { %v2926_v18 = vadd.f32 1.0, %v5188_v35 }
0x170a   :  { %5189 = vrcp.f32 %v2926_v18  ;;  %v2938_v40 = vand.u32 2147483648, %v2926_v18  ;;  %v2936_v8 = vand.u32 2147483647, %v2926_v18  ;;  %vm2932_vm1 = vweird.f32 %v2926_v18 }
0x170c   :  { %v2939_v26 = vor.u32 1.1754944e-38, %v2938_v40  ;;  %vm2937_vm5 = vcmp.eq.f32.partialorder %v2936_v8, 8.507059e+37  ;;  %v2864_v40 = vrot.slane %v7183_v13, 6 }
0x1710   :  { %v5190_v2 = vpop.eup %5189 }
0x1711   :  { %v2928_v6 = vmul.f32 %v5190_v2, %v2926_v18  ;;  %vm2933_vm0 = vweird.f32 %v5190_v2 }
0x1712   :  { %vm2934_vm4 = vmor %vm2932_vm1, %vm2933_vm0 }
0x1713   :  { %v2929_v42 = vsub.f32 1.0, %v2928_v6  ;;  %v8351_v6 = vld [vmem:[#allocation22_spill] sm:$0xff] }
0x1715   :  { %v2930_v50 = vmul.f32 %v5190_v2, %v2929_v42 }
0x1717   :  { %v2931_v19 = vadd.f32 %v5190_v2, %v2930_v50 }
0x1719   :  { %v2935_v12 = vsel %vm2934_vm4, %v5190_v2, %v2931_v19 }
0x171a   :  { %v2940_v9 = vsel %vm2937_vm5, %v2939_v26, %v2935_v12  ;;  %vm999_vm5 = vcmask 523270  }
0x171b   :  { %v2945_v23 = vmul.f32 %v2943_v11, %v2940_v9  ;;  %v2948_v53 = vsub.f32 1.0, %v2940_v9  ;;  %v2956_v37 = vmul.f32 %v2954_v34, %v2940_v9 }
0x171d   :  { %v2946_v17 = vadd.f32 %v2945_v23, %v7035_v58 }
0x171f   :  { %5191 = vtanh.f32 %v2946_v17 }
0x1725   :  { %v5192_v24 = vpop.eup %5191 }
0x1726   :  { %2950 = vrot.lane.b32.xlu0 %v5192_v24, %s5439_s8 }
0x1760   :  { %v2786_v10 = vpop.permute.xlu1 %2785 }
0x1761   :  { %4945 = vmatmul.msk.f32.vlgmr.msrb.gmra.mxu0 %vm395_vm13, %v2786_v10  ;;  %4946 = vmatmul.msk.f32.vlgmr.msrb.gmra.mxu1 %vm395_vm13, %v2786_v10 }
0x1798   :  { %v2951_v20 = vpop.permute.xlu0 %2950 }
0x1799   :  { %v2953_v14 = vmul.f32 %v2951_v20, %v2948_v53 }
0x179b   :  { %v7195_v49 = vadd.f32 %v2956_v37, %v2953_v14 }
0x179d   :  { %v3049_v21 = vrot.slane %v7195_v49, 2 }
0x179f   :  { %3050 = vrot.lane.b32.xlu2 %v3049_v21, %s5439_s8 }
0x17a7   :  { %642 = vrot.lane.b32.xlu2 %v8350_v62, %s5439_s8 }
0x17de   :  { %v2806_v43 = vpop.f32.mrf.mxu0  ;;  %v2826_v31 = vpop.f32.mrf.mxu1 }
0x17df   :  { %v2807_v25 = vadd.f32 %v2806_v43, %v5931_v5  ;;  %v2827_v16 = vadd.f32 %v2826_v31, %v5969_v0  ;;  %v3158_v31 = vld [vmem:[%s8264_s10 + $0xd8] sm:$0xff] }
0x17e1   :  { %v2830_v29 = vrot.slane %v2807_v25, 4  ;;  %v2853_v55 = vrot.slane %v2827_v16, 4  ;;  %v7265_v16 = vld [vmem:[%s8265_s11 + $0x60] sm:$0xff] }
0x17e3   :  { %v2832_v3 = vadd.f32 %v2830_v29, %v7093_v48 }
0x17e5   :  { %v4947_v54 = vmul.f32 -1.442695, %v2832_v3 }
0x17e7   :  { %5193 = vpow2.f32 %v4947_v54 }
0x17ed   :  { %v5194_v27 = vpop.eup %5193 }
0x17ee   :  { %v2836_v45 = vadd.f32 1.0, %v5194_v27  ;;  %v8352_v27 = vld [vmem:[#allocation17_spill] sm:$0xff] }
0x17f0   :  { %5195 = vrcp.f32 %v2836_v45  ;;  %v2848_v33 = vand.u32 2147483648, %v2836_v45  ;;  %v2846_v59 = vand.u32 2147483647, %v2836_v45  ;;  %vm2842_vm7 = vweird.f32 %v2836_v45 }
0x17f2   :  { %v2849_v52 = vor.u32 1.1754944e-38, %v2848_v33  ;;  %vm2847_vm3 = vcmp.eq.f32.partialorder %v2846_v59, 8.507059e+37  ;;  %v7260_v33 = vld [vmem:[%s8265_s11 + $0x70] sm:$0xff]  ;;  %v3154_v59 = vld [vmem:[%s8264_s10 + $0xb8] sm:$0xff] }
0x17f3   :  { %3257 = vmatpush.msra.mxu2 %v7260_v33 }
0x17f5   :  { %3258 = vmatpush.msra.mxu2 %v7265_v16 }
0x17f6   :  { %v5196_v22 = vpop.eup %5195 }
0x17f7   :  { %v2838_v61 = vmul.f32 %v5196_v22, %v2836_v45  ;;  %vm2843_vm6 = vweird.f32 %v5196_v22  ;;  %v3161_v45 = vld [vmem:[%s8264_s10 + $0xf0] sm:$0xff] }
0x17f8   :  { %vm2844_vm8 = vmor %vm2842_vm7, %vm2843_vm6  ;;  %3169 = vmatpush.msrb.mxu0 %v3161_v45 }
0x17f9   :  { %v2839_v60 = vsub.f32 1.0, %v2838_v61  ;;  %v3051_v38 = vpop.permute.xlu2 %3050  ;;  %v3157_v61 = vld [vmem:[%s8264_s10 + $0xd0] sm:$0xff] }
0x17fa   :  { %4954 = vmatmul.msk.f32.vlgmr.msrb.gmra.mxu2 %vm395_vm13, %v3051_v38  ;;  %4955 = vmatmul.msk.f32.vlgmr.msrb.gmra.mxu3 %vm395_vm13, %v3051_v38  ;;  %v3156_v38 = vld [vmem:[%s8264_s10 + $0xc8] sm:$0xff] }
0x17fb   :  { %v2840_v4 = vmul.f32 %v5196_v22, %v2839_v60  ;;  %v3155_v60 = vld [vmem:[%s8264_s10 + $0xc0] sm:$0xff] }
0x17fd   :  { %v2841_v51 = vadd.f32 %v5196_v22, %v2840_v4  ;;  %v3153_v4 = vld [vmem:[%s8264_s10 + $0xb0] sm:$0xff] }
0x17ff   :  { %v2845_v57 = vsel %vm2844_vm8, %v5196_v22, %v2841_v51  ;;  %v3159_v22 = vld [vmem:[%s8264_s10 + $0xe0] sm:$0xff] }
0x1800   :  { %v2850_v1 = vsel %vm2847_vm3, %v2849_v52, %v2845_v57  ;;  %3170 = vmatpush.msrb.mxu0 %v3159_v22  ;;  %v3151_v51 = vld [vmem:[%s8264_s10 + $0xa0] sm:$0xff]  ;;  %v3152_v52 = vld [vmem:[%s8264_s10 + $0xa8] sm:$0xff]  ;;  %v3149_v57 = vld [vmem:[%s8264_s10 + $0x90] sm:$0xff] }
0x1801   :  { %v2855_v41 = vmul.f32 %v2853_v55, %v2850_v1  ;;  %v643_v35 = vpop.permute.xlu2 %642  ;;  %v2858_v42 = vsub.f32 1.0, %v2850_v1  ;;  %v2866_v8 = vmul.f32 %v2864_v40, %v2850_v1  ;;  %v3150_v55 = vld [vmem:[%s8264_s10 + $0x98] sm:$0xff]  ;;  %v3144_v40 = vld [vmem:[%s8264_s10 + $0x68] sm:$0xff] }
0x1802   :  { %646 = vst.msk [vmem:[#allocation2] sm:$0xc] %vm645_vm10, %v643_v35  ;;  %3171 = vmatpush.msrb.mxu0 %v3157_v61  ;;  %v3148_v35 = vld [vmem:[%s8264_s10 + $0x88] sm:$0xff] }
0x1803   :  { %v2856_v18 = vadd.f32 %v2855_v41, %v7100_v46  ;;  %2958 = vst.msk [vmem:[#allocation2] sm:$0xc] %vm909_vm14, %v7195_v49  ;;  %v3147_v41 = vld [vmem:[%s8264_s10 + $0x80] sm:$0xff] }
0x1804   :  { %3172 = vmatpush.msrb.mxu0 %v3155_v60 }
0x1805   :  { %5197 = vtanh.f32 %v2856_v18  ;;  %v7298_v18 = vld [vmem:[%s8265_s11 + $0x50] sm:$0xff] }
0x1806   :  { %3173 = vmatpush.msrb.mxu0 %v3153_v4  ;;  %3259 = vmatpush.msra.mxu2 %v7298_v18 }
0x1808   :  { %3174 = vmatpush.msrb.mxu0 %v3151_v51 }
0x180a   :  { %3175 = vmatpush.msrb.mxu0 %v3149_v57 }
0x180b   :  { %v5198_v2 = vpop.eup %5197 }
0x180c   :  { %2860 = vrot.lane.b32.xlu0 %v5198_v2, %s5439_s8  ;;  %3176 = vmatpush.msrb.mxu0 %v3147_v41  ;;  %v3145_v2 = vld [vmem:[%s8264_s10 + $0x70] sm:$0xff] }
0x180e   :  { %3177 = vmatpush.msrb.mxu0 %v3145_v2 }
0x1814   :  { %819 = vrot.lane.b32.xlu0 %v8351_v6, %s5439_s8  ;;  %v3146_v6 = vld [vmem:[%s8264_s10 + $0x78] sm:$0xff] }
0x187d   :  { %v3071_v47 = vpop.f32.mrf.mxu2  ;;  %v3091_v37 = vpop.f32.mrf.mxu3 }
0x187e   :  { %v3072_v36 = vadd.f32 %v3071_v47, %v5950_v28  ;;  %v2861_v50 = vpop.permute.xlu0 %2860  ;;  %v3092_v43 = vadd.f32 %v3091_v37, %v5964_v63  ;;  %v3162_v63 = vld [vmem:[%s8264_s10 + $0xf8] sm:$0xff]  ;;  %v7309_v47 = vld [vmem:[%s8265_s11 + $0x40] sm:$0xff] }
0x187f   :  { %v2863_v19 = vmul.f32 %v2861_v50, %v2858_v42  ;;  %3198 = vmatpush.msrb.mxu1 %v3162_v63  ;;  %v3143_v42 = vld [vmem:[%s8264_s10 + $0x60] sm:$0xff]  ;;  %3260 = vmatpush.msra.mxu2 %v7309_v47  ;;  %v3141_v50 = vld [vmem:[%s8264_s10 + $0x50] sm:$0xff]  ;;  %v7380_v37 = vld [vmem:[%s8265_s11 + $0x78] sm:$0xff] }
0x1880   :  { %v3094_v26 = vadd.f32 %v3072_v36, %v7021_v32  ;;  %v7321_v36 = vld [vmem:[%s8265_s11 + $0x30] sm:$0xff]  ;;  %3178 = vmatpush.msrb.mxu0 %v3143_v42  ;;  %3277 = vmatpush.msra.mxu3 %v7380_v37 }
0x1881   :  { %v7218_v12 = vadd.f32 %v2866_v8, %v2863_v19  ;;  %v3142_v8 = vld [vmem:[%s8264_s10 + $0x58] sm:$0xff]  ;;  %v7333_v19 = vld [vmem:[%s8265_s11 + $0x20] sm:$0xff]  ;;  %3261 = vmatpush.msra.mxu2 %v7321_v36 }
0x1882   :  { %v4956_v11 = vmul.f32 -1.442695, %v3094_v26  ;;  %v3139_v26 = vld [vmem:[%s8264_s10 + $0x40] sm:$0xff]  ;;  %3179 = vmatpush.msrb.mxu0 %v3141_v50 }
0x1883   :  { %v2959_v9 = vrot.slane %v7218_v12, 4  ;;  %3262 = vmatpush.msra.mxu2 %v7333_v19 }
0x1884   :  { %5199 = vpow2.f32 %v4956_v11  ;;  %v3140_v11 = vld [vmem:[%s8264_s10 + $0x48] sm:$0xff]  ;;  %3180 = vmatpush.msrb.mxu0 %v3139_v26 }
0x1885   :  { %2960 = vrot.lane.b32.xlu2 %v2959_v9, %s5439_s8  ;;  %v7345_v9 = vld [vmem:[%s8265_s11 + $0x10] sm:$0xff] }
0x1886   :  { %v820_v23 = vpop.permute.xlu0 %819  ;;  %3263 = vmatpush.msra.mxu2 %v7345_v9 }
0x1887   :  { %823 = vst.msk [vmem:[#allocation2] sm:$0x30] %vm822_vm11, %v820_v23  ;;  %v3137_v23 = vld [vmem:[%s8264_s10 + $0x30] sm:$0xff] }
0x1888   :  { %2783 = vst.msk [vmem:[#allocation2] sm:$0x30] %vm732_vm2, %v7171_v7  ;;  %3181 = vmatpush.msrb.mxu0 %v3137_v23 }
0x188a   :  { %v5200_v28 = vpop.eup %5199 }
0x188b   :  { %v3098_v17 = vadd.f32 1.0, %v5200_v28  ;;  %v3138_v28 = vld [vmem:[%s8264_s10 + $0x38] sm:$0xff] }
0x188d   :  { %5201 = vrcp.f32 %v3098_v17  ;;  %v3110_v53 = vand.u32 2147483648, %v3098_v17  ;;  %v3108_v20 = vand.u32 2147483647, %v3098_v17  ;;  %vm3104_vm0 = vweird.f32 %v3098_v17 }
0x188f   :  { %v3111_v62 = vor.u32 1.1754944e-38, %v3110_v53  ;;  %vm3109_vm4 = vcmp.eq.f32.partialorder %v3108_v20, 8.507059e+37  ;;  %v8353_v53 = vmov 0.0   ;;  %v3131_v20 = vld [vmem:[%s8264_s10] sm:$0xff] }
0x1893   :  { %v5202_v24 = vpop.eup %5201 }
0x1894   :  { %v3100_v32 = vmul.f32 %v5202_v24, %v3098_v17  ;;  %vm3105_vm15 = vweird.f32 %v5202_v24  ;;  %v7357_v17 = vld [vmem:[%s8265_s11] sm:$0xff] }
0x1895   :  { %vm3106_vm1 = vmor %vm3104_vm0, %vm3105_vm15  ;;  %3264 = vmatpush.msra.mxu2 %v7357_v17 }
0x1896   :  { %v3101_v10 = vsub.f32 1.0, %v3100_v32  ;;  %v3136_v32 = vld [vmem:[%s8264_s10 + $0x28] sm:$0xff]  ;;  %3265 = vmatmul.f32.vlgmr.msra.gmra.mxu2 %v8353_v53 }
0x1897   :  { %3333 = vmatpush.msrb.mxu2 %v7260_v33 }
0x1898   :  { %v3102_v34 = vmul.f32 %v5202_v24, %v3101_v10  ;;  %v3133_v10 = vld [vmem:[%s8264_s10 + $0x10] sm:$0xff] }
0x1899   :  { %3334 = vmatpush.msrb.mxu2 %v7265_v16 }
0x189a   :  { %v3103_v14 = vadd.f32 %v5202_v24, %v3102_v34  ;;  %v3134_v34 = vld [vmem:[%s8264_s10 + $0x18] sm:$0xff] }
0x189b   :  { %3335 = vmatpush.msrb.mxu2 %v7298_v18 }
0x189c   :  { %v3107_v25 = vsel %vm3106_vm1, %v5202_v24, %v3103_v14  ;;  %v3135_v24 = vld [vmem:[%s8264_s10 + $0x20] sm:$0xff]  ;;  %v7385_v14 = vld [vmem:[%s8265_s11 + $0x68] sm:$0xff] }
0x189d   :  { %v7226_v7 = vsel %vm3109_vm4, %v3111_v62, %v3107_v25  ;;  %3182 = vmatpush.msrb.mxu0 %v3135_v24  ;;  %v3132_v62 = vld [vmem:[%s8264_s10 + $0x8] sm:$0xff]  ;;  %3278 = vmatpush.msra.mxu3 %v7385_v14 }
0x189e   :  { %v3114_v29 = vmul.f32 %v7226_v7, %v3092_v43  ;;  %v7395_v43 = vld [vmem:[%s8265_s11 + $0x58] sm:$0xff]  ;;  %v7402_v25 = vld [vmem:[%s8265_s11 + $0x48] sm:$0xff]  ;;  %3336 = vmatpush.msrb.mxu2 %v7309_v47  ;;  %v3117_v45 = vsub.f32 1.0, %v7226_v7  ;;  %v3124_v22 = vmul.f32 %v7226_v7, %v3049_v21  ;;  %v3243_v7 = vld [vmem:[%s8267_s13] sm:$0x3]  ;;  %s4837_s13 = sshll.u32 %s8274_s20, 4  ;;  %s4838_s13 = int_to_ptr.hbm [resolvable:$true] %s4837_s13 }
0x189f   :  { %3183 = vmatpush.msrb.mxu0 %v3133_v10  ;;  %3279 = vmatpush.msra.mxu3 %v7395_v43  ;;  %v7507_v60 = vperm.slane %v3243_v7, 0  ;;  %v7516_v42 = vperm.slane %v3243_v7, 1 }
0x18a0   :  { %v3115_v3 = vadd.f32 %v3114_v29, %v7035_v58  ;;  %v3160_v58 = vld [vmem:[%s8264_s10 + $0xe8] sm:$0xff]  ;;  %v7410_v29 = vld [vmem:[%s8265_s11 + $0x38] sm:$0xff]  ;;  %3337 = vmatpush.msrb.mxu2 %v7321_v36 }
0x18a1   :  { %3199 = vmatpush.msrb.mxu1 %v3160_v58  ;;  %3184 = vmatpush.msrb.mxu0 %v3131_v20 }
0x18a2   :  { %5203 = vtanh.f32 %v3115_v3  ;;  %3280 = vmatpush.msra.mxu3 %v7402_v25  ;;  %v7419_v3 = vld [vmem:[%s8265_s11 + $0x28] sm:$0xff]  ;;  %3338 = vmatpush.msrb.mxu2 %v7333_v19 }
0x18a3   :  { %3200 = vmatpush.msrb.mxu1 %v3158_v31  ;;  %v3163_v31 = vld [vmem:[%s8266_s12] sm:$0x3] }
0x18a4   :  { %3281 = vmatpush.msra.mxu3 %v7410_v29  ;;  %3339 = vmatpush.msrb.mxu2 %v7345_v9  ;;  %v7509_v4 = vperm.slane %v3163_v31, 0  ;;  %v7518_v23 = vperm.slane %v3163_v31, 1 }
0x18a5   :  { %3201 = vmatpush.msrb.mxu1 %v3156_v38 }
0x18a6   :  { %3282 = vmatpush.msra.mxu3 %v7419_v3  ;;  %3340 = vmatpush.msrb.mxu2 %v7357_v17 }
0x18a7   :  { %3202 = vmatpush.msrb.mxu1 %v3154_v59 }
0x18a8   :  { %v5204_v54 = vpop.eup %5203  ;;  %3418 = vmatpush.msra.mxu2 %v7260_v33 }
0x18a9   :  { %3119 = vrot.lane.b32.xlu1 %v5204_v54, %s5439_s8  ;;  %3203 = vmatpush.msrb.mxu1 %v3152_v52  ;;  %v7428_v54 = vld [vmem:[%s8265_s11 + $0x18] sm:$0xff] }
0x18aa   :  { %3283 = vmatpush.msra.mxu3 %v7428_v54  ;;  %3419 = vmatpush.msra.mxu2 %v7265_v16 }
0x18ab   :  { %3204 = vmatpush.msrb.mxu1 %v3150_v55 }
0x18ac   :  { %3420 = vmatpush.msra.mxu2 %v7298_v18 }
0x18ad   :  { %3205 = vmatpush.msrb.mxu1 %v3148_v35 }
0x18ae   :  { %3421 = vmatpush.msra.mxu2 %v7309_v47 }
0x18af   :  { %3206 = vmatpush.msrb.mxu1 %v3146_v6 }
0x18b0   :  { %3422 = vmatpush.msra.mxu2 %v7321_v36 }
0x18b1   :  { %996 = vrot.lane.b32.xlu1 %v8352_v27, %s5439_s8  ;;  %3207 = vmatpush.msrb.mxu1 %v3144_v40  ;;  %v7437_v27 = vld [vmem:[%s8265_s11 + $0x8] sm:$0xff] }
0x18b2   :  { %3284 = vmatpush.msra.mxu3 %v7437_v27  ;;  %3423 = vmatpush.msra.mxu2 %v7333_v19 }
0x18b3   :  { %3208 = vmatpush.msrb.mxu1 %v3142_v8  ;;  %3285 = vmatmul.f32.vlgmr.msra.gmra.mxu3 %v8353_v53 }
0x18b4   :  { %3353 = vmatpush.msrb.mxu3 %v7380_v37  ;;  %3424 = vmatpush.msra.mxu2 %v7345_v9 }
0x18b5   :  { %3209 = vmatpush.msrb.mxu1 %v3140_v11 }
0x18b6   :  { %3354 = vmatpush.msrb.mxu3 %v7385_v14  ;;  %3425 = vmatpush.msra.mxu2 %v7357_v17 }
0x18b7   :  { %3210 = vmatpush.msrb.mxu1 %v3138_v28 }
0x18b8   :  { %3355 = vmatpush.msrb.mxu3 %v7395_v43 }
0x18b9   :  { %3211 = vmatpush.msrb.mxu1 %v3136_v32 }
0x18ba   :  { %3356 = vmatpush.msrb.mxu3 %v7402_v25 }
0x18bb   :  { %3212 = vmatpush.msrb.mxu1 %v3134_v34 }
0x18bc   :  { %3357 = vmatpush.msrb.mxu3 %v7410_v29 }
0x18bd   :  { %3213 = vmatpush.msrb.mxu1 %v3132_v62 }
0x18be   :  { %3358 = vmatpush.msrb.mxu3 %v7419_v3 }
0x18c0   :  { %3359 = vmatpush.msrb.mxu3 %v7428_v54 }
0x18c2   :  { %3360 = vmatpush.msrb.mxu3 %v7437_v27 }
0x18c4   :  { %3438 = vmatpush.msra.mxu3 %v7380_v37 }
0x18c6   :  { %3439 = vmatpush.msra.mxu3 %v7385_v14 }
0x18c8   :  { %3440 = vmatpush.msra.mxu3 %v7395_v43 }
0x18ca   :  { %3441 = vmatpush.msra.mxu3 %v7402_v25 }
0x18cc   :  { %3442 = vmatpush.msra.mxu3 %v7410_v29 }
0x18ce   :  { %3443 = vmatpush.msra.mxu3 %v7419_v3 }
0x18d0   :  { %3444 = vmatpush.msra.mxu3 %v7428_v54 }
0x18d2   :  { %3445 = vmatpush.msra.mxu3 %v7437_v27 }
0x18df   :  { %v2961_v1 = vpop.permute.xlu2 %2960 }
0x18e0   :  { %4951 = vmatmul.msk.f32.vlgmr.msra.gmra.mxu0 %vm395_vm13, %v2961_v1  ;;  %4952 = vmatmul.msk.f32.vlgmr.msra.gmra.mxu1 %vm395_vm13, %v2961_v1 }
0x18e1   :  { %3503 = vmatpush.msra.mxu0 %v7260_v33  ;;  %3523 = vmatpush.msra.mxu1 %v7380_v37 }
0x18e3   :  { %3504 = vmatpush.msra.mxu0 %v7265_v16  ;;  %3524 = vmatpush.msra.mxu1 %v7385_v14 }
0x18e5   :  { %3505 = vmatpush.msra.mxu0 %v7298_v18  ;;  %3525 = vmatpush.msra.mxu1 %v7395_v43 }
0x18e7   :  { %3506 = vmatpush.msra.mxu0 %v7309_v47  ;;  %3526 = vmatpush.msra.mxu1 %v7402_v25 }
0x18e9   :  { %3507 = vmatpush.msra.mxu0 %v7321_v36  ;;  %3527 = vmatpush.msra.mxu1 %v7410_v29 }
0x18eb   :  { %3508 = vmatpush.msra.mxu0 %v7333_v19  ;;  %3528 = vmatpush.msra.mxu1 %v7419_v3 }
0x18ed   :  { %3509 = vmatpush.msra.mxu0 %v7345_v9  ;;  %3529 = vmatpush.msra.mxu1 %v7428_v54 }
0x18ef   :  { %3510 = vmatpush.msra.mxu0 %v7357_v17  ;;  %3530 = vmatpush.msra.mxu1 %v7437_v27 }
0x1919   :  { %v3266_v38 = vpop.f32.mrf.mxu2 }
0x191a   :  { %v3267_v59 = vadd.f32 %v3266_v38, %v7507_v60 }
0x191b   :  { %v3120_v63 = vpop.permute.xlu1 %3119 }
0x191c   :  { %v3122_v58 = vmul.f32 %v3120_v63, %v3117_v45 }
0x191e   :  { %v3125_v61 = vadd.f32 %v3124_v22, %v3122_v58 }
0x1920   :  { %3126 = vst.msk [vmem:[#allocation2] sm:$0x3] %vm1079_vm9, %v3125_v61 }
0x1923   :  { %v997_v49 = vpop.permute.xlu1 %996 }
0x1924   :  { %1000 = vst.msk [vmem:[#allocation2] sm:$0xc0] %vm999_vm5, %v997_v49 }
0x1925   :  { %2611 = vst.msk [vmem:[#allocation2] sm:$0xc0] %vm558_vm12, %v7087_v44 }
0x192c   :  { %v3127_v21 = vld [vmem:[#allocation2] sm:$0xff] }
0x192d   :  { %3185 = vmatmul.f32.vlgmr.msrb.gmra.mxu0 %v3127_v21  ;;  %3214 = vmatmul.f32.vlgmr.msrb.gmra.mxu1 %v3127_v21 }
0x192e   :  { %3665 = vmatpush.msrb.mxu0 %v7260_v33  ;;  %3685 = vmatpush.msrb.mxu1 %v7380_v37 }
0x1930   :  { %3666 = vmatpush.msrb.mxu0 %v7265_v16  ;;  %3686 = vmatpush.msrb.mxu1 %v7385_v14 }
0x1932   :  { %3667 = vmatpush.msrb.mxu0 %v7298_v18  ;;  %3687 = vmatpush.msrb.mxu1 %v7395_v43 }
0x1934   :  { %3668 = vmatpush.msrb.mxu0 %v7309_v47  ;;  %3688 = vmatpush.msrb.mxu1 %v7402_v25 }
0x1936   :  { %3669 = vmatpush.msrb.mxu0 %v7321_v36  ;;  %3689 = vmatpush.msrb.mxu1 %v7410_v29  ;;  %v3286_v50 = vpop.f32.mrf.mxu3 }
0x1937   :  { %v3287_v28 = vadd.f32 %v3286_v50, %v7516_v42 }
0x1938   :  { %3670 = vmatpush.msrb.mxu0 %v7333_v19  ;;  %3690 = vmatpush.msrb.mxu1 %v7419_v3 }
0x193a   :  { %3671 = vmatpush.msrb.mxu0 %v7345_v9  ;;  %3691 = vmatpush.msrb.mxu1 %v7428_v54 }
0x193c   :  { %3672 = vmatpush.msrb.mxu0 %v7357_v17  ;;  %3692 = vmatpush.msrb.mxu1 %v7437_v27 }
0x195d   :  { %v2981_v44 = vpop.f32.mrf.mxu0  ;;  %v3001_v2 = vpop.f32.mrf.mxu1 }
0x195e   :  { %v2982_v58 = vadd.f32 %v2981_v44, %v5931_v5  ;;  %v3002_v5 = vadd.f32 %v3001_v2, %v5969_v0  ;;  %v8354_v0 = vld [vmem:[#allocation18_spill] sm:$0xff] }
0x1960   :  { %v3005_v61 = vrot.slane %v2982_v58, 2 }
0x1962   :  { %v3007_v49 = vadd.f32 %v3005_v61, %v7093_v48 }
0x1964   :  { %v4953_v21 = vmul.f32 -1.442695, %v3007_v49 }
0x19aa   :  { %v3186_v51 = vpop.f32.mrf.mxu0  ;;  %v3215_v32 = vpop.f32.mrf.mxu1 }
0x19ab   :  { %v7513_v52 = vadd.f32 %v3186_v51, %v7509_v4  ;;  %v7522_v62 = vadd.f32 %v3215_v32, %v7518_v23 }
0x19ad   :  { %v3289_v57 = vadd.f32 %v3267_v59, %v7513_v52 }
0x19af   :  { %v4957_v55 = vmul.f32 -1.442695, %v3289_v57 }
0x19b1   :  { %5205 = vpow2.f32 %v4957_v55 }
0x19b7   :  { %v5206_v1 = vpop.eup %5205 }
0x19b8   :  { %v3293_v41 = vadd.f32 1.0, %v5206_v1 }
0x19ba   :  { %5207 = vrcp.f32 %v3293_v41  ;;  %v3305_v8 = vand.u32 2147483648, %v3293_v41  ;;  %v3303_v11 = vand.u32 2147483647, %v3293_v41  ;;  %vm3299_vm6 = vweird.f32 %v3293_v41 }
0x19bc   :  { %v3306_v10 = vor.u32 1.1754944e-38, %v3305_v8  ;;  %vm3304_vm8 = vcmp.eq.f32.partialorder %v3303_v11, 8.507059e+37 }
0x19c0   :  { %v5208_v35 = vpop.eup %5207 }
0x19c1   :  { %v3295_v6 = vmul.f32 %v5208_v35, %v3293_v41  ;;  %vm3300_vm9 = vweird.f32 %v5208_v35 }
0x19c2   :  { %vm3301_vm7 = vmor %vm3299_vm6, %vm3300_vm9 }
0x19c3   :  { %v3296_v40 = vsub.f32 1.0, %v3295_v6  ;;  %v3028_v6 = vrot.slane %v3002_v5, 2 }
0x19c5   :  { %v3297_v26 = vmul.f32 %v5208_v35, %v3296_v40 }
0x19c7   :  { %v3298_v24 = vadd.f32 %v5208_v35, %v3297_v26 }
0x19c9   :  { %v3302_v34 = vsel %vm3301_vm7, %v5208_v35, %v3298_v24 }
0x19ca   :  { %v3307_v20 = vsel %vm3304_vm8, %v3306_v10, %v3302_v34 }
0x19cb   :  { %v3309_v45 = vmul.f32 %v3307_v20, %v3287_v28  ;;  %v3312_v50 = vsub.f32 1.0, %v3307_v20  ;;  %v3318_v26 = vmul.f32 0.0, %v3307_v20 }
0x19cd   :  { %v3310_v63 = vadd.f32 %v3309_v45, %v7522_v62 }
0x19cf   :  { %5209 = vtanh.f32 %v3310_v63  ;;  %v8355_v63 = vld [vmem:[#allocation12_spill] sm:$0xff] }
0x19d0   :  { %5211 = vpow2.f32 %v4953_v21 }
0x19d5   :  { %v5210_v22 = vpop.eup %5209 }
0x19d6   :  { %3314 = vrot.lane.b32.xlu0 %v5210_v22, %s5439_s8  ;;  %v5212_v7 = vpop.eup %5211 }
0x19d7   :  { %v3011_v31 = vadd.f32 1.0, %v5212_v7 }
0x19d9   :  { %5213 = vrcp.f32 %v3011_v31  ;;  %v3023_v1 = vand.u32 2147483648, %v3011_v31  ;;  %vm3017_vm15 = vweird.f32 %v3011_v31  ;;  %v3021_v41 = vand.u32 2147483647, %v3011_v31 }
0x19db   :  { %v3024_v35 = vor.u32 1.1754944e-38, %v3023_v1  ;;  %vm3022_vm1 = vcmp.eq.f32.partialorder %v3021_v41, 8.507059e+37 }
0x19df   :  { %v5214_v38 = vpop.eup %5213 }
0x19e0   :  { %v3013_v59 = vmul.f32 %v5214_v38, %v3011_v31  ;;  %vm3018_vm3 = vweird.f32 %v5214_v38 }
0x19e1   :  { %vm3019_vm0 = vmor %vm3017_vm15, %vm3018_vm3 }
0x19e2   :  { %v3014_v51 = vsub.f32 1.0, %v3013_v59 }
0x19e4   :  { %v3015_v57 = vmul.f32 %v5214_v38, %v3014_v51 }
0x19e6   :  { %v3016_v55 = vadd.f32 %v5214_v38, %v3015_v57 }
0x19e8   :  { %v3020_v44 = vsel %vm3019_vm0, %v5214_v38, %v3016_v55 }
0x19e9   :  { %v3025_v48 = vsel %vm3022_vm1, %v3024_v35, %v3020_v44 }
0x19ea   :  { %v3030_v40 = vmul.f32 %v3028_v6, %v3025_v48 }
0x19ec   :  { %v3031_v28 = vadd.f32 %v3030_v40, %v7100_v46  ;;  %v3039_v46 = vrot.slane %v7218_v12, 6 }
0x19ee   :  { %5215 = vtanh.f32 %v3031_v28  ;;  %v3041_v34 = vmul.f32 %v3039_v46, %v3025_v48 }
0x19f4   :  { %v5216_v32 = vpop.eup %5215 }
0x1a48   :  { %v3315_v8 = vpop.permute.xlu0 %3314 }
0x1a49   :  { %v3317_v11 = vmul.f32 %v3315_v8, %v3312_v50 }
0x1a4b   :  { %v7530_v24 = vadd.f32 %v3318_v26, %v3317_v11 }
0x1a4d   :  { %3321 = vrot.lane.b32.xlu1 %v7530_v24, %s5439_s8  ;;  %v3400_v40 = vrot.slane %v7530_v24, 6  ;;  %v8356_v24 = vld [vmem:[#allocation14_spill] sm:$0xff] }
0x1a55   :  { %3035 = vrot.lane.b32.xlu1 %v5216_v32, %s5439_s8 }
0x1a5d   :  { %1505 = vrot.lane.b32.xlu1 %v8354_v0, %s5439_s8 }
0x1a65   :  { %2187 = vrot.lane.b32.xlu1 %v6962_v15, %s5439_s8  ;;  %v3033_v15 = vsub.f32 1.0, %v3025_v48 }
0x1a6d   :  { %2869 = vrot.lane.b32.xlu1 %v7218_v12, %s5439_s8 }
0x1abf   :  { %v3322_v2 = vpop.permute.xlu1 %3321 }
0x1ac0   :  { %4958 = vmatmul.msk.f32.vlgmr.msrb.gmra.mxu2 %vm395_vm13, %v3322_v2  ;;  %4959 = vmatmul.msk.f32.vlgmr.msrb.gmra.mxu3 %vm395_vm13, %v3322_v2 }
0x1ac1   :  { %3588 = vmatpush.msrb.mxu2 %v7260_v33  ;;  %3608 = vmatpush.msrb.mxu3 %v7380_v37 }
0x1ac3   :  { %3589 = vmatpush.msrb.mxu2 %v7265_v16  ;;  %3609 = vmatpush.msrb.mxu3 %v7385_v14 }
0x1ac5   :  { %3590 = vmatpush.msrb.mxu2 %v7298_v18  ;;  %3610 = vmatpush.msrb.mxu3 %v7395_v43 }
0x1ac7   :  { %v3036_v10 = vpop.permute.xlu1 %3035  ;;  %3591 = vmatpush.msrb.mxu2 %v7309_v47  ;;  %3611 = vmatpush.msrb.mxu3 %v7402_v25 }
0x1ac8   :  { %v3038_v20 = vmul.f32 %v3036_v10, %v3033_v15 }
0x1ac9   :  { %3592 = vmatpush.msrb.mxu2 %v7321_v36  ;;  %3612 = vmatpush.msrb.mxu3 %v7410_v29 }
0x1aca   :  { %v7554_v45 = vadd.f32 %v3041_v34, %v3038_v20 }
0x1acb   :  { %3593 = vmatpush.msrb.mxu2 %v7333_v19  ;;  %3613 = vmatpush.msrb.mxu3 %v7419_v3 }
0x1acd   :  { %3594 = vmatpush.msrb.mxu2 %v7345_v9  ;;  %3614 = vmatpush.msrb.mxu3 %v7428_v54 }
0x1acf   :  { %v1506_v12 = vpop.permute.xlu1 %1505  ;;  %3595 = vmatpush.msrb.mxu2 %v7357_v17  ;;  %3615 = vmatpush.msrb.mxu3 %v7437_v27 }
0x1ad0   :  { %1508 = vst.msk [vmem:[#allocation2 + $0x8] sm:$0x30] %vm822_vm11, %v1506_v12 }
0x1ad1   :  { %2101 = vst.msk [vmem:[#allocation2 + $0x8] sm:$0x30] %vm732_vm2, %v8355_v63 }
0x1ad7   :  { %v2188_v22 = vpop.permute.xlu1 %2187 }
0x1ad8   :  { %2190 = vst.msk [vmem:[#allocation2 + $0x10] sm:$0x30] %vm822_vm11, %v2188_v22 }
0x1adf   :  { %v2870_v58 = vpop.permute.xlu1 %2869 }
0x1ae0   :  { %2872 = vst.msk [vmem:[#allocation2 + $0x18] sm:$0x30] %vm822_vm11, %v2870_v58 }
0x1b43   :  { %v3342_v61 = vpop.f32.mrf.mxu2  ;;  %v3362_v55 = vpop.f32.mrf.mxu3 }
0x1b44   :  { %v3343_v49 = vadd.f32 %v3342_v61, %v7507_v60  ;;  %v3363_v5 = vadd.f32 %v3362_v55, %v7516_v42 }
0x1b46   :  { %v3366_v21 = vrot.slane %v3343_v49, 6  ;;  %v3389_v8 = vrot.slane %v3363_v5, 6 }
0x1b48   :  { %v3368_v7 = vadd.f32 %v3366_v21, %v7513_v52 }
0x1b4a   :  { %v4960_v31 = vmul.f32 -1.442695, %v3368_v7 }
0x1b4c   :  { %5217 = vpow2.f32 %v4960_v31 }
0x1b52   :  { %v5218_v38 = vpop.eup %5217 }
0x1b53   :  { %v3372_v59 = vadd.f32 1.0, %v5218_v38 }
0x1b55   :  { %5219 = vrcp.f32 %v3372_v59  ;;  %v3384_v41 = vand.u32 2147483648, %v3372_v59  ;;  %v3382_v35 = vand.u32 2147483647, %v3372_v59  ;;  %vm3378_vm11 = vweird.f32 %v3372_v59 }
0x1b57   :  { %v3385_v6 = vor.u32 1.1754944e-38, %v3384_v41  ;;  %vm3383_vm9 = vcmp.eq.f32.partialorder %v3382_v35, 8.507059e+37 }
0x1b5b   :  { %v5220_v51 = vpop.eup %5219 }
0x1b5c   :  { %v3374_v57 = vmul.f32 %v5220_v51, %v3372_v59  ;;  %vm3379_vm2 = vweird.f32 %v5220_v51 }
0x1b5d   :  { %vm3380_vm4 = vmor %vm3378_vm11, %vm3379_vm2 }
0x1b5e   :  { %v3375_v1 = vsub.f32 1.0, %v3374_v57 }
0x1b60   :  { %v3376_v44 = vmul.f32 %v5220_v51, %v3375_v1 }
0x1b62   :  { %v3377_v48 = vadd.f32 %v5220_v51, %v3376_v44 }
0x1b64   :  { %v3381_v50 = vsel %vm3380_vm4, %v5220_v51, %v3377_v48 }
0x1b65   :  { %v3386_v26 = vsel %vm3383_vm9, %v3385_v6, %v3381_v50 }
0x1b66   :  { %v3391_v11 = vmul.f32 %v3389_v8, %v3386_v26  ;;  %v3402_v28 = vmul.f32 %v3400_v40, %v3386_v26  ;;  %v3394_v2 = vsub.f32 1.0, %v3386_v26 }
0x1b68   :  { %v3392_v32 = vadd.f32 %v3391_v11, %v7522_v62  ;;  %v8357_v11 = vld [vmem:[#allocation10_spill] sm:$0xff] }
0x1b6a   :  { %5221 = vtanh.f32 %v3392_v32 }
0x1b70   :  { %v5222_v0 = vpop.eup %5221 }
0x1b71   :  { %3396 = vrot.lane.b32.xlu2 %v5222_v0, %s5439_s8 }
0x1bcb   :  { %v3397_v15 = vpop.permute.xlu2 %3396 }
0x1bcc   :  { %v3399_v46 = vmul.f32 %v3397_v15, %v3394_v2 }
0x1bce   :  { %v3403_v10 = vadd.f32 %v3402_v28, %v3399_v46 }
0x1bd0   :  { %v3405_v34 = vrot.slane %v3403_v10, 2  ;;  %v3485_v44 = vrot.slane %v3403_v10, 6  ;;  %v8358_v10 = vld [vmem:[#allocation19_spill] sm:$0xff] }
0x1bd2   :  { %3406 = vrot.lane.b32.xlu0 %v3405_v34, %s5439_s8 }
0x1bda   :  { %1330 = vrot.lane.b32.xlu0 %v8356_v24, %s5439_s8 }
0x1be2   :  { %2012 = vrot.lane.b32.xlu0 %v6904_v56, %s5439_s8 }
0x1bea   :  { %2694 = vrot.lane.b32.xlu0 %v7183_v13, %s5439_s8 }
0x1c44   :  { %v3407_v20 = vpop.permute.xlu0 %3406 }
0x1c45   :  { %4961 = vmatmul.msk.f32.vlgmr.msra.gmra.mxu2 %vm395_vm13, %v3407_v20  ;;  %4962 = vmatmul.msk.f32.vlgmr.msra.gmra.mxu3 %vm395_vm13, %v3407_v20 }
0x1c46   :  { %3750 = vmatpush.msra.mxu2 %v7260_v33  ;;  %3770 = vmatpush.msra.mxu3 %v7380_v37 }
0x1c48   :  { %3751 = vmatpush.msra.mxu2 %v7265_v16  ;;  %3771 = vmatpush.msra.mxu3 %v7385_v14 }
0x1c4a   :  { %3752 = vmatpush.msra.mxu2 %v7298_v18  ;;  %3772 = vmatpush.msra.mxu3 %v7395_v43 }
0x1c4c   :  { %v1331_v56 = vpop.permute.xlu0 %1330  ;;  %3753 = vmatpush.msra.mxu2 %v7309_v47  ;;  %3773 = vmatpush.msra.mxu3 %v7402_v25 }
0x1c4d   :  { %1333 = vst.msk [vmem:[#allocation2 + $0x8] sm:$0xc] %vm645_vm10, %v1331_v56 }
0x1c4e   :  { %2276 = vst.msk [vmem:[#allocation2 + $0x8] sm:$0xc] %vm909_vm14, %v6924_v39  ;;  %3754 = vmatpush.msra.mxu2 %v7321_v36  ;;  %3774 = vmatpush.msra.mxu3 %v7410_v29 }
0x1c50   :  { %3755 = vmatpush.msra.mxu2 %v7333_v19  ;;  %3775 = vmatpush.msra.mxu3 %v7419_v3 }
0x1c52   :  { %3756 = vmatpush.msra.mxu2 %v7345_v9  ;;  %3776 = vmatpush.msra.mxu3 %v7428_v54 }
0x1c54   :  { %v2013_v13 = vpop.permute.xlu0 %2012  ;;  %3757 = vmatpush.msra.mxu2 %v7357_v17  ;;  %3777 = vmatpush.msra.mxu3 %v7437_v27 }
0x1c55   :  { %2015 = vst.msk [vmem:[#allocation2 + $0x10] sm:$0xc] %vm645_vm10, %v2013_v13 }
0x1c5c   :  { %v2695_v39 = vpop.permute.xlu0 %2694 }
0x1c5d   :  { %2697 = vst.msk [vmem:[#allocation2 + $0x18] sm:$0xc] %vm645_vm10, %v2695_v39 }
0x1cc8   :  { %v3427_v12 = vpop.f32.mrf.mxu2  ;;  %v3447_v38 = vpop.f32.mrf.mxu3 }
0x1cc9   :  { %v3428_v63 = vadd.f32 %v3427_v12, %v7507_v60  ;;  %v3448_v57 = vadd.f32 %v3447_v38, %v7516_v42 }
0x1ccb   :  { %v3451_v22 = vrot.slane %v3428_v63, 4  ;;  %v3474_v48 = vrot.slane %v3448_v57, 4 }
0x1ccd   :  { %v3453_v58 = vadd.f32 %v3451_v22, %v7513_v52 }
0x1ccf   :  { %v4963_v61 = vmul.f32 -1.442695, %v3453_v58 }
0x1cd1   :  { %5223 = vpow2.f32 %v4963_v61 }
0x1cd7   :  { %v5224_v49 = vpop.eup %5223 }
0x1cd8   :  { %v3457_v21 = vadd.f32 1.0, %v5224_v49 }
0x1cda   :  { %5225 = vrcp.f32 %v3457_v21  ;;  %v3469_v51 = vand.u32 2147483648, %v3457_v21  ;;  %v3467_v1 = vand.u32 2147483647, %v3457_v21  ;;  %vm3463_vm10 = vweird.f32 %v3457_v21 }
0x1cdc   :  { %v3470_v5 = vor.u32 1.1754944e-38, %v3469_v51  ;;  %vm3468_vm7 = vcmp.eq.f32.partialorder %v3467_v1, 8.507059e+37 }
0x1ce0   :  { %v5226_v7 = vpop.eup %5225 }
0x1ce1   :  { %v3459_v31 = vmul.f32 %v5226_v7, %v3457_v21  ;;  %vm3464_vm14 = vweird.f32 %v5226_v7 }
0x1ce2   :  { %vm3465_vm6 = vmor %vm3463_vm10, %vm3464_vm14 }
0x1ce3   :  { %v3460_v59 = vsub.f32 1.0, %v3459_v31 }
0x1ce5   :  { %v3461_v55 = vmul.f32 %v5226_v7, %v3460_v59 }
0x1ce7   :  { %v3462_v41 = vadd.f32 %v5226_v7, %v3461_v55 }
0x1ce9   :  { %v3466_v35 = vsel %vm3465_vm6, %v5226_v7, %v3462_v41 }
0x1cea   :  { %v3471_v6 = vsel %vm3468_vm7, %v3470_v5, %v3466_v35 }
0x1ceb   :  { %v3476_v40 = vmul.f32 %v3474_v48, %v3471_v6  ;;  %v3487_v50 = vmul.f32 %v3485_v44, %v3471_v6  ;;  %v3479_v28 = vsub.f32 1.0, %v3471_v6 }
0x1ced   :  { %v3477_v8 = vadd.f32 %v3476_v40, %v7522_v62 }
0x1cef   :  { %5227 = vtanh.f32 %v3477_v8 }
0x1cf5   :  { %v5228_v26 = vpop.eup %5227 }
0x1cf6   :  { %3481 = vrot.lane.b32.xlu2 %v5228_v26, %s5439_s8 }
0x1cfe   :  { %1680 = vrot.lane.b32.xlu2 %v8357_v11, %s5439_s8 }
0x1d06   :  { %2362 = vrot.lane.b32.xlu2 %v7025_v30, %s5439_s8 }
0x1d0e   :  { %3044 = vrot.lane.b32.xlu2 %v7554_v45, %s5439_s8 }
0x1d50   :  { %v3482_v32 = vpop.permute.xlu2 %3481 }
0x1d51   :  { %v3484_v0 = vmul.f32 %v3482_v32, %v3479_v28 }
0x1d53   :  { %v7614_v2 = vadd.f32 %v3487_v50, %v3484_v0 }
0x1d55   :  { %v3490_v15 = vrot.slane %v7614_v2, 4  ;;  %v3570_v6 = vrot.slane %v7614_v2, 6 }
0x1d57   :  { %3491 = vrot.lane.b32.xlu0 %v3490_v15, %s5439_s8 }
0x1d58   :  { %v1681_v46 = vpop.permute.xlu2 %1680 }
0x1d59   :  { %1683 = vst.msk [vmem:[#allocation2 + $0x8] sm:$0xc0] %vm999_vm5, %v1681_v46 }
0x1d5a   :  { %1929 = vst.msk [vmem:[#allocation2 + $0x8] sm:$0xc0] %vm558_vm12, %v8358_v10 }
0x1d60   :  { %v2363_v34 = vpop.permute.xlu2 %2362 }
0x1d61   :  { %2365 = vst.msk [vmem:[#allocation2 + $0x10] sm:$0xc0] %vm999_vm5, %v2363_v34  ;;  %v3128_v30 = vld [vmem:[#allocation2 + $0x8] sm:$0xff] }
0x1d62   :  { %3188 = vmatmul.f32.gmra.mxu0 %v3128_v30  ;;  %3217 = vmatmul.f32.gmra.mxu1 %v3128_v30 }
0x1d68   :  { %v3045_v45 = vpop.permute.xlu2 %3044  ;;  %v3129_v24 = vld [vmem:[#allocation2 + $0x10] sm:$0xff] }
0x1d69   :  { %3047 = vst.msk [vmem:[#allocation2 + $0x18] sm:$0xc0] %vm999_vm5, %v3045_v45 }
0x1d6a   :  { %3191 = vmatmul.f32.gmra.mxu0 %v3129_v24  ;;  %3220 = vmatmul.f32.gmra.mxu1 %v3129_v24 }
0x1d70   :  { %v3130_v20 = vld [vmem:[#allocation2 + $0x18] sm:$0xff] }
0x1d72   :  { %3194 = vmatmul.f32.gmra.mxu0 %v3130_v20  ;;  %3223 = vmatmul.f32.gmra.mxu1 %v3130_v20 }
0x1dc9   :  { %v3492_v56 = vpop.permute.xlu0 %3491 }
0x1dca   :  { %4964 = vmatmul.msk.f32.vlgmr.msra.gmra.mxu0 %vm395_vm13, %v3492_v56  ;;  %4965 = vmatmul.msk.f32.vlgmr.msra.gmra.mxu1 %vm395_vm13, %v3492_v56 }
0x1dcb   :  { %3835 = vmatpush.msra.mxu0 %v7260_v33  ;;  %3855 = vmatpush.msra.mxu1 %v7380_v37 }
0x1dcd   :  { %3836 = vmatpush.msra.mxu0 %v7265_v16  ;;  %3856 = vmatpush.msra.mxu1 %v7385_v14 }
0x1dcf   :  { %3837 = vmatpush.msra.mxu0 %v7298_v18  ;;  %3857 = vmatpush.msra.mxu1 %v7395_v43 }
0x1dd1   :  { %3838 = vmatpush.msra.mxu0 %v7309_v47  ;;  %3858 = vmatpush.msra.mxu1 %v7402_v25 }
0x1dd3   :  { %3839 = vmatpush.msra.mxu0 %v7321_v36  ;;  %3859 = vmatpush.msra.mxu1 %v7410_v29 }
0x1dd5   :  { %3840 = vmatpush.msra.mxu0 %v7333_v19  ;;  %3860 = vmatpush.msra.mxu1 %v7419_v3 }
0x1dd7   :  { %3841 = vmatpush.msra.mxu0 %v7345_v9  ;;  %3861 = vmatpush.msra.mxu1 %v7428_v54 }
0x1dd9   :  { %3842 = vmatpush.msra.mxu0 %v7357_v17  ;;  %3862 = vmatpush.msra.mxu1 %v7437_v27 }
0x1ddf   :  { %v7641_v13 = vpop.f32.mrf.mxu0  ;;  %v7647_v63 = vpop.f32.mrf.mxu1 }
0x1de7   :  { %v7643_v39 = vpop.f32.mrf.mxu0  ;;  %v7651_v7 = vpop.f32.mrf.mxu1 }
0x1def   :  { %v7645_v12 = vpop.f32.mrf.mxu0  ;;  %v7653_v59 = vpop.f32.mrf.mxu1 }
0x1e47   :  { %v3512_v22 = vpop.f32.mrf.mxu0  ;;  %v3532_v55 = vpop.f32.mrf.mxu1 }
0x1e48   :  { %v3513_v58 = vadd.f32 %v3512_v22, %v7507_v60  ;;  %v3533_v5 = vadd.f32 %v3532_v55, %v7516_v42 }
0x1e4a   :  { %v3536_v61 = vrot.slane %v3513_v58, 2  ;;  %v3559_v50 = vrot.slane %v3533_v5, 2 }
0x1e4c   :  { %v3538_v49 = vadd.f32 %v3536_v61, %v7513_v52 }
0x1e4e   :  { %v4966_v21 = vmul.f32 -1.442695, %v3538_v49 }
0x1e50   :  { %5229 = vpow2.f32 %v4966_v21 }
0x1e56   :  { %v5230_v31 = vpop.eup %5229 }
0x1e57   :  { %v3542_v38 = vadd.f32 1.0, %v5230_v31 }
0x1e59   :  { %5231 = vrcp.f32 %v3542_v38  ;;  %v3554_v41 = vand.u32 2147483648, %v3542_v38  ;;  %v3552_v35 = vand.u32 2147483647, %v3542_v38  ;;  %vm3548_vm5 = vweird.f32 %v3542_v38 }
0x1e5b   :  { %v3555_v48 = vor.u32 1.1754944e-38, %v3554_v41  ;;  %vm3553_vm3 = vcmp.eq.f32.partialorder %v3552_v35, 8.507059e+37 }
0x1e5f   :  { %v5232_v51 = vpop.eup %5231 }
0x1e60   :  { %v3544_v57 = vmul.f32 %v5232_v51, %v3542_v38  ;;  %vm3549_vm12 = vweird.f32 %v5232_v51 }
0x1e61   :  { %vm3550_vm8 = vmor %vm3548_vm5, %vm3549_vm12 }
0x1e62   :  { %v3545_v1 = vsub.f32 1.0, %v3544_v57 }
0x1e64   :  { %v3546_v44 = vmul.f32 %v5232_v51, %v3545_v1  ;;  %v7687_v1 = vadd.f32 %v7647_v63, %v7518_v23  ;;  %v7697_v63 = vld [vmem:[%s8265_s11 + $0x70] sm:$0xff] }
0x1e66   :  { %v3547_v52 = vadd.f32 %v5232_v51, %v3546_v44 }
0x1e68   :  { %v3551_v40 = vsel %vm3550_vm8, %v5232_v51, %v3547_v52 }
0x1e69   :  { %v3556_v8 = vsel %vm3553_vm3, %v3555_v48, %v3551_v40 }
0x1e6a   :  { %v3561_v26 = vmul.f32 %v3559_v50, %v3556_v8  ;;  %v3572_v11 = vmul.f32 %v3570_v6, %v3556_v8  ;;  %v3564_v0 = vsub.f32 1.0, %v3556_v8  ;;  %v7704_v8 = vld [vmem:[%s8265_s11 + $0x60] sm:$0xff] }
0x1e6c   :  { %v3562_v28 = vadd.f32 %v3561_v26, %v7522_v62 }
0x1e6e   :  { %5233 = vtanh.f32 %v3562_v28 }
0x1e74   :  { %v5234_v32 = vpop.eup %5233 }
0x1e75   :  { %3566 = vrot.lane.b32.xlu1 %v5234_v32, %s5439_s8 }
0x1ee7   :  { %v3567_v15 = vpop.permute.xlu1 %3566 }
0x1ee8   :  { %v3569_v46 = vmul.f32 %v3567_v15, %v3564_v0 }
0x1eea   :  { %v3573_v10 = vadd.f32 %v3572_v11, %v3569_v46 }
0x1eec   :  { %v3575_v34 = vrot.slane %v3573_v10, 6 }
0x1eee   :  { %3576 = vrot.lane.b32.xlu2 %v3575_v34, %s5439_s8 }
0x1f48   :  { %v3577_v2 = vpop.permute.xlu2 %3576 }
0x1f49   :  { %4967 = vmatmul.msk.f32.vlgmr.msrb.gmra.mxu2 %vm395_vm13, %v3577_v2  ;;  %4968 = vmatmul.msk.f32.vlgmr.msrb.gmra.mxu3 %vm395_vm13, %v3577_v2 }
0x1f4a   :  { %3920 = vmatpush.msrb.mxu2 %v7260_v33  ;;  %3940 = vmatpush.msrb.mxu3 %v7380_v37 }
0x1f4c   :  { %3921 = vmatpush.msrb.mxu2 %v7265_v16  ;;  %3941 = vmatpush.msrb.mxu3 %v7385_v14  ;;  %v7680_v16 = vadd.f32 %v7641_v13, %v7509_v4 }
0x1f4e   :  { %3922 = vmatpush.msrb.mxu2 %v7298_v18  ;;  %3942 = vmatpush.msrb.mxu3 %v7395_v43 }
0x1f50   :  { %3923 = vmatpush.msrb.mxu2 %v7309_v47  ;;  %3943 = vmatpush.msrb.mxu3 %v7402_v25 }
0x1f52   :  { %3924 = vmatpush.msrb.mxu2 %v7321_v36  ;;  %3944 = vmatpush.msrb.mxu3 %v7410_v29 }
0x1f54   :  { %3925 = vmatpush.msrb.mxu2 %v7333_v19  ;;  %3945 = vmatpush.msrb.mxu3 %v7419_v3 }
0x1f56   :  { %3926 = vmatpush.msrb.mxu2 %v7345_v9  ;;  %3946 = vmatpush.msrb.mxu3 %v7428_v54 }
0x1f58   :  { %3927 = vmatpush.msrb.mxu2 %v7357_v17  ;;  %3947 = vmatpush.msrb.mxu3 %v7437_v27 }
0x1fcc   :  { %v3597_v33 = vpop.f32.mrf.mxu2  ;;  %v3617_v31 = vpop.f32.mrf.mxu3 }
0x1fcd   :  { %v3598_v62 = vadd.f32 %v3597_v33, %v7507_v60  ;;  %v3618_v51 = vadd.f32 %v3617_v31, %v7516_v42  ;;  %v7739_v31 = vld [vmem:[%s8265_s11 + $0x68] sm:$0xff] }
0x1fcf   :  { %v3620_v30 = vadd.f32 %v3598_v62, %v7680_v16 }
0x1fd1   :  { %v4969_v45 = vmul.f32 -1.442695, %v3620_v30 }
0x1fd3   :  { %5235 = vpow2.f32 %v4969_v45 }
0x1fd9   :  { %v5236_v24 = vpop.eup %5235 }
0x1fda   :  { %v3624_v20 = vadd.f32 1.0, %v5236_v24 }
0x1fdc   :  { %5237 = vrcp.f32 %v3624_v20  ;;  %v3636_v61 = vand.u32 2147483648, %v3624_v20  ;;  %v3634_v21 = vand.u32 2147483647, %v3624_v20  ;;  %vm3630_vm0 = vweird.f32 %v3624_v20 }
0x1fde   :  { %v3637_v13 = vor.u32 1.1754944e-38, %v3636_v61  ;;  %vm3635_vm2 = vcmp.eq.f32.partialorder %v3634_v21, 8.507059e+37  ;;  %v7732_v21 = vld [vmem:[%s8265_s11 + $0x78] sm:$0xff] }
0x1fe2   :  { %v5238_v56 = vpop.eup %5237 }
0x1fe3   :  { %v3626_v22 = vmul.f32 %v5238_v56, %v3624_v20  ;;  %vm3631_vm15 = vweird.f32 %v5238_v56 }
0x1fe4   :  { %vm3632_vm1 = vmor %vm3630_vm0, %vm3631_vm15 }
0x1fe5   :  { %v3627_v58 = vsub.f32 1.0, %v3626_v22 }
0x1fe7   :  { %v3628_v49 = vmul.f32 %v5238_v56, %v3627_v58 }
0x1fe9   :  { %v3629_v38 = vadd.f32 %v5238_v56, %v3628_v49 }
0x1feb   :  { %v3633_v57 = vsel %vm3632_vm1, %v5238_v56, %v3629_v38  ;;  %v7745_v38 = vld [vmem:[%s8265_s11 + $0x50] sm:$0xff] }
0x1fec   :  { %v3638_v55 = vsel %vm3635_vm2, %v3637_v13, %v3633_v57  ;;  %v7751_v13 = vld [vmem:[%s8265_s11 + $0x58] sm:$0xff]  ;;  %v7763_v57 = vld [vmem:[%s8265_s11 + $0x48] sm:$0xff] }
0x1fed   :  { %v3640_v41 = vmul.f32 %v3638_v55, %v3618_v51  ;;  %v3643_v35 = vsub.f32 1.0, %v3638_v55  ;;  %v3650_v48 = vmul.f32 %v3638_v55, %v3575_v34  ;;  %v7757_v51 = vld [vmem:[%s8265_s11 + $0x40] sm:$0xff]  ;;  %v7769_v55 = vld [vmem:[%s8265_s11 + $0x30] sm:$0xff] }
0x1fef   :  { %v3641_v5 = vadd.f32 %v3640_v41, %v7687_v1  ;;  %v7776_v41 = vld [vmem:[%s8265_s11 + $0x20] sm:$0xff] }
0x1ff1   :  { %5239 = vtanh.f32 %v3641_v5  ;;  %v7783_v5 = vld [vmem:[%s8265_s11 + $0x10] sm:$0xff] }
0x1ff7   :  { %v5240_v44 = vpop.eup %5239 }
0x1ff8   :  { %3645 = vrot.lane.b32.xlu0 %v5240_v44, %s5439_s8 }
0x206a   :  { %v3646_v52 = vpop.permute.xlu0 %3645 }
0x206b   :  { %v3648_v6 = vmul.f32 %v3646_v52, %v3643_v35 }
0x206d   :  { %v3651_v40 = vadd.f32 %v3650_v48, %v3648_v6 }
0x206f   :  { %3653 = vrot.lane.b32.xlu1 %v3651_v40, %s5439_s8  ;;  %v3732_v10 = vrot.slane %v3651_v40, 6 }
0x20e1   :  { %v3654_v50 = vpop.permute.xlu1 %3653 }
0x20e2   :  { %4970 = vmatmul.msk.f32.vlgmr.msrb.gmra.mxu0 %vm395_vm13, %v3654_v50  ;;  %4971 = vmatmul.msk.f32.vlgmr.msrb.gmra.mxu1 %vm395_vm13, %v3654_v50 }
0x20e3   :  { %3997 = vmatpush.msrb.mxu0 %v7697_v63  ;;  %4017 = vmatpush.msrb.mxu1 %v7380_v37 }
0x20e5   :  { %3998 = vmatpush.msrb.mxu0 %v7704_v8  ;;  %4018 = vmatpush.msrb.mxu1 %v7385_v14 }
0x20e7   :  { %3999 = vmatpush.msrb.mxu0 %v7298_v18  ;;  %4019 = vmatpush.msrb.mxu1 %v7395_v43 }
0x20e9   :  { %4000 = vmatpush.msrb.mxu0 %v7309_v47  ;;  %4020 = vmatpush.msrb.mxu1 %v7402_v25 }
0x20eb   :  { %4001 = vmatpush.msrb.mxu0 %v7321_v36  ;;  %4021 = vmatpush.msrb.mxu1 %v7410_v29 }
0x20ed   :  { %4002 = vmatpush.msrb.mxu0 %v7333_v19  ;;  %4022 = vmatpush.msrb.mxu1 %v7419_v3 }
0x20ef   :  { %4003 = vmatpush.msrb.mxu0 %v7345_v9  ;;  %4023 = vmatpush.msrb.mxu1 %v7428_v54 }
0x20f1   :  { %4004 = vmatpush.msrb.mxu0 %v7357_v17  ;;  %4024 = vmatpush.msrb.mxu1 %v7437_v27 }
0x215f   :  { %v3674_v18 = vpop.f32.mrf.mxu0  ;;  %v3694_v9 = vpop.f32.mrf.mxu1 }
0x2160   :  { %v3675_v47 = vadd.f32 %v3674_v18, %v7507_v60  ;;  %v3695_v17 = vadd.f32 %v3694_v9, %v7516_v42 }
0x2162   :  { %v3698_v37 = vrot.slane %v3675_v47, 6  ;;  %v3721_v2 = vrot.slane %v3695_v17, 6 }
0x2164   :  { %v3700_v36 = vadd.f32 %v3698_v37, %v7680_v16 }
0x2166   :  { %v4972_v14 = vmul.f32 -1.442695, %v3700_v36 }
0x2168   :  { %5241 = vpow2.f32 %v4972_v14 }
0x216e   :  { %v5242_v43 = vpop.eup %5241 }
0x216f   :  { %v3704_v19 = vadd.f32 1.0, %v5242_v43 }
0x2171   :  { %5243 = vrcp.f32 %v3704_v19  ;;  %v3716_v28 = vand.u32 2147483648, %v3704_v19  ;;  %v3714_v0 = vand.u32 2147483647, %v3704_v19  ;;  %vm3710_vm4 = vweird.f32 %v3704_v19 }
0x2173   :  { %v3717_v46 = vor.u32 1.1754944e-38, %v3716_v28  ;;  %vm3715_vm14 = vcmp.eq.f32.partialorder %v3714_v0, 8.507059e+37 }
0x2177   :  { %v5244_v25 = vpop.eup %5243 }
0x2178   :  { %v3706_v26 = vmul.f32 %v5244_v25, %v3704_v19  ;;  %vm3711_vm11 = vweird.f32 %v5244_v25 }
0x2179   :  { %vm3712_vm9 = vmor %vm3710_vm4, %vm3711_vm11 }
0x217a   :  { %v3707_v11 = vsub.f32 1.0, %v3706_v26 }
0x217c   :  { %v3708_v32 = vmul.f32 %v5244_v25, %v3707_v11 }
0x217e   :  { %v3709_v15 = vadd.f32 %v5244_v25, %v3708_v32 }
0x2180   :  { %v3713_v34 = vsel %vm3712_vm9, %v5244_v25, %v3709_v15 }
0x2181   :  { %v3718_v33 = vsel %vm3715_vm14, %v3717_v46, %v3713_v34 }
0x2182   :  { %v3723_v62 = vmul.f32 %v3721_v2, %v3718_v33  ;;  %v3734_v30 = vmul.f32 %v3732_v10, %v3718_v33  ;;  %v3726_v20 = vsub.f32 1.0, %v3718_v33 }
0x2184   :  { %v3724_v45 = vadd.f32 %v3723_v62, %v7687_v1  ;;  %v7814_v62 = vld [vmem:[%s8265_s11 + $0x38] sm:$0xff] }
0x2186   :  { %5245 = vtanh.f32 %v3724_v45  ;;  %v7828_v45 = vld [vmem:[%s8265_s11 + $0x18] sm:$0xff] }
0x218c   :  { %v5246_v24 = vpop.eup %5245 }
0x218d   :  { %3728 = vrot.lane.b32.xlu2 %v5246_v24, %s5439_s8  ;;  %v7835_v24 = vld [vmem:[%s8265_s11 + $0x8] sm:$0xff] }
0x21e7   :  { %v3729_v56 = vpop.permute.xlu2 %3728 }
0x21e8   :  { %v3731_v22 = vmul.f32 %v3729_v56, %v3726_v20 }
0x21ea   :  { %v3735_v58 = vadd.f32 %v3734_v30, %v3731_v22  ;;  %v7821_v30 = vld [vmem:[%s8265_s11 + $0x28] sm:$0xff] }
0x21ec   :  { %v3737_v61 = vrot.slane %v3735_v58, 2  ;;  %v3817_v25 = vrot.slane %v3735_v58, 6 }
0x21ee   :  { %3738 = vrot.lane.b32.xlu0 %v3737_v61, %s5439_s8 }
0x2260   :  { %v3739_v49 = vpop.permute.xlu0 %3738 }
0x2261   :  { %4973 = vmatmul.msk.f32.vlgmr.msra.gmra.mxu2 %vm395_vm13, %v3739_v49  ;;  %4974 = vmatmul.msk.f32.vlgmr.msra.gmra.mxu3 %vm395_vm13, %v3739_v49 }
0x2262   :  { %4082 = vmatpush.msra.mxu2 %v7697_v63  ;;  %4102 = vmatpush.msra.mxu3 %v7732_v21 }
0x2264   :  { %4083 = vmatpush.msra.mxu2 %v7704_v8  ;;  %4103 = vmatpush.msra.mxu3 %v7739_v31 }
0x2266   :  { %4084 = vmatpush.msra.mxu2 %v7745_v38  ;;  %4104 = vmatpush.msra.mxu3 %v7751_v13 }
0x2268   :  { %4085 = vmatpush.msra.mxu2 %v7757_v51  ;;  %4105 = vmatpush.msra.mxu3 %v7763_v57 }
0x226a   :  { %4086 = vmatpush.msra.mxu2 %v7769_v55  ;;  %4106 = vmatpush.msra.mxu3 %v7410_v29  ;;  %v7790_v29 = vld [vmem:[%s8265_s11] sm:$0xff] }
0x226c   :  { %4087 = vmatpush.msra.mxu2 %v7776_v41  ;;  %4107 = vmatpush.msra.mxu3 %v7419_v3 }
0x226e   :  { %4088 = vmatpush.msra.mxu2 %v7783_v5  ;;  %4108 = vmatpush.msra.mxu3 %v7428_v54 }
0x2270   :  { %4089 = vmatpush.msra.mxu2 %v7790_v29  ;;  %4109 = vmatpush.msra.mxu3 %v7437_v27 }
0x22e4   :  { %v3759_v44 = vpop.f32.mrf.mxu2  ;;  %v3779_v18 = vpop.f32.mrf.mxu3 }
0x22e5   :  { %v3760_v3 = vadd.f32 %v3759_v44, %v7507_v60  ;;  %v3780_v36 = vadd.f32 %v3779_v18, %v7516_v42 }
0x22e7   :  { %v3783_v35 = vrot.slane %v3760_v3, 4  ;;  %v3806_v9 = vrot.slane %v3780_v36, 4 }
0x22e9   :  { %v3785_v52 = vadd.f32 %v3783_v35, %v7680_v16 }
0x22eb   :  { %v4975_v48 = vmul.f32 -1.442695, %v3785_v52 }
0x22ed   :  { %5247 = vpow2.f32 %v4975_v48 }
0x22f3   :  { %v5248_v6 = vpop.eup %5247 }
0x22f4   :  { %v3789_v40 = vadd.f32 1.0, %v5248_v6 }
0x22f6   :  { %5249 = vrcp.f32 %v3789_v40  ;;  %v3801_v37 = vand.u32 2147483648, %v3789_v40  ;;  %v3799_v27 = vand.u32 2147483647, %v3789_v40  ;;  %vm3795_vm6 = vweird.f32 %v3789_v40 }
0x22f8   :  { %v3802_v19 = vor.u32 1.1754944e-38, %v3801_v37  ;;  %vm3800_vm12 = vcmp.eq.f32.partialorder %v3799_v27, 8.507059e+37 }
0x22fc   :  { %v5250_v54 = vpop.eup %5249 }
0x22fd   :  { %v3791_v50 = vmul.f32 %v5250_v54, %v3789_v40  ;;  %vm3796_vm10 = vweird.f32 %v5250_v54 }
0x22fe   :  { %vm3797_vm7 = vmor %vm3795_vm6, %vm3796_vm10 }
0x22ff   :  { %v3792_v47 = vsub.f32 1.0, %v3791_v50 }
0x2301   :  { %v3793_v14 = vmul.f32 %v5250_v54, %v3792_v47 }
0x2303   :  { %v3794_v43 = vadd.f32 %v5250_v54, %v3793_v14 }
0x2305   :  { %v3798_v26 = vsel %vm3797_vm7, %v5250_v54, %v3794_v43 }
0x2306   :  { %v3803_v11 = vsel %vm3800_vm12, %v3802_v19, %v3798_v26 }
0x2307   :  { %v3808_v28 = vmul.f32 %v3806_v9, %v3803_v11  ;;  %v3819_v17 = vmul.f32 %v3817_v25, %v3803_v11  ;;  %v3811_v15 = vsub.f32 1.0, %v3803_v11 }
0x2309   :  { %v3809_v32 = vadd.f32 %v3808_v28, %v7687_v1 }
0x230b   :  { %5251 = vtanh.f32 %v3809_v32 }
0x2311   :  { %v5252_v0 = vpop.eup %5251 }
0x2312   :  { %3813 = vrot.lane.b32.xlu1 %v5252_v0, %s5439_s8  ;;  %v7864_v0 = vadd.f32 %v7643_v39, %v7509_v4 }
0x2384   :  { %v3814_v46 = vpop.permute.xlu1 %3813 }
0x2385   :  { %v3816_v10 = vmul.f32 %v3814_v46, %v3811_v15 }
0x2387   :  { %v3820_v34 = vadd.f32 %v3819_v17, %v3816_v10 }
0x2389   :  { %v3822_v2 = vrot.slane %v3820_v34, 4 }
0x238b   :  { %3823 = vrot.lane.b32.xlu2 %v3822_v2, %s5439_s8 }
0x23e5   :  { %v3824_v33 = vpop.permute.xlu2 %3823 }
0x23e6   :  { %4976 = vmatmul.msk.f32.vlgmr.msra.gmra.mxu0 %vm395_vm13, %v3824_v33  ;;  %4977 = vmatmul.msk.f32.vlgmr.msra.gmra.mxu1 %vm395_vm13, %v3824_v33 }
0x23e7   :  { %4167 = vmatpush.msra.mxu0 %v7697_v63  ;;  %4187 = vmatpush.msra.mxu1 %v7732_v21 }
0x23e9   :  { %4168 = vmatpush.msra.mxu0 %v7704_v8  ;;  %4188 = vmatpush.msra.mxu1 %v7739_v31 }
0x23eb   :  { %4169 = vmatpush.msra.mxu0 %v7745_v38  ;;  %4189 = vmatpush.msra.mxu1 %v7751_v13 }
0x23ed   :  { %4170 = vmatpush.msra.mxu0 %v7757_v51  ;;  %4190 = vmatpush.msra.mxu1 %v7763_v57 }
0x23ef   :  { %4171 = vmatpush.msra.mxu0 %v7769_v55  ;;  %4191 = vmatpush.msra.mxu1 %v7814_v62 }
0x23f1   :  { %4172 = vmatpush.msra.mxu0 %v7776_v41  ;;  %4192 = vmatpush.msra.mxu1 %v7821_v30 }
0x23f3   :  { %4173 = vmatpush.msra.mxu0 %v7783_v5  ;;  %4193 = vmatpush.msra.mxu1 %v7828_v45 }
0x23f5   :  { %4174 = vmatpush.msra.mxu0 %v7790_v29  ;;  %4194 = vmatpush.msra.mxu1 %v7835_v24 }
0x2463   :  { %v3844_v20 = vpop.f32.mrf.mxu0  ;;  %v3864_v52 = vpop.f32.mrf.mxu1 }
0x2464   :  { %v3845_v56 = vadd.f32 %v3844_v20, %v7507_v60  ;;  %v3865_v40 = vadd.f32 %v3864_v52, %v7516_v42 }
0x2466   :  { %v3868_v22 = vrot.slane %v3845_v56, 2  ;;  %v3891_v36 = vrot.slane %v3865_v40, 2 }
0x2468   :  { %v3870_v58 = vadd.f32 %v3868_v22, %v7680_v16  ;;  %v3902_v16 = vrot.slane %v3820_v34, 6 }
0x246a   :  { %v4978_v61 = vmul.f32 -1.442695, %v3870_v58 }
0x246c   :  { %5253 = vpow2.f32 %v4978_v61 }
0x2472   :  { %v5254_v49 = vpop.eup %5253 }
0x2473   :  { %v3874_v44 = vadd.f32 1.0, %v5254_v49 }
0x2475   :  { %5255 = vrcp.f32 %v3874_v44  ;;  %v3886_v6 = vand.u32 2147483648, %v3874_v44  ;;  %v3884_v50 = vand.u32 2147483647, %v3874_v44  ;;  %vm3880_vm8 = vweird.f32 %v3874_v44 }
0x2477   :  { %v3887_v47 = vor.u32 1.1754944e-38, %v3886_v6  ;;  %vm3885_vm15 = vcmp.eq.f32.partialorder %v3884_v50, 8.507059e+37 }
0x247b   :  { %v5256_v3 = vpop.eup %5255 }
0x247c   :  { %v3876_v35 = vmul.f32 %v5256_v3, %v3874_v44  ;;  %vm3881_vm5 = vweird.f32 %v5256_v3 }
0x247d   :  { %vm3882_vm3 = vmor %vm3880_vm8, %vm3881_vm5 }
0x247e   :  { %v3877_v48 = vsub.f32 1.0, %v3876_v35 }
0x2480   :  { %v3878_v54 = vmul.f32 %v5256_v3, %v3877_v48  ;;  %v7871_v48 = vadd.f32 %v7651_v7, %v7518_v23 }
0x2482   :  { %v3879_v18 = vadd.f32 %v5256_v3, %v3878_v54 }
0x2484   :  { %v3883_v37 = vsel %vm3882_vm3, %v5256_v3, %v3879_v18 }
0x2485   :  { %v3888_v14 = vsel %vm3885_vm15, %v3887_v47, %v3883_v37 }
0x2486   :  { %v3893_v27 = vmul.f32 %v3891_v36, %v3888_v14  ;;  %v3904_v43 = vmul.f32 %v3902_v16, %v3888_v14  ;;  %v3896_v26 = vsub.f32 1.0, %v3888_v14 }
0x2488   :  { %v3894_v19 = vadd.f32 %v3893_v27, %v7687_v1 }
0x248a   :  { %5257 = vtanh.f32 %v3894_v19 }
0x2490   :  { %v5258_v25 = vpop.eup %5257 }
0x2491   :  { %3898 = vrot.lane.b32.xlu0 %v5258_v25, %s5439_s8 }
0x2503   :  { %v3899_v9 = vpop.permute.xlu0 %3898 }
0x2504   :  { %v3901_v11 = vmul.f32 %v3899_v9, %v3896_v26 }
0x2506   :  { %v3905_v28 = vadd.f32 %v3904_v43, %v3901_v11 }
0x2508   :  { %v3907_v17 = vrot.slane %v3905_v28, 6 }
0x250a   :  { %3908 = vrot.lane.b32.xlu1 %v3907_v17, %s5439_s8 }
0x257c   :  { %v3909_v32 = vpop.permute.xlu1 %3908 }
0x257d   :  { %4979 = vmatmul.msk.f32.vlgmr.msrb.gmra.mxu2 %vm395_vm13, %v3909_v32  ;;  %4980 = vmatmul.msk.f32.vlgmr.msrb.gmra.mxu3 %vm395_vm13, %v3909_v32 }
0x257e   :  { %4252 = vmatpush.msrb.mxu2 %v7697_v63  ;;  %4272 = vmatpush.msrb.mxu3 %v7732_v21 }
0x2580   :  { %4253 = vmatpush.msrb.mxu2 %v7704_v8  ;;  %4273 = vmatpush.msrb.mxu3 %v7739_v31 }
0x2582   :  { %4254 = vmatpush.msrb.mxu2 %v7745_v38  ;;  %4274 = vmatpush.msrb.mxu3 %v7751_v13 }
0x2584   :  { %4255 = vmatpush.msrb.mxu2 %v7757_v51  ;;  %4275 = vmatpush.msrb.mxu3 %v7763_v57 }
0x2586   :  { %4256 = vmatpush.msrb.mxu2 %v7769_v55  ;;  %4276 = vmatpush.msrb.mxu3 %v7814_v62 }
0x2588   :  { %4257 = vmatpush.msrb.mxu2 %v7776_v41  ;;  %4277 = vmatpush.msrb.mxu3 %v7821_v30 }
0x258a   :  { %4258 = vmatpush.msrb.mxu2 %v7783_v5  ;;  %4278 = vmatpush.msrb.mxu3 %v7828_v45 }
0x258c   :  { %4259 = vmatpush.msrb.mxu2 %v7790_v29  ;;  %4279 = vmatpush.msrb.mxu3 %v7835_v24 }
0x2600   :  { %v3929_v1 = vpop.f32.mrf.mxu2  ;;  %v3949_v49 = vpop.f32.mrf.mxu3 }
0x2601   :  { %v3930_v15 = vadd.f32 %v3929_v1, %v7507_v60  ;;  %v3950_v3 = vadd.f32 %v3949_v49, %v7516_v42 }
0x2603   :  { %v3952_v46 = vadd.f32 %v3930_v15, %v7864_v0 }
0x2605   :  { %v4981_v10 = vmul.f32 -1.442695, %v3952_v46 }
0x2607   :  { %5259 = vpow2.f32 %v4981_v10 }
0x260d   :  { %v5260_v34 = vpop.eup %5259 }
0x260e   :  { %v3956_v2 = vadd.f32 1.0, %v5260_v34 }
0x2610   :  { %5261 = vrcp.f32 %v3956_v2  ;;  %v3968_v22 = vand.u32 2147483648, %v3956_v2  ;;  %v3966_v61 = vand.u32 2147483647, %v3956_v2  ;;  %vm3962_vm1 = vweird.f32 %v3956_v2 }
0x2612   :  { %v3969_v39 = vor.u32 1.1754944e-38, %v3968_v22  ;;  %vm3967_vm11 = vcmp.eq.f32.partialorder %v3966_v61, 8.507059e+37 }
0x2616   :  { %v5262_v33 = vpop.eup %5261 }
0x2617   :  { %v3958_v20 = vmul.f32 %v5262_v33, %v3956_v2  ;;  %vm3963_vm0 = vweird.f32 %v5262_v33 }
0x2618   :  { %vm3964_vm2 = vmor %vm3962_vm1, %vm3963_vm0 }
0x2619   :  { %v3959_v56 = vsub.f32 1.0, %v3958_v20 }
0x261b   :  { %v3960_v58 = vmul.f32 %v5262_v33, %v3959_v56 }
0x261d   :  { %v3961_v44 = vadd.f32 %v5262_v33, %v3960_v58 }
0x261f   :  { %v3965_v35 = vsel %vm3964_vm2, %v5262_v33, %v3961_v44 }
0x2620   :  { %v3970_v52 = vsel %vm3967_vm11, %v3969_v39, %v3965_v35 }
0x2621   :  { %v3972_v6 = vmul.f32 %v3970_v52, %v3950_v3  ;;  %v3975_v50 = vsub.f32 1.0, %v3970_v52  ;;  %v3982_v47 = vmul.f32 %v3970_v52, %v3907_v17 }
0x2623   :  { %v3973_v40 = vadd.f32 %v3972_v6, %v7871_v48 }
0x2625   :  { %5263 = vtanh.f32 %v3973_v40 }
0x262b   :  { %v5264_v54 = vpop.eup %5263 }
0x262c   :  { %3977 = vrot.lane.b32.xlu2 %v5264_v54, %s5439_s8 }
0x2686   :  { %v3978_v18 = vpop.permute.xlu2 %3977 }
0x2687   :  { %v3980_v16 = vmul.f32 %v3978_v18, %v3975_v50 }
0x2689   :  { %v3983_v37 = vadd.f32 %v3982_v47, %v3980_v16 }
0x268b   :  { %3985 = vrot.lane.b32.xlu0 %v3983_v37, %s5439_s8  ;;  %v4064_v2 = vrot.slane %v3983_v37, 6 }
0x26fd   :  { %v3986_v36 = vpop.permute.xlu0 %3985 }
0x26fe   :  { %4982 = vmatmul.msk.f32.vlgmr.msrb.gmra.mxu0 %vm395_vm13, %v3986_v36  ;;  %4983 = vmatmul.msk.f32.vlgmr.msrb.gmra.mxu1 %vm395_vm13, %v3986_v36 }
0x26ff   :  { %4329 = vmatpush.msrb.mxu0 %v7697_v63  ;;  %4349 = vmatpush.msrb.mxu1 %v7732_v21 }
0x2701   :  { %4330 = vmatpush.msrb.mxu0 %v7704_v8  ;;  %4350 = vmatpush.msrb.mxu1 %v7739_v31 }
0x2703   :  { %4331 = vmatpush.msrb.mxu0 %v7745_v38  ;;  %4351 = vmatpush.msrb.mxu1 %v7751_v13 }
0x2705   :  { %4332 = vmatpush.msrb.mxu0 %v7757_v51  ;;  %4352 = vmatpush.msrb.mxu1 %v7763_v57 }
0x2707   :  { %4333 = vmatpush.msrb.mxu0 %v7769_v55  ;;  %4353 = vmatpush.msrb.mxu1 %v7814_v62 }
0x2709   :  { %4334 = vmatpush.msrb.mxu0 %v7776_v41  ;;  %4354 = vmatpush.msrb.mxu1 %v7821_v30 }
0x270b   :  { %4335 = vmatpush.msrb.mxu0 %v7783_v5  ;;  %4355 = vmatpush.msrb.mxu1 %v7828_v45 }
0x270d   :  { %4336 = vmatpush.msrb.mxu0 %v7790_v29  ;;  %4356 = vmatpush.msrb.mxu1 %v7835_v24 }
0x277b   :  { %v4006_v7 = vpop.f32.mrf.mxu0  ;;  %v4026_v28 = vpop.f32.mrf.mxu1 }
0x277c   :  { %v4007_v14 = vadd.f32 %v4006_v7, %v7507_v60  ;;  %v4027_v1 = vadd.f32 %v4026_v28, %v7516_v42 }
0x277e   :  { %v4030_v27 = vrot.slane %v4007_v14, 6  ;;  %v4053_v20 = vrot.slane %v4027_v1, 6 }
0x2780   :  { %v4032_v43 = vadd.f32 %v4030_v27, %v7864_v0 }
0x2782   :  { %v4984_v19 = vmul.f32 -1.442695, %v4032_v43 }
0x2784   :  { %5265 = vpow2.f32 %v4984_v19 }
0x278a   :  { %v5266_v25 = vpop.eup %5265 }
0x278b   :  { %v4036_v26 = vadd.f32 1.0, %v5266_v25 }
0x278d   :  { %5267 = vrcp.f32 %v4036_v26  ;;  %v4048_v32 = vand.u32 2147483648, %v4036_v26  ;;  %v4046_v46 = vand.u32 2147483647, %v4036_v26  ;;  %vm4042_vm9 = vweird.f32 %v4036_v26 }
0x278f   :  { %v4049_v34 = vor.u32 1.1754944e-38, %v4048_v32  ;;  %vm4047_vm10 = vcmp.eq.f32.partialorder %v4046_v46, 8.507059e+37 }
0x2793   :  { %v5268_v9 = vpop.eup %5267 }
0x2794   :  { %v4038_v11 = vmul.f32 %v5268_v9, %v4036_v26  ;;  %vm4043_vm4 = vweird.f32 %v5268_v9 }
0x2795   :  { %vm4044_vm14 = vmor %vm4042_vm9, %vm4043_vm4 }
0x2796   :  { %v4039_v17 = vsub.f32 1.0, %v4038_v11 }
0x2798   :  { %v4040_v15 = vmul.f32 %v5268_v9, %v4039_v17 }
0x279a   :  { %v4041_v10 = vadd.f32 %v5268_v9, %v4040_v15 }
0x279c   :  { %v4045_v33 = vsel %vm4044_vm14, %v5268_v9, %v4041_v10 }
0x279d   :  { %v4050_v56 = vsel %vm4047_vm10, %v4049_v34, %v4045_v33 }
0x279e   :  { %v4055_v22 = vmul.f32 %v4053_v20, %v4050_v56  ;;  %v4066_v58 = vmul.f32 %v4064_v2, %v4050_v56  ;;  %v4058_v44 = vsub.f32 1.0, %v4050_v56 }
0x27a0   :  { %v4056_v61 = vadd.f32 %v4055_v22, %v7871_v48 }
0x27a2   :  { %5269 = vtanh.f32 %v4056_v61 }
0x27a8   :  { %v5270_v49 = vpop.eup %5269 }
0x27a9   :  { %4060 = vrot.lane.b32.xlu1 %v5270_v49, %s5439_s8 }
0x281b   :  { %v4061_v39 = vpop.permute.xlu1 %4060 }
0x281c   :  { %v4063_v3 = vmul.f32 %v4061_v39, %v4058_v44 }
0x281e   :  { %v4067_v35 = vadd.f32 %v4066_v58, %v4063_v3 }
0x2820   :  { %v4069_v52 = vrot.slane %v4067_v35, 2  ;;  %v4149_v28 = vrot.slane %v4067_v35, 6 }
0x2822   :  { %4070 = vrot.lane.b32.xlu2 %v4069_v52, %s5439_s8 }
0x287c   :  { %v4071_v6 = vpop.permute.xlu2 %4070 }
0x287d   :  { %4985 = vmatmul.msk.f32.vlgmr.msra.gmra.mxu2 %vm395_vm13, %v4071_v6  ;;  %4986 = vmatmul.msk.f32.vlgmr.msra.gmra.mxu3 %vm395_vm13, %v4071_v6 }
0x287e   :  { %4414 = vmatpush.msra.mxu2 %v7697_v63  ;;  %4434 = vmatpush.msra.mxu3 %v7732_v21 }
0x2880   :  { %4415 = vmatpush.msra.mxu2 %v7704_v8  ;;  %4435 = vmatpush.msra.mxu3 %v7739_v31 }
0x2882   :  { %4416 = vmatpush.msra.mxu2 %v7745_v38  ;;  %4436 = vmatpush.msra.mxu3 %v7751_v13 }
0x2884   :  { %4417 = vmatpush.msra.mxu2 %v7757_v51  ;;  %4437 = vmatpush.msra.mxu3 %v7763_v57 }
0x2886   :  { %4418 = vmatpush.msra.mxu2 %v7769_v55  ;;  %4438 = vmatpush.msra.mxu3 %v7814_v62 }
0x2888   :  { %4419 = vmatpush.msra.mxu2 %v7776_v41  ;;  %4439 = vmatpush.msra.mxu3 %v7821_v30 }
0x288a   :  { %4420 = vmatpush.msra.mxu2 %v7783_v5  ;;  %4440 = vmatpush.msra.mxu3 %v7828_v45 }
0x288c   :  { %4421 = vmatpush.msra.mxu2 %v7790_v29  ;;  %4441 = vmatpush.msra.mxu3 %v7835_v24 }
0x2900   :  { %v4091_v40 = vpop.f32.mrf.mxu2  ;;  %v4111_v14 = vpop.f32.mrf.mxu3 }
0x2901   :  { %v4092_v54 = vadd.f32 %v4091_v40, %v7507_v60  ;;  %v4112_v19 = vadd.f32 %v4111_v14, %v7516_v42 }
0x2903   :  { %v4115_v50 = vrot.slane %v4092_v54, 4  ;;  %v4138_v32 = vrot.slane %v4112_v19, 4 }
0x2905   :  { %v4117_v18 = vadd.f32 %v4115_v50, %v7864_v0 }
0x2907   :  { %v4987_v47 = vmul.f32 -1.442695, %v4117_v18 }
0x2909   :  { %5271 = vpow2.f32 %v4987_v47 }
0x290f   :  { %v5272_v16 = vpop.eup %5271 }
0x2910   :  { %v4121_v37 = vadd.f32 1.0, %v5272_v16 }
0x2912   :  { %5273 = vrcp.f32 %v4121_v37  ;;  %v4133_v43 = vand.u32 2147483648, %v4121_v37  ;;  %v4131_v26 = vand.u32 2147483647, %v4121_v37  ;;  %vm4127_vm7 = vweird.f32 %v4121_v37 }
0x2914   :  { %v4134_v11 = vor.u32 1.1754944e-38, %v4133_v43  ;;  %vm4132_vm5 = vcmp.eq.f32.partialorder %v4131_v26, 8.507059e+37 }
0x2918   :  { %v5274_v36 = vpop.eup %5273 }
0x2919   :  { %v4123_v7 = vmul.f32 %v5274_v36, %v4121_v37  ;;  %vm4128_vm6 = vweird.f32 %v5274_v36 }
0x291a   :  { %vm4129_vm12 = vmor %vm4127_vm7, %vm4128_vm6 }
0x291b   :  { %v4124_v27 = vsub.f32 1.0, %v4123_v7 }
0x291d   :  { %v4125_v25 = vmul.f32 %v5274_v36, %v4124_v27 }
0x291f   :  { %v4126_v9 = vadd.f32 %v5274_v36, %v4125_v25 }
0x2921   :  { %v4130_v17 = vsel %vm4129_vm12, %v5274_v36, %v4126_v9 }
0x2922   :  { %v4135_v1 = vsel %vm4132_vm5, %v4134_v11, %v4130_v17 }
0x2923   :  { %v4140_v15 = vmul.f32 %v4138_v32, %v4135_v1  ;;  %v4151_v46 = vmul.f32 %v4149_v28, %v4135_v1  ;;  %v4143_v2 = vsub.f32 1.0, %v4135_v1 }
0x2925   :  { %v4141_v10 = vadd.f32 %v4140_v15, %v7871_v48 }
0x2927   :  { %5275 = vtanh.f32 %v4141_v10 }
0x292d   :  { %v5276_v34 = vpop.eup %5275 }
0x292e   :  { %4145 = vrot.lane.b32.xlu0 %v5276_v34, %s5439_s8 }
0x29a0   :  { %v4146_v33 = vpop.permute.xlu0 %4145 }
0x29a1   :  { %v4148_v20 = vmul.f32 %v4146_v33, %v4143_v2 }
0x29a3   :  { %v4152_v56 = vadd.f32 %v4151_v46, %v4148_v20  ;;  %v7959_v46 = vadd.f32 %v7653_v59, %v7518_v23 }
0x29a5   :  { %v4154_v22 = vrot.slane %v4152_v56, 4 }
0x29a7   :  { %4155 = vrot.lane.b32.xlu1 %v4154_v22, %s5439_s8 }
0x2a19   :  { %v4156_v58 = vpop.permute.xlu1 %4155 }
0x2a1a   :  { %4988 = vmatmul.msk.f32.vlgmr.msra.gmra.mxu0 %vm395_vm13, %v4156_v58  ;;  %4989 = vmatmul.msk.f32.vlgmr.msra.gmra.mxu1 %vm395_vm13, %v4156_v58 }
0x2a1b   :  { %4499 = vmatpush.msra.mxu0 %v7697_v63  ;;  %4519 = vmatpush.msra.mxu1 %v7732_v21 }
0x2a1d   :  { %4500 = vmatpush.msra.mxu0 %v7704_v8  ;;  %4520 = vmatpush.msra.mxu1 %v7739_v31 }
0x2a1f   :  { %4501 = vmatpush.msra.mxu0 %v7745_v38  ;;  %4521 = vmatpush.msra.mxu1 %v7751_v13 }
0x2a21   :  { %4502 = vmatpush.msra.mxu0 %v7757_v51  ;;  %4522 = vmatpush.msra.mxu1 %v7763_v57 }
0x2a23   :  { %4503 = vmatpush.msra.mxu0 %v7769_v55  ;;  %4523 = vmatpush.msra.mxu1 %v7814_v62 }
0x2a25   :  { %4504 = vmatpush.msra.mxu0 %v7776_v41  ;;  %4524 = vmatpush.msra.mxu1 %v7821_v30 }
0x2a27   :  { %4505 = vmatpush.msra.mxu0 %v7783_v5  ;;  %4525 = vmatpush.msra.mxu1 %v7828_v45 }
0x2a29   :  { %4506 = vmatpush.msra.mxu0 %v7790_v29  ;;  %4526 = vmatpush.msra.mxu1 %v7835_v24 }
0x2a97   :  { %v4176_v63 = vpop.f32.mrf.mxu0  ;;  %v4196_v41 = vpop.f32.mrf.mxu1 }
0x2a98   :  { %v4177_v8 = vadd.f32 %v4176_v63, %v7507_v60  ;;  %v4197_v29 = vadd.f32 %v4196_v41, %v7516_v42 }
0x2a9a   :  { %v4200_v21 = vrot.slane %v4177_v8, 2  ;;  %v4223_v44 = vrot.slane %v4197_v29, 2 }
0x2a9c   :  { %v4202_v31 = vadd.f32 %v4200_v21, %v7864_v0  ;;  %v4234_v0 = vrot.slane %v4152_v56, 6 }
0x2a9e   :  { %v4990_v38 = vmul.f32 -1.442695, %v4202_v31 }
0x2aa0   :  { %5277 = vpow2.f32 %v4990_v38 }
0x2aa6   :  { %v5278_v13 = vpop.eup %5277 }
0x2aa7   :  { %v4206_v51 = vadd.f32 1.0, %v5278_v13 }
0x2aa9   :  { %5279 = vrcp.f32 %v4206_v51  ;;  %v4218_v62 = vand.u32 2147483648, %v4206_v51  ;;  %v4216_v45 = vand.u32 2147483647, %v4206_v51  ;;  %vm4212_vm3 = vweird.f32 %v4206_v51 }
0x2aab   :  { %v4219_v61 = vor.u32 1.1754944e-38, %v4218_v62  ;;  %vm4217_vm0 = vcmp.eq.f32.partialorder %v4216_v45, 8.507059e+37 }
0x2aaf   :  { %v5280_v57 = vpop.eup %5279 }
0x2ab0   :  { %v4208_v55 = vmul.f32 %v5280_v57, %v4206_v51  ;;  %vm4213_vm8 = vweird.f32 %v5280_v57 }
0x2ab1   :  { %vm4214_vm15 = vmor %vm4212_vm3, %vm4213_vm8 }
0x2ab2   :  { %v4209_v5 = vsub.f32 1.0, %v4208_v55 }
0x2ab4   :  { %v4210_v30 = vmul.f32 %v5280_v57, %v4209_v5 }
0x2ab6   :  { %v4211_v24 = vadd.f32 %v5280_v57, %v4210_v30 }
0x2ab8   :  { %v4215_v49 = vsel %vm4214_vm15, %v5280_v57, %v4211_v24 }
0x2ab9   :  { %v4220_v39 = vsel %vm4217_vm0, %v4219_v61, %v4215_v49 }
0x2aba   :  { %v4225_v3 = vmul.f32 %v4223_v44, %v4220_v39  ;;  %v4236_v35 = vmul.f32 %v4234_v0, %v4220_v39  ;;  %v4228_v40 = vsub.f32 1.0, %v4220_v39 }
0x2abc   :  { %v4226_v52 = vadd.f32 %v4225_v3, %v7871_v48  ;;  %v7952_v48 = vadd.f32 %v7645_v12, %v7509_v4 }
0x2abe   :  { %5281 = vtanh.f32 %v4226_v52 }
0x2ac4   :  { %v5282_v6 = vpop.eup %5281 }
0x2ac5   :  { %4230 = vrot.lane.b32.xlu2 %v5282_v6, %s5439_s8  ;;  %v4600_v6 = vld [vmem:[%s8268_s14 + $0xf0] sm:$0xff] }
0x2b1f   :  { %v4231_v54 = vpop.permute.xlu2 %4230 }
0x2b20   :  { %v4233_v50 = vmul.f32 %v4231_v54, %v4228_v40  ;;  %v4601_v40 = vld [vmem:[%s8268_s14 + $0xf8] sm:$0xff]  ;;  %v4598_v54 = vld [vmem:[%s8268_s14 + $0xe0] sm:$0xff] }
0x2b22   :  { %v4237_v18 = vadd.f32 %v4236_v35, %v4233_v50  ;;  %v4599_v50 = vld [vmem:[%s8268_s14 + $0xe8] sm:$0xff] }
0x2b24   :  { %v4239_v47 = vrot.slane %v4237_v18, 6  ;;  %v4596_v18 = vld [vmem:[%s8268_s14 + $0xd0] sm:$0xff] }
0x2b26   :  { %4240 = vrot.lane.b32.xlu0 %v4239_v47, %s5439_s8 }
0x2b98   :  { %v4241_v16 = vpop.permute.xlu0 %4240 }
0x2b99   :  { %4991 = vmatmul.msk.f32.vlgmr.msrb.gmra.mxu2 %vm395_vm13, %v4241_v16  ;;  %4992 = vmatmul.msk.f32.vlgmr.msrb.gmra.mxu3 %vm395_vm13, %v4241_v16  ;;  %v4594_v16 = vld [vmem:[%s8268_s14 + $0xc0] sm:$0xff] }
0x2b9a   :  { %4611 = vmatpush.msrb.mxu2 %v4600_v6  ;;  %4631 = vmatpush.msrb.mxu3 %v4601_v40 }
0x2b9c   :  { %4612 = vmatpush.msrb.mxu2 %v4598_v54  ;;  %4632 = vmatpush.msrb.mxu3 %v4599_v50 }
0x2b9e   :  { %4613 = vmatpush.msrb.mxu2 %v4596_v18 }
0x2ba0   :  { %4614 = vmatpush.msrb.mxu2 %v4594_v16  ;;  %v4665_v16 = vld [vmem:[%s8269_s15 + $0x70] sm:$0xff] }
0x2c1c   :  { %v4261_v37 = vpop.f32.mrf.mxu2  ;;  %v4281_v17 = vpop.f32.mrf.mxu3 }
0x2c1d   :  { %v4262_v36 = vadd.f32 %v4261_v37, %v7507_v60  ;;  %v4282_v12 = vadd.f32 %v4281_v17, %v7516_v42  ;;  %v4595_v37 = vld [vmem:[%s8268_s14 + $0xc8] sm:$0xff] }
0x2c1e   :  { %v4583_v17 = vld [vmem:[%s8268_s14 + $0x68] sm:$0xff] }
0x2c1f   :  { %v4284_v7 = vadd.f32 %v4262_v36, %v7952_v48  ;;  %v4592_v36 = vld [vmem:[%s8268_s14 + $0xb0] sm:$0xff] }
0x2c20   :  { %4615 = vmatpush.msrb.mxu2 %v4592_v36  ;;  %v4661_v36 = vld [vmem:[%s8269_s15 + $0x50] sm:$0xff] }
0x2c21   :  { %v4993_v14 = vmul.f32 -1.442695, %v4284_v7  ;;  %v4593_v7 = vld [vmem:[%s8268_s14 + $0xb8] sm:$0xff] }
0x2c23   :  { %5283 = vpow2.f32 %v4993_v14  ;;  %v4590_v14 = vld [vmem:[%s8268_s14 + $0xa0] sm:$0xff] }
0x2c24   :  { %4616 = vmatpush.msrb.mxu2 %v4590_v14 }
0x2c29   :  { %v5284_v27 = vpop.eup %5283 }
0x2c2a   :  { %v4288_v43 = vadd.f32 1.0, %v5284_v27  ;;  %v4591_v27 = vld [vmem:[%s8268_s14 + $0xa8] sm:$0xff] }
0x2c2c   :  { %5285 = vrcp.f32 %v4288_v43  ;;  %v4300_v9 = vand.u32 2147483648, %v4288_v43  ;;  %v4298_v28 = vand.u32 2147483647, %v4288_v43  ;;  %vm4294_vm2 = vweird.f32 %v4288_v43 }
0x2c2e   :  { %v4301_v4 = vor.u32 1.1754944e-38, %v4300_v9  ;;  %vm4299_vm4 = vcmp.eq.f32.partialorder %v4298_v28, 8.507059e+37  ;;  %v4584_v9 = vld [vmem:[%s8268_s14 + $0x70] sm:$0xff]  ;;  %v4582_v28 = vld [vmem:[%s8268_s14 + $0x60] sm:$0xff] }
0x2c32   :  { %v5286_v19 = vpop.eup %5285 }
0x2c33   :  { %v4290_v25 = vmul.f32 %v5286_v19, %v4288_v43  ;;  %vm4295_vm1 = vweird.f32 %v5286_v19  ;;  %v4588_v43 = vld [vmem:[%s8268_s14 + $0x90] sm:$0xff] }
0x2c34   :  { %vm4296_vm11 = vmor %vm4294_vm2, %vm4295_vm1  ;;  %4617 = vmatpush.msrb.mxu2 %v4588_v43 }
0x2c35   :  { %v4291_v26 = vsub.f32 1.0, %v4290_v25  ;;  %v4586_v25 = vld [vmem:[%s8268_s14 + $0x80] sm:$0xff] }
0x2c36   :  { %4618 = vmatpush.msrb.mxu2 %v4586_v25 }
0x2c37   :  { %v4292_v11 = vmul.f32 %v5286_v19, %v4291_v26  ;;  %v4587_v26 = vld [vmem:[%s8268_s14 + $0x88] sm:$0xff] }
0x2c38   :  { %4619 = vmatpush.msrb.mxu2 %v4584_v9  ;;  %v4655_v9 = vld [vmem:[%s8269_s15 + $0x20] sm:$0xff] }
0x2c39   :  { %v4293_v32 = vadd.f32 %v5286_v19, %v4292_v11  ;;  %v4585_v11 = vld [vmem:[%s8268_s14 + $0x78] sm:$0xff] }
0x2c3a   :  { %4620 = vmatpush.msrb.mxu2 %v4582_v28  ;;  %v4651_v28 = vld [vmem:[%s8269_s15] sm:$0xff] }
0x2c3b   :  { %v4297_v1 = vsel %vm4296_vm11, %v5286_v19, %v4293_v32  ;;  %v4589_v19 = vld [vmem:[%s8268_s14 + $0x98] sm:$0xff]  ;;  %v4580_v32 = vld [vmem:[%s8268_s14 + $0x50] sm:$0xff] }
0x2c3c   :  { %v4302_v15 = vsel %vm4299_vm4, %v4301_v4, %v4297_v1  ;;  %v4581_v4 = vld [vmem:[%s8268_s14 + $0x58] sm:$0xff]  ;;  %v4579_v1 = vld [vmem:[%s8268_s14 + $0x48] sm:$0xff]  ;;  %4621 = vmatpush.msrb.mxu2 %v4580_v32 }
0x2c3d   :  { %v4304_v10 = vmul.f32 %v4302_v15, %v4282_v12  ;;  %v4307_v33 = vsub.f32 1.0, %v4302_v15  ;;  %v4314_v56 = vmul.f32 %v4302_v15, %v4239_v47  ;;  %v4597_v47 = vld [vmem:[%s8268_s14 + $0xd8] sm:$0xff]  ;;  %v4578_v12 = vld [vmem:[%s8268_s14 + $0x40] sm:$0xff]  ;;  %v4664_v32 = vld [vmem:[%s8269_s15 + $0x68] sm:$0xff] }
0x2c3e   :  { %4633 = vmatpush.msrb.mxu3 %v4597_v47  ;;  %4622 = vmatpush.msrb.mxu2 %v4578_v12  ;;  %v4660_v12 = vld [vmem:[%s8269_s15 + $0x48] sm:$0xff] }
0x2c3f   :  { %v4305_v34 = vadd.f32 %v4304_v10, %v7959_v46 }
0x2c40   :  { %4634 = vmatpush.msrb.mxu3 %v4595_v37  ;;  %v4663_v37 = vld [vmem:[%s8269_s15 + $0x60] sm:$0xff] }
0x2c41   :  { %5287 = vtanh.f32 %v4305_v34 }
0x2c42   :  { %4635 = vmatpush.msrb.mxu3 %v4593_v7  ;;  %v4659_v7 = vld [vmem:[%s8269_s15 + $0x40] sm:$0xff] }
0x2c44   :  { %4636 = vmatpush.msrb.mxu3 %v4591_v27 }
0x2c46   :  { %4637 = vmatpush.msrb.mxu3 %v4589_v19 }
0x2c47   :  { %v5288_v2 = vpop.eup %5287 }
0x2c48   :  { %4309 = vrot.lane.b32.xlu1 %v5288_v2, %s5439_s8  ;;  %4638 = vmatpush.msrb.mxu3 %v4587_v26  ;;  %v4657_v26 = vld [vmem:[%s8269_s15 + $0x30] sm:$0xff] }
0x2c4a   :  { %4639 = vmatpush.msrb.mxu3 %v4585_v11  ;;  %v4653_v11 = vld [vmem:[%s8269_s15 + $0x10] sm:$0xff] }
0x2c4c   :  { %4640 = vmatpush.msrb.mxu3 %v4583_v17  ;;  %v4666_v17 = vld [vmem:[%s8269_s15 + $0x78] sm:$0xff] }
0x2c4e   :  { %4641 = vmatpush.msrb.mxu3 %v4581_v4  ;;  %v4662_v4 = vld [vmem:[%s8269_s15 + $0x58] sm:$0xff] }
0x2c50   :  { %4642 = vmatpush.msrb.mxu3 %v4579_v1  ;;  %v4658_v1 = vld [vmem:[%s8269_s15 + $0x38] sm:$0xff] }
0x2cba   :  { %v4310_v20 = vpop.permute.xlu1 %4309 }
0x2cbb   :  { %v4312_v22 = vmul.f32 %v4310_v20, %v4307_v33  ;;  %v4576_v20 = vld [vmem:[%s8268_s14 + $0x30] sm:$0xff] }
0x2cbc   :  { %4623 = vmatpush.msrb.mxu2 %v4576_v20 }
0x2cbd   :  { %v4315_v58 = vadd.f32 %v4314_v56, %v4312_v22  ;;  %v4577_v56 = vld [vmem:[%s8268_s14 + $0x38] sm:$0xff]  ;;  %v4574_v22 = vld [vmem:[%s8268_s14 + $0x20] sm:$0xff] }
0x2cbe   :  { %4643 = vmatpush.msrb.mxu3 %v4577_v56  ;;  %4624 = vmatpush.msrb.mxu2 %v4574_v22  ;;  %v8135_v56 = vld [vmem:[%s8270_s16] sm:$0x3] }
0x2cbf   :  { %4317 = vrot.lane.b32.xlu2 %v4315_v58, %s5439_s8  ;;  %v4396_v61 = vrot.slane %v4315_v58, 6  ;;  %v4575_v58 = vld [vmem:[%s8268_s14 + $0x28] sm:$0xff]  ;;  %v4667_v22 = vld [vmem:[%s8271_s17] sm:$0x3] }
0x2cc0   :  { %4644 = vmatpush.msrb.mxu3 %v4575_v58 }
0x2d19   :  { %v4318_v63 = vpop.permute.xlu2 %4317 }
0x2d1a   :  { %4994 = vmatmul.msk.f32.vlgmr.msrb.gmra.mxu0 %vm395_vm13, %v4318_v63  ;;  %4995 = vmatmul.msk.f32.vlgmr.msrb.gmra.mxu1 %vm395_vm13, %v4318_v63  ;;  %v4572_v63 = vld [vmem:[%s8268_s14 + $0x10] sm:$0xff] }
0x2d1b   :  { %4625 = vmatpush.msrb.mxu2 %v4572_v63  ;;  %4681 = vmatpush.msrb.mxu0 %v4665_v16  ;;  %v4604_v63 = vperm.slane %v8135_v56, 0 }
0x2d1c   :  { %4701 = vmatpush.msrb.mxu1 %v4666_v17 }
0x2d1d   :  { %4682 = vmatpush.msrb.mxu0 %v4663_v37 }
0x2d1e   :  { %4702 = vmatpush.msrb.mxu1 %v4664_v32  ;;  %v4767_v32 = vld [vmem:[%s8272_s18 + $0x78] sm:$0xff] }
0x2d1f   :  { %4683 = vmatpush.msrb.mxu0 %v4661_v36  ;;  %v4605_v36 = vperm.slane %v8135_v56, 1  ;;  %v4757_v56 = vld [vmem:[%s8272_s18 + $0x28] sm:$0xff] }
0x2d20   :  { %4703 = vmatpush.msrb.mxu1 %v4662_v4  ;;  %v4766_v4 = vld [vmem:[%s8272_s18 + $0x70] sm:$0xff] }
0x2d21   :  { %4684 = vmatpush.msrb.mxu0 %v4659_v7 }
0x2d22   :  { %4704 = vmatpush.msrb.mxu1 %v4660_v12  ;;  %v4765_v12 = vld [vmem:[%s8272_s18 + $0x68] sm:$0xff] }
0x2d23   :  { %4685 = vmatpush.msrb.mxu0 %v4657_v26 }
0x2d24   :  { %4705 = vmatpush.msrb.mxu1 %v4658_v1  ;;  %v4764_v1 = vld [vmem:[%s8272_s18 + $0x60] sm:$0xff] }
0x2d25   :  { %4686 = vmatpush.msrb.mxu0 %v4655_v9 }
0x2d27   :  { %4687 = vmatpush.msrb.mxu0 %v4653_v11 }
0x2d29   :  { %4688 = vmatpush.msrb.mxu0 %v4651_v28 }
0x2d97   :  { %v4338_v23 = vpop.f32.mrf.mxu0  ;;  %v4358_v55 = vpop.f32.mrf.mxu1 }
0x2d98   :  { %v4339_v59 = vadd.f32 %v4338_v23, %v7507_v60  ;;  %v4359_v62 = vadd.f32 %v4358_v55, %v7516_v42  ;;  %v4573_v23 = vld [vmem:[%s8268_s14 + $0x18] sm:$0xff] }
0x2d99   :  { %4645 = vmatpush.msrb.mxu3 %v4573_v23 }
0x2d9a   :  { %v4362_v8 = vrot.slane %v4339_v59, 6  ;;  %v4385_v49 = vrot.slane %v4359_v62, 6  ;;  %v4570_v59 = vld [vmem:[%s8268_s14] sm:$0xff] }
0x2d9b   :  { %4626 = vmatpush.msrb.mxu2 %v4570_v59  ;;  %v4669_v59 = vperm.slane %v4667_v22, 0 }
0x2d9c   :  { %v4364_v21 = vadd.f32 %v4362_v8, %v7952_v48  ;;  %v4571_v8 = vld [vmem:[%s8268_s14 + $0x8] sm:$0xff] }
0x2d9d   :  { %4646 = vmatpush.msrb.mxu3 %v4571_v8 }
0x2d9e   :  { %v4996_v31 = vmul.f32 -1.442695, %v4364_v21 }
0x2da0   :  { %5289 = vpow2.f32 %v4996_v31  ;;  %v5410_v31 = vld [vmem:[#allocation2 + $0x18] sm:$0xff] }
0x2da6   :  { %v5290_v38 = vpop.eup %5289 }
0x2da7   :  { %v4368_v13 = vadd.f32 1.0, %v5290_v38  ;;  %v4609_v38 = vrot.slane %v5410_v31, 6 }
0x2da9   :  { %5291 = vrcp.f32 %v4368_v13  ;;  %v4380_v5 = vand.u32 2147483648, %v4368_v13  ;;  %v4378_v30 = vand.u32 2147483647, %v4368_v13  ;;  %vm4374_vm14 = vweird.f32 %v4368_v13 }
0x2dab   :  { %v4381_v24 = vor.u32 1.1754944e-38, %v4380_v5  ;;  %vm4379_vm6 = vcmp.eq.f32.partialorder %v4378_v30, 8.507059e+37 }
0x2daf   :  { %v5292_v51 = vpop.eup %5291 }
0x2db0   :  { %v4370_v57 = vmul.f32 %v5292_v51, %v4368_v13  ;;  %vm4375_vm9 = vweird.f32 %v5292_v51 }
0x2db1   :  { %vm4376_vm10 = vmor %vm4374_vm14, %vm4375_vm9 }
0x2db2   :  { %v4371_v41 = vsub.f32 1.0, %v4370_v57 }
0x2db4   :  { %v4372_v29 = vmul.f32 %v5292_v51, %v4371_v41 }
0x2db6   :  { %v4373_v45 = vadd.f32 %v5292_v51, %v4372_v29 }
0x2db8   :  { %v4377_v0 = vsel %vm4376_vm10, %v5292_v51, %v4373_v45 }
0x2db9   :  { %v4382_v44 = vsel %vm4379_vm6, %v4381_v24, %v4377_v0 }
0x2dba   :  { %v4387_v39 = vmul.f32 %v4385_v49, %v4382_v44  ;;  %v4398_v3 = vmul.f32 %v4396_v61, %v4382_v44  ;;  %v4390_v15 = vsub.f32 1.0, %v4382_v44 }
0x2dbc   :  { %v4388_v35 = vadd.f32 %v4387_v39, %v7959_v46 }
0x2dbe   :  { %5293 = vtanh.f32 %v4388_v35 }
0x2dc4   :  { %v5294_v52 = vpop.eup %5293 }
0x2dc5   :  { %4392 = vrot.lane.b32.xlu0 %v5294_v52, %s5439_s8 }
0x2e37   :  { %v4393_v10 = vpop.permute.xlu0 %4392 }
0x2e38   :  { %v4395_v34 = vmul.f32 %v4393_v10, %v4390_v15  ;;  %v4656_v15 = vld [vmem:[%s8269_s15 + $0x28] sm:$0xff]  ;;  %v4654_v10 = vld [vmem:[%s8269_s15 + $0x18] sm:$0xff] }
0x2e39   :  { %4706 = vmatpush.msrb.mxu1 %v4656_v15  ;;  %v4763_v15 = vld [vmem:[%s8272_s18 + $0x58] sm:$0xff] }
0x2e3a   :  { %v4399_v2 = vadd.f32 %v4398_v3, %v4395_v34  ;;  %v4652_v34 = vld [vmem:[%s8269_s15 + $0x8] sm:$0xff] }
0x2e3b   :  { %4707 = vmatpush.msrb.mxu1 %v4654_v10  ;;  %v4762_v10 = vld [vmem:[%s8272_s18 + $0x50] sm:$0xff] }
0x2e3c   :  { %v4401_v33 = vrot.slane %v4399_v2, 2  ;;  %v4481_v35 = vrot.slane %v4399_v2, 6 }
0x2e3d   :  { %4708 = vmatpush.msrb.mxu1 %v4652_v34  ;;  %v4761_v34 = vld [vmem:[%s8272_s18 + $0x48] sm:$0xff] }
0x2e3e   :  { %4402 = vrot.lane.b32.xlu1 %v4401_v33, %s5439_s8 }
0x2eb0   :  { %v4403_v21 = vpop.permute.xlu1 %4402 }
0x2eb1   :  { %4997 = vmatmul.msk.f32.vlgmr.msra.gmra.mxu2 %vm395_vm13, %v4403_v21  ;;  %4998 = vmatmul.msk.f32.vlgmr.msra.gmra.mxu3 %vm395_vm13, %v4403_v21 }
0x2eb9   :  { %4627 = vmatmul.f32.vlgmr.msrb.gmra.mxu2 %v4609_v38  ;;  %4647 = vmatmul.f32.vlgmr.msrb.gmra.mxu3 %v4609_v38 }
0x2f34   :  { %v4423_v13 = vpop.f32.mrf.mxu2  ;;  %v4443_v45 = vpop.f32.mrf.mxu3 }
0x2f35   :  { %v4424_v51 = vadd.f32 %v4423_v13, %v7507_v60  ;;  %v4444_v0 = vadd.f32 %v4443_v45, %v7516_v42 }
0x2f37   :  { %v4447_v57 = vrot.slane %v4424_v51, 4  ;;  %v4470_v6 = vrot.slane %v4444_v0, 4 }
0x2f39   :  { %v4449_v55 = vadd.f32 %v4447_v57, %v7952_v48 }
0x2f3b   :  { %v4999_v41 = vmul.f32 -1.442695, %v4449_v55 }
0x2f3c   :  { %v4628_v8 = vpop.f32.mrf.mxu2 }
0x2f3d   :  { %5295 = vpow2.f32 %v4999_v41  ;;  %v4629_v31 = vadd.f32 %v4628_v8, %v4604_v63  ;;  %v4754_v63 = vld [vmem:[%s8272_s18 + $0x10] sm:$0xff] }
0x2f43   :  { %v5296_v5 = vpop.eup %5295 }
0x2f44   :  { %v4453_v62 = vadd.f32 1.0, %v5296_v5 }
0x2f46   :  { %5297 = vrcp.f32 %v4453_v62  ;;  %v4465_v61 = vand.u32 2147483648, %v4453_v62  ;;  %v4463_v44 = vand.u32 2147483647, %v4453_v62  ;;  %vm4459_vm12 = vweird.f32 %v4453_v62 }
0x2f48   :  { %v4466_v3 = vor.u32 1.1754944e-38, %v4465_v61  ;;  %vm4464_vm8 = vcmp.eq.f32.partialorder %v4463_v44, 8.507059e+37 }
0x2f4c   :  { %v5298_v29 = vpop.eup %5297 }
0x2f4d   :  { %v4455_v30 = vmul.f32 %v5298_v29, %v4453_v62  ;;  %vm4460_vm7 = vweird.f32 %v5298_v29 }
0x2f4e   :  { %vm4461_vm5 = vmor %vm4459_vm12, %vm4460_vm7 }
0x2f4f   :  { %v4456_v24 = vsub.f32 1.0, %v4455_v30 }
0x2f51   :  { %v4457_v49 = vmul.f32 %v5298_v29, %v4456_v24 }
0x2f53   :  { %v4458_v39 = vadd.f32 %v5298_v29, %v4457_v49 }
0x2f55   :  { %v4462_v52 = vsel %vm4461_vm5, %v5298_v29, %v4458_v39 }
0x2f56   :  { %v4467_v40 = vsel %vm4464_vm8, %v4466_v3, %v4462_v52 }
0x2f57   :  { %v4472_v54 = vmul.f32 %v4470_v6, %v4467_v40  ;;  %v4483_v50 = vmul.f32 %v4481_v35, %v4467_v40  ;;  %v4475_v14 = vsub.f32 1.0, %v4467_v40  ;;  %v4670_v6 = vperm.slane %v4667_v22, 1  ;;  %v4756_v22 = vld [vmem:[%s8272_s18 + $0x20] sm:$0xff] }
0x2f59   :  { %v4473_v18 = vadd.f32 %v4472_v54, %v7959_v46 }
0x2f5b   :  { %5299 = vtanh.f32 %v4473_v18 }
0x2f61   :  { %v5300_v47 = vpop.eup %5299 }
0x2f62   :  { %4477 = vrot.lane.b32.xlu2 %v5300_v47, %s5439_s8 }
0x2fbc   :  { %v4478_v27 = vpop.permute.xlu2 %4477 }
0x2fbd   :  { %v4480_v43 = vmul.f32 %v4478_v27, %v4475_v14 }
0x2fbf   :  { %v8087_v19 = vadd.f32 %v4483_v50, %v4480_v43  ;;  %v4648_v43 = vpop.f32.mrf.mxu3 }
0x2fc0   :  { %v4649_v9 = vadd.f32 %v4648_v43, %v4605_v36 }
0x2fc1   :  { %v4486_v25 = vrot.slane %v8087_v19, 4  ;;  %v4566_v39 = vrot.slane %v8087_v19, 6 }
0x2fc3   :  { %4487 = vrot.lane.b32.xlu0 %v4486_v25, %s5439_s8 }
0x3035   :  { %v4488_v2 = vpop.permute.xlu0 %4487 }
0x3036   :  { %5000 = vmatmul.msk.f32.vlgmr.msra.gmra.mxu0 %vm395_vm13, %v4488_v2  ;;  %5001 = vmatmul.msk.f32.vlgmr.msra.gmra.mxu1 %vm395_vm13, %v4488_v2  ;;  %v4760_v2 = vld [vmem:[%s8272_s18 + $0x40] sm:$0xff] }
0x3037   :  { %4771 = vmatpush.msra.mxu0 %v4767_v32 }
0x3039   :  { %4772 = vmatpush.msra.mxu0 %v4766_v4 }
0x303b   :  { %4773 = vmatpush.msra.mxu0 %v4765_v12 }
0x303d   :  { %4774 = vmatpush.msra.mxu0 %v4764_v1 }
0x303e   :  { %4689 = vmatmul.f32.vlgmr.msrb.gmra.mxu0 %v8353_v53  ;;  %4709 = vmatmul.f32.vlgmr.msrb.gmra.mxu1 %v8353_v53 }
0x303f   :  { %4775 = vmatpush.msra.mxu0 %v4763_v15 }
0x3041   :  { %4776 = vmatpush.msra.mxu0 %v4762_v10 }
0x3043   :  { %4777 = vmatpush.msra.mxu0 %v4761_v34 }
0x3045   :  { %4778 = vmatpush.msra.mxu0 %v4760_v2 }
0x30b3   :  { %v4508_v33 = vpop.f32.mrf.mxu0  ;;  %v4528_v62 = vpop.f32.mrf.mxu1 }
0x30b4   :  { %v4509_v20 = vadd.f32 %v4508_v33, %v7507_v60  ;;  %v4529_v30 = vadd.f32 %v4528_v62, %v7516_v42  ;;  %v4759_v33 = vld [vmem:[%s8272_s18 + $0x38] sm:$0xff] }
0x30b5   :  { %4779 = vmatpush.msra.mxu0 %v4759_v33  ;;  %v4799_v62 = vld [vmem:[%s8273_s19 + $0x38] sm:$0xff] }
0x30b6   :  { %v4532_v58 = vrot.slane %v4509_v20, 2  ;;  %v4555_v35 = vrot.slane %v4529_v30, 2  ;;  %v4758_v20 = vld [vmem:[%s8272_s18 + $0x30] sm:$0xff] }
0x30b7   :  { %4780 = vmatpush.msra.mxu0 %v4758_v20 }
0x30b8   :  { %v4534_v23 = vadd.f32 %v4532_v58, %v7952_v48  ;;  %v4755_v58 = vld [vmem:[%s8272_s18 + $0x18] sm:$0xff] }
0x30b9   :  { %4781 = vmatpush.msra.mxu0 %v4757_v56 }
0x30ba   :  { %v5002_v53 = vmul.f32 -1.442695, %v4534_v23 }
0x30bb   :  { %v4690_v21 = vpop.f32.mrf.mxu0  ;;  %v4710_v50 = vpop.f32.mrf.mxu1  ;;  %4782 = vmatpush.msra.mxu0 %v4756_v22 }
0x30bc   :  { %5301 = vpow2.f32 %v5002_v53  ;;  %v4691_v60 = vadd.f32 %v4690_v21, %v4669_v59  ;;  %v4711_v14 = vadd.f32 %v4710_v50, %v4670_v6  ;;  %v4753_v21 = vld [vmem:[%s8272_s18 + $0x8] sm:$0xff]  ;;  %v4794_v6 = vld [vmem:[%s8273_s19 + $0x10] sm:$0xff] }
0x30bd   :  { %4783 = vmatpush.msra.mxu0 %v4755_v58 }
0x30be   :  { %v4713_v38 = vadd.f32 %v4691_v60, %v4629_v31  ;;  %v4752_v31 = vld [vmem:[%s8272_s18] sm:$0xff]  ;;  %v4807_v60 = vld [vmem:[%s8273_s19 + $0x78] sm:$0xff] }
0x30bf   :  { %4784 = vmatpush.msra.mxu0 %v4754_v63  ;;  %4808 = vmatpush.msra.mxu1 %v4807_v60 }
0x30c0   :  { %v5003_v13 = vmul.f32 -1.442695, %v4713_v38  ;;  %v4806_v38 = vld [vmem:[%s8273_s19 + $0x70] sm:$0xff] }
0x30c1   :  { %4785 = vmatpush.msra.mxu0 %v4753_v21  ;;  %4809 = vmatpush.msra.mxu1 %v4806_v38 }
0x30c2   :  { %v5302_v51 = vpop.eup %5301  ;;  %5303 = vpow2.f32 %v5003_v13  ;;  %v4805_v13 = vld [vmem:[%s8273_s19 + $0x68] sm:$0xff] }
0x30c3   :  { %v4538_v57 = vadd.f32 1.0, %v5302_v51  ;;  %4786 = vmatpush.msra.mxu0 %v4752_v31  ;;  %v4804_v51 = vld [vmem:[%s8273_s19 + $0x60] sm:$0xff]  ;;  %4810 = vmatpush.msra.mxu1 %v4805_v13 }
0x30c5   :  { %5305 = vrcp.f32 %v4538_v57  ;;  %v4550_v45 = vand.u32 2147483648, %v4538_v57  ;;  %v4548_v61 = vand.u32 2147483647, %v4538_v57  ;;  %vm4544_vm15 = vweird.f32 %v4538_v57  ;;  %4811 = vmatpush.msra.mxu1 %v4804_v51 }
0x30c7   :  { %v4551_v3 = vor.u32 1.1754944e-38, %v4550_v45  ;;  %vm4549_vm1 = vcmp.eq.f32.partialorder %v4548_v61, 8.507059e+37  ;;  %v4797_v45 = vld [vmem:[%s8273_s19 + $0x28] sm:$0xff]  ;;  %v4796_v61 = vld [vmem:[%s8273_s19 + $0x20] sm:$0xff] }
0x30c8   :  { %v5304_v55 = vpop.eup %5303 }
0x30c9   :  { %v4717_v41 = vadd.f32 1.0, %v5304_v55  ;;  %v4802_v55 = vld [vmem:[%s8273_s19 + $0x50] sm:$0xff] }
0x30cb   :  { %v5306_v5 = vpop.eup %5305  ;;  %5307 = vrcp.f32 %v4717_v41  ;;  %v4727_v42 = vand.u32 2147483647, %v4717_v41  ;;  %v4729_v18 = vand.u32 2147483648, %v4717_v41  ;;  %vm4723_vm11 = vweird.f32 %v4717_v41 }
0x30cc   :  { %v4540_v29 = vmul.f32 %v5306_v5, %v4538_v57  ;;  %vm4545_vm3 = vweird.f32 %v5306_v5  ;;  %v4803_v57 = vld [vmem:[%s8273_s19 + $0x58] sm:$0xff] }
0x30cd   :  { %vm4546_vm0 = vmor %vm4544_vm15, %vm4545_vm3  ;;  %v4730_v19 = vor.u32 1.1754944e-38, %v4729_v18  ;;  %vm4728_vm9 = vcmp.eq.f32.partialorder %v4727_v42, 8.507059e+37  ;;  %4812 = vmatpush.msra.mxu1 %v4803_v57 }
0x30ce   :  { %v4541_v48 = vsub.f32 1.0, %v4540_v29 }
0x30cf   :  { %4813 = vmatpush.msra.mxu1 %v4802_v55 }
0x30d0   :  { %v4542_v24 = vmul.f32 %v5306_v5, %v4541_v48  ;;  %v4798_v48 = vld [vmem:[%s8273_s19 + $0x30] sm:$0xff] }
0x30d1   :  { %v5308_v0 = vpop.eup %5307 }
0x30d2   :  { %v4543_v49 = vadd.f32 %v5306_v5, %v4542_v24  ;;  %v4719_v44 = vmul.f32 %v5308_v0, %v4717_v41  ;;  %vm4724_vm2 = vweird.f32 %v5308_v0  ;;  %v4801_v41 = vld [vmem:[%s8273_s19 + $0x48] sm:$0xff] }
0x30d3   :  { %vm4725_vm4 = vmor %vm4723_vm11, %vm4724_vm2  ;;  %4814 = vmatpush.msra.mxu1 %v4801_v41 }
0x30d4   :  { %v4547_v52 = vsel %vm4546_vm0, %v5306_v5, %v4543_v49  ;;  %v4720_v40 = vsub.f32 1.0, %v4719_v44  ;;  %v4800_v5 = vld [vmem:[%s8273_s19 + $0x40] sm:$0xff] }
0x30d5   :  { %v4552_v54 = vsel %vm4549_vm1, %v4551_v3, %v4547_v52  ;;  %4815 = vmatpush.msra.mxu1 %v4800_v5  ;;  %v4795_v52 = vld [vmem:[%s8273_s19 + $0x18] sm:$0xff] }
0x30d6   :  { %v4557_v47 = vmul.f32 %v4555_v35, %v4552_v54  ;;  %v4721_v16 = vmul.f32 %v5308_v0, %v4720_v40  ;;  %v4568_v37 = vmul.f32 %v4566_v39, %v4552_v54  ;;  %v4560_v23 = vsub.f32 1.0, %v4552_v54  ;;  %v4793_v40 = vld [vmem:[%s8273_s19 + $0x8] sm:$0xff]  ;;  %v4792_v54 = vld [vmem:[%s8273_s19] sm:$0xff] }
0x30d7   :  { %4816 = vmatpush.msra.mxu1 %v4799_v62 }
0x30d8   :  { %v4558_v7 = vadd.f32 %v4557_v47, %v7959_v46  ;;  %v4722_v27 = vadd.f32 %v5308_v0, %v4721_v16 }
0x30d9   :  { %4817 = vmatpush.msra.mxu1 %v4798_v48 }
0x30da   :  { %5309 = vtanh.f32 %v4558_v7  ;;  %v4726_v25 = vsel %vm4725_vm4, %v5308_v0, %v4722_v27 }
0x30db   :  { %v8146_v26 = vsel %vm4728_vm9, %v4730_v19, %v4726_v25  ;;  %4818 = vmatpush.msra.mxu1 %v4797_v45 }
0x30dc   :  { %v4733_v11 = vmul.f32 %v8146_v26, %v4711_v14  ;;  %v4736_v30 = vsub.f32 1.0, %v8146_v26  ;;  %v4742_v0 = vmul.f32 0.0, %v8146_v26 }
0x30dd   :  { %4819 = vmatpush.msra.mxu1 %v4796_v61 }
0x30de   :  { %v4734_v28 = vadd.f32 %v4733_v11, %v4649_v9 }
0x30df   :  { %4820 = vmatpush.msra.mxu1 %v4795_v52 }
0x30e0   :  { %v5310_v17 = vpop.eup %5309  ;;  %5311 = vtanh.f32 %v4734_v28 }
0x30e1   :  { %4562 = vrot.lane.b32.xlu1 %v5310_v17, %s5439_s8  ;;  %4821 = vmatpush.msra.mxu1 %v4794_v6 }
0x30e3   :  { %4822 = vmatpush.msra.mxu1 %v4793_v40 }
0x30e5   :  { %4823 = vmatpush.msra.mxu1 %v4792_v54 }
0x30e6   :  { %v5312_v46 = vpop.eup %5311 }
0x30e7   :  { %4738 = vrot.lane.b32.xlu2 %v5312_v46, %s5439_s8 }
0x3141   :  { %v4739_v29 = vpop.permute.xlu2 %4738 }
0x3142   :  { %v4741_v24 = vmul.f32 %v4739_v29, %v4736_v30 }
0x3144   :  { %v4743_v49 = vadd.f32 %v4742_v0, %v4741_v24 }
0x3146   :  { %v4749_v44 = vrot.slane %v4743_v49, 2 }
0x3153   :  { %v4563_v59 = vpop.permute.xlu1 %4562 }
0x3154   :  { %v4565_v8 = vmul.f32 %v4563_v59, %v4560_v23 }
0x3156   :  { %v4569_v53 = vadd.f32 %v4568_v37, %v4565_v8 }
0x3158   :  { %4745 = vrot.lane.b32.xlu0 %v4569_v53, %s5439_s8  ;;  %s4835_s8 = sshll.u32 %s5440_s27, 4  ;;  %s4836_s8 = int_to_ptr.vmem [resolvable:$true] %s4835_s8 }
0x31ca   :  { %v4746_v39 = vpop.permute.xlu0 %4745 }
0x31cb   :  { %v4751_v3 = vsel %vm395_vm13, %v4746_v39, %v4749_v44  ;;  %vm4828_vm13 = vcmask 17408  }
0x31cc   :  { %v4769_v35 = vrot.slane %v4751_v3, 6 }
0x31ce   :  { %4787 = vmatmul.f32.vlgmr.msra.gmra.mxu0 %v4769_v35 }
0x324b   :  { %v4788_v50 = vpop.f32.mrf.mxu0 }
0x324c   :  { %5313 = vtanh.f32 %v4788_v50 }
0x3252   :  { %v5314_v42 = vpop.eup %5313 }
0x3253   :  { %4824 = vmatmul.f32.vlgmr.msra.gmra.mxu1 %v5314_v42 }
0x32d0   :  { %v4825_v18 = vpop.f32.mrf.mxu1 }
0x32d1   :  { %4829 = vst.msk [vmem:[#allocation3] sm:$0x3] %vm4828_vm13, %v4825_v18 }
0x32d2   :  { %4840 = dma.vmem_to_hbm [thread:$0]  %s4836_s8, 32, %s4838_s13, [#allocation4]  }
0x32d3   :  { %5435 = dma.done.wait [#allocation4], 32  }
0x32d4   :  { %5436 = vsyncadd [#allocation4], 4294967264 }
0x32d5   :  { %4845 = vsyncpa [#allocation4], 1 }

</bundles_post_ra>
